<compile_context>
chip_gen: v7x
topology: tpu7x:2x2x1
jax: 0.10.0
libtpu: 0.0.40
codegen_flags: <defaults>
</compile_context>

<pallas_src>
import functools

import jax
import jax.numpy as jnp
from jax.experimental import pallas as pl
from jax.experimental.pallas import tpu as pltpu


# ----------------------------------------------------------------------------------
# Tiling helpers
# ----------------------------------------------------------------------------------
def _row_tiling(M):
    """Pad rows to a multiple of 8 and pick a row tile.

    Prefers large tiles (amortizes ~0.35us per grid step) while keeping >= 2 grid
    steps so a "parallel" grid axis can feed both TensorCores on v7x.
    """
    pad = (-M) % 8
    Mp = M + pad
    tm = Mp
    for t in (1024, 512, 256, 128, 64, 32, 16, 8):
        if Mp % t == 0 and Mp // t >= 2:
            tm = t
            break
    return Mp, tm


def _pad_rows(x, Mp):
    M = x.shape[0]
    return x if Mp == M else jnp.pad(x, ((0, Mp - M), (0, 0)))


def _pick_window_tile(BW):
    """Largest window-batch per grid step that still leaves >= 2 grid steps."""
    for wb in (64, 32, 16, 8, 4, 2):
        if BW % wb == 0 and BW // wb >= 2:
            return wb
    return BW


# ----------------------------------------------------------------------------------
# Pallas kernels
# ----------------------------------------------------------------------------------
def _matmul_kernel(x_ref, w_ref, b_ref, o_ref, *, activation):
    acc = jnp.dot(x_ref[...], w_ref[...], preferred_element_type=jnp.float32)
    acc = acc + b_ref[...].astype(jnp.float32)
    if activation == "gelu":
        # TODO(synk): tanh approximation; PyTorch nn.GELU default is exact erf.
        acc = jax.nn.gelu(acc)
    elif activation == "tanh":
        acc = jnp.tanh(acc)
    o_ref[...] = acc.astype(o_ref.dtype)


def _matmul_res_kernel(x_ref, w_ref, b_ref, r_ref, o_ref):
    acc = jnp.dot(x_ref[...], w_ref[...], preferred_element_type=jnp.float32)
    acc = acc + b_ref[...].astype(jnp.float32) + r_ref[...].astype(jnp.float32)
    o_ref[...] = acc.astype(o_ref.dtype)


def _ln_matmul_kernel(x_ref, g_ref, b_ref, w_ref, wb_ref, o_ref, *, eps, activation):
    # LayerNorm statistics in f32 (v5e VPU/EUP have no bf16 path).
    x = x_ref[...].astype(jnp.float32)
    mu = jnp.mean(x, axis=-1, keepdims=True)
    var = jnp.mean(jnp.square(x - mu), axis=-1, keepdims=True)
    xn = (x - mu) * jax.lax.rsqrt(var + eps)
    xn = xn * g_ref[...].astype(jnp.float32) + b_ref[...].astype(jnp.float32)
    acc = jnp.dot(xn.astype(w_ref.dtype), w_ref[...], preferred_element_type=jnp.float32)
    acc = acc + wb_ref[...].astype(jnp.float32)
    if activation == "gelu":
        acc = jax.nn.gelu(acc)
    o_ref[...] = acc.astype(o_ref.dtype)


def _window_attn_kernel(qkv_ref, mask_ref, o_ref, *, scale, num_heads, head_dim):
    C = num_heads * head_dim
    qkv = qkv_ref[...]                                              # (WB, T, 3C) bf16
    # Key-mask additive bias built in-kernel (no HBM bias tensor), f32.
    bias = jnp.where(mask_ref[...] > 0.5, 0.0, -1e9).astype(jnp.float32)  # (WB, 1, T)
    outs = []
    for h in range(num_heads):                                      # static unroll, nH tiny
        q = qkv[:, :, h * head_dim:(h + 1) * head_dim]
        k = qkv[:, :, C + h * head_dim:C + (h + 1) * head_dim]
        v = qkv[:, :, 2 * C + h * head_dim:2 * C + (h + 1) * head_dim]
        s = jnp.einsum("wqd,wkd->wqk", q, k,
                       preferred_element_type=jnp.float32) * scale
        s = s + bias
        m = jnp.max(s, axis=-1, keepdims=True)                      # softmax math in f32
        p = jnp.exp(s - m)
        l = jnp.sum(p, axis=-1, keepdims=True)
        inv_l = pl.reciprocal(l, approx=True)
        o = jnp.einsum("wqk,wkd->wqd", p.astype(qkv.dtype), v,
                       preferred_element_type=jnp.float32) * inv_l
        outs.append(o)
    o_full = outs[0] if num_heads == 1 else jnp.concatenate(outs, axis=-1)
    o_ref[...] = o_full.astype(o_ref.dtype)                         # lane-dense (WB, T, C)


# ----------------------------------------------------------------------------------
# Kernel wrappers
# ----------------------------------------------------------------------------------
def matmul_bias(x, w, b, activation=None, residual=None):
    """x: (M, K) @ w: (K, N) + b, optional fused activation or residual add."""
    M, K = x.shape
    N = w.shape[1]
    Mp, tm = _row_tiling(M)
    xp = _pad_rows(x, Mp)
    cp = pltpu.CompilerParams(dimension_semantics=("parallel",))
    out_shape = jax.ShapeDtypeStruct((Mp, N), x.dtype)
    if residual is None:
        out = pl.pallas_call(
            functools.partial(_matmul_kernel, activation=activation),
            out_shape=out_shape,
            grid_spec=pltpu.PrefetchScalarGridSpec(
                num_scalar_prefetch=0,
                grid=(Mp // tm,),
                in_specs=[
                    pl.BlockSpec((tm, K), lambda i: (i, 0)),
                    pl.BlockSpec((K, N), lambda i: (0, 0)),
                    pl.BlockSpec((1, N), lambda i: (0, 0)),
                ],
                out_specs=pl.BlockSpec((tm, N), lambda i: (i, 0)),
            ),
            compiler_params=cp,
        )(xp, w, b.reshape(1, N))
    else:
        rp = _pad_rows(residual, Mp)
        out = pl.pallas_call(
            _matmul_res_kernel,
            out_shape=out_shape,
            grid_spec=pltpu.PrefetchScalarGridSpec(
                num_scalar_prefetch=0,
                grid=(Mp // tm,),
                in_specs=[
                    pl.BlockSpec((tm, K), lambda i: (i, 0)),
                    pl.BlockSpec((K, N), lambda i: (0, 0)),
                    pl.BlockSpec((1, N), lambda i: (0, 0)),
                    pl.BlockSpec((tm, N), lambda i: (i, 0)),
                ],
                out_specs=pl.BlockSpec((tm, N), lambda i: (i, 0)),
            ),
            compiler_params=cp,
        )(xp, w, b.reshape(1, N), rp)
    return out[:M] if Mp != M else out


def ln_matmul(x, gamma, beta, w, b, activation=None, eps=1e-5):
    """LayerNorm(x) @ w + b fused in one kernel. x: (M, C)."""
    M, C = x.shape
    N = w.shape[1]
    Mp, tm = _row_tiling(M)
    xp = _pad_rows(x, Mp)
    out = pl.pallas_call(
        functools.partial(_ln_matmul_kernel, eps=eps, activation=activation),
        out_shape=jax.ShapeDtypeStruct((Mp, N), x.dtype),
        grid_spec=pltpu.PrefetchScalarGridSpec(
            num_scalar_prefetch=0,
            grid=(Mp // tm,),
            in_specs=[
                pl.BlockSpec((tm, C), lambda i: (i, 0)),
                pl.BlockSpec((1, C), lambda i: (0, 0)),
                pl.BlockSpec((1, C), lambda i: (0, 0)),
                pl.BlockSpec((C, N), lambda i: (0, 0)),
                pl.BlockSpec((1, N), lambda i: (0, 0)),
            ],
            out_specs=pl.BlockSpec((tm, N), lambda i: (i, 0)),
        ),
        compiler_params=pltpu.CompilerParams(dimension_semantics=("parallel",)),
    )(xp, gamma.reshape(1, C), beta.reshape(1, C), w, b.reshape(1, N))
    return out[:M] if Mp != M else out


def window_attention(qkv, mask_w, num_heads):
    """qkv: (BW, T, 3C) packed; mask_w: (BW, 1, T) float; returns (BW, T, C)."""
    BW, T, C3 = qkv.shape
    C = C3 // 3
    Dh = C // num_heads
    scale = Dh ** -0.5
    WB = _pick_window_tile(BW)
    return pl.pallas_call(
        functools.partial(_window_attn_kernel, scale=scale,
                          num_heads=num_heads, head_dim=Dh),
        out_shape=jax.ShapeDtypeStruct((BW, T, C), qkv.dtype),
        grid_spec=pltpu.PrefetchScalarGridSpec(
            num_scalar_prefetch=0,
            grid=(BW // WB,),
            in_specs=[
                pl.BlockSpec((WB, T, C3), lambda i: (i, 0, 0)),
                pl.BlockSpec((WB, 1, T), lambda i: (i, 0, 0)),
            ],
            out_specs=pl.BlockSpec((WB, T, C), lambda i: (i, 0, 0)),
        ),
        compiler_params=pltpu.CompilerParams(dimension_semantics=("parallel",)),
    )(qkv, mask_w)


# ----------------------------------------------------------------------------------
# JAX glue (window partition / module wiring)
# ----------------------------------------------------------------------------------
def window_partition(x, ws):
    B, H, W, C = x.shape
    x = x.reshape(B, H // ws, ws, W // ws, ws, C)
    x = jnp.transpose(x, (0, 1, 3, 2, 4, 5))
    return x.reshape(B * (H // ws) * (W // ws), ws * ws, C)


def window_reverse(xw, ws, B, H, W):
    C = xw.shape[-1]
    x = xw.reshape(B, H // ws, W // ws, ws, ws, C)
    x = jnp.transpose(x, (0, 1, 3, 2, 4, 5))
    return x.reshape(B, H, W, C)


def swin_block_windowed(xw, mask_w, p, num_heads):
    """One (non-shifted) Swin block, fully in windowed (BW, T, C) layout."""
    BW, T, C = xw.shape
    M = BW * T
    xflat = xw.reshape(M, C)
    qkv = ln_matmul(xflat, p["ln1_g"], p["ln1_b"], p["w_qkv"], p["b_qkv"])      # (M, 3C)
    attn = window_attention(qkv.reshape(BW, T, 3 * C), mask_w, num_heads)       # (BW, T, C)
    x1 = matmul_bias(attn.reshape(M, C), p["w_proj"], p["b_proj"], residual=xflat)
    h1 = ln_matmul(x1, p["ln2_g"], p["ln2_b"], p["w_fc1"], p["b_fc1"], activation="gelu")
    x2 = matmul_bias(h1, p["w_fc2"], p["b_fc2"], residual=x1)
    return x2.reshape(BW, T, C)


def basic_layer_2d(x, mask, blocks, num_heads, window_size):
    # TODO(synk): exact `partial=True` mask-update semantics of BasicLayer2d are not
    # provided; we apply mask-gated (key-bias) window attention and return mask unchanged.
    B, H, W, C = x.shape
    ws = window_size
    T = ws * ws
    xw = window_partition(x, ws)                               # (BW, T, C)
    BW = xw.shape[0]
    mw = window_partition(mask[..., None], ws)[..., 0]         # (BW, T)
    mw = mw.reshape(BW, 1, T)
    for p in blocks:
        xw = swin_block_windowed(xw, mw, p, num_heads)
    return window_reverse(xw, ws, B, H, W), mask


def patch_resizing_up(x, w, b):
    # TODO(synk): PatchResizing2d internals not provided; 1x1 channel projection at the
    # low resolution then nearest 2x upsample (the two commute; 4x less matmul work).
    B, H, W, C = x.shape
    out = matmul_bias(x.reshape(B * H * W, C), w, b).reshape(B, H, W, w.shape[1])
    return jnp.repeat(jnp.repeat(out, 2, axis=1), 2, axis=2)


def conv_norm_act_1x1_tanh(x, w, b):
    # TODO(synk): ConvNormAct norm layer type not provided; implemented as 1x1 conv + tanh.
    B, H, W, C = x.shape
    out = matmul_bias(x.reshape(B * H * W, C), w, b, activation="tanh")
    return out.reshape(B, H, W, w.shape[1])


def decoder_forward(params, X, skips, masks, num_heads, window_size):
    X = X.astype(jnp.bfloat16)
    n_stages = len(params["stages"])
    for i in reversed(range(n_stages)):
        stage = params["stages"][i]
        X = jnp.concatenate([X, skips[i].astype(jnp.bfloat16)], axis=-1)
        X, _ = basic_layer_2d(X, masks[i].astype(jnp.float32), stage["blocks"],
                              num_heads[i], window_size)
        if i > 0:
            X = patch_resizing_up(X, stage["up_w"], stage["up_b"])
    # n_conv_stages == 0 -> no conv_up_blocks (Upsample path not exercised)
    X = conv_norm_act_1x1_tanh(X, params["last_w"], params["last_b"])
    return jnp.transpose(X, (0, 3, 1, 2)).astype(jnp.float32)   # NHWC -> NCHW like PyTorch


# ----------------------------------------------------------------------------------
# Deterministic parameter init (shapes follow Decoder.__init__); weights in bf16.
# ----------------------------------------------------------------------------------
def init_decoder_params(key, dim, dim_mults, depths):
    wdt = jnp.bfloat16
    dims = [dim * m for m in dim_mults]
    stages = []
    for i in range(len(dim_mults)):
        C = dims[i] * 2
        blocks = []
        for _ in range(depths[i]):
            key, k0, k1, k2, k3 = jax.random.split(key, 5)
            blocks.append({
                "ln1_g": jnp.ones((C,), jnp.float32),
                "ln1_b": jnp.zeros((C,), jnp.float32),
                "w_qkv": (0.02 * jax.random.normal(k0, (C, 3 * C), jnp.float32)).astype(wdt),
                "b_qkv": jnp.zeros((3 * C,), jnp.float32),
                "w_proj": (0.02 * jax.random.normal(k1, (C, C), jnp.float32)).astype(wdt),
                "b_proj": jnp.zeros((C,), jnp.float32),
                "ln2_g": jnp.ones((C,), jnp.float32),
                "ln2_b": jnp.zeros((C,), jnp.float32),
                "w_fc1": (0.02 * jax.random.normal(k2, (C, 4 * C), jnp.float32)).astype(wdt),
                "b_fc1": jnp.zeros((4 * C,), jnp.float32),
                "w_fc2": (0.02 * jax.random.normal(k3, (4 * C, C), jnp.float32)).astype(wdt),
                "b_fc2": jnp.zeros((C,), jnp.float32),
            })
        stage = {"blocks": blocks}
        if i > 0:
            key, ku = jax.random.split(key)
            stage["up_w"] = (0.02 * jax.random.normal(ku, (C, dims[i - 1]), jnp.float32)).astype(wdt)
            stage["up_b"] = jnp.zeros((dims[i - 1],), jnp.float32)
        stages.append(stage)
    key, kl = jax.random.split(key)
    return {
        "stages": stages,
        "last_w": (0.02 * jax.random.normal(kl, (dim * 2, 3), jnp.float32)).astype(wdt),
        "last_b": jnp.zeros((3,), jnp.float32),
    }


# ----------------------------------------------------------------------------------
if __name__ == "__main__":
    img_size = 16
    dim = 16
    dim_mults = [1, 2]
    depths = [1, 1]
    window_size = 4
    num_heads = dim_mults
    dims = [dim * m for m in dim_mults]
    B = 2

    key = jax.random.PRNGKey(0)
    key, kp, kx, ks0, ks1, km0, km1 = jax.random.split(key, 7)
    params = init_decoder_params(kp, dim, dim_mults, depths)

    # X enters at the deepest resolution with dims[-1] channels (NHWC).
    X = jax.random.normal(kx, (B, img_size // 2, img_size // 2, dims[1]), jnp.float32)
    skips = [
        jax.random.normal(ks0, (B, img_size, img_size, dims[0]), jnp.float32),
        jax.random.normal(ks1, (B, img_size // 2, img_size // 2, dims[1]), jnp.float32),
    ]
    masks = [
        (jax.random.uniform(km0, (B, img_size, img_size)) > 0.3).astype(jnp.float32),
        (jax.random.uniform(km1, (B, img_size // 2, img_size // 2)) > 0.3).astype(jnp.float32),
    ]

    @jax.jit
    def fwd(params, X, skips, masks):
        return decoder_forward(params, X, skips, masks, num_heads, window_size)

    out = fwd(params, X, skips, masks)
    out = jax.block_until_ready(out)
    assert out.shape == (B, 3, img_size, img_size), out.shape
    assert jnp.all(jnp.isfinite(out))
    print("KERNEL_OK")
</pallas_src>

<mosaic_0001>
module attributes {stable_mosaic.version = 11 : i64} {
  func.func @_window_attn_kernel(%arg0: i32, %arg1: memref<4x16x192xbf16, #tpu.memory_space<vmem>>, %arg2: memref<4x1x16xf32, #tpu.memory_space<vmem>>, %arg3: memref<4x16x64xbf16, #tpu.memory_space<vmem>>) attributes {dimension_semantics = [#tpu.dimension_semantics<parallel>], iteration_bounds = array<i64: 2>, scalar_prefetch = 0 : i64, scratch_operands = 0 : i64, tpu.core_type = #tpu.core_type<tc>, window_params = [{transform_indices = @transform_0, window_bounds = array<i64: 4, 16, 192>}, {transform_indices = @transform_1, window_bounds = array<i64: 4, 1, 16>}, {transform_indices = @transform_2, window_bounds = array<i64: 4, 16, 64>}]} {
    %c0 = arith.constant 0 : index
    %c0_0 = arith.constant 0 : index
    %c0_1 = arith.constant 0 : index
    %0 = vector.load %arg1[%c0, %c0_0, %c0_1] : memref<4x16x192xbf16, #tpu.memory_space<vmem>>, vector<4x16x192xbf16>
    %c0_2 = arith.constant 0 : index
    %c0_3 = arith.constant 0 : index
    %c0_4 = arith.constant 0 : index
    %1 = vector.load %arg2[%c0_2, %c0_3, %c0_4] : memref<4x1x16xf32, #tpu.memory_space<vmem>>, vector<4x1x16xf32>
    %cst = arith.constant 5.000000e-01 : f32
    %2 = vector.broadcast %cst : f32 to vector<4x1x16xf32>
    %3 = arith.cmpf ogt, %1, %2 : vector<4x1x16xf32>
    %cst_5 = arith.constant 0.000000e+00 : f32
    %cst_6 = arith.constant -1.000000e+09 : f32
    %4 = vector.broadcast %cst_5 : f32 to vector<4x1x16xf32>
    %5 = vector.broadcast %cst_6 : f32 to vector<4x1x16xf32>
    %6 = arith.select %3, %4, %5 : vector<4x1x16xi1>, vector<4x1x16xf32>
    %7 = vector.extract_strided_slice %0 {offsets = [0, 0, 0], sizes = [4, 16, 32], strides = [1, 1, 1]} : vector<4x16x192xbf16> to vector<4x16x32xbf16>
    %8 = vector.extract_strided_slice %0 {offsets = [0, 0, 64], sizes = [4, 16, 32], strides = [1, 1, 1]} : vector<4x16x192xbf16> to vector<4x16x32xbf16>
    %9 = vector.extract_strided_slice %0 {offsets = [0, 0, 128], sizes = [4, 16, 32], strides = [1, 1, 1]} : vector<4x16x192xbf16> to vector<4x16x32xbf16>
    "tpu.trace_start"() <{level = 10 : i32, message = "wqd,wkd->wqk"}> : () -> ()
    %cst_7 = arith.constant dense<0.000000e+00> : vector<4x16x16xf32>
    %10 = tpu.matmul %7, %8, %cst_7 {dimension_numbers = #tpu.dot_dimension_numbers<[2], [2], [1], [1], [0, 0, 0, 1, 1, 1], [0], [0]>} : vector<4x16x32xbf16>, vector<4x16x32xbf16>, vector<4x16x16xf32> -> vector<4x16x16xf32>
    "tpu.trace_stop"() : () -> ()
    %cst_8 = arith.constant 0.176776692 : f32
    %11 = vector.broadcast %cst_8 : f32 to vector<4x16x16xf32>
    %12 = arith.mulf %10, %11 : vector<4x16x16xf32>
    %13 = vector.broadcast %6 : vector<4x1x16xf32> to vector<4x16x16xf32>
    %14 = arith.addf %12, %13 : vector<4x16x16xf32>
    %cst_9 = arith.constant dense<0xFF800000> : vector<4x16xf32>
    %15 = vector.multi_reduction <maximumf>, %14, %cst_9 [2] : vector<4x16x16xf32> to vector<4x16xf32>
    %16 = vector.shape_cast %15 : vector<4x16xf32> to vector<4x16x1xf32>
    %17 = vector.broadcast %16 : vector<4x16x1xf32> to vector<4x16x16xf32>
    %18 = arith.subf %14, %17 : vector<4x16x16xf32>
    %19 = math.exp %18 : vector<4x16x16xf32>
    %cst_10 = arith.constant dense<0.000000e+00> : vector<4x16xf32>
    %20 = vector.multi_reduction <add>, %19, %cst_10 [2] : vector<4x16x16xf32> to vector<4x16xf32>
    %21 = vector.shape_cast %20 : vector<4x16xf32> to vector<4x16x1xf32>
    %22 = tpu.reciprocal %21 {approx = true} : vector<4x16x1xf32> -> vector<4x16x1xf32>
    %23 = arith.truncf %19 : vector<4x16x16xf32> to vector<4x16x16xbf16>
    "tpu.trace_start"() <{level = 10 : i32, message = "wqk,wkd->wqd"}> : () -> ()
    %cst_11 = arith.constant dense<0.000000e+00> : vector<4x16x32xf32>
    %24 = tpu.matmul %23, %9, %cst_11 {dimension_numbers = #tpu.dot_dimension_numbers<[2], [1], [1], [2], [0, 0, 0, 1, 1, 2], [0], [0]>} : vector<4x16x16xbf16>, vector<4x16x32xbf16>, vector<4x16x32xf32> -> vector<4x16x32xf32>
    "tpu.trace_stop"() : () -> ()
    %25 = vector.broadcast %22 : vector<4x16x1xf32> to vector<4x16x32xf32>
    %26 = arith.mulf %24, %25 : vector<4x16x32xf32>
    %27 = vector.extract_strided_slice %0 {offsets = [0, 0, 32], sizes = [4, 16, 32], strides = [1, 1, 1]} : vector<4x16x192xbf16> to vector<4x16x32xbf16>
    %28 = vector.extract_strided_slice %0 {offsets = [0, 0, 96], sizes = [4, 16, 32], strides = [1, 1, 1]} : vector<4x16x192xbf16> to vector<4x16x32xbf16>
    %29 = vector.extract_strided_slice %0 {offsets = [0, 0, 160], sizes = [4, 16, 32], strides = [1, 1, 1]} : vector<4x16x192xbf16> to vector<4x16x32xbf16>
    "tpu.trace_start"() <{level = 10 : i32, message = "wqd,wkd->wqk"}> : () -> ()
    %cst_12 = arith.constant dense<0.000000e+00> : vector<4x16x16xf32>
    %30 = tpu.matmul %27, %28, %cst_12 {dimension_numbers = #tpu.dot_dimension_numbers<[2], [2], [1], [1], [0, 0, 0, 1, 1, 1], [0], [0]>} : vector<4x16x32xbf16>, vector<4x16x32xbf16>, vector<4x16x16xf32> -> vector<4x16x16xf32>
    "tpu.trace_stop"() : () -> ()
    %cst_13 = arith.constant 0.176776692 : f32
    %31 = vector.broadcast %cst_13 : f32 to vector<4x16x16xf32>
    %32 = arith.mulf %30, %31 : vector<4x16x16xf32>
    %33 = vector.broadcast %6 : vector<4x1x16xf32> to vector<4x16x16xf32>
    %34 = arith.addf %32, %33 : vector<4x16x16xf32>
    %cst_14 = arith.constant dense<0xFF800000> : vector<4x16xf32>
    %35 = vector.multi_reduction <maximumf>, %34, %cst_14 [2] : vector<4x16x16xf32> to vector<4x16xf32>
    %36 = vector.shape_cast %35 : vector<4x16xf32> to vector<4x16x1xf32>
    %37 = vector.broadcast %36 : vector<4x16x1xf32> to vector<4x16x16xf32>
    %38 = arith.subf %34, %37 : vector<4x16x16xf32>
    %39 = math.exp %38 : vector<4x16x16xf32>
    %cst_15 = arith.constant dense<0.000000e+00> : vector<4x16xf32>
    %40 = vector.multi_reduction <add>, %39, %cst_15 [2] : vector<4x16x16xf32> to vector<4x16xf32>
    %41 = vector.shape_cast %40 : vector<4x16xf32> to vector<4x16x1xf32>
    %42 = tpu.reciprocal %41 {approx = true} : vector<4x16x1xf32> -> vector<4x16x1xf32>
    %43 = arith.truncf %39 : vector<4x16x16xf32> to vector<4x16x16xbf16>
    "tpu.trace_start"() <{level = 10 : i32, message = "wqk,wkd->wqd"}> : () -> ()
    %cst_16 = arith.constant dense<0.000000e+00> : vector<4x16x32xf32>
    %44 = tpu.matmul %43, %29, %cst_16 {dimension_numbers = #tpu.dot_dimension_numbers<[2], [1], [1], [2], [0, 0, 0, 1, 1, 2], [0], [0]>} : vector<4x16x16xbf16>, vector<4x16x32xbf16>, vector<4x16x32xf32> -> vector<4x16x32xf32>
    "tpu.trace_stop"() : () -> ()
    %45 = vector.broadcast %42 : vector<4x16x1xf32> to vector<4x16x32xf32>
    %46 = arith.mulf %44, %45 : vector<4x16x32xf32>
    %47 = tpu.concatenate %26, %46 in 2 : vector<4x16x32xf32>, vector<4x16x32xf32> -> vector<4x16x64xf32>
    %48 = arith.truncf %47 : vector<4x16x64xf32> to vector<4x16x64xbf16>
    %c0_17 = arith.constant 0 : index
    %c0_18 = arith.constant 0 : index
    %c0_19 = arith.constant 0 : index
    %49 = vector.load %arg3[%c0_17, %c0_18, %c0_19] : memref<4x16x64xbf16, #tpu.memory_space<vmem>>, vector<4x16x64xbf16>
    tpu.vector_store %arg3[%c0_17, %c0_18, %c0_19], %48 {strides = array<i32>} : memref<4x16x64xbf16, #tpu.memory_space<vmem>>, vector<4x16x64xbf16>,
    return
  }
  func.func @transform_0(%arg0: i32) -> (i32, i32, i32) {
    %c0_i32 = arith.constant 0 : i32
    %c0_i32_0 = arith.constant 0 : i32
    %c0_i32_1 = arith.constant 0 : i32
    return %arg0, %c0_i32, %c0_i32_0 : i32, i32, i32
  }
  func.func @transform_1(%arg0: i32) -> (i32, i32, i32) {
    %c0_i32 = arith.constant 0 : i32
    %c0_i32_0 = arith.constant 0 : i32
    %c0_i32_1 = arith.constant 0 : i32
    return %arg0, %c0_i32, %c0_i32_0 : i32, i32, i32
  }
  func.func @transform_2(%arg0: i32) -> (i32, i32, i32) {
    %c0_i32 = arith.constant 0 : i32
    %c0_i32_0 = arith.constant 0 : i32
    %c0_i32_1 = arith.constant 0 : i32
    return %arg0, %c0_i32, %c0_i32_0 : i32, i32, i32
  }
}

module attributes {stable_mosaic.version = 11 : i64} {
  func.func @_ln_matmul_kernel(%arg0: i32, %arg1: memref<64x64xbf16, #tpu.memory_space<vmem>>, %arg2: memref<1x64xf32, #tpu.memory_space<vmem>>, %arg3: memref<1x64xf32, #tpu.memory_space<vmem>>, %arg4: memref<64x192xbf16, #tpu.memory_space<vmem>>, %arg5: memref<1x192xf32, #tpu.memory_space<vmem>>, %arg6: memref<64x192xbf16, #tpu.memory_space<vmem>>) attributes {dimension_semantics = [#tpu.dimension_semantics<parallel>], iteration_bounds = array<i64: 2>, scalar_prefetch = 0 : i64, scratch_operands = 0 : i64, tpu.core_type = #tpu.core_type<tc>, window_params = [{transform_indices = @transform_0, window_bounds = array<i64: 64, 64>}, {pipeline_mode = #tpu.pipeline_mode<synchronous>, transform_indices = @transform_1, window_bounds = array<i64: 1, 64>}, {pipeline_mode = #tpu.pipeline_mode<synchronous>, transform_indices = @transform_2, window_bounds = array<i64: 1, 64>}, {pipeline_mode = #tpu.pipeline_mode<synchronous>, transform_indices = @transform_3, window_bounds = array<i64: 64, 192>}, {pipeline_mode = #tpu.pipeline_mode<synchronous>, transform_indices = @transform_4, window_bounds = array<i64: 1, 192>}, {transform_indices = @transform_5, window_bounds = array<i64: 64, 192>}]} {
    %c0 = arith.constant 0 : index
    %c0_0 = arith.constant 0 : index
    %0 = vector.load %arg1[%c0, %c0_0] : memref<64x64xbf16, #tpu.memory_space<vmem>>, vector<64x64xbf16>
    %1 = arith.extf %0 : vector<64x64xbf16> to vector<64x64xf32>
    %cst = arith.constant dense<0.000000e+00> : vector<64xf32>
    %2 = vector.multi_reduction <add>, %1, %cst [1] : vector<64x64xf32> to vector<64xf32>
    %3 = vector.shape_cast %2 : vector<64xf32> to vector<64x1xf32>
    %cst_1 = arith.constant 6.400000e+01 : f32
    %4 = vector.broadcast %cst_1 : f32 to vector<64x1xf32>
    %5 = arith.divf %3, %4 : vector<64x1xf32>
    %6 = vector.broadcast %5 : vector<64x1xf32> to vector<64x64xf32>
    %7 = arith.subf %1, %6 : vector<64x64xf32>
    %8 = arith.mulf %7, %7 : vector<64x64xf32>
    %cst_2 = arith.constant dense<0.000000e+00> : vector<64xf32>
    %9 = vector.multi_reduction <add>, %8, %cst_2 [1] : vector<64x64xf32> to vector<64xf32>
    %10 = vector.shape_cast %9 : vector<64xf32> to vector<64x1xf32>
    %cst_3 = arith.constant 6.400000e+01 : f32
    %11 = vector.broadcast %cst_3 : f32 to vector<64x1xf32>
    %12 = arith.divf %10, %11 : vector<64x1xf32>
    %13 = vector.broadcast %5 : vector<64x1xf32> to vector<64x64xf32>
    %14 = arith.subf %1, %13 : vector<64x64xf32>
    %cst_4 = arith.constant 9.99999974E-6 : f32
    %15 = vector.broadcast %cst_4 : f32 to vector<64x1xf32>
    %16 = arith.addf %12, %15 : vector<64x1xf32>
    %17 = math.rsqrt %16 : vector<64x1xf32>
    %18 = vector.broadcast %17 : vector<64x1xf32> to vector<64x64xf32>
    %19 = arith.mulf %14, %18 : vector<64x64xf32>
    %c0_5 = arith.constant 0 : index
    %c0_6 = arith.constant 0 : index
    %20 = vector.load %arg2[%c0_5, %c0_6] : memref<1x64xf32, #tpu.memory_space<vmem>>, vector<1x64xf32>
    %21 = vector.broadcast %20 : vector<1x64xf32> to vector<64x64xf32>
    %22 = arith.mulf %19, %21 : vector<64x64xf32>
    %c0_7 = arith.constant 0 : index
    %c0_8 = arith.constant 0 : index
    %23 = vector.load %arg3[%c0_7, %c0_8] : memref<1x64xf32, #tpu.memory_space<vmem>>, vector<1x64xf32>
    %24 = vector.broadcast %23 : vector<1x64xf32> to vector<64x64xf32>
    %25 = arith.addf %22, %24 : vector<64x64xf32>
    %26 = arith.truncf %25 : vector<64x64xf32> to vector<64x64xbf16>
    %c0_9 = arith.constant 0 : index
    %c0_10 = arith.constant 0 : index
    %27 = vector.load %arg4[%c0_9, %c0_10] : memref<64x192xbf16, #tpu.memory_space<vmem>>, vector<64x192xbf16>
    %cst_11 = arith.constant dense<0.000000e+00> : vector<64x192xf32>
    %28 = tpu.matmul %26, %27, %cst_11 {dimension_numbers = #tpu.dot_dimension_numbers<[1], [0], [0], [1], [0, 0, 1, 1], [], []>} : vector<64x64xbf16>, vector<64x192xbf16>, vector<64x192xf32> -> vector<64x192xf32>
    %c0_12 = arith.constant 0 : index
    %c0_13 = arith.constant 0 : index
    %29 = vector.load %arg5[%c0_12, %c0_13] : memref<1x192xf32, #tpu.memory_space<vmem>>, vector<1x192xf32>
    %30 = vector.broadcast %29 : vector<1x192xf32> to vector<64x192xf32>
    %31 = arith.addf %28, %30 : vector<64x192xf32>
    %32 = arith.truncf %31 : vector<64x192xf32> to vector<64x192xbf16>
    %c0_14 = arith.constant 0 : index
    %c0_15 = arith.constant 0 : index
    %33 = vector.load %arg6[%c0_14, %c0_15] : memref<64x192xbf16, #tpu.memory_space<vmem>>, vector<64x192xbf16>
    tpu.vector_store %arg6[%c0_14, %c0_15], %32 {strides = array<i32>} : memref<64x192xbf16, #tpu.memory_space<vmem>>, vector<64x192xbf16>,
    return
  }
  func.func @transform_0(%arg0: i32) -> (i32, i32) {
    %c0_i32 = arith.constant 0 : i32
    %c0_i32_0 = arith.constant 0 : i32
    return %arg0, %c0_i32 : i32, i32
  }
  func.func @transform_1(%arg0: i32) -> (i32, i32) {
    %c0_i32 = arith.constant 0 : i32
    %c0_i32_0 = arith.constant 0 : i32
    %c0_i32_1 = arith.constant 0 : i32
    return %c0_i32, %c0_i32_0 : i32, i32
  }
  func.func @transform_2(%arg0: i32) -> (i32, i32) {
    %c0_i32 = arith.constant 0 : i32
    %c0_i32_0 = arith.constant 0 : i32
    %c0_i32_1 = arith.constant 0 : i32
    return %c0_i32, %c0_i32_0 : i32, i32
  }
  func.func @transform_3(%arg0: i32) -> (i32, i32) {
    %c0_i32 = arith.constant 0 : i32
    %c0_i32_0 = arith.constant 0 : i32
    %c0_i32_1 = arith.constant 0 : i32
    return %c0_i32, %c0_i32_0 : i32, i32
  }
  func.func @transform_4(%arg0: i32) -> (i32, i32) {
    %c0_i32 = arith.constant 0 : i32
    %c0_i32_0 = arith.constant 0 : i32
    %c0_i32_1 = arith.constant 0 : i32
    return %c0_i32, %c0_i32_0 : i32, i32
  }
  func.func @transform_5(%arg0: i32) -> (i32, i32) {
    %c0_i32 = arith.constant 0 : i32
    %c0_i32_0 = arith.constant 0 : i32
    return %arg0, %c0_i32 : i32, i32
  }
}

module attributes {stable_mosaic.version = 11 : i64} {
  func.func @_matmul_res_kernel(%arg0: i32, %arg1: memref<64x64xbf16, #tpu.memory_space<vmem>>, %arg2: memref<64x64xbf16, #tpu.memory_space<vmem>>, %arg3: memref<1x64xf32, #tpu.memory_space<vmem>>, %arg4: memref<64x64xbf16, #tpu.memory_space<vmem>>, %arg5: memref<64x64xbf16, #tpu.memory_space<vmem>>) attributes {dimension_semantics = [#tpu.dimension_semantics<parallel>], iteration_bounds = array<i64: 2>, scalar_prefetch = 0 : i64, scratch_operands = 0 : i64, tpu.core_type = #tpu.core_type<tc>, window_params = [{transform_indices = @transform_0, window_bounds = array<i64: 64, 64>}, {pipeline_mode = #tpu.pipeline_mode<synchronous>, transform_indices = @transform_1, window_bounds = array<i64: 64, 64>}, {pipeline_mode = #tpu.pipeline_mode<synchronous>, transform_indices = @transform_2, window_bounds = array<i64: 1, 64>}, {transform_indices = @transform_3, window_bounds = array<i64: 64, 64>}, {transform_indices = @transform_4, window_bounds = array<i64: 64, 64>}]} {
    %c0 = arith.constant 0 : index
    %c0_0 = arith.constant 0 : index
    %0 = vector.load %arg1[%c0, %c0_0] : memref<64x64xbf16, #tpu.memory_space<vmem>>, vector<64x64xbf16>
    %c0_1 = arith.constant 0 : index
    %c0_2 = arith.constant 0 : index
    %1 = vector.load %arg2[%c0_1, %c0_2] : memref<64x64xbf16, #tpu.memory_space<vmem>>, vector<64x64xbf16>
    %cst = arith.constant dense<0.000000e+00> : vector<64x64xf32>
    %2 = tpu.matmul %0, %1, %cst {dimension_numbers = #tpu.dot_dimension_numbers<[1], [0], [0], [1], [0, 0, 1, 1], [], []>} : vector<64x64xbf16>, vector<64x64xbf16>, vector<64x64xf32> -> vector<64x64xf32>
    %c0_3 = arith.constant 0 : index
    %c0_4 = arith.constant 0 : index
    %3 = vector.load %arg3[%c0_3, %c0_4] : memref<1x64xf32, #tpu.memory_space<vmem>>, vector<1x64xf32>
    %4 = vector.broadcast %3 : vector<1x64xf32> to vector<64x64xf32>
    %5 = arith.addf %2, %4 : vector<64x64xf32>
    %c0_5 = arith.constant 0 : index
    %c0_6 = arith.constant 0 : index
    %6 = vector.load %arg4[%c0_5, %c0_6] : memref<64x64xbf16, #tpu.memory_space<vmem>>, vector<64x64xbf16>
    %7 = arith.extf %6 : vector<64x64xbf16> to vector<64x64xf32>
    %8 = arith.addf %5, %7 : vector<64x64xf32>
    %9 = arith.truncf %8 : vector<64x64xf32> to vector<64x64xbf16>
    %c0_7 = arith.constant 0 : index
    %c0_8 = arith.constant 0 : index
    %10 = vector.load %arg5[%c0_7, %c0_8] : memref<64x64xbf16, #tpu.memory_space<vmem>>, vector<64x64xbf16>
    tpu.vector_store %arg5[%c0_7, %c0_8], %9 {strides = array<i32>} : memref<64x64xbf16, #tpu.memory_space<vmem>>, vector<64x64xbf16>,
    return
  }
  func.func @transform_0(%arg0: i32) -> (i32, i32) {
    %c0_i32 = arith.constant 0 : i32
    %c0_i32_0 = arith.constant 0 : i32
    return %arg0, %c0_i32 : i32, i32
  }
  func.func @transform_1(%arg0: i32) -> (i32, i32) {
    %c0_i32 = arith.constant 0 : i32
    %c0_i32_0 = arith.constant 0 : i32
    %c0_i32_1 = arith.constant 0 : i32
    return %c0_i32, %c0_i32_0 : i32, i32
  }
  func.func @transform_2(%arg0: i32) -> (i32, i32) {
    %c0_i32 = arith.constant 0 : i32
    %c0_i32_0 = arith.constant 0 : i32
    %c0_i32_1 = arith.constant 0 : i32
    return %c0_i32, %c0_i32_0 : i32, i32
  }
  func.func @transform_3(%arg0: i32) -> (i32, i32) {
    %c0_i32 = arith.constant 0 : i32
    %c0_i32_0 = arith.constant 0 : i32
    return %arg0, %c0_i32 : i32, i32
  }
  func.func @transform_4(%arg0: i32) -> (i32, i32) {
    %c0_i32 = arith.constant 0 : i32
    %c0_i32_0 = arith.constant 0 : i32
    return %arg0, %c0_i32 : i32, i32
  }
}

module attributes {stable_mosaic.version = 11 : i64} {
  func.func @_ln_matmul_kernel(%arg0: i32, %arg1: memref<64x64xbf16, #tpu.memory_space<vmem>>, %arg2: memref<1x64xf32, #tpu.memory_space<vmem>>, %arg3: memref<1x64xf32, #tpu.memory_space<vmem>>, %arg4: memref<64x256xbf16, #tpu.memory_space<vmem>>, %arg5: memref<1x256xf32, #tpu.memory_space<vmem>>, %arg6: memref<64x256xbf16, #tpu.memory_space<vmem>>) attributes {dimension_semantics = [#tpu.dimension_semantics<parallel>], iteration_bounds = array<i64: 2>, scalar_prefetch = 0 : i64, scratch_operands = 0 : i64, tpu.core_type = #tpu.core_type<tc>, window_params = [{transform_indices = @transform_0, window_bounds = array<i64: 64, 64>}, {pipeline_mode = #tpu.pipeline_mode<synchronous>, transform_indices = @transform_1, window_bounds = array<i64: 1, 64>}, {pipeline_mode = #tpu.pipeline_mode<synchronous>, transform_indices = @transform_2, window_bounds = array<i64: 1, 64>}, {pipeline_mode = #tpu.pipeline_mode<synchronous>, transform_indices = @transform_3, window_bounds = array<i64: 64, 256>}, {pipeline_mode = #tpu.pipeline_mode<synchronous>, transform_indices = @transform_4, window_bounds = array<i64: 1, 256>}, {transform_indices = @transform_5, window_bounds = array<i64: 64, 256>}]} {
    %c0 = arith.constant 0 : index
    %c0_0 = arith.constant 0 : index
    %0 = vector.load %arg1[%c0, %c0_0] : memref<64x64xbf16, #tpu.memory_space<vmem>>, vector<64x64xbf16>
    %1 = arith.extf %0 : vector<64x64xbf16> to vector<64x64xf32>
    %cst = arith.constant dense<0.000000e+00> : vector<64xf32>
    %2 = vector.multi_reduction <add>, %1, %cst [1] : vector<64x64xf32> to vector<64xf32>
    %3 = vector.shape_cast %2 : vector<64xf32> to vector<64x1xf32>
    %cst_1 = arith.constant 6.400000e+01 : f32
    %4 = vector.broadcast %cst_1 : f32 to vector<64x1xf32>
    %5 = arith.divf %3, %4 : vector<64x1xf32>
    %6 = vector.broadcast %5 : vector<64x1xf32> to vector<64x64xf32>
    %7 = arith.subf %1, %6 : vector<64x64xf32>
    %8 = arith.mulf %7, %7 : vector<64x64xf32>
    %cst_2 = arith.constant dense<0.000000e+00> : vector<64xf32>
    %9 = vector.multi_reduction <add>, %8, %cst_2 [1] : vector<64x64xf32> to vector<64xf32>
    %10 = vector.shape_cast %9 : vector<64xf32> to vector<64x1xf32>
    %cst_3 = arith.constant 6.400000e+01 : f32
    %11 = vector.broadcast %cst_3 : f32 to vector<64x1xf32>
    %12 = arith.divf %10, %11 : vector<64x1xf32>
    %13 = vector.broadcast %5 : vector<64x1xf32> to vector<64x64xf32>
    %14 = arith.subf %1, %13 : vector<64x64xf32>
    %cst_4 = arith.constant 9.99999974E-6 : f32
    %15 = vector.broadcast %cst_4 : f32 to vector<64x1xf32>
    %16 = arith.addf %12, %15 : vector<64x1xf32>
    %17 = math.rsqrt %16 : vector<64x1xf32>
    %18 = vector.broadcast %17 : vector<64x1xf32> to vector<64x64xf32>
    %19 = arith.mulf %14, %18 : vector<64x64xf32>
    %c0_5 = arith.constant 0 : index
    %c0_6 = arith.constant 0 : index
    %20 = vector.load %arg2[%c0_5, %c0_6] : memref<1x64xf32, #tpu.memory_space<vmem>>, vector<1x64xf32>
    %21 = vector.broadcast %20 : vector<1x64xf32> to vector<64x64xf32>
    %22 = arith.mulf %19, %21 : vector<64x64xf32>
    %c0_7 = arith.constant 0 : index
    %c0_8 = arith.constant 0 : index
    %23 = vector.load %arg3[%c0_7, %c0_8] : memref<1x64xf32, #tpu.memory_space<vmem>>, vector<1x64xf32>
    %24 = vector.broadcast %23 : vector<1x64xf32> to vector<64x64xf32>
    %25 = arith.addf %22, %24 : vector<64x64xf32>
    %26 = arith.truncf %25 : vector<64x64xf32> to vector<64x64xbf16>
    %c0_9 = arith.constant 0 : index
    %c0_10 = arith.constant 0 : index
    %27 = vector.load %arg4[%c0_9, %c0_10] : memref<64x256xbf16, #tpu.memory_space<vmem>>, vector<64x256xbf16>
    %cst_11 = arith.constant dense<0.000000e+00> : vector<64x256xf32>
    %28 = tpu.matmul %26, %27, %cst_11 {dimension_numbers = #tpu.dot_dimension_numbers<[1], [0], [0], [1], [0, 0, 1, 1], [], []>} : vector<64x64xbf16>, vector<64x256xbf16>, vector<64x256xf32> -> vector<64x256xf32>
    %c0_12 = arith.constant 0 : index
    %c0_13 = arith.constant 0 : index
    %29 = vector.load %arg5[%c0_12, %c0_13] : memref<1x256xf32, #tpu.memory_space<vmem>>, vector<1x256xf32>
    %30 = vector.broadcast %29 : vector<1x256xf32> to vector<64x256xf32>
    %31 = arith.addf %28, %30 : vector<64x256xf32>
    %32 = arith.mulf %31, %31 : vector<64x256xf32>
    %33 = arith.mulf %31, %32 : vector<64x256xf32>
    %cst_14 = arith.constant 4.471500e-02 : f32
    %34 = vector.broadcast %cst_14 : f32 to vector<64x256xf32>
    %35 = arith.mulf %34, %33 : vector<64x256xf32>
    %36 = arith.addf %31, %35 : vector<64x256xf32>
    %cst_15 = arith.constant 0.797884583 : f32
    %37 = vector.broadcast %cst_15 : f32 to vector<64x256xf32>
    %38 = arith.mulf %37, %36 : vector<64x256xf32>
    %39 = math.tanh %38 : vector<64x256xf32>
    %cst_16 = arith.constant 1.000000e+00 : f32
    %40 = vector.broadcast %cst_16 : f32 to vector<64x256xf32>
    %41 = arith.addf %40, %39 : vector<64x256xf32>
    %cst_17 = arith.constant 5.000000e-01 : f32
    %42 = vector.broadcast %cst_17 : f32 to vector<64x256xf32>
    %43 = arith.mulf %42, %41 : vector<64x256xf32>
    %44 = arith.mulf %31, %43 : vector<64x256xf32>
    %45 = arith.truncf %44 : vector<64x256xf32> to vector<64x256xbf16>
    %c0_18 = arith.constant 0 : index
    %c0_19 = arith.constant 0 : index
    %46 = vector.load %arg6[%c0_18, %c0_19] : memref<64x256xbf16, #tpu.memory_space<vmem>>, vector<64x256xbf16>
    tpu.vector_store %arg6[%c0_18, %c0_19], %45 {strides = array<i32>} : memref<64x256xbf16, #tpu.memory_space<vmem>>, vector<64x256xbf16>,
    return
  }
  func.func @transform_0(%arg0: i32) -> (i32, i32) {
    %c0_i32 = arith.constant 0 : i32
    %c0_i32_0 = arith.constant 0 : i32
    return %arg0, %c0_i32 : i32, i32
  }
  func.func @transform_1(%arg0: i32) -> (i32, i32) {
    %c0_i32 = arith.constant 0 : i32
    %c0_i32_0 = arith.constant 0 : i32
    %c0_i32_1 = arith.constant 0 : i32
    return %c0_i32, %c0_i32_0 : i32, i32
  }
  func.func @transform_2(%arg0: i32) -> (i32, i32) {
    %c0_i32 = arith.constant 0 : i32
    %c0_i32_0 = arith.constant 0 : i32
    %c0_i32_1 = arith.constant 0 : i32
    return %c0_i32, %c0_i32_0 : i32, i32
  }
  func.func @transform_3(%arg0: i32) -> (i32, i32) {
    %c0_i32 = arith.constant 0 : i32
    %c0_i32_0 = arith.constant 0 : i32
    %c0_i32_1 = arith.constant 0 : i32
    return %c0_i32, %c0_i32_0 : i32, i32
  }
  func.func @transform_4(%arg0: i32) -> (i32, i32) {
    %c0_i32 = arith.constant 0 : i32
    %c0_i32_0 = arith.constant 0 : i32
    %c0_i32_1 = arith.constant 0 : i32
    return %c0_i32, %c0_i32_0 : i32, i32
  }
  func.func @transform_5(%arg0: i32) -> (i32, i32) {
    %c0_i32 = arith.constant 0 : i32
    %c0_i32_0 = arith.constant 0 : i32
    return %arg0, %c0_i32 : i32, i32
  }
}

module attributes {stable_mosaic.version = 11 : i64} {
  func.func @_matmul_res_kernel(%arg0: i32, %arg1: memref<64x256xbf16, #tpu.memory_space<vmem>>, %arg2: memref<256x64xbf16, #tpu.memory_space<vmem>>, %arg3: memref<1x64xf32, #tpu.memory_space<vmem>>, %arg4: memref<64x64xbf16, #tpu.memory_space<vmem>>, %arg5: memref<64x64xbf16, #tpu.memory_space<vmem>>) attributes {dimension_semantics = [#tpu.dimension_semantics<parallel>], iteration_bounds = array<i64: 2>, scalar_prefetch = 0 : i64, scratch_operands = 0 : i64, tpu.core_type = #tpu.core_type<tc>, window_params = [{transform_indices = @transform_0, window_bounds = array<i64: 64, 256>}, {pipeline_mode = #tpu.pipeline_mode<synchronous>, transform_indices = @transform_1, window_bounds = array<i64: 256, 64>}, {pipeline_mode = #tpu.pipeline_mode<synchronous>, transform_indices = @transform_2, window_bounds = array<i64: 1, 64>}, {transform_indices = @transform_3, window_bounds = array<i64: 64, 64>}, {transform_indices = @transform_4, window_bounds = array<i64: 64, 64>}]} {
    %c0 = arith.constant 0 : index
    %c0_0 = arith.constant 0 : index
    %0 = vector.load %arg1[%c0, %c0_0] : memref<64x256xbf16, #tpu.memory_space<vmem>>, vector<64x256xbf16>
    %c0_1 = arith.constant 0 : index
    %c0_2 = arith.constant 0 : index
    %1 = vector.load %arg2[%c0_1, %c0_2] : memref<256x64xbf16, #tpu.memory_space<vmem>>, vector<256x64xbf16>
    %cst = arith.constant dense<0.000000e+00> : vector<64x64xf32>
    %2 = tpu.matmul %0, %1, %cst {dimension_numbers = #tpu.dot_dimension_numbers<[1], [0], [0], [1], [0, 0, 1, 1], [], []>} : vector<64x256xbf16>, vector<256x64xbf16>, vector<64x64xf32> -> vector<64x64xf32>
    %c0_3 = arith.constant 0 : index
    %c0_4 = arith.constant 0 : index
    %3 = vector.load %arg3[%c0_3, %c0_4] : memref<1x64xf32, #tpu.memory_space<vmem>>, vector<1x64xf32>
    %4 = vector.broadcast %3 : vector<1x64xf32> to vector<64x64xf32>
    %5 = arith.addf %2, %4 : vector<64x64xf32>
    %c0_5 = arith.constant 0 : index
    %c0_6 = arith.constant 0 : index
    %6 = vector.load %arg4[%c0_5, %c0_6] : memref<64x64xbf16, #tpu.memory_space<vmem>>, vector<64x64xbf16>
    %7 = arith.extf %6 : vector<64x64xbf16> to vector<64x64xf32>
    %8 = arith.addf %5, %7 : vector<64x64xf32>
    %9 = arith.truncf %8 : vector<64x64xf32> to vector<64x64xbf16>
    %c0_7 = arith.constant 0 : index
    %c0_8 = arith.constant 0 : index
    %10 = vector.load %arg5[%c0_7, %c0_8] : memref<64x64xbf16, #tpu.memory_space<vmem>>, vector<64x64xbf16>
    tpu.vector_store %arg5[%c0_7, %c0_8], %9 {strides = array<i32>} : memref<64x64xbf16, #tpu.memory_space<vmem>>, vector<64x64xbf16>,
    return
  }
  func.func @transform_0(%arg0: i32) -> (i32, i32) {
    %c0_i32 = arith.constant 0 : i32
    %c0_i32_0 = arith.constant 0 : i32
    return %arg0, %c0_i32 : i32, i32
  }
  func.func @transform_1(%arg0: i32) -> (i32, i32) {
    %c0_i32 = arith.constant 0 : i32
    %c0_i32_0 = arith.constant 0 : i32
    %c0_i32_1 = arith.constant 0 : i32
    return %c0_i32, %c0_i32_0 : i32, i32
  }
  func.func @transform_2(%arg0: i32) -> (i32, i32) {
    %c0_i32 = arith.constant 0 : i32
    %c0_i32_0 = arith.constant 0 : i32
    %c0_i32_1 = arith.constant 0 : i32
    return %c0_i32, %c0_i32_0 : i32, i32
  }
  func.func @transform_3(%arg0: i32) -> (i32, i32) {
    %c0_i32 = arith.constant 0 : i32
    %c0_i32_0 = arith.constant 0 : i32
    return %arg0, %c0_i32 : i32, i32
  }
  func.func @transform_4(%arg0: i32) -> (i32, i32) {
    %c0_i32 = arith.constant 0 : i32
    %c0_i32_0 = arith.constant 0 : i32
    return %arg0, %c0_i32 : i32, i32
  }
}

module attributes {stable_mosaic.version = 11 : i64} {
  func.func @_matmul_kernel(%arg0: i32, %arg1: memref<64x64xbf16, #tpu.memory_space<vmem>>, %arg2: memref<64x16xbf16, #tpu.memory_space<vmem>>, %arg3: memref<1x16xf32, #tpu.memory_space<vmem>>, %arg4: memref<64x16xbf16, #tpu.memory_space<vmem>>) attributes {dimension_semantics = [#tpu.dimension_semantics<parallel>], iteration_bounds = array<i64: 2>, scalar_prefetch = 0 : i64, scratch_operands = 0 : i64, tpu.core_type = #tpu.core_type<tc>, window_params = [{transform_indices = @transform_0, window_bounds = array<i64: 64, 64>}, {pipeline_mode = #tpu.pipeline_mode<synchronous>, transform_indices = @transform_1, window_bounds = array<i64: 64, 16>}, {pipeline_mode = #tpu.pipeline_mode<synchronous>, transform_indices = @transform_2, window_bounds = array<i64: 1, 16>}, {transform_indices = @transform_3, window_bounds = array<i64: 64, 16>}]} {
    %c0 = arith.constant 0 : index
    %c0_0 = arith.constant 0 : index
    %0 = vector.load %arg1[%c0, %c0_0] : memref<64x64xbf16, #tpu.memory_space<vmem>>, vector<64x64xbf16>
    %c0_1 = arith.constant 0 : index
    %c0_2 = arith.constant 0 : index
    %1 = vector.load %arg2[%c0_1, %c0_2] : memref<64x16xbf16, #tpu.memory_space<vmem>>, vector<64x16xbf16>
    %cst = arith.constant dense<0.000000e+00> : vector<64x16xf32>
    %2 = tpu.matmul %0, %1, %cst {dimension_numbers = #tpu.dot_dimension_numbers<[1], [0], [0], [1], [0, 0, 1, 1], [], []>} : vector<64x64xbf16>, vector<64x16xbf16>, vector<64x16xf32> -> vector<64x16xf32>
    %c0_3 = arith.constant 0 : index
    %c0_4 = arith.constant 0 : index
    %3 = vector.load %arg3[%c0_3, %c0_4] : memref<1x16xf32, #tpu.memory_space<vmem>>, vector<1x16xf32>
    %4 = vector.broadcast %3 : vector<1x16xf32> to vector<64x16xf32>
    %5 = arith.addf %2, %4 : vector<64x16xf32>
    %6 = arith.truncf %5 : vector<64x16xf32> to vector<64x16xbf16>
    %c0_5 = arith.constant 0 : index
    %c0_6 = arith.constant 0 : index
    %7 = vector.load %arg4[%c0_5, %c0_6] : memref<64x16xbf16, #tpu.memory_space<vmem>>, vector<64x16xbf16>
    tpu.vector_store %arg4[%c0_5, %c0_6], %6 {strides = array<i32>} : memref<64x16xbf16, #tpu.memory_space<vmem>>, vector<64x16xbf16>,
    return
  }
  func.func @transform_0(%arg0: i32) -> (i32, i32) {
    %c0_i32 = arith.constant 0 : i32
    %c0_i32_0 = arith.constant 0 : i32
    return %arg0, %c0_i32 : i32, i32
  }
  func.func @transform_1(%arg0: i32) -> (i32, i32) {
    %c0_i32 = arith.constant 0 : i32
    %c0_i32_0 = arith.constant 0 : i32
    %c0_i32_1 = arith.constant 0 : i32
    return %c0_i32, %c0_i32_0 : i32, i32
  }
  func.func @transform_2(%arg0: i32) -> (i32, i32) {
    %c0_i32 = arith.constant 0 : i32
    %c0_i32_0 = arith.constant 0 : i32
    %c0_i32_1 = arith.constant 0 : i32
    return %c0_i32, %c0_i32_0 : i32, i32
  }
  func.func @transform_3(%arg0: i32) -> (i32, i32) {
    %c0_i32 = arith.constant 0 : i32
    %c0_i32_0 = arith.constant 0 : i32
    return %arg0, %c0_i32 : i32, i32
  }
}

module attributes {stable_mosaic.version = 11 : i64} {
  func.func @_ln_matmul_kernel(%arg0: i32, %arg1: memref<256x32xbf16, #tpu.memory_space<vmem>>, %arg2: memref<1x32xf32, #tpu.memory_space<vmem>>, %arg3: memref<1x32xf32, #tpu.memory_space<vmem>>, %arg4: memref<32x96xbf16, #tpu.memory_space<vmem>>, %arg5: memref<1x96xf32, #tpu.memory_space<vmem>>, %arg6: memref<256x96xbf16, #tpu.memory_space<vmem>>) attributes {dimension_semantics = [#tpu.dimension_semantics<parallel>], iteration_bounds = array<i64: 2>, scalar_prefetch = 0 : i64, scratch_operands = 0 : i64, tpu.core_type = #tpu.core_type<tc>, window_params = [{transform_indices = @transform_0, window_bounds = array<i64: 256, 32>}, {pipeline_mode = #tpu.pipeline_mode<synchronous>, transform_indices = @transform_1, window_bounds = array<i64: 1, 32>}, {pipeline_mode = #tpu.pipeline_mode<synchronous>, transform_indices = @transform_2, window_bounds = array<i64: 1, 32>}, {pipeline_mode = #tpu.pipeline_mode<synchronous>, transform_indices = @transform_3, window_bounds = array<i64: 32, 96>}, {pipeline_mode = #tpu.pipeline_mode<synchronous>, transform_indices = @transform_4, window_bounds = array<i64: 1, 96>}, {transform_indices = @transform_5, window_bounds = array<i64: 256, 96>}]} {
    %c0 = arith.constant 0 : index
    %c0_0 = arith.constant 0 : index
    %0 = vector.load %arg1[%c0, %c0_0] : memref<256x32xbf16, #tpu.memory_space<vmem>>, vector<256x32xbf16>
    %1 = arith.extf %0 : vector<256x32xbf16> to vector<256x32xf32>
    %cst = arith.constant dense<0.000000e+00> : vector<256xf32>
    %2 = vector.multi_reduction <add>, %1, %cst [1] : vector<256x32xf32> to vector<256xf32>
    %3 = vector.shape_cast %2 : vector<256xf32> to vector<256x1xf32>
    %cst_1 = arith.constant 3.200000e+01 : f32
    %4 = vector.broadcast %cst_1 : f32 to vector<256x1xf32>
    %5 = arith.divf %3, %4 : vector<256x1xf32>
    %6 = vector.broadcast %5 : vector<256x1xf32> to vector<256x32xf32>
    %7 = arith.subf %1, %6 : vector<256x32xf32>
    %8 = arith.mulf %7, %7 : vector<256x32xf32>
    %cst_2 = arith.constant dense<0.000000e+00> : vector<256xf32>
    %9 = vector.multi_reduction <add>, %8, %cst_2 [1] : vector<256x32xf32> to vector<256xf32>
    %10 = vector.shape_cast %9 : vector<256xf32> to vector<256x1xf32>
    %cst_3 = arith.constant 3.200000e+01 : f32
    %11 = vector.broadcast %cst_3 : f32 to vector<256x1xf32>
    %12 = arith.divf %10, %11 : vector<256x1xf32>
    %13 = vector.broadcast %5 : vector<256x1xf32> to vector<256x32xf32>
    %14 = arith.subf %1, %13 : vector<256x32xf32>
    %cst_4 = arith.constant 9.99999974E-6 : f32
    %15 = vector.broadcast %cst_4 : f32 to vector<256x1xf32>
    %16 = arith.addf %12, %15 : vector<256x1xf32>
    %17 = math.rsqrt %16 : vector<256x1xf32>
    %18 = vector.broadcast %17 : vector<256x1xf32> to vector<256x32xf32>
    %19 = arith.mulf %14, %18 : vector<256x32xf32>
    %c0_5 = arith.constant 0 : index
    %c0_6 = arith.constant 0 : index
    %20 = vector.load %arg2[%c0_5, %c0_6] : memref<1x32xf32, #tpu.memory_space<vmem>>, vector<1x32xf32>
    %21 = vector.broadcast %20 : vector<1x32xf32> to vector<256x32xf32>
    %22 = arith.mulf %19, %21 : vector<256x32xf32>
    %c0_7 = arith.constant 0 : index
    %c0_8 = arith.constant 0 : index
    %23 = vector.load %arg3[%c0_7, %c0_8] : memref<1x32xf32, #tpu.memory_space<vmem>>, vector<1x32xf32>
    %24 = vector.broadcast %23 : vector<1x32xf32> to vector<256x32xf32>
    %25 = arith.addf %22, %24 : vector<256x32xf32>
    %26 = arith.truncf %25 : vector<256x32xf32> to vector<256x32xbf16>
    %c0_9 = arith.constant 0 : index
    %c0_10 = arith.constant 0 : index
    %27 = vector.load %arg4[%c0_9, %c0_10] : memref<32x96xbf16, #tpu.memory_space<vmem>>, vector<32x96xbf16>
    %cst_11 = arith.constant dense<0.000000e+00> : vector<256x96xf32>
    %28 = tpu.matmul %26, %27, %cst_11 {dimension_numbers = #tpu.dot_dimension_numbers<[1], [0], [0], [1], [0, 0, 1, 1], [], []>} : vector<256x32xbf16>, vector<32x96xbf16>, vector<256x96xf32> -> vector<256x96xf32>
    %c0_12 = arith.constant 0 : index
    %c0_13 = arith.constant 0 : index
    %29 = vector.load %arg5[%c0_12, %c0_13] : memref<1x96xf32, #tpu.memory_space<vmem>>, vector<1x96xf32>
    %30 = vector.broadcast %29 : vector<1x96xf32> to vector<256x96xf32>
    %31 = arith.addf %28, %30 : vector<256x96xf32>
    %32 = arith.truncf %31 : vector<256x96xf32> to vector<256x96xbf16>
    %c0_14 = arith.constant 0 : index
    %c0_15 = arith.constant 0 : index
    %33 = vector.load %arg6[%c0_14, %c0_15] : memref<256x96xbf16, #tpu.memory_space<vmem>>, vector<256x96xbf16>
    tpu.vector_store %arg6[%c0_14, %c0_15], %32 {strides = array<i32>} : memref<256x96xbf16, #tpu.memory_space<vmem>>, vector<256x96xbf16>,
    return
  }
  func.func @transform_0(%arg0: i32) -> (i32, i32) {
    %c0_i32 = arith.constant 0 : i32
    %c0_i32_0 = arith.constant 0 : i32
    return %arg0, %c0_i32 : i32, i32
  }
  func.func @transform_1(%arg0: i32) -> (i32, i32) {
    %c0_i32 = arith.constant 0 : i32
    %c0_i32_0 = arith.constant 0 : i32
    %c0_i32_1 = arith.constant 0 : i32
    return %c0_i32, %c0_i32_0 : i32, i32
  }
  func.func @transform_2(%arg0: i32) -> (i32, i32) {
    %c0_i32 = arith.constant 0 : i32
    %c0_i32_0 = arith.constant 0 : i32
    %c0_i32_1 = arith.constant 0 : i32
    return %c0_i32, %c0_i32_0 : i32, i32
  }
  func.func @transform_3(%arg0: i32) -> (i32, i32) {
    %c0_i32 = arith.constant 0 : i32
    %c0_i32_0 = arith.constant 0 : i32
    %c0_i32_1 = arith.constant 0 : i32
    return %c0_i32, %c0_i32_0 : i32, i32
  }
  func.func @transform_4(%arg0: i32) -> (i32, i32) {
    %c0_i32 = arith.constant 0 : i32
    %c0_i32_0 = arith.constant 0 : i32
    %c0_i32_1 = arith.constant 0 : i32
    return %c0_i32, %c0_i32_0 : i32, i32
  }
  func.func @transform_5(%arg0: i32) -> (i32, i32) {
    %c0_i32 = arith.constant 0 : i32
    %c0_i32_0 = arith.constant 0 : i32
    return %arg0, %c0_i32 : i32, i32
  }
}

module attributes {stable_mosaic.version = 11 : i64} {
  func.func @_window_attn_kernel(%arg0: i32, %arg1: memref<16x16x96xbf16, #tpu.memory_space<vmem>>, %arg2: memref<16x1x16xf32, #tpu.memory_space<vmem>>, %arg3: memref<16x16x32xbf16, #tpu.memory_space<vmem>>) attributes {dimension_semantics = [#tpu.dimension_semantics<parallel>], iteration_bounds = array<i64: 2>, scalar_prefetch = 0 : i64, scratch_operands = 0 : i64, tpu.core_type = #tpu.core_type<tc>, window_params = [{transform_indices = @transform_0, window_bounds = array<i64: 16, 16, 96>}, {transform_indices = @transform_1, window_bounds = array<i64: 16, 1, 16>}, {transform_indices = @transform_2, window_bounds = array<i64: 16, 16, 32>}]} {
    %c0 = arith.constant 0 : index
    %c0_0 = arith.constant 0 : index
    %c0_1 = arith.constant 0 : index
    %0 = vector.load %arg1[%c0, %c0_0, %c0_1] : memref<16x16x96xbf16, #tpu.memory_space<vmem>>, vector<16x16x96xbf16>
    %c0_2 = arith.constant 0 : index
    %c0_3 = arith.constant 0 : index
    %c0_4 = arith.constant 0 : index
    %1 = vector.load %arg2[%c0_2, %c0_3, %c0_4] : memref<16x1x16xf32, #tpu.memory_space<vmem>>, vector<16x1x16xf32>
    %cst = arith.constant 5.000000e-01 : f32
    %2 = vector.broadcast %cst : f32 to vector<16x1x16xf32>
    %3 = arith.cmpf ogt, %1, %2 : vector<16x1x16xf32>
    %cst_5 = arith.constant 0.000000e+00 : f32
    %cst_6 = arith.constant -1.000000e+09 : f32
    %4 = vector.broadcast %cst_5 : f32 to vector<16x1x16xf32>
    %5 = vector.broadcast %cst_6 : f32 to vector<16x1x16xf32>
    %6 = arith.select %3, %4, %5 : vector<16x1x16xi1>, vector<16x1x16xf32>
    %7 = vector.extract_strided_slice %0 {offsets = [0, 0, 0], sizes = [16, 16, 32], strides = [1, 1, 1]} : vector<16x16x96xbf16> to vector<16x16x32xbf16>
    %8 = vector.extract_strided_slice %0 {offsets = [0, 0, 32], sizes = [16, 16, 32], strides = [1, 1, 1]} : vector<16x16x96xbf16> to vector<16x16x32xbf16>
    %9 = vector.extract_strided_slice %0 {offsets = [0, 0, 64], sizes = [16, 16, 32], strides = [1, 1, 1]} : vector<16x16x96xbf16> to vector<16x16x32xbf16>
    "tpu.trace_start"() <{level = 10 : i32, message = "wqd,wkd->wqk"}> : () -> ()
    %cst_7 = arith.constant dense<0.000000e+00> : vector<16x16x16xf32>
    %10 = tpu.matmul %7, %8, %cst_7 {dimension_numbers = #tpu.dot_dimension_numbers<[2], [2], [1], [1], [0, 0, 0, 1, 1, 1], [0], [0]>} : vector<16x16x32xbf16>, vector<16x16x32xbf16>, vector<16x16x16xf32> -> vector<16x16x16xf32>
    "tpu.trace_stop"() : () -> ()
    %cst_8 = arith.constant 0.176776692 : f32
    %11 = vector.broadcast %cst_8 : f32 to vector<16x16x16xf32>
    %12 = arith.mulf %10, %11 : vector<16x16x16xf32>
    %13 = vector.broadcast %6 : vector<16x1x16xf32> to vector<16x16x16xf32>
    %14 = arith.addf %12, %13 : vector<16x16x16xf32>
    %cst_9 = arith.constant dense<0xFF800000> : vector<16x16xf32>
    %15 = vector.multi_reduction <maximumf>, %14, %cst_9 [2] : vector<16x16x16xf32> to vector<16x16xf32>
    %16 = vector.shape_cast %15 : vector<16x16xf32> to vector<16x16x1xf32>
    %17 = vector.broadcast %16 : vector<16x16x1xf32> to vector<16x16x16xf32>
    %18 = arith.subf %14, %17 : vector<16x16x16xf32>
    %19 = math.exp %18 : vector<16x16x16xf32>
    %cst_10 = arith.constant dense<0.000000e+00> : vector<16x16xf32>
    %20 = vector.multi_reduction <add>, %19, %cst_10 [2] : vector<16x16x16xf32> to vector<16x16xf32>
    %21 = vector.shape_cast %20 : vector<16x16xf32> to vector<16x16x1xf32>
    %22 = tpu.reciprocal %21 {approx = true} : vector<16x16x1xf32> -> vector<16x16x1xf32>
    %23 = arith.truncf %19 : vector<16x16x16xf32> to vector<16x16x16xbf16>
    "tpu.trace_start"() <{level = 10 : i32, message = "wqk,wkd->wqd"}> : () -> ()
    %cst_11 = arith.constant dense<0.000000e+00> : vector<16x16x32xf32>
    %24 = tpu.matmul %23, %9, %cst_11 {dimension_numbers = #tpu.dot_dimension_numbers<[2], [1], [1], [2], [0, 0, 0, 1, 1, 2], [0], [0]>} : vector<16x16x16xbf16>, vector<16x16x32xbf16>, vector<16x16x32xf32> -> vector<16x16x32xf32>
    "tpu.trace_stop"() : () -> ()
    %25 = vector.broadcast %22 : vector<16x16x1xf32> to vector<16x16x32xf32>
    %26 = arith.mulf %24, %25 : vector<16x16x32xf32>
    %27 = arith.truncf %26 : vector<16x16x32xf32> to vector<16x16x32xbf16>
    %c0_12 = arith.constant 0 : index
    %c0_13 = arith.constant 0 : index
    %c0_14 = arith.constant 0 : index
    %28 = vector.load %arg3[%c0_12, %c0_13, %c0_14] : memref<16x16x32xbf16, #tpu.memory_space<vmem>>, vector<16x16x32xbf16>
    tpu.vector_store %arg3[%c0_12, %c0_13, %c0_14], %27 {strides = array<i32>} : memref<16x16x32xbf16, #tpu.memory_space<vmem>>, vector<16x16x32xbf16>,
    return
  }
  func.func @transform_0(%arg0: i32) -> (i32, i32, i32) {
    %c0_i32 = arith.constant 0 : i32
    %c0_i32_0 = arith.constant 0 : i32
    %c0_i32_1 = arith.constant 0 : i32
    return %arg0, %c0_i32, %c0_i32_0 : i32, i32, i32
  }
  func.func @transform_1(%arg0: i32) -> (i32, i32, i32) {
    %c0_i32 = arith.constant 0 : i32
    %c0_i32_0 = arith.constant 0 : i32
    %c0_i32_1 = arith.constant 0 : i32
    return %arg0, %c0_i32, %c0_i32_0 : i32, i32, i32
  }
  func.func @transform_2(%arg0: i32) -> (i32, i32, i32) {
    %c0_i32 = arith.constant 0 : i32
    %c0_i32_0 = arith.constant 0 : i32
    %c0_i32_1 = arith.constant 0 : i32
    return %arg0, %c0_i32, %c0_i32_0 : i32, i32, i32
  }
}

module attributes {stable_mosaic.version = 11 : i64} {
  func.func @_matmul_res_kernel(%arg0: i32, %arg1: memref<256x32xbf16, #tpu.memory_space<vmem>>, %arg2: memref<32x32xbf16, #tpu.memory_space<vmem>>, %arg3: memref<1x32xf32, #tpu.memory_space<vmem>>, %arg4: memref<256x32xbf16, #tpu.memory_space<vmem>>, %arg5: memref<256x32xbf16, #tpu.memory_space<vmem>>) attributes {dimension_semantics = [#tpu.dimension_semantics<parallel>], iteration_bounds = array<i64: 2>, scalar_prefetch = 0 : i64, scratch_operands = 0 : i64, tpu.core_type = #tpu.core_type<tc>, window_params = [{transform_indices = @transform_0, window_bounds = array<i64: 256, 32>}, {pipeline_mode = #tpu.pipeline_mode<synchronous>, transform_indices = @transform_1, window_bounds = array<i64: 32, 32>}, {pipeline_mode = #tpu.pipeline_mode<synchronous>, transform_indices = @transform_2, window_bounds = array<i64: 1, 32>}, {transform_indices = @transform_3, window_bounds = array<i64: 256, 32>}, {transform_indices = @transform_4, window_bounds = array<i64: 256, 32>}]} {
    %c0 = arith.constant 0 : index
    %c0_0 = arith.constant 0 : index
    %0 = vector.load %arg1[%c0, %c0_0] : memref<256x32xbf16, #tpu.memory_space<vmem>>, vector<256x32xbf16>
    %c0_1 = arith.constant 0 : index
    %c0_2 = arith.constant 0 : index
    %1 = vector.load %arg2[%c0_1, %c0_2] : memref<32x32xbf16, #tpu.memory_space<vmem>>, vector<32x32xbf16>
    %cst = arith.constant dense<0.000000e+00> : vector<256x32xf32>
    %2 = tpu.matmul %0, %1, %cst {dimension_numbers = #tpu.dot_dimension_numbers<[1], [0], [0], [1], [0, 0, 1, 1], [], []>} : vector<256x32xbf16>, vector<32x32xbf16>, vector<256x32xf32> -> vector<256x32xf32>
    %c0_3 = arith.constant 0 : index
    %c0_4 = arith.constant 0 : index
    %3 = vector.load %arg3[%c0_3, %c0_4] : memref<1x32xf32, #tpu.memory_space<vmem>>, vector<1x32xf32>
    %4 = vector.broadcast %3 : vector<1x32xf32> to vector<256x32xf32>
    %5 = arith.addf %2, %4 : vector<256x32xf32>
    %c0_5 = arith.constant 0 : index
    %c0_6 = arith.constant 0 : index
    %6 = vector.load %arg4[%c0_5, %c0_6] : memref<256x32xbf16, #tpu.memory_space<vmem>>, vector<256x32xbf16>
    %7 = arith.extf %6 : vector<256x32xbf16> to vector<256x32xf32>
    %8 = arith.addf %5, %7 : vector<256x32xf32>
    %9 = arith.truncf %8 : vector<256x32xf32> to vector<256x32xbf16>
    %c0_7 = arith.constant 0 : index
    %c0_8 = arith.constant 0 : index
    %10 = vector.load %arg5[%c0_7, %c0_8] : memref<256x32xbf16, #tpu.memory_space<vmem>>, vector<256x32xbf16>
    tpu.vector_store %arg5[%c0_7, %c0_8], %9 {strides = array<i32>} : memref<256x32xbf16, #tpu.memory_space<vmem>>, vector<256x32xbf16>,
    return
  }
  func.func @transform_0(%arg0: i32) -> (i32, i32) {
    %c0_i32 = arith.constant 0 : i32
    %c0_i32_0 = arith.constant 0 : i32
    return %arg0, %c0_i32 : i32, i32
  }
  func.func @transform_1(%arg0: i32) -> (i32, i32) {
    %c0_i32 = arith.constant 0 : i32
    %c0_i32_0 = arith.constant 0 : i32
    %c0_i32_1 = arith.constant 0 : i32
    return %c0_i32, %c0_i32_0 : i32, i32
  }
  func.func @transform_2(%arg0: i32) -> (i32, i32) {
    %c0_i32 = arith.constant 0 : i32
    %c0_i32_0 = arith.constant 0 : i32
    %c0_i32_1 = arith.constant 0 : i32
    return %c0_i32, %c0_i32_0 : i32, i32
  }
  func.func @transform_3(%arg0: i32) -> (i32, i32) {
    %c0_i32 = arith.constant 0 : i32
    %c0_i32_0 = arith.constant 0 : i32
    return %arg0, %c0_i32 : i32, i32
  }
  func.func @transform_4(%arg0: i32) -> (i32, i32) {
    %c0_i32 = arith.constant 0 : i32
    %c0_i32_0 = arith.constant 0 : i32
    return %arg0, %c0_i32 : i32, i32
  }
}

module attributes {stable_mosaic.version = 11 : i64} {
  func.func @_ln_matmul_kernel(%arg0: i32, %arg1: memref<256x32xbf16, #tpu.memory_space<vmem>>, %arg2: memref<1x32xf32, #tpu.memory_space<vmem>>, %arg3: memref<1x32xf32, #tpu.memory_space<vmem>>, %arg4: memref<32x128xbf16, #tpu.memory_space<vmem>>, %arg5: memref<1x128xf32, #tpu.memory_space<vmem>>, %arg6: memref<256x128xbf16, #tpu.memory_space<vmem>>) attributes {dimension_semantics = [#tpu.dimension_semantics<parallel>], iteration_bounds = array<i64: 2>, scalar_prefetch = 0 : i64, scratch_operands = 0 : i64, tpu.core_type = #tpu.core_type<tc>, window_params = [{transform_indices = @transform_0, window_bounds = array<i64: 256, 32>}, {pipeline_mode = #tpu.pipeline_mode<synchronous>, transform_indices = @transform_1, window_bounds = array<i64: 1, 32>}, {pipeline_mode = #tpu.pipeline_mode<synchronous>, transform_indices = @transform_2, window_bounds = array<i64: 1, 32>}, {pipeline_mode = #tpu.pipeline_mode<synchronous>, transform_indices = @transform_3, window_bounds = array<i64: 32, 128>}, {pipeline_mode = #tpu.pipeline_mode<synchronous>, transform_indices = @transform_4, window_bounds = array<i64: 1, 128>}, {transform_indices = @transform_5, window_bounds = array<i64: 256, 128>}]} {
    %c0 = arith.constant 0 : index
    %c0_0 = arith.constant 0 : index
    %0 = vector.load %arg1[%c0, %c0_0] : memref<256x32xbf16, #tpu.memory_space<vmem>>, vector<256x32xbf16>
    %1 = arith.extf %0 : vector<256x32xbf16> to vector<256x32xf32>
    %cst = arith.constant dense<0.000000e+00> : vector<256xf32>
    %2 = vector.multi_reduction <add>, %1, %cst [1] : vector<256x32xf32> to vector<256xf32>
    %3 = vector.shape_cast %2 : vector<256xf32> to vector<256x1xf32>
    %cst_1 = arith.constant 3.200000e+01 : f32
    %4 = vector.broadcast %cst_1 : f32 to vector<256x1xf32>
    %5 = arith.divf %3, %4 : vector<256x1xf32>
    %6 = vector.broadcast %5 : vector<256x1xf32> to vector<256x32xf32>
    %7 = arith.subf %1, %6 : vector<256x32xf32>
    %8 = arith.mulf %7, %7 : vector<256x32xf32>
    %cst_2 = arith.constant dense<0.000000e+00> : vector<256xf32>
    %9 = vector.multi_reduction <add>, %8, %cst_2 [1] : vector<256x32xf32> to vector<256xf32>
    %10 = vector.shape_cast %9 : vector<256xf32> to vector<256x1xf32>
    %cst_3 = arith.constant 3.200000e+01 : f32
    %11 = vector.broadcast %cst_3 : f32 to vector<256x1xf32>
    %12 = arith.divf %10, %11 : vector<256x1xf32>
    %13 = vector.broadcast %5 : vector<256x1xf32> to vector<256x32xf32>
    %14 = arith.subf %1, %13 : vector<256x32xf32>
    %cst_4 = arith.constant 9.99999974E-6 : f32
    %15 = vector.broadcast %cst_4 : f32 to vector<256x1xf32>
    %16 = arith.addf %12, %15 : vector<256x1xf32>
    %17 = math.rsqrt %16 : vector<256x1xf32>
    %18 = vector.broadcast %17 : vector<256x1xf32> to vector<256x32xf32>
    %19 = arith.mulf %14, %18 : vector<256x32xf32>
    %c0_5 = arith.constant 0 : index
    %c0_6 = arith.constant 0 : index
    %20 = vector.load %arg2[%c0_5, %c0_6] : memref<1x32xf32, #tpu.memory_space<vmem>>, vector<1x32xf32>
    %21 = vector.broadcast %20 : vector<1x32xf32> to vector<256x32xf32>
    %22 = arith.mulf %19, %21 : vector<256x32xf32>
    %c0_7 = arith.constant 0 : index
    %c0_8 = arith.constant 0 : index
    %23 = vector.load %arg3[%c0_7, %c0_8] : memref<1x32xf32, #tpu.memory_space<vmem>>, vector<1x32xf32>
    %24 = vector.broadcast %23 : vector<1x32xf32> to vector<256x32xf32>
    %25 = arith.addf %22, %24 : vector<256x32xf32>
    %26 = arith.truncf %25 : vector<256x32xf32> to vector<256x32xbf16>
    %c0_9 = arith.constant 0 : index
    %c0_10 = arith.constant 0 : index
    %27 = vector.load %arg4[%c0_9, %c0_10] : memref<32x128xbf16, #tpu.memory_space<vmem>>, vector<32x128xbf16>
    %cst_11 = arith.constant dense<0.000000e+00> : vector<256x128xf32>
    %28 = tpu.matmul %26, %27, %cst_11 {dimension_numbers = #tpu.dot_dimension_numbers<[1], [0], [0], [1], [0, 0, 1, 1], [], []>} : vector<256x32xbf16>, vector<32x128xbf16>, vector<256x128xf32> -> vector<256x128xf32>
    %c0_12 = arith.constant 0 : index
    %c0_13 = arith.constant 0 : index
    %29 = vector.load %arg5[%c0_12, %c0_13] : memref<1x128xf32, #tpu.memory_space<vmem>>, vector<1x128xf32>
    %30 = vector.broadcast %29 : vector<1x128xf32> to vector<256x128xf32>
    %31 = arith.addf %28, %30 : vector<256x128xf32>
    %32 = arith.mulf %31, %31 : vector<256x128xf32>
    %33 = arith.mulf %31, %32 : vector<256x128xf32>
    %cst_14 = arith.constant 4.471500e-02 : f32
    %34 = vector.broadcast %cst_14 : f32 to vector<256x128xf32>
    %35 = arith.mulf %34, %33 : vector<256x128xf32>
    %36 = arith.addf %31, %35 : vector<256x128xf32>
    %cst_15 = arith.constant 0.797884583 : f32
    %37 = vector.broadcast %cst_15 : f32 to vector<256x128xf32>
    %38 = arith.mulf %37, %36 : vector<256x128xf32>
    %39 = math.tanh %38 : vector<256x128xf32>
    %cst_16 = arith.constant 1.000000e+00 : f32
    %40 = vector.broadcast %cst_16 : f32 to vector<256x128xf32>
    %41 = arith.addf %40, %39 : vector<256x128xf32>
    %cst_17 = arith.constant 5.000000e-01 : f32
    %42 = vector.broadcast %cst_17 : f32 to vector<256x128xf32>
    %43 = arith.mulf %42, %41 : vector<256x128xf32>
    %44 = arith.mulf %31, %43 : vector<256x128xf32>
    %45 = arith.truncf %44 : vector<256x128xf32> to vector<256x128xbf16>
    %c0_18 = arith.constant 0 : index
    %c0_19 = arith.constant 0 : index
    %46 = vector.load %arg6[%c0_18, %c0_19] : memref<256x128xbf16, #tpu.memory_space<vmem>>, vector<256x128xbf16>
    tpu.vector_store %arg6[%c0_18, %c0_19], %45 {strides = array<i32>} : memref<256x128xbf16, #tpu.memory_space<vmem>>, vector<256x128xbf16>,
    return
  }
  func.func @transform_0(%arg0: i32) -> (i32, i32) {
    %c0_i32 = arith.constant 0 : i32
    %c0_i32_0 = arith.constant 0 : i32
    return %arg0, %c0_i32 : i32, i32
  }
  func.func @transform_1(%arg0: i32) -> (i32, i32) {
    %c0_i32 = arith.constant 0 : i32
    %c0_i32_0 = arith.constant 0 : i32
    %c0_i32_1 = arith.constant 0 : i32
    return %c0_i32, %c0_i32_0 : i32, i32
  }
  func.func @transform_2(%arg0: i32) -> (i32, i32) {
    %c0_i32 = arith.constant 0 : i32
    %c0_i32_0 = arith.constant 0 : i32
    %c0_i32_1 = arith.constant 0 : i32
    return %c0_i32, %c0_i32_0 : i32, i32
  }
  func.func @transform_3(%arg0: i32) -> (i32, i32) {
    %c0_i32 = arith.constant 0 : i32
    %c0_i32_0 = arith.constant 0 : i32
    %c0_i32_1 = arith.constant 0 : i32
    return %c0_i32, %c0_i32_0 : i32, i32
  }
  func.func @transform_4(%arg0: i32) -> (i32, i32) {
    %c0_i32 = arith.constant 0 : i32
    %c0_i32_0 = arith.constant 0 : i32
    %c0_i32_1 = arith.constant 0 : i32
    return %c0_i32, %c0_i32_0 : i32, i32
  }
  func.func @transform_5(%arg0: i32) -> (i32, i32) {
    %c0_i32 = arith.constant 0 : i32
    %c0_i32_0 = arith.constant 0 : i32
    return %arg0, %c0_i32 : i32, i32
  }
}

module attributes {stable_mosaic.version = 11 : i64} {
  func.func @_matmul_res_kernel(%arg0: i32, %arg1: memref<256x128xbf16, #tpu.memory_space<vmem>>, %arg2: memref<128x32xbf16, #tpu.memory_space<vmem>>, %arg3: memref<1x32xf32, #tpu.memory_space<vmem>>, %arg4: memref<256x32xbf16, #tpu.memory_space<vmem>>, %arg5: memref<256x32xbf16, #tpu.memory_space<vmem>>) attributes {dimension_semantics = [#tpu.dimension_semantics<parallel>], iteration_bounds = array<i64: 2>, scalar_prefetch = 0 : i64, scratch_operands = 0 : i64, tpu.core_type = #tpu.core_type<tc>, window_params = [{transform_indices = @transform_0, window_bounds = array<i64: 256, 128>}, {pipeline_mode = #tpu.pipeline_mode<synchronous>, transform_indices = @transform_1, window_bounds = array<i64: 128, 32>}, {pipeline_mode = #tpu.pipeline_mode<synchronous>, transform_indices = @transform_2, window_bounds = array<i64: 1, 32>}, {transform_indices = @transform_3, window_bounds = array<i64: 256, 32>}, {transform_indices = @transform_4, window_bounds = array<i64: 256, 32>}]} {
    %c0 = arith.constant 0 : index
    %c0_0 = arith.constant 0 : index
    %0 = vector.load %arg1[%c0, %c0_0] : memref<256x128xbf16, #tpu.memory_space<vmem>>, vector<256x128xbf16>
    %c0_1 = arith.constant 0 : index
    %c0_2 = arith.constant 0 : index
    %1 = vector.load %arg2[%c0_1, %c0_2] : memref<128x32xbf16, #tpu.memory_space<vmem>>, vector<128x32xbf16>
    %cst = arith.constant dense<0.000000e+00> : vector<256x32xf32>
    %2 = tpu.matmul %0, %1, %cst {dimension_numbers = #tpu.dot_dimension_numbers<[1], [0], [0], [1], [0, 0, 1, 1], [], []>} : vector<256x128xbf16>, vector<128x32xbf16>, vector<256x32xf32> -> vector<256x32xf32>
    %c0_3 = arith.constant 0 : index
    %c0_4 = arith.constant 0 : index
    %3 = vector.load %arg3[%c0_3, %c0_4] : memref<1x32xf32, #tpu.memory_space<vmem>>, vector<1x32xf32>
    %4 = vector.broadcast %3 : vector<1x32xf32> to vector<256x32xf32>
    %5 = arith.addf %2, %4 : vector<256x32xf32>
    %c0_5 = arith.constant 0 : index
    %c0_6 = arith.constant 0 : index
    %6 = vector.load %arg4[%c0_5, %c0_6] : memref<256x32xbf16, #tpu.memory_space<vmem>>, vector<256x32xbf16>
    %7 = arith.extf %6 : vector<256x32xbf16> to vector<256x32xf32>
    %8 = arith.addf %5, %7 : vector<256x32xf32>
    %9 = arith.truncf %8 : vector<256x32xf32> to vector<256x32xbf16>
    %c0_7 = arith.constant 0 : index
    %c0_8 = arith.constant 0 : index
    %10 = vector.load %arg5[%c0_7, %c0_8] : memref<256x32xbf16, #tpu.memory_space<vmem>>, vector<256x32xbf16>
    tpu.vector_store %arg5[%c0_7, %c0_8], %9 {strides = array<i32>} : memref<256x32xbf16, #tpu.memory_space<vmem>>, vector<256x32xbf16>,
    return
  }
  func.func @transform_0(%arg0: i32) -> (i32, i32) {
    %c0_i32 = arith.constant 0 : i32
    %c0_i32_0 = arith.constant 0 : i32
    return %arg0, %c0_i32 : i32, i32
  }
  func.func @transform_1(%arg0: i32) -> (i32, i32) {
    %c0_i32 = arith.constant 0 : i32
    %c0_i32_0 = arith.constant 0 : i32
    %c0_i32_1 = arith.constant 0 : i32
    return %c0_i32, %c0_i32_0 : i32, i32
  }
  func.func @transform_2(%arg0: i32) -> (i32, i32) {
    %c0_i32 = arith.constant 0 : i32
    %c0_i32_0 = arith.constant 0 : i32
    %c0_i32_1 = arith.constant 0 : i32
    return %c0_i32, %c0_i32_0 : i32, i32
  }
  func.func @transform_3(%arg0: i32) -> (i32, i32) {
    %c0_i32 = arith.constant 0 : i32
    %c0_i32_0 = arith.constant 0 : i32
    return %arg0, %c0_i32 : i32, i32
  }
  func.func @transform_4(%arg0: i32) -> (i32, i32) {
    %c0_i32 = arith.constant 0 : i32
    %c0_i32_0 = arith.constant 0 : i32
    return %arg0, %c0_i32 : i32, i32
  }
}

module attributes {stable_mosaic.version = 11 : i64} {
  func.func @_matmul_kernel(%arg0: i32, %arg1: memref<256x32xbf16, #tpu.memory_space<vmem>>, %arg2: memref<32x3xbf16, #tpu.memory_space<vmem>>, %arg3: memref<1x3xf32, #tpu.memory_space<vmem>>, %arg4: memref<256x3xbf16, #tpu.memory_space<vmem>>) attributes {dimension_semantics = [#tpu.dimension_semantics<parallel>], iteration_bounds = array<i64: 2>, scalar_prefetch = 0 : i64, scratch_operands = 0 : i64, tpu.core_type = #tpu.core_type<tc>, window_params = [{transform_indices = @transform_0, window_bounds = array<i64: 256, 32>}, {pipeline_mode = #tpu.pipeline_mode<synchronous>, transform_indices = @transform_1, window_bounds = array<i64: 32, 3>}, {pipeline_mode = #tpu.pipeline_mode<synchronous>, transform_indices = @transform_2, window_bounds = array<i64: 1, 3>}, {transform_indices = @transform_3, window_bounds = array<i64: 256, 3>}]} {
    %c0 = arith.constant 0 : index
    %c0_0 = arith.constant 0 : index
    %0 = vector.load %arg1[%c0, %c0_0] : memref<256x32xbf16, #tpu.memory_space<vmem>>, vector<256x32xbf16>
    %c0_1 = arith.constant 0 : index
    %c0_2 = arith.constant 0 : index
    %1 = vector.load %arg2[%c0_1, %c0_2] : memref<32x3xbf16, #tpu.memory_space<vmem>>, vector<32x3xbf16>
    %cst = arith.constant dense<0.000000e+00> : vector<256x3xf32>
    %2 = tpu.matmul %0, %1, %cst {dimension_numbers = #tpu.dot_dimension_numbers<[1], [0], [0], [1], [0, 0, 1, 1], [], []>} : vector<256x32xbf16>, vector<32x3xbf16>, vector<256x3xf32> -> vector<256x3xf32>
    %c0_3 = arith.constant 0 : index
    %c0_4 = arith.constant 0 : index
    %3 = vector.load %arg3[%c0_3, %c0_4] : memref<1x3xf32, #tpu.memory_space<vmem>>, vector<1x3xf32>
    %4 = vector.broadcast %3 : vector<1x3xf32> to vector<256x3xf32>
    %5 = arith.addf %2, %4 : vector<256x3xf32>
    %6 = math.tanh %5 : vector<256x3xf32>
    %7 = arith.truncf %6 : vector<256x3xf32> to vector<256x3xbf16>
    %c0_5 = arith.constant 0 : index
    %c0_6 = arith.constant 0 : index
    %8 = vector.load %arg4[%c0_5, %c0_6] : memref<256x3xbf16, #tpu.memory_space<vmem>>, vector<256x3xbf16>
    tpu.vector_store %arg4[%c0_5, %c0_6], %7 {strides = array<i32>} : memref<256x3xbf16, #tpu.memory_space<vmem>>, vector<256x3xbf16>,
    return
  }
  func.func @transform_0(%arg0: i32) -> (i32, i32) {
    %c0_i32 = arith.constant 0 : i32
    %c0_i32_0 = arith.constant 0 : i32
    return %arg0, %c0_i32 : i32, i32
  }
  func.func @transform_1(%arg0: i32) -> (i32, i32) {
    %c0_i32 = arith.constant 0 : i32
    %c0_i32_0 = arith.constant 0 : i32
    %c0_i32_1 = arith.constant 0 : i32
    return %c0_i32, %c0_i32_0 : i32, i32
  }
  func.func @transform_2(%arg0: i32) -> (i32, i32) {
    %c0_i32 = arith.constant 0 : i32
    %c0_i32_0 = arith.constant 0 : i32
    %c0_i32_1 = arith.constant 0 : i32
    return %c0_i32, %c0_i32_0 : i32, i32
  }
  func.func @transform_3(%arg0: i32) -> (i32, i32) {
    %c0_i32 = arith.constant 0 : i32
    %c0_i32_0 = arith.constant 0 : i32
    return %arg0, %c0_i32 : i32, i32
  }
}

</mosaic_0001>

<bundles_post_ra>
// kernel: fwd.14
= control target key start
LH: loop header
LB: loop body
LE: loop exit
PB: predicated region body
PF: predicated region fallthrough
CT: control target
= control target key end

     0   :  { %s644_s15 = smov 0   ;;  %s696_s0 = inlined_call_operand.vmem [shape: bf16[128,64], index: 0, kind: input, shape index: {}]   ;;  %s697_s1 = inlined_call_operand.vmem [shape: bf16[64,64], index: 1, kind: input, shape index: {}]   ;;  %s698_s2 = inlined_call_operand.vmem [shape: f32[1,64], index: 2, kind: input, shape index: {}]   ;;  %s699_s3 = inlined_call_operand.vmem [shape: bf16[128,64], index: 3, kind: input, shape index: {}]   ;;  %s700_s4 = inlined_call_operand.vmem [shape: bf16[128,64], index: 4, kind: output, shape index: {}]  }
   0x1 LB: > { %s502_s16 = sadd.s32 4294967295, %s617_s15   ;;  %p506_p0 = scmp.ge.s32.totalorder %s617_s15, 1  ;;  %s617_s15 = sphi %s644_s15, %s14_s15  }
   0x2   : > { %p174_p1 = scmp.lt.s32.totalorder %s617_s15, 3 }
   0x4   : > { %p175_p2 = pnand %p506_p0, %p174_p1 }
   0x5   : > { %v603_v0 = vld [vmem:[%s697_s1] sm:$0xff] (!%p175_p2)   ;;  %s507_s19 = sshll.u32 (!%p175_p2), %s502_s16, 3  ;;  %v604_v1 = vld [vmem:[%s697_s1 + $0x8] sm:$0xff] (!%p175_p2)   ;;  %v605_v2 = vld [vmem:[%s697_s1 + $0x10] sm:$0xff] (!%p175_p2)   ;;  %vm291_vm0 = vcmask (!%p175_p2), 523264   ;;  %vm425_vm1 = vcmask (!%p175_p2), 519168  }
   0x6   : > { %178 = sbr.rel (%p175_p2) target bundleno = 244 (0xf4), region = 36  ;;  %p206_p3 = scmp.lt.s32.totalorder (!%p175_p2), %s507_s19, 15  ;;  %571 = vmatprep.subr.bf16.mxu0 (!%p175_p2), %v603_v0  ;;  %587 = vmatprep.subr.bf16.mxu1 (!%p175_p2), %v603_v0  ;;  %v606_v3 = vld [vmem:[%s697_s1 + $0x18] sm:$0xff] (!%p175_p2)   ;;  %v513_v12 = vld [vmem:[%s698_s2] ss:$0 sm:$0xff] (!%p175_p2) }
   0x7   : > { %572 = vmatpush3.bf16.msra.mxu0 (!%p175_p2), %v603_v0  ;;  %591 = vmatpush3.bf16.msra.mxu1 (!%p175_p2), %v603_v0 }
   0x8   : > { %573 = vmatprep.subr.bf16.mxu0 (!%p175_p2), %v604_v1  ;;  %588 = vmatprep.subr.bf16.mxu1 (!%p175_p2), %v604_v1 }
   0xb   : > { %574 = vmatpush3.bf16.msra.mxu0 (!%p175_p2), %v604_v1  ;;  %592 = vmatpush3.bf16.msra.mxu1 (!%p175_p2), %v604_v1 }
   0xc   : > { %575 = vmatprep.subr.bf16.mxu0 (!%p175_p2), %v605_v2  ;;  %589 = vmatprep.subr.bf16.mxu1 (!%p175_p2), %v605_v2 }
   0xd   : > { %s702_s19 = smov (!%p206_p3, %s507_s19), 15 }
   0xe   : > { %s661_s24 = sshll.u32 %s702_s19, 2 }
   0xf   : > { %s209_s29 = scalar_lea.vmem %s696_s0, %s661_s24  ;;  %576 = vmatpush3.bf16.msra.mxu0 %v605_v2  ;;  %593 = vmatpush3.bf16.msra.mxu1 %v605_v2  ;;  %s215_s6 = scalar_lea.vmem %s699_s3, %s661_s24 }
  0x10   : > { %v607_v4 = vld [vmem:[%s209_s29] sm:$0xff]   ;;  %v608_v5 = vld [vmem:[%s209_s29 + $0x10] sm:$0xff]   ;;  %577 = vmatprep.subr.bf16.mxu0 %v606_v3  ;;  %590 = vmatprep.subr.bf16.mxu1 %v606_v3  ;;  %v609_v6 = vld [vmem:[%s209_s29 + $0x8] sm:$0xff]   ;;  %s221_s11 = scalar_lea.vmem %s700_s4, %s661_s24 }
  0x11   : > { %579 = vmatprep.mubr.msk.bf16.mxu0 %vm291_vm0, %v607_v4  ;;  %583 = vmatprep.mubr.msk.bf16.mxu1 %vm291_vm0, %v608_v5  ;;  %v610_v7 = vld [vmem:[%s209_s29 + $0x18] sm:$0xff]   ;;  %v560_v8 = vld [vmem:[%s215_s6 + $0x8] sm:$0xff]   ;;  %v545_v10 = vld [vmem:[%s215_s6] sm:$0xff]  }
  0x12   : > { %v562_v9 = vld [vmem:[%s215_s6 + $0x18] sm:$0xff]   ;;  %v561_v11 = vld [vmem:[%s215_s6 + $0x10] sm:$0xff]   ;;  %v550_v13 = vunpack.c.l.bf16 %v560_v8  ;;  %v546_v17 = vunpack.c.l.bf16 %v545_v10  ;;  %v551_v19 = vunpack.c.h.bf16 %v560_v8  ;;  %v547_v25 = vunpack.c.h.bf16 %v545_v10 }
  0x13   : > { %578 = vmatpush3.bf16.msra.mxu0 %v606_v3  ;;  %594 = vmatpush3.bf16.msra.mxu1 %v606_v3  ;;  %v558_v14 = vunpack.c.l.bf16 %v562_v9  ;;  %v554_v18 = vunpack.c.l.bf16 %v561_v11  ;;  %v559_v24 = vunpack.c.h.bf16 %v562_v9  ;;  %v555_v30 = vunpack.c.h.bf16 %v561_v11 }
  0x16   : > { %580 = vmatmul.mubr.msk.bf16.vlgmr.msra.gmra.mrb[0].mxu0 %vm291_vm0, %v609_v6  ;;  %584 = vmatmul.mubr.msk.bf16.vlgmr.msra.gmra.mrb[0].mxu1 %vm291_vm0, %v610_v7 }
  0xe9   : > { %v581_v15 = vpop.f32.mrb[0].mxu0  ;;  %v585_v16 = vpop.f32.mrb[0].mxu1 }
  0xea   : > { %v347_v20 = vadd.f32 %v581_v15, %v513_v12  ;;  %v363_v21 = vadd.f32 %v585_v16, %v513_v12  ;;  %v338_v22 = vpop.f32.mrb[1].mxu0  ;;  %v354_v23 = vpop.f32.mrb[1].mxu1 }
  0xeb   : > { %v339_v26 = vadd.f32 %v513_v12, %v338_v22  ;;  %v355_v27 = vadd.f32 %v513_v12, %v354_v23  ;;  %v582_v28 = vpop.f32.mrb[2].mxu0  ;;  %v586_v29 = vpop.f32.mrb[2].mxu1 }
  0xec   : > { %v387_v31 = vadd.f32 %v550_v13, %v347_v20  ;;  %v391_v32 = vadd.f32 %v558_v14, %v363_v21  ;;  %v350_v33 = vadd.f32 %v582_v28, %v513_v12  ;;  %v366_v34 = vadd.f32 %v586_v29, %v513_v12  ;;  %v341_v35 = vpop.f32.mrb[3].mxu0  ;;  %v357_v36 = vpop.f32.mrb[3].mxu1 }
  0xed   : > { %v385_v37 = vadd.f32 %v546_v17, %v339_v26  ;;  %v389_v38 = vadd.f32 %v554_v18, %v355_v27  ;;  %v342_v39 = vadd.f32 %v513_v12, %v341_v35  ;;  %v358_v40 = vadd.f32 %v513_v12, %v357_v36 }
  0xee   : > { %v538_v41 = vpack.c.bf16 %v387_v31, %v387_v31  ;;  %v542_v42 = vpack.c.bf16 %v391_v32, %v391_v32  ;;  %v388_v43 = vadd.f32 %v551_v19, %v350_v33  ;;  %v392_v44 = vadd.f32 %v559_v24, %v366_v34 }
  0xef   : > { %v536_v45 = vpack.c.bf16 %v385_v37, %v385_v37  ;;  %v540_v46 = vpack.c.bf16 %v389_v38, %v389_v38  ;;  %v386_v47 = vadd.f32 %v547_v25, %v342_v39  ;;  %v390_v48 = vadd.f32 %v555_v30, %v358_v40 }
  0xf0   : > { %428 = vst.msk [vmem:[%s221_s11 + $0x8] sm:$0xf] %vm425_vm1, %v538_v41  ;;  %432 = vst.msk [vmem:[%s221_s11 + $0x18] sm:$0xf] %vm425_vm1, %v542_v42  ;;  %v539_v49 = vpack.c.bf16 %v388_v43, %v388_v43  ;;  %v543_v50 = vpack.c.bf16 %v392_v44, %v392_v44 }
  0xf1   : > { %426 = vst.msk [vmem:[%s221_s11] sm:$0xf] %vm425_vm1, %v536_v45  ;;  %430 = vst.msk [vmem:[%s221_s11 + $0x10] sm:$0xf] %vm425_vm1, %v540_v46  ;;  %v537_v51 = vpack.c.bf16 %v386_v47, %v386_v47  ;;  %v541_v52 = vpack.c.bf16 %v390_v48, %v390_v48 }
  0xf2   : > { %429 = vst.msk [vmem:[%s221_s11 + $0xc] sm:$0xf] %vm425_vm1, %v539_v49  ;;  %433 = vst.msk [vmem:[%s221_s11 + $0x1c] sm:$0xf] %vm425_vm1, %v543_v50 }
  0xf3   : > { %427 = vst.msk [vmem:[%s221_s11 + $0x4] sm:$0xf] %vm425_vm1, %v537_v51  ;;  %431 = vst.msk [vmem:[%s221_s11 + $0x14] sm:$0xf] %vm425_vm1, %v541_v52 }
  0xf4 PF: > { %s14_s15 = sadd.s32 1, %s617_s15  }
  0xf5   : > { %p11_p4 = scmp.ge.s32.totalorder %s14_s15, 4  }
  0xf7   :  { %13 = sbr.rel (!%p11_p4) target bundleno = 1 (0x1), region = 69 }

// kernel: fwd.15
= control target key start
LH: loop header
LB: loop body
LE: loop exit
PB: predicated region body
PF: predicated region fallthrough
CT: control target
= control target key end

     0   :  { %s968_s18 = smov 0   ;;  %s1228_s0 = inlined_call_operand.vmem [shape: bf16[128,64], index: 0, kind: input, shape index: {}]   ;;  %s1229_s1 = inlined_call_operand.vmem [shape: f32[1,64], index: 1, kind: input, shape index: {}]   ;;  %s1230_s2 = inlined_call_operand.vmem [shape: f32[1,64], index: 2, kind: input, shape index: {}]   ;;  %s1231_s3 = inlined_call_operand.vmem [shape: bf16[64,256], index: 3, kind: input, shape index: {}]   ;;  %s1232_s4 = inlined_call_operand.vmem [shape: f32[1,256], index: 4, kind: input, shape index: {}]   ;;  %s1233_s5 = inlined_call_operand.vmem [shape: bf16[128,256], index: 5, kind: output, shape index: {}]  }
   0x1 LB: > { %s790_s19 = sadd.s32 4294967295, %s935_s18   ;;  %p794_p0 = scmp.ge.s32.totalorder %s935_s18, 1  ;;  %s935_s18 = sphi %s968_s18, %s15_s18  }
   0x2   : > { %p188_p1 = scmp.lt.s32.totalorder %s935_s18, 3 }
   0x4   : > { %p189_p2 = pnand %p794_p0, %p188_p1 }
   0x5   : > { %s795_s20 = sshll.u32 (!%p189_p2), %s790_s19, 3  ;;  %vm247_vm0 = vcmask (!%p189_p2), 523264   ;;  %v869_v60 = vld [vmem:[%s1231_s3 + $0x4] ss:$8 sps:$4 sm:$0xff] (!%p189_p2)   ;;  %v871_v61 = vld [vmem:[%s1231_s3] ss:$8 sps:$4 sm:$0xff] (!%p189_p2)  }
   0x6   : > { %192 = sbr.rel (%p189_p2) target bundleno = 613 (0x265), region = 40  ;;  %p218_p3 = scmp.lt.s32.totalorder (!%p189_p2), %s795_s20, 15  ;;  %459 = vmatprep.subr.bf16.mxu0 (!%p189_p2), %v869_v60  ;;  %852 = vmatprep.subr.bf16.mxu1 (!%p189_p2), %v869_v60  ;;  %v872_v62 = vld [vmem:[%s1231_s3 + $0x14] ss:$8 sps:$4 sm:$0xff] (!%p189_p2)   ;;  %v874_v63 = vld [vmem:[%s1231_s3 + $0x10] ss:$8 sps:$4 sm:$0xff] (!%p189_p2)  }
   0x7   : > { %460 = vmatpush1.bf16.msra.mxu0 (!%p189_p2), %v871_v61  ;;  %856 = vmatpush1.bf16.msra.mxu1 (!%p189_p2), %v871_v61 }
   0x8   : > { %461 = vmatprep.subr.bf16.mxu0 (!%p189_p2), %v872_v62  ;;  %853 = vmatprep.subr.bf16.mxu1 (!%p189_p2), %v872_v62 }
   0xb   : > { %462 = vmatpush1.bf16.msra.mxu0 (!%p189_p2), %v874_v63  ;;  %857 = vmatpush1.bf16.msra.mxu1 (!%p189_p2), %v874_v63 }
   0xd   : > { %s1235_s20 = smov (!%p218_p3, %s795_s20), 15 }
   0xe   : > { %s796_s21 = sshll.u32 %s1235_s20, 2 }
   0xf   : > { %s221_s24 = scalar_lea.vmem %s1228_s0, %s796_s21 }
  0x10   : > { %v834_v0 = vld [vmem:[%s221_s24] sm:$0xff]   ;;  %v850_v1 = vld [vmem:[%s221_s24 + $0x10] sm:$0xff]   ;;  %v849_v6 = vld [vmem:[%s221_s24 + $0x8] sm:$0xff]  }
  0x11   : > { %v835_v2 = vunpack.c.l.bf16 %v834_v0  ;;  %v843_v3 = vunpack.c.l.bf16 %v850_v1  ;;  %v836_v4 = vunpack.c.h.bf16 %v834_v0  ;;  %v844_v5 = vunpack.c.h.bf16 %v850_v1  ;;  %v851_v13 = vld [vmem:[%s221_s24 + $0x18] sm:$0xff]   ;;  %v875_v0 = vld [vmem:[%s1231_s3 + $0x24] ss:$8 sps:$4 sm:$0xff]   ;;  %v877_v1 = vld [vmem:[%s1231_s3 + $0x20] ss:$8 sps:$4 sm:$0xff]   ;;  %s824_s24 = sshll.u32 %s1235_s20, 3 }
  0x12   : > { %v839_v11 = vunpack.c.l.bf16 %v849_v6  ;;  %v840_v12 = vunpack.c.h.bf16 %v849_v6  ;;  %v847_v16 = vunpack.c.l.bf16 %v851_v13  ;;  %v848_v17 = vunpack.c.h.bf16 %v851_v13  ;;  %463 = vmatprep.subr.bf16.mxu0 %v875_v0  ;;  %854 = vmatprep.subr.bf16.mxu1 %v875_v0  ;;  %s1193_s20 = scalar_lea.vmem %s1233_s5, %s824_s24 }
  0x13   : > { %v248_v7 = vsel %vm247_vm0, %v835_v2, 0.0  ;;  %v260_v8 = vsel %vm247_vm0, %v843_v3, 0.0  ;;  %v251_v9 = vsel %vm247_vm0, %v836_v4, 0.0  ;;  %v263_v10 = vsel %vm247_vm0, %v844_v5, 0.0  ;;  %464 = vmatpush1.bf16.msra.mxu0 %v877_v1  ;;  %858 = vmatpush1.bf16.msra.mxu1 %v877_v1 }
  0x14   : > { %249 = vadd.xlane.f32.xlu0 %v248_v7  ;;  %261 = vadd.xlane.f32.xlu1 %v260_v8  ;;  %v254_v14 = vsel %vm247_vm0, %v839_v11, 0.0  ;;  %v257_v15 = vsel %vm247_vm0, %v840_v12, 0.0  ;;  %v266_v18 = vsel %vm247_vm0, %v847_v16, 0.0  ;;  %v269_v19 = vsel %vm247_vm0, %v848_v17, 0.0 }
  0x18   : > { %252 = vadd.xlane.f32.xlu0 %v251_v9  ;;  %264 = vadd.xlane.f32.xlu1 %v263_v10 }
  0x1c   : > { %255 = vadd.xlane.f32.xlu0 %v254_v14  ;;  %258 = vadd.xlane.f32.xlu1 %v257_v15 }
  0x20   : > { %267 = vadd.xlane.f32.xlu0 %v266_v18  ;;  %270 = vadd.xlane.f32.xlu1 %v269_v19 }
  0xa1   : > { %v250_v20 = vpop.xlane.xlu0 %249  ;;  %v262_v21 = vpop.xlane.xlu1 %261 }
  0xa2   : > { %v273_v22 = vmul.f32 0.015625, %v250_v20  ;;  %v277_v23 = vmul.f32 0.015625, %v262_v21 }
  0xa4   : > { %v990_v24 = vsub.f32 %v835_v2, %v273_v22  ;;  %v992_v25 = vsub.f32 %v843_v3, %v277_v23  ;;  %v878_v2 = vld [vmem:[%s1231_s3 + $0x34] ss:$8 sps:$4 sm:$0xff]   ;;  %v880_v3 = vld [vmem:[%s1231_s3 + $0x30] ss:$8 sps:$4 sm:$0xff]  }
  0xa5   : > { %v253_v26 = vpop.xlane.xlu0 %252  ;;  %v265_v27 = vpop.xlane.xlu1 %264  ;;  %465 = vmatprep.subr.bf16.mxu0 %v878_v2  ;;  %855 = vmatprep.subr.bf16.mxu1 %v878_v2 }
  0xa6   : > { %v274_v28 = vmul.f32 0.015625, %v253_v26  ;;  %v278_v29 = vmul.f32 0.015625, %v265_v27  ;;  %v289_v30 = vmul.f32 %v990_v24, %v990_v24  ;;  %v293_v31 = vmul.f32 %v992_v25, %v992_v25  ;;  %466 = vmatpush1.bf16.msra.mxu0 %v880_v3  ;;  %859 = vmatpush1.bf16.msra.mxu1 %v880_v3 }
  0xa8   : > { %v998_v32 = vsub.f32 %v836_v4, %v274_v28  ;;  %v1000_v33 = vsub.f32 %v844_v5, %v278_v29  ;;  %v297_v34 = vsel %vm247_vm0, %v289_v30, 0.0  ;;  %v309_v37 = vsel %vm247_vm0, %v293_v31, 0.0 }
  0xa9   : > { %298 = vadd.xlane.f32.xlu0 %v297_v34  ;;  %v256_v35 = vpop.xlane.xlu0 %255  ;;  %v259_v36 = vpop.xlane.xlu1 %258  ;;  %v937_v4 = vmov 0   ;;  %v800_v34 = vld [vmem:[%s1229_s1] ss:$0 sm:$0xff] }
  0xaa   : > { %v275_v38 = vmul.f32 0.015625, %v256_v35  ;;  %v276_v39 = vmul.f32 0.015625, %v259_v36  ;;  %v290_v40 = vmul.f32 %v998_v32, %v998_v32  ;;  %v294_v41 = vmul.f32 %v1000_v33, %v1000_v33  ;;  %491 = vmatprep.mubr.bf16.mxu0 %v937_v4  ;;  %511 = vmatprep.mubr.bf16.mxu1 %v937_v4 }
  0xac   : > { %v1008_v42 = vsub.f32 %v839_v11, %v275_v38  ;;  %v1010_v43 = vsub.f32 %v840_v12, %v276_v39  ;;  %v300_v44 = vsel %vm247_vm0, %v290_v40, 0.0  ;;  %v312_v47 = vsel %vm247_vm0, %v294_v41, 0.0 }
  0xad   : > { %310 = vadd.xlane.f32.xlu0 %v309_v37  ;;  %301 = vadd.xlane.f32.xlu1 %v300_v44  ;;  %v268_v45 = vpop.xlane.xlu0 %267  ;;  %v271_v46 = vpop.xlane.xlu1 %270 }
  0xae   : > { %v279_v48 = vmul.f32 0.015625, %v268_v45  ;;  %v280_v49 = vmul.f32 0.015625, %v271_v46  ;;  %v291_v50 = vmul.f32 %v1008_v42, %v1008_v42  ;;  %v292_v51 = vmul.f32 %v1010_v43, %v1010_v43 }
  0xb0   : > { %v1018_v52 = vsub.f32 %v847_v16, %v279_v48  ;;  %v1020_v53 = vsub.f32 %v848_v17, %v280_v49  ;;  %v303_v54 = vsel %vm247_vm0, %v291_v50, 0.0  ;;  %v306_v55 = vsel %vm247_vm0, %v292_v51, 0.0 }
  0xb1   : > { %313 = vadd.xlane.f32.xlu1 %v312_v47  ;;  %304 = vadd.xlane.f32.xlu0 %v303_v54 }
  0xb2   : > { %v295_v56 = vmul.f32 %v1018_v52, %v1018_v52  ;;  %v296_v57 = vmul.f32 %v1020_v53, %v1020_v53 }
  0xb4   : > { %v315_v58 = vsel %vm247_vm0, %v295_v56, 0.0  ;;  %v318_v59 = vsel %vm247_vm0, %v296_v57, 0.0 }
  0xb5   : > { %307 = vadd.xlane.f32.xlu1 %v306_v55  ;;  %316 = vadd.xlane.f32.xlu0 %v315_v58 }
  0xb9   : > { %319 = vadd.xlane.f32.xlu1 %v318_v59 }
 0x136   : > { %v299_v5 = vpop.xlane.xlu0 %298 }
 0x137   : > { %v321_v6 = vmul.f32 0.015625, %v299_v5  ;;  %v397_v5 = vlaneseq }
 0x139   : > { %v329_v7 = vadd.f32 1e-05, %v321_v6  ;;  %v398_v6 = vshrl.u32 %v397_v5, 7 }
 0x13a   : > { %v302_v8 = vpop.xlane.xlu1 %301  ;;  %v311_v9 = vpop.xlane.xlu0 %310 }
 0x13b   : > { %881 = vrsqrt.f32 %v329_v7  ;;  %v322_v10 = vmul.f32 0.015625, %v302_v8  ;;  %v325_v11 = vmul.f32 0.015625, %v311_v9  ;;  %v399_v7 = vsub.s32 0, %v398_v6 }
 0x13c   : > { %v403_v8 = vsub.s32 1, %v398_v6 }
 0x13d   : > { %v330_v12 = vadd.f32 1e-05, %v322_v10  ;;  %v333_v13 = vadd.f32 1e-05, %v325_v11 }
 0x13e   : > { %v314_v14 = vpop.xlane.xlu1 %313  ;;  %v305_v15 = vpop.xlane.xlu0 %304 }
 0x13f   : > { %883 = vrsqrt.f32 %v330_v12  ;;  %v326_v16 = vmul.f32 0.015625, %v314_v14  ;;  %v323_v17 = vmul.f32 0.015625, %v305_v15 }
 0x140   : > { %885 = vrsqrt.f32 %v333_v13 }
 0x141   : > { %v334_v18 = vadd.f32 1e-05, %v326_v16  ;;  %v331_v19 = vadd.f32 1e-05, %v323_v17 }
 0x142   : > { %v308_v20 = vpop.xlane.xlu1 %307  ;;  %v317_v21 = vpop.xlane.xlu0 %316 }
 0x143   : > { %887 = vrsqrt.f32 %v334_v18  ;;  %v324_v22 = vmul.f32 0.015625, %v308_v20  ;;  %v327_v23 = vmul.f32 0.015625, %v317_v21 }
 0x144   : > { %889 = vrsqrt.f32 %v331_v19 }
 0x145   : > { %v882_v26 = vpop.eup %881  ;;  %v332_v27 = vadd.f32 1e-05, %v324_v22  ;;  %v335_v28 = vadd.f32 1e-05, %v327_v23 }
 0x146   : > { %v345_v29 = vmul.f32 %v882_v26, %v990_v24  ;;  %v320_v30 = vpop.xlane.xlu1 %319  ;;  %v801_v24 = vld [vmem:[%s1230_s2] ss:$0 sm:$0xff] }
 0x147   : > { %891 = vrsqrt.f32 %v332_v27  ;;  %v328_v31 = vmul.f32 0.015625, %v320_v30 }
 0x148   : > { %893 = vrsqrt.f32 %v335_v28  ;;  %v360_v39 = vmul.f32 %v800_v34, %v345_v29 }
 0x149   : > { %v884_v35 = vpop.eup %883  ;;  %v336_v36 = vadd.f32 1e-05, %v328_v31 }
 0x14a   : > { %v886_v37 = vpop.eup %885  ;;  %v346_v38 = vmul.f32 %v884_v35, %v998_v32  ;;  %v375_v47 = vadd.f32 %v801_v24, %v360_v39 }
 0x14b   : > { %v349_v40 = vmul.f32 %v886_v37, %v992_v25  ;;  %895 = vrsqrt.f32 %v336_v36 }
 0x14c   : > { %v361_v41 = vmul.f32 %v800_v34, %v346_v38 }
 0x14d   : > { %v888_v44 = vpop.eup %887  ;;  %v364_v49 = vmul.f32 %v800_v34, %v349_v40 }
 0x14e   : > { %v890_v45 = vpop.eup %889  ;;  %v350_v46 = vmul.f32 %v888_v44, %v1000_v33  ;;  %v376_v48 = vadd.f32 %v801_v24, %v361_v41 }
 0x14f   : > { %v347_v50 = vmul.f32 %v890_v45, %v1008_v42  ;;  %v379_v56 = vadd.f32 %v801_v24, %v364_v49 }
 0x150   : > { %v383_v51 = vpack.c.bf16 %v376_v48, %v375_v47  ;;  %v365_v32 = vmul.f32 %v800_v34, %v350_v46 }
 0x151   : > { %v892_v54 = vpop.eup %891  ;;  %v362_v58 = vmul.f32 %v800_v34, %v347_v50 }
 0x152   : > { %v894_v55 = vpop.eup %893  ;;  %v348_v25 = vmul.f32 %v892_v54, %v1010_v43  ;;  %810 = vmatmul.mubr.msk.bf16.vlgmr.msra.gmra.mrb[0].mxu0 %vm247_vm0, %v383_v51  ;;  %v380_v57 = vadd.f32 %v801_v24, %v365_v32 }
 0x153   : > { %v351_v59 = vmul.f32 %v894_v55, %v1018_v52  ;;  %501 = vmatprep.mubr.bf16.mxu0 %v937_v4  ;;  %v377_v62 = vadd.f32 %v801_v24, %v362_v58 }
 0x154   : > { %v385_v33 = vpack.c.bf16 %v380_v57, %v379_v56  ;;  %v363_v60 = vmul.f32 %v800_v34, %v348_v25 }
 0x155   : > { %v896_v61 = vpop.eup %895  ;;  %v366_v0 = vmul.f32 %v800_v34, %v351_v59 }
 0x156   : > { %v352_v42 = vmul.f32 %v896_v61, %v1020_v53  ;;  %812 = vmatmul.mubr.msk.bf16.vlgmr.msra.gmra.mrb[0].mxu1 %vm247_vm0, %v385_v33  ;;  %v378_v63 = vadd.f32 %v801_v24, %v363_v60  ;;  %v395_v53 = vld [vmem:[%s1232_s4] sm:$0x3] }
 0x157   : > { %521 = vmatprep.mubr.bf16.mxu1 %v937_v4  ;;  %v381_v2 = vadd.f32 %v801_v24, %v366_v0  ;;  %v1079_v9 = vrot.slane %v395_v53, %v399_v7  ;;  %v1081_v4 = vrot.slane %v395_v53, %v403_v8 }
 0x158   : > { %v384_v43 = vpack.c.bf16 %v378_v63, %v377_v62  ;;  %v367_v1 = vmul.f32 %v800_v34, %v352_v42 }
 0x15a   : > { %811 = vmatmul.mubr.msk.bf16.gmra.mrb[4].mxu0 %vm247_vm0, %v384_v43  ;;  %v382_v52 = vadd.f32 %v801_v24, %v367_v1 }
 0x15c   : > { %v386_v3 = vpack.c.bf16 %v382_v52, %v381_v2 }
 0x15e   : > { %813 = vmatmul.mubr.msk.bf16.gmra.mrb[4].mxu1 %vm247_vm0, %v386_v3 }
 0x225   : > { %v493_v10 = vpop.f32.mrb[0].mxu0 }
 0x226   : > { %v1084_v11 = vadd.f32 %v493_v10, %v1079_v9  ;;  %v495_v12 = vpop.f32.mrb[1].mxu0 }
 0x227   : > { %v1087_v13 = vadd.f32 %v495_v12, %v1081_v4  ;;  %v497_v14 = vpop.f32.mrb[2].mxu0 }
 0x228   : > { %v532_v15 = vmul.f32 %v1084_v11, %v1084_v11  ;;  %v1092_v16 = vadd.f32 %v497_v14, %v1079_v9  ;;  %v499_v17 = vpop.f32.mrb[3].mxu0 }
 0x229   : > { %v533_v18 = vmul.f32 %v1087_v13, %v1087_v13  ;;  %v1097_v19 = vadd.f32 %v499_v17, %v1081_v4  ;;  %v513_v20 = vpop.f32.mrb[0].mxu1 }
 0x22a   : > { %v548_v21 = vmul.f32 %v532_v15, %v1084_v11  ;;  %v534_v22 = vmul.f32 %v1092_v16, %v1092_v16  ;;  %v1103_v23 = vadd.f32 %v513_v20, %v1079_v9  ;;  %v515_v26 = vpop.f32.mrb[1].mxu1 }
 0x22b   : > { %v549_v27 = vmul.f32 %v533_v18, %v1087_v13  ;;  %v535_v28 = vmul.f32 %v1097_v19, %v1097_v19  ;;  %v1109_v29 = vadd.f32 %v515_v26, %v1081_v4  ;;  %v517_v30 = vpop.f32.mrb[2].mxu1 }
 0x22c   : > { %v564_v31 = vmul.f32 0.044715, %v548_v21  ;;  %v550_v34 = vmul.f32 %v534_v22, %v1092_v16  ;;  %v540_v35 = vmul.f32 %v1103_v23, %v1103_v23  ;;  %v1115_v36 = vadd.f32 %v517_v30, %v1079_v9  ;;  %v519_v37 = vpop.f32.mrb[3].mxu1 }
 0x22d   : > { %v565_v38 = vmul.f32 0.044715, %v549_v27  ;;  %v551_v39 = vmul.f32 %v535_v28, %v1097_v19  ;;  %v541_v40 = vmul.f32 %v1109_v29, %v1109_v29  ;;  %v1121_v24 = vadd.f32 %v519_v37, %v1081_v4  ;;  %v503_v41 = vpop.f32.mrb[4].mxu0 }
 0x22e   : > { %v580_v44 = vadd.f32 %v564_v31, %v1084_v11  ;;  %v566_v45 = vmul.f32 0.044715, %v550_v34  ;;  %v556_v46 = vmul.f32 %v540_v35, %v1103_v23  ;;  %v542_v47 = vmul.f32 %v1115_v36, %v1115_v36  ;;  %v505_v48 = vpop.f32.mrb[5].mxu0 }
 0x22f   : > { %v581_v49 = vadd.f32 %v565_v38, %v1087_v13  ;;  %v567_v50 = vmul.f32 0.044715, %v551_v39  ;;  %v557_v51 = vmul.f32 %v541_v40, %v1109_v29  ;;  %v543_v32 = vmul.f32 %v1121_v24, %v1121_v24  ;;  %v507_v54 = vpop.f32.mrb[6].mxu0 }
 0x230   : > { %v596_v55 = vmul.f32 0.7978846, %v580_v44  ;;  %v582_v25 = vadd.f32 %v566_v45, %v1092_v16  ;;  %v572_v56 = vmul.f32 0.044715, %v556_v46  ;;  %v558_v57 = vmul.f32 %v542_v47, %v1115_v36  ;;  %v509_v58 = vpop.f32.mrb[7].mxu0 }
 0x231   : > { %v597_v59 = vmul.f32 0.7978846, %v581_v49  ;;  %v583_v33 = vadd.f32 %v567_v50, %v1097_v19  ;;  %v573_v60 = vmul.f32 0.044715, %v557_v51  ;;  %v559_v61 = vmul.f32 %v543_v32, %v1121_v24  ;;  %v523_v42 = vpop.f32.mrb[4].mxu1 }
 0x232   : > { %897 = vtanh.f32 %v596_v55  ;;  %v598_v62 = vmul.f32 0.7978846, %v582_v25  ;;  %v588_v63 = vadd.f32 %v572_v56, %v1103_v23  ;;  %v574_v0 = vmul.f32 0.044715, %v558_v57  ;;  %v525_v43 = vpop.f32.mrb[5].mxu1 }
 0x233   : > { %899 = vtanh.f32 %v597_v59  ;;  %v599_v1 = vmul.f32 0.7978846, %v583_v33  ;;  %v589_v2 = vadd.f32 %v573_v60, %v1109_v29  ;;  %v575_v52 = vmul.f32 0.044715, %v559_v61  ;;  %v527_v3 = vpop.f32.mrb[6].mxu1 }
 0x234   : > { %901 = vtanh.f32 %v598_v62  ;;  %v604_v5 = vmul.f32 0.7978846, %v588_v63  ;;  %v590_v6 = vadd.f32 %v574_v0, %v1115_v36  ;;  %v1139_v7 = vadd.f32 %v503_v41, %v1079_v9  ;;  %v529_v53 = vpop.f32.mrb[7].mxu1 }
 0x235   : > { %903 = vtanh.f32 %v599_v1  ;;  %v605_v8 = vmul.f32 0.7978846, %v589_v2  ;;  %v591_v10 = vadd.f32 %v575_v52, %v1121_v24  ;;  %v1143_v12 = vadd.f32 %v505_v48, %v1081_v4 }
 0x236   : > { %905 = vtanh.f32 %v604_v5  ;;  %v606_v14 = vmul.f32 0.7978846, %v590_v6  ;;  %v536_v15 = vmul.f32 %v1139_v7, %v1139_v7  ;;  %v1148_v17 = vadd.f32 %v507_v54, %v1079_v9 }
 0x237   : > { %907 = vtanh.f32 %v605_v8  ;;  %v607_v18 = vmul.f32 0.7978846, %v591_v10  ;;  %v537_v20 = vmul.f32 %v1143_v12, %v1143_v12  ;;  %v1153_v21 = vadd.f32 %v509_v58, %v1081_v4 }
 0x238   : > { %909 = vtanh.f32 %v606_v14  ;;  %v552_v22 = vmul.f32 %v536_v15, %v1139_v7  ;;  %v538_v26 = vmul.f32 %v1148_v17, %v1148_v17  ;;  %v1159_v27 = vadd.f32 %v523_v42, %v1079_v9 }
 0x239   : > { %911 = vtanh.f32 %v607_v18  ;;  %v553_v28 = vmul.f32 %v537_v20, %v1143_v12  ;;  %v539_v30 = vmul.f32 %v1153_v21, %v1153_v21  ;;  %v1165_v31 = vadd.f32 %v525_v43, %v1081_v4 }
 0x23a   : > { %v568_v34 = vmul.f32 0.044715, %v552_v22  ;;  %v554_v35 = vmul.f32 %v538_v26, %v1148_v17  ;;  %v544_v37 = vmul.f32 %v1159_v27, %v1159_v27  ;;  %v1171_v38 = vadd.f32 %v527_v3, %v1079_v9 }
 0x23b   : > { %v569_v39 = vmul.f32 0.044715, %v553_v28  ;;  %v555_v40 = vmul.f32 %v539_v30, %v1153_v21  ;;  %v545_v41 = vmul.f32 %v1165_v31, %v1165_v31  ;;  %v1177_v44 = vadd.f32 %v529_v53, %v1081_v4 }
 0x23c   : > { %v898_v45 = vpop.eup %897  ;;  %v584_v46 = vadd.f32 %v568_v34, %v1139_v7  ;;  %v570_v47 = vmul.f32 0.044715, %v554_v35  ;;  %v560_v48 = vmul.f32 %v544_v37, %v1159_v27  ;;  %v546_v49 = vmul.f32 %v1171_v38, %v1171_v38 }
 0x23d   : > { %v900_v9 = vpop.eup %899  ;;  %v628_v50 = vadd.f32 1.0, %v898_v45  ;;  %v585_v51 = vadd.f32 %v569_v39, %v1143_v12  ;;  %v571_v32 = vmul.f32 0.044715, %v555_v40  ;;  %v561_v54 = vmul.f32 %v545_v41, %v1165_v31 }
 0x23e   : > { %v902_v55 = vpop.eup %901  ;;  %v629_v4 = vadd.f32 1.0, %v900_v9  ;;  %v600_v25 = vmul.f32 0.7978846, %v584_v46  ;;  %v586_v56 = vadd.f32 %v570_v47, %v1148_v17  ;;  %v576_v57 = vmul.f32 0.044715, %v560_v48 }
 0x23f   : > { %v904_v58 = vpop.eup %903  ;;  %v644_v59 = vmul.f32 0.5, %v628_v50  ;;  %v630_v33 = vadd.f32 1.0, %v902_v55  ;;  %v601_v60 = vmul.f32 0.7978846, %v585_v51  ;;  %v587_v61 = vadd.f32 %v571_v32, %v1153_v21 }
 0x240   : > { %v906_v42 = vpop.eup %905  ;;  %v645_v62 = vmul.f32 0.5, %v629_v4  ;;  %v631_v63 = vadd.f32 1.0, %v904_v58  ;;  %913 = vtanh.f32 %v600_v25  ;;  %v602_v0 = vmul.f32 0.7978846, %v586_v56 }
 0x241   : > { %v908_v43 = vpop.eup %907  ;;  %v660_v1 = vmul.f32 %v644_v59, %v1084_v11  ;;  %v646_v2 = vmul.f32 0.5, %v630_v33  ;;  %v636_v52 = vadd.f32 1.0, %v906_v42  ;;  %915 = vtanh.f32 %v601_v60 }
 0x242   : > { %v910_v3 = vpop.eup %909  ;;  %v661_v5 = vmul.f32 %v645_v62, %v1087_v13  ;;  %v647_v6 = vmul.f32 0.5, %v631_v63  ;;  %v637_v53 = vadd.f32 1.0, %v908_v43  ;;  %917 = vtanh.f32 %v602_v0 }
 0x243   : > { %v912_v8 = vpop.eup %911  ;;  %v662_v10 = vmul.f32 %v646_v2, %v1092_v16  ;;  %v652_v14 = vmul.f32 0.5, %v636_v52  ;;  %v638_v11 = vadd.f32 1.0, %v910_v3  ;;  %v603_v15 = vmul.f32 0.7978846, %v587_v61 }
 0x244   : > { %v825_v18 = vpack.c.bf16 %v661_v5, %v660_v1  ;;  %v663_v20 = vmul.f32 %v647_v6, %v1097_v19  ;;  %v653_v13 = vmul.f32 0.5, %v637_v53  ;;  %v639_v22 = vadd.f32 1.0, %v912_v8 }
 0x245   : > { %v668_v26 = vmul.f32 %v652_v14, %v1103_v23  ;;  %v654_v28 = vmul.f32 0.5, %v638_v11  ;;  %919 = vtanh.f32 %v603_v15  ;;  %v592_v30 = vadd.f32 %v576_v57, %v1159_v27 }
 0x246   : > { %724 = vst [vmem:[%s1193_s20] sm:$0xff] %v825_v18  ;;  %v826_v34 = vpack.c.bf16 %v663_v20, %v662_v10  ;;  %v669_v16 = vmul.f32 %v653_v13, %v1109_v29  ;;  %v655_v35 = vmul.f32 0.5, %v639_v22  ;;  %v577_v37 = vmul.f32 0.044715, %v561_v54 }
 0x247   : > { %v670_v39 = vmul.f32 %v654_v28, %v1115_v36  ;;  %v608_v40 = vmul.f32 0.7978846, %v592_v30  ;;  %v562_v19 = vmul.f32 %v546_v49, %v1171_v38  ;;  %v547_v41 = vmul.f32 %v1177_v44, %v1177_v44 }
 0x248   : > { %725 = vst [vmem:[%s1193_s20 + $0x8] sm:$0xff] %v826_v34  ;;  %v829_v23 = vpack.c.bf16 %v669_v16, %v668_v26  ;;  %v671_v45 = vmul.f32 %v655_v35, %v1121_v24  ;;  %v593_v46 = vadd.f32 %v577_v37, %v1165_v31 }
 0x249   : > { %921 = vtanh.f32 %v608_v40  ;;  %v578_v47 = vmul.f32 0.044715, %v562_v19  ;;  %v563_v29 = vmul.f32 %v547_v41, %v1177_v44 }
 0x24a   : > { %v914_v48 = vpop.eup %913  ;;  %728 = vst [vmem:[%s1193_s20 + $0x20] sm:$0xff] %v829_v23  ;;  %v830_v36 = vpack.c.bf16 %v671_v45, %v670_v39  ;;  %v609_v9 = vmul.f32 0.7978846, %v593_v46 }
 0x24b   : > { %v916_v50 = vpop.eup %915  ;;  %v632_v49 = vadd.f32 1.0, %v914_v48  ;;  %v594_v51 = vadd.f32 %v578_v47, %v1171_v38  ;;  %v579_v32 = vmul.f32 0.044715, %v563_v29 }
 0x24c   : > { %v918_v54 = vpop.eup %917  ;;  %729 = vst [vmem:[%s1193_s20 + $0x28] sm:$0xff] %v830_v36  ;;  %v633_v55 = vadd.f32 1.0, %v916_v50  ;;  %923 = vtanh.f32 %v609_v9 }
 0x24d   : > { %v648_v24 = vmul.f32 0.5, %v632_v49  ;;  %v634_v4 = vadd.f32 1.0, %v918_v54  ;;  %v610_v25 = vmul.f32 0.7978846, %v594_v51  ;;  %v595_v56 = vadd.f32 %v579_v32, %v1177_v44 }
 0x24e   : > { %v649_v57 = vmul.f32 0.5, %v633_v55 }
 0x24f   : > { %v920_v58 = vpop.eup %919  ;;  %v664_v59 = vmul.f32 %v648_v24, %v1139_v7  ;;  %v650_v33 = vmul.f32 0.5, %v634_v4  ;;  %925 = vtanh.f32 %v610_v25  ;;  %v611_v60 = vmul.f32 0.7978846, %v595_v56 }
 0x250   : > { %v665_v61 = vmul.f32 %v649_v57, %v1143_v12  ;;  %v635_v42 = vadd.f32 1.0, %v920_v58 }
 0x251   : > { %927 = vtanh.f32 %v611_v60  ;;  %v666_v63 = vmul.f32 %v650_v33, %v1148_v17 }
 0x252   : > { %v827_v62 = vpack.c.bf16 %v665_v61, %v664_v59  ;;  %v651_v0 = vmul.f32 0.5, %v635_v42 }
 0x253   : > { %v922_v43 = vpop.eup %921 }
 0x254   : > { %726 = vst [vmem:[%s1193_s20 + $0x10] sm:$0xff] %v827_v62  ;;  %v667_v1 = vmul.f32 %v651_v0, %v1153_v21  ;;  %v640_v2 = vadd.f32 1.0, %v922_v43 }
 0x256   : > { %v924_v52 = vpop.eup %923  ;;  %v828_v7 = vpack.c.bf16 %v667_v1, %v666_v63  ;;  %v656_v3 = vmul.f32 0.5, %v640_v2 }
 0x257   : > { %v641_v5 = vadd.f32 1.0, %v924_v52 }
 0x258   : > { %727 = vst [vmem:[%s1193_s20 + $0x18] sm:$0xff] %v828_v7  ;;  %v672_v12 = vmul.f32 %v656_v3, %v1159_v27 }
 0x259   : > { %v926_v6 = vpop.eup %925  ;;  %v657_v53 = vmul.f32 0.5, %v641_v5 }
 0x25a   : > { %v642_v8 = vadd.f32 1.0, %v926_v6 }
 0x25b   : > { %v928_v10 = vpop.eup %927  ;;  %v673_v17 = vmul.f32 %v657_v53, %v1165_v31 }
 0x25c   : > { %v658_v14 = vmul.f32 0.5, %v642_v8  ;;  %v643_v11 = vadd.f32 1.0, %v928_v10 }
 0x25d   : > { %v831_v15 = vpack.c.bf16 %v673_v17, %v672_v12 }
 0x25e   : > { %v674_v21 = vmul.f32 %v658_v14, %v1171_v38  ;;  %v659_v18 = vmul.f32 0.5, %v643_v11 }
 0x25f   : > { %730 = vst [vmem:[%s1193_s20 + $0x30] sm:$0xff] %v831_v15 }
 0x260   : > { %v675_v20 = vmul.f32 %v659_v18, %v1177_v44 }
 0x262   : > { %v832_v13 = vpack.c.bf16 %v675_v20, %v674_v21 }
 0x264   : > { %731 = vst [vmem:[%s1193_s20 + $0x38] sm:$0xff] %v832_v13 }
 0x265 PF: > { %s15_s18 = sadd.s32 1, %s935_s18  }
 0x266   : > { %p12_p4 = scmp.ge.s32.totalorder %s15_s18, 4  }
 0x268   :  { %14 = sbr.rel (!%p12_p4) target bundleno = 1 (0x1), region = 70 }

// kernel: fwd.12
= control target key start
LH: loop header
LB: loop body
LE: loop exit
PB: predicated region body
PF: predicated region fallthrough
CT: control target
= control target key end

     0   :  { %s795_s18 = smov 0   ;;  %s943_s0 = inlined_call_operand.vmem [shape: bf16[128,64], index: 0, kind: input, shape index: {}]   ;;  %s944_s1 = inlined_call_operand.vmem [shape: f32[1,64], index: 1, kind: input, shape index: {}]   ;;  %s945_s2 = inlined_call_operand.vmem [shape: f32[1,64], index: 2, kind: input, shape index: {}]   ;;  %s946_s3 = inlined_call_operand.vmem [shape: bf16[64,192], index: 3, kind: input, shape index: {}]   ;;  %s947_s4 = inlined_call_operand.vmem [shape: f32[1,192], index: 4, kind: input, shape index: {}]   ;;  %s948_s5 = inlined_call_operand.vmem [shape: bf16[128,192], index: 5, kind: output, shape index: {}]  }
   0x1 LB: > { %s649_s19 = sadd.s32 4294967295, %s762_s18   ;;  %p653_p0 = scmp.ge.s32.totalorder %s762_s18, 1  ;;  %s762_s18 = sphi %s795_s18, %s15_s18  }
   0x2   : > { %p188_p1 = scmp.lt.s32.totalorder %s762_s18, 3 }
   0x4   : > { %p189_p2 = pnand %p653_p0, %p188_p1 }
   0x5   : > { %s654_s20 = sshll.u32 (!%p189_p2), %s649_s19, 3  ;;  %vm247_vm0 = vcmask (!%p189_p2), 523264   ;;  %v728_v60 = vld [vmem:[%s946_s3 + $0x4] ss:$8 sps:$4 sm:$0xff] (!%p189_p2)   ;;  %v730_v61 = vld [vmem:[%s946_s3] ss:$8 sps:$4 sm:$0xff] (!%p189_p2)  }
   0x6   : > { %192 = sbr.rel (%p189_p2) target bundleno = 570 (0x23a), region = 40  ;;  %p218_p3 = scmp.lt.s32.totalorder (!%p189_p2), %s654_s20, 15  ;;  %459 = vmatprep.subr.bf16.mxu0 (!%p189_p2), %v728_v60  ;;  %711 = vmatprep.subr.bf16.mxu1 (!%p189_p2), %v728_v60  ;;  %v731_v62 = vld [vmem:[%s946_s3 + $0x14] ss:$8 sps:$4 sm:$0xff] (!%p189_p2)   ;;  %v733_v63 = vld [vmem:[%s946_s3 + $0x10] ss:$8 sps:$4 sm:$0xff] (!%p189_p2)  }
   0x7   : > { %460 = vmatpush1.bf16.msra.mxu0 (!%p189_p2), %v730_v61  ;;  %715 = vmatpush1.bf16.msra.mxu1 (!%p189_p2), %v730_v61  ;;  %vm580_vm1 = vcmask (!%p189_p2), 1043456   ;;  %vm581_vm2 = vcmask (!%p189_p2), 523268  }
   0x8   : > { %461 = vmatprep.subr.bf16.mxu0 (!%p189_p2), %v731_v62  ;;  %712 = vmatprep.subr.bf16.mxu1 (!%p189_p2), %v731_v62  ;;  %vm912_vm3 = vmor (!%p189_p2), %vm581_vm2, %vm580_vm1 }
   0xb   : > { %462 = vmatpush1.bf16.msra.mxu0 (!%p189_p2), %v733_v63  ;;  %716 = vmatpush1.bf16.msra.mxu1 (!%p189_p2), %v733_v63 }
   0xd   : > { %s952_s20 = smov (!%p218_p3, %s654_s20), 15 }
   0xe   : > { %s655_s21 = sshll.u32 %s952_s20, 2 }
   0xf   : > { %s221_s24 = scalar_lea.vmem %s943_s0, %s655_s21 }
  0x10   : > { %v693_v0 = vld [vmem:[%s221_s24] sm:$0xff]   ;;  %v709_v1 = vld [vmem:[%s221_s24 + $0x10] sm:$0xff]   ;;  %v708_v6 = vld [vmem:[%s221_s24 + $0x8] sm:$0xff]  }
  0x11   : > { %v694_v2 = vunpack.c.l.bf16 %v693_v0  ;;  %v702_v3 = vunpack.c.l.bf16 %v709_v1  ;;  %v695_v4 = vunpack.c.h.bf16 %v693_v0  ;;  %v703_v5 = vunpack.c.h.bf16 %v709_v1  ;;  %v710_v13 = vld [vmem:[%s221_s24 + $0x18] sm:$0xff]   ;;  %v734_v0 = vld [vmem:[%s946_s3 + $0x24] ss:$8 sps:$4 sm:$0xff]   ;;  %v736_v1 = vld [vmem:[%s946_s3 + $0x20] ss:$8 sps:$4 sm:$0xff]   ;;  %s683_s24 = sshll.u32 %s952_s20, 3 }
  0x12   : > { %v698_v11 = vunpack.c.l.bf16 %v708_v6  ;;  %v699_v12 = vunpack.c.h.bf16 %v708_v6  ;;  %v706_v16 = vunpack.c.l.bf16 %v710_v13  ;;  %v707_v17 = vunpack.c.h.bf16 %v710_v13  ;;  %463 = vmatprep.subr.bf16.mxu0 %v734_v0  ;;  %713 = vmatprep.subr.bf16.mxu1 %v734_v0  ;;  %s910_s27 = scalar_lea.vmem %s948_s5, %s683_s24 }
  0x13   : > { %v248_v7 = vsel %vm247_vm0, %v694_v2, 0.0  ;;  %v260_v8 = vsel %vm247_vm0, %v702_v3, 0.0  ;;  %v251_v9 = vsel %vm247_vm0, %v695_v4, 0.0  ;;  %v263_v10 = vsel %vm247_vm0, %v703_v5, 0.0  ;;  %464 = vmatpush1.bf16.msra.mxu0 %v736_v1  ;;  %717 = vmatpush1.bf16.msra.mxu1 %v736_v1 }
  0x14   : > { %249 = vadd.xlane.f32.xlu0 %v248_v7  ;;  %261 = vadd.xlane.f32.xlu1 %v260_v8  ;;  %v254_v14 = vsel %vm247_vm0, %v698_v11, 0.0  ;;  %v257_v15 = vsel %vm247_vm0, %v699_v12, 0.0  ;;  %v266_v18 = vsel %vm247_vm0, %v706_v16, 0.0  ;;  %v269_v19 = vsel %vm247_vm0, %v707_v17, 0.0 }
  0x18   : > { %252 = vadd.xlane.f32.xlu0 %v251_v9  ;;  %264 = vadd.xlane.f32.xlu1 %v263_v10 }
  0x1c   : > { %255 = vadd.xlane.f32.xlu0 %v254_v14  ;;  %258 = vadd.xlane.f32.xlu1 %v257_v15 }
  0x20   : > { %267 = vadd.xlane.f32.xlu0 %v266_v18  ;;  %270 = vadd.xlane.f32.xlu1 %v269_v19 }
  0xa1   : > { %v250_v20 = vpop.xlane.xlu0 %249  ;;  %v262_v21 = vpop.xlane.xlu1 %261 }
  0xa2   : > { %v273_v22 = vmul.f32 0.015625, %v250_v20  ;;  %v277_v23 = vmul.f32 0.015625, %v262_v21 }
  0xa4   : > { %v817_v24 = vsub.f32 %v694_v2, %v273_v22  ;;  %v819_v25 = vsub.f32 %v702_v3, %v277_v23  ;;  %v737_v2 = vld [vmem:[%s946_s3 + $0x34] ss:$8 sps:$4 sm:$0xff]   ;;  %v739_v3 = vld [vmem:[%s946_s3 + $0x30] ss:$8 sps:$4 sm:$0xff]  }
  0xa5   : > { %v253_v26 = vpop.xlane.xlu0 %252  ;;  %v265_v27 = vpop.xlane.xlu1 %264  ;;  %465 = vmatprep.subr.bf16.mxu0 %v737_v2  ;;  %714 = vmatprep.subr.bf16.mxu1 %v737_v2 }
  0xa6   : > { %v274_v28 = vmul.f32 0.015625, %v253_v26  ;;  %v278_v29 = vmul.f32 0.015625, %v265_v27  ;;  %v289_v30 = vmul.f32 %v817_v24, %v817_v24  ;;  %v293_v31 = vmul.f32 %v819_v25, %v819_v25  ;;  %466 = vmatpush1.bf16.msra.mxu0 %v739_v3  ;;  %718 = vmatpush1.bf16.msra.mxu1 %v739_v3 }
  0xa8   : > { %v825_v32 = vsub.f32 %v695_v4, %v274_v28  ;;  %v827_v33 = vsub.f32 %v703_v5, %v278_v29  ;;  %v297_v34 = vsel %vm247_vm0, %v289_v30, 0.0  ;;  %v309_v37 = vsel %vm247_vm0, %v293_v31, 0.0 }
  0xa9   : > { %298 = vadd.xlane.f32.xlu0 %v297_v34  ;;  %v256_v35 = vpop.xlane.xlu0 %255  ;;  %v259_v36 = vpop.xlane.xlu1 %258  ;;  %v764_v4 = vmov 0   ;;  %v659_v34 = vld [vmem:[%s944_s1] ss:$0 sm:$0xff] }
  0xaa   : > { %v275_v38 = vmul.f32 0.015625, %v256_v35  ;;  %v276_v39 = vmul.f32 0.015625, %v259_v36  ;;  %v290_v40 = vmul.f32 %v825_v32, %v825_v32  ;;  %v294_v41 = vmul.f32 %v827_v33, %v827_v33  ;;  %491 = vmatprep.mubr.bf16.mxu0 %v764_v4  ;;  %511 = vmatprep.mubr.bf16.mxu1 %v764_v4 }
  0xac   : > { %v835_v42 = vsub.f32 %v698_v11, %v275_v38  ;;  %v837_v43 = vsub.f32 %v699_v12, %v276_v39  ;;  %v300_v44 = vsel %vm247_vm0, %v290_v40, 0.0  ;;  %v312_v47 = vsel %vm247_vm0, %v294_v41, 0.0 }
  0xad   : > { %310 = vadd.xlane.f32.xlu0 %v309_v37  ;;  %301 = vadd.xlane.f32.xlu1 %v300_v44  ;;  %v268_v45 = vpop.xlane.xlu0 %267  ;;  %v271_v46 = vpop.xlane.xlu1 %270 }
  0xae   : > { %v279_v48 = vmul.f32 0.015625, %v268_v45  ;;  %v280_v49 = vmul.f32 0.015625, %v271_v46  ;;  %v291_v50 = vmul.f32 %v835_v42, %v835_v42  ;;  %v292_v51 = vmul.f32 %v837_v43, %v837_v43 }
  0xb0   : > { %v845_v52 = vsub.f32 %v706_v16, %v279_v48  ;;  %v847_v53 = vsub.f32 %v707_v17, %v280_v49  ;;  %v303_v54 = vsel %vm247_vm0, %v291_v50, 0.0  ;;  %v306_v55 = vsel %vm247_vm0, %v292_v51, 0.0 }
  0xb1   : > { %313 = vadd.xlane.f32.xlu1 %v312_v47  ;;  %304 = vadd.xlane.f32.xlu0 %v303_v54 }
  0xb2   : > { %v295_v56 = vmul.f32 %v845_v52, %v845_v52  ;;  %v296_v57 = vmul.f32 %v847_v53, %v847_v53 }
  0xb4   : > { %v315_v58 = vsel %vm247_vm0, %v295_v56, 0.0  ;;  %v318_v59 = vsel %vm247_vm0, %v296_v57, 0.0 }
  0xb5   : > { %307 = vadd.xlane.f32.xlu1 %v306_v55  ;;  %316 = vadd.xlane.f32.xlu0 %v315_v58 }
  0xb9   : > { %319 = vadd.xlane.f32.xlu1 %v318_v59 }
 0x136   : > { %v299_v5 = vpop.xlane.xlu0 %298 }
 0x137   : > { %v321_v6 = vmul.f32 0.015625, %v299_v5  ;;  %v397_v5 = vlaneseq }
 0x139   : > { %v329_v7 = vadd.f32 1e-05, %v321_v6  ;;  %v398_v6 = vshrl.u32 %v397_v5, 7 }
 0x13a   : > { %v302_v8 = vpop.xlane.xlu1 %301  ;;  %v311_v9 = vpop.xlane.xlu0 %310 }
 0x13b   : > { %740 = vrsqrt.f32 %v329_v7  ;;  %v322_v10 = vmul.f32 0.015625, %v302_v8  ;;  %v325_v11 = vmul.f32 0.015625, %v311_v9  ;;  %v395_v7 = vld [vmem:[%s947_s4] sm:$0x3]  ;;  %v403_v8 = vsub.s32 1, %v398_v6 }
 0x13d   : > { %v330_v12 = vadd.f32 1e-05, %v322_v10  ;;  %v333_v13 = vadd.f32 1e-05, %v325_v11  ;;  %v404_v10 = vrot.slane %v395_v7, %v403_v8 }
 0x13e   : > { %v314_v14 = vpop.xlane.xlu1 %313  ;;  %v305_v15 = vpop.xlane.xlu0 %304 }
 0x13f   : > { %742 = vrsqrt.f32 %v330_v12  ;;  %v326_v16 = vmul.f32 0.015625, %v314_v14  ;;  %v323_v17 = vmul.f32 0.015625, %v305_v15 }
 0x140   : > { %744 = vrsqrt.f32 %v333_v13 }
 0x141   : > { %v334_v18 = vadd.f32 1e-05, %v326_v16  ;;  %v331_v19 = vadd.f32 1e-05, %v323_v17 }
 0x142   : > { %v308_v20 = vpop.xlane.xlu1 %307  ;;  %v317_v21 = vpop.xlane.xlu0 %316 }
 0x143   : > { %746 = vrsqrt.f32 %v334_v18  ;;  %v324_v22 = vmul.f32 0.015625, %v308_v20  ;;  %v327_v23 = vmul.f32 0.015625, %v317_v21 }
 0x144   : > { %748 = vrsqrt.f32 %v331_v19 }
 0x145   : > { %v741_v26 = vpop.eup %740  ;;  %v332_v27 = vadd.f32 1e-05, %v324_v22  ;;  %v335_v28 = vadd.f32 1e-05, %v327_v23 }
 0x146   : > { %v345_v29 = vmul.f32 %v741_v26, %v817_v24  ;;  %v320_v30 = vpop.xlane.xlu1 %319  ;;  %v660_v24 = vld [vmem:[%s945_s2] ss:$0 sm:$0xff] }
 0x147   : > { %750 = vrsqrt.f32 %v332_v27  ;;  %v328_v31 = vmul.f32 0.015625, %v320_v30 }
 0x148   : > { %752 = vrsqrt.f32 %v335_v28  ;;  %v360_v39 = vmul.f32 %v659_v34, %v345_v29 }
 0x149   : > { %v743_v35 = vpop.eup %742  ;;  %v336_v36 = vadd.f32 1e-05, %v328_v31 }
 0x14a   : > { %v745_v37 = vpop.eup %744  ;;  %v346_v38 = vmul.f32 %v743_v35, %v825_v32  ;;  %v375_v47 = vadd.f32 %v660_v24, %v360_v39 }
 0x14b   : > { %v349_v40 = vmul.f32 %v745_v37, %v819_v25  ;;  %754 = vrsqrt.f32 %v336_v36 }
 0x14c   : > { %v361_v41 = vmul.f32 %v659_v34, %v346_v38 }
 0x14d   : > { %v747_v44 = vpop.eup %746  ;;  %v364_v49 = vmul.f32 %v659_v34, %v349_v40 }
 0x14e   : > { %v749_v45 = vpop.eup %748  ;;  %v350_v46 = vmul.f32 %v747_v44, %v827_v33  ;;  %v376_v48 = vadd.f32 %v660_v24, %v361_v41 }
 0x14f   : > { %v347_v50 = vmul.f32 %v749_v45, %v835_v42  ;;  %v379_v56 = vadd.f32 %v660_v24, %v364_v49 }
 0x150   : > { %v383_v51 = vpack.c.bf16 %v376_v48, %v375_v47  ;;  %v365_v32 = vmul.f32 %v659_v34, %v350_v46 }
 0x151   : > { %v751_v54 = vpop.eup %750  ;;  %v362_v58 = vmul.f32 %v659_v34, %v347_v50 }
 0x152   : > { %v753_v55 = vpop.eup %752  ;;  %v348_v25 = vmul.f32 %v751_v54, %v837_v43  ;;  %669 = vmatmul.mubr.msk.bf16.vlgmr.msra.gmra.mrb[0].mxu0 %vm247_vm0, %v383_v51  ;;  %v380_v57 = vadd.f32 %v660_v24, %v365_v32 }
 0x153   : > { %v351_v59 = vmul.f32 %v753_v55, %v845_v52  ;;  %501 = vmatprep.mubr.bf16.mxu0 %v764_v4  ;;  %v377_v62 = vadd.f32 %v660_v24, %v362_v58 }
 0x154   : > { %v385_v33 = vpack.c.bf16 %v380_v57, %v379_v56  ;;  %v363_v60 = vmul.f32 %v659_v34, %v348_v25 }
 0x155   : > { %v755_v61 = vpop.eup %754  ;;  %v366_v0 = vmul.f32 %v659_v34, %v351_v59 }
 0x156   : > { %v352_v42 = vmul.f32 %v755_v61, %v847_v53  ;;  %671 = vmatmul.mubr.msk.bf16.vlgmr.msra.gmra.mrb[0].mxu1 %vm247_vm0, %v385_v33  ;;  %v378_v63 = vadd.f32 %v660_v24, %v363_v60  ;;  %v399_v53 = vsub.s32 0, %v398_v6 }
 0x157   : > { %521 = vmatprep.mubr.bf16.mxu1 %v764_v4  ;;  %v381_v52 = vadd.f32 %v660_v24, %v366_v0 }
 0x158   : > { %v384_v43 = vpack.c.bf16 %v378_v63, %v377_v62  ;;  %v367_v1 = vmul.f32 %v659_v34, %v352_v42  ;;  %v400_v9 = vrot.slane %v395_v7, %v399_v53 }
 0x15a   : > { %670 = vmatmul.mubr.msk.bf16.gmra.mrb[4].mxu0 %vm247_vm0, %v384_v43  ;;  %v382_v2 = vadd.f32 %v660_v24, %v367_v1 }
 0x15c   : > { %v386_v3 = vpack.c.bf16 %v382_v2, %v381_v52 }
 0x15e   : > { %672 = vmatmul.mubr.msk.bf16.gmra.mrb[4].mxu1 %vm247_vm0, %v386_v3 }
 0x225   : > { %v493_v4 = vpop.f32.mrb[0].mxu0 }
 0x226   : > { %v494_v11 = vadd.f32 %v493_v4, %v400_v9  ;;  %v495_v12 = vpop.f32.mrb[1].mxu0 }
 0x227   : > { %v496_v13 = vadd.f32 %v495_v12, %v404_v10  ;;  %v497_v14 = vpop.f32.mrb[2].mxu0 }
 0x228   : > { %v498_v16 = vadd.f32 %v497_v14, %v400_v9  ;;  %v499_v17 = vpop.f32.mrb[3].mxu0 }
 0x229   : > { %v684_v18 = vpack.c.bf16 %v496_v13, %v494_v11  ;;  %v500_v19 = vadd.f32 %v499_v17, %v404_v10  ;;  %v513_v20 = vpop.f32.mrb[0].mxu1 }
 0x22a   : > { %v514_v21 = vadd.f32 %v513_v20, %v400_v9  ;;  %v515_v22 = vpop.f32.mrb[1].mxu1 }
 0x22b   : > { %583 = vst.msk [vmem:[%s910_s27] sm:$0xff] %vm912_vm3, %v684_v18  ;;  %v685_v23 = vpack.c.bf16 %v500_v19, %v498_v16  ;;  %v516_v26 = vadd.f32 %v515_v22, %v404_v10  ;;  %v517_v27 = vpop.f32.mrb[2].mxu1 }
 0x22c   : > { %v518_v28 = vadd.f32 %v517_v27, %v400_v9  ;;  %v519_v29 = vpop.f32.mrb[3].mxu1 }
 0x22d   : > { %584 = vst.msk [vmem:[%s910_s27 + $0x8] sm:$0xff] %vm912_vm3, %v685_v23  ;;  %v688_v30 = vpack.c.bf16 %v516_v26, %v514_v21  ;;  %v520_v31 = vadd.f32 %v519_v29, %v404_v10  ;;  %v503_v34 = vpop.f32.mrb[4].mxu0 }
 0x22e   : > { %v504_v35 = vadd.f32 %v503_v34, %v400_v9  ;;  %v505_v36 = vpop.f32.mrb[5].mxu0 }
 0x22f   : > { %587 = vst.msk [vmem:[%s910_s27 + $0x20] sm:$0xff] %vm912_vm3, %v688_v30  ;;  %v689_v37 = vpack.c.bf16 %v520_v31, %v518_v28  ;;  %v506_v38 = vadd.f32 %v505_v36, %v404_v10  ;;  %v507_v39 = vpop.f32.mrb[6].mxu0 }
 0x230   : > { %v508_v40 = vadd.f32 %v507_v39, %v400_v9  ;;  %v509_v24 = vpop.f32.mrb[7].mxu0 }
 0x231   : > { %588 = vst.msk [vmem:[%s910_s27 + $0x28] sm:$0xff] %vm912_vm3, %v689_v37  ;;  %v686_v41 = vpack.c.bf16 %v506_v38, %v504_v35  ;;  %v510_v44 = vadd.f32 %v509_v24, %v404_v10  ;;  %v523_v45 = vpop.f32.mrb[4].mxu1 }
 0x232   : > { %v524_v46 = vadd.f32 %v523_v45, %v400_v9  ;;  %v525_v47 = vpop.f32.mrb[5].mxu1 }
 0x233   : > { %585 = vst.msk [vmem:[%s910_s27 + $0x10] sm:$0xff] %vm912_vm3, %v686_v41  ;;  %v687_v48 = vpack.c.bf16 %v510_v44, %v508_v40  ;;  %v526_v49 = vadd.f32 %v525_v47, %v404_v10  ;;  %v527_v50 = vpop.f32.mrb[6].mxu1 }
 0x234   : > { %v528_v51 = vadd.f32 %v527_v50, %v400_v9  ;;  %v529_v32 = vpop.f32.mrb[7].mxu1 }
 0x235   : > { %586 = vst.msk [vmem:[%s910_s27 + $0x18] sm:$0xff] %vm912_vm3, %v687_v48  ;;  %v690_v54 = vpack.c.bf16 %v526_v49, %v524_v46  ;;  %v530_v55 = vadd.f32 %v529_v32, %v404_v10 }
 0x237   : > { %589 = vst.msk [vmem:[%s910_s27 + $0x30] sm:$0xff] %vm912_vm3, %v690_v54  ;;  %v691_v25 = vpack.c.bf16 %v530_v55, %v528_v51 }
 0x239   : > { %590 = vst.msk [vmem:[%s910_s27 + $0x38] sm:$0xff] %vm912_vm3, %v691_v25 }
 0x23a PF: > { %s15_s18 = sadd.s32 1, %s762_s18  }
 0x23b   : > { %p12_p4 = scmp.ge.s32.totalorder %s15_s18, 4  }
 0x23d   :  { %14 = sbr.rel (!%p12_p4) target bundleno = 1 (0x1), region = 70 }

// kernel: fwd.13
= control target key start
LH: loop header
LB: loop body
LE: loop exit
PB: predicated region body
PF: predicated region fallthrough
CT: control target
= control target key end

     0   :  { %s1737_s9 = smov 0   ;;  %s2084_s0 = inlined_call_operand.vmem [shape: bf16[8,16,192], index: 0, kind: input, shape index: {}]   ;;  %s2085_s1 = inlined_call_operand.vmem [shape: f32[8,1,16], index: 1, kind: input, shape index: {}]   ;;  %s2086_s2 = inlined_call_operand.vmem [shape: bf16[8,16,64], index: 2, kind: output, shape index: {}]  }
   0x1 LB: > { %s1418_s10 = sadd.s32 4294967295, %s1714_s9   ;;  %p1422_p0 = scmp.ge.s32.totalorder %s1714_s9, 1  ;;  %s1714_s9 = sphi %s1737_s9, %s12_s9  }
   0x2   : > { %p124_p1 = scmp.lt.s32.totalorder %s1714_s9, 3 }
   0x4   : > { %p125_p2 = pnand %p1422_p0, %p124_p1 }
   0x5   : > { %s1423_s11 = sshll.u32 (!%p125_p2), %s1418_s10, 2  ;;  %v1716_v0 = vmov (!%p125_p2), 0.0   ;;  %vm1717_vm0 = vmmov (!%p125_p2), 0   ;;  %s1718_s16 = smov (!%p125_p2), 64   ;;  %vm199_vm1 = vcmask (!%p125_p2), 261120   ;;  %v421_v21 = vlaneseq (!%p125_p2) }
   0x6   : > { %128 = sbr.rel (%p125_p2) target bundleno = 1271 (0x4f7), region = 28  ;;  %p153_p3 = scmp.lt.s32.totalorder (!%p125_p2), %s1423_s11, 7  ;;  %1510 = vmatprep.subr.bf16.mxu0 (!%p125_p2), %v1716_v0  ;;  %1516 = vmatprep.subr.bf16.mxu1 (!%p125_p2), %v1716_v0  ;;  %v1720_v26 = vmov (!%p125_p2), -1e+09   ;;  %vm449_vm5 = vcmask (!%p125_p2), 130048   ;;  %vm1342_vm7 = vcmask (!%p125_p2), 519168  }
   0x7   : > { %1512 = vmatprep.mubr.msk.bf16.mxu0 (!%p125_p2), %vm1717_vm0, %v1716_v0  ;;  %1518 = vmatprep.mubr.msk.bf16.mxu1 (!%p125_p2), %vm1717_vm0, %v1716_v0  ;;  %s1719_s17 = smov (!%p125_p2), 32   ;;  %v422_v23 = vshrl.u32 (!%p125_p2), %v421_v21, 7  ;;  %s1721_s21 = smov (!%p125_p2), 96  }
   0x9   : > { %v423_v25 = vsub.s32 (!%p125_p2), 0, %v422_v23 }
   0xd   : > { %s2088_s11 = smov (!%p153_p3, %s1423_s11), 7 }
   0xe   : > { %s1468_s12 = sshll.u32 %s2088_s11, 4  ;;  %s162_s20 = scalar_lea.vmem %s2085_s1, %s2088_s11 }
   0xf   : > { %s157_s15 = scalar_lea.vmem %s2084_s0, %s1468_s12  ;;  %v180_v22 = vld [vmem:[%s162_s20] sm:$0x1]  ;;  %v181_v24 = vld [vmem:[%s162_s20 + $0x1] sm:$0x1]  ;;  %v182_v28 = vld [vmem:[%s162_s20 + $0x2] sm:$0x1] }
  0x10   : > { %v1757_v1 = vld [vmem:[%s157_s15] sm:$0xff]  ;;  %v1759_v2 = vld [vmem:[%s157_s15 + $0x8] sm:$0xff]  ;;  %v1761_v3 = vld [vmem:[%s157_s15 + $0x10] sm:$0xff]  ;;  %vm184_vm2 = vcmp.gt.f32.partialorder %v180_v22, 0.5  ;;  %vm185_vm3 = vcmp.gt.f32.partialorder %v181_v24, 0.5  ;;  %vm186_vm4 = vcmp.gt.f32.partialorder %v182_v28, 0.5 }
  0x11   : > { %v1765_v4 = vcombine.low %v1757_v1, %v1759_v2  ;;  %v1767_v5 = vld [vmem:[%s157_s15 + $0x18] sm:$0xff]  ;;  %v1769_v6 = vld [vmem:[%s157_s15 + $0x20] sm:$0xff]  ;;  %v1771_v7 = vld [vmem:[%s157_s15 + $0x28] sm:$0xff]  ;;  %v188_v27 = vsel %vm184_vm2, 0.0, %v1720_v26  ;;  %v189_v31 = vsel %vm185_vm3, 0.0, %v1720_v26  ;;  %v190_v41 = vsel %vm186_vm4, 0.0, %v1720_v26 }
  0x12   : > { %v1775_v8 = vcombine.low %v1769_v6, %v1771_v7  ;;  %v1777_v9 = vld [vmem:[%s157_s15 + $0x30] sm:$0xff]  ;;  %v1779_v10 = vld [vmem:[%s157_s15 + $0x38] sm:$0xff]  ;;  %v1784_v11 = vcombine.low %v1761_v3, %v1767_v5  ;;  %v1823_v29 = vrot.slane %v188_v27, %v423_v25  ;;  %v183_v35 = vld [vmem:[%s162_s20 + $0x3] sm:$0x1]  ;;  %v1828_v39 = vrot.slane %v189_v31, %v423_v25  ;;  %s1469_s22 = sshll.u32 %s2088_s11, 3 }
  0x13   : > { %197 = vrot.lane.b32.xlu0 %v1765_v4, %s1718_s16  ;;  %v1789_v12 = vcombine.low %v1777_v9, %v1779_v10  ;;  %vm187_vm6 = vcmp.gt.f32.partialorder %v183_v35, 0.5  ;;  %v1840_v51 = vrot.slane %v190_v41, %v423_v25  ;;  %v535_v27 = vrot.slane %v1759_v2, 4  ;;  %s2049_s25 = scalar_lea.vmem %s2086_s2, %s1469_s22 }
  0x14   : > { %306 = vrot.lane.b32.xlu1 %v1775_v8, %s1718_s16  ;;  %v191_v53 = vsel %vm187_vm6, 0.0, %v1720_v26  ;;  %v534_v26 = vrot.slane %v1757_v1, 4  ;;  %v585_v31 = vrot.slane %v1767_v5, 4 }
  0x15   : > { %v1850_v62 = vrot.slane %v191_v53, %v423_v25 }
  0x16   : > { %v1438_v28 = vcombine.low %v534_v26, %v535_v27 }
  0x17   : > { %252 = vrot.lane.b32.xlu0 %v1784_v11, %s1718_s16 }
  0x18   : > { %360 = vrot.lane.b32.xlu1 %v1789_v12, %s1718_s16 }
  0x1c   : > { %744 = vrot.lane.b32.xlu1 %v1765_v4, %s1719_s17 }
  0x85   : > { %v198_v13 = vpop.permute.xlu0 %197 }
  0x86   : > { %v204_v14 = vsel %vm199_vm1, %v198_v13, 0  ;;  %v307_v15 = vpop.permute.xlu1 %306 }
  0x87   : > { %1511 = vmatpush3.bf16.xpose.msra.mxu0 %v204_v14  ;;  %v312_v18 = vsel %vm199_vm1, %v307_v15, 0 }
  0x88   : > { %1522 = vmatprep.subr.bf16.mxu0 %v1716_v0 }
  0x89   : > { %v253_v16 = vpop.permute.xlu0 %252 }
  0x8a   : > { %v258_v17 = vsel %vm199_vm1, %v253_v16, 0  ;;  %v361_v19 = vpop.permute.xlu1 %360 }
  0x8b   : > { %1517 = vmatpush3.bf16.xpose.msra.mxu1 %v258_v17  ;;  %v366_v20 = vsel %vm199_vm1, %v361_v19, 0 }
  0x8c   : > { %1528 = vmatprep.subr.bf16.mxu1 %v1716_v0 }
  0x8e   : > { %1513 = vmatmul.mubr.msk.bf16.vlgmr.msra.gmra.mrb[0].mxu0 %vm199_vm1, %v1765_v4 }
  0x8f   : > { %1523 = vmatpush3.bf16.xpose.msra.mxu0 %v312_v18  ;;  %1524 = vmatprep.mubr.msk.bf16.mxu0 %vm1717_vm0, %v1716_v0 }
  0x90   : > { %1534 = vmatprep.subr.bf16.mxu0 %v1716_v0 }
  0x92   : > { %1519 = vmatmul.mubr.msk.bf16.vlgmr.msra.gmra.mrb[0].mxu1 %vm199_vm1, %v1784_v11 }
  0x93   : > { %1529 = vmatpush3.bf16.xpose.msra.mxu1 %v366_v20  ;;  %1530 = vmatprep.mubr.msk.bf16.mxu1 %vm1717_vm0, %v1716_v0 }
  0x94   : > { %1540 = vmatprep.subr.bf16.mxu1 %v1716_v0 }
  0x96   : > { %1525 = vmatmul.mubr.msk.bf16.vlgmr.msra.gmra.mrb[4].mxu0 %vm199_vm1, %v1775_v8 }
  0x97   : > { %1536 = vmatprep.mubr.msk.bf16.mxu0 %vm1717_vm0, %v1716_v0  ;;  %1535 = vmatpush3.bf16.msra.mxu0 %v1438_v28 }
  0x98   : > { %1546 = vmatprep.subr.bf16.mxu0 %v1716_v0 }
  0x9a   : > { %1531 = vmatmul.mubr.msk.bf16.vlgmr.msra.gmra.mrb[4].mxu1 %vm199_vm1, %v1789_v12 }
  0x9b   : > { %1542 = vmatprep.mubr.msk.bf16.mxu1 %vm1717_vm0, %v1716_v0 }
 0x161   : > { %v240_v30 = vpop.f32.mrb[0].mxu0 }
 0x162   : > { %v409_v32 = vmul.f32 0.17677669, %v240_v30  ;;  %v1514_v33 = vpop.f32.mrb[1].mxu0  ;;  %v584_v30 = vrot.slane %v1761_v3, 4 }
 0x163   : > { %v243_v34 = vpop.f32.mrb[2].mxu0 }
 0x164   : > { %v410_v36 = vmul.f32 0.17677669, %v243_v34  ;;  %v1515_v37 = vpop.f32.mrb[3].mxu0  ;;  %v1826_v38 = vadd.f32 %v1823_v29, %v409_v32  ;;  %v1440_v32 = vcombine.low %v584_v30, %v585_v31 }
 0x165   : > { %v294_v40 = vpop.f32.mrb[0].mxu1 }
 0x166   : > { %v411_v42 = vmul.f32 0.17677669, %v294_v40  ;;  %v1520_v43 = vpop.f32.mrb[1].mxu1  ;;  %v450_v44 = vsel %vm449_vm5, %v1826_v38, -inf  ;;  %v1833_v45 = vadd.f32 %v1823_v29, %v410_v36  ;;  %1541 = vmatpush3.bf16.msra.mxu1 %v1440_v32 }
 0x167   : > { %451 = vmax.xlane.f32.xlu0 %v450_v44  ;;  %v297_v46 = vpop.f32.mrb[2].mxu1  ;;  %1552 = vmatprep.subr.bf16.mxu1 %v1716_v0  ;;  %v634_v43 = vrot.slane %v1769_v6, 4  ;;  %v635_v44 = vrot.slane %v1771_v7, 4 }
 0x168   : > { %v412_v47 = vmul.f32 0.17677669, %v297_v46  ;;  %v1521_v48 = vpop.f32.mrb[3].mxu1  ;;  %v453_v49 = vsel %vm449_vm5, %v1833_v45, -inf  ;;  %v1838_v50 = vadd.f32 %v1828_v39, %v411_v42 }
 0x169   : > { %454 = vmax.xlane.f32.xlu1 %v453_v49  ;;  %v348_v52 = vpop.f32.mrb[4].mxu0 }
 0x16a   : > { %v413_v54 = vmul.f32 0.17677669, %v348_v52  ;;  %v1526_v55 = vpop.f32.mrb[5].mxu0  ;;  %v456_v56 = vsel %vm449_vm5, %v1838_v50, -inf  ;;  %v1845_v57 = vadd.f32 %v1828_v39, %v412_v47 }
 0x16b   : > { %v351_v58 = vpop.f32.mrb[6].mxu0  ;;  %457 = vmax.xlane.f32.xlu0 %v456_v56  ;;  %v1442_v55 = vcombine.low %v634_v43, %v635_v44  ;;  %v684_v56 = vrot.slane %v1777_v9, 4 }
 0x16c   : > { %v414_v59 = vmul.f32 0.17677669, %v351_v58  ;;  %v1527_v60 = vpop.f32.mrb[7].mxu0  ;;  %v1848_v61 = vadd.f32 %v1840_v51, %v413_v54  ;;  %v459_v16 = vsel %vm449_vm5, %v1845_v57, -inf }
 0x16d   : > { %v402_v63 = vpop.f32.mrb[4].mxu1 }
 0x16e   : > { %v415_v13 = vmul.f32 0.17677669, %v402_v63  ;;  %v1532_v14 = vpop.f32.mrb[5].mxu1  ;;  %v462_v15 = vsel %vm449_vm5, %v1848_v61, -inf  ;;  %v1857_v17 = vadd.f32 %v1840_v51, %v414_v59 }
 0x16f   : > { %463 = vmax.xlane.f32.xlu1 %v462_v15  ;;  %460 = vmax.xlane.f32.xlu0 %v459_v16  ;;  %v405_v18 = vpop.f32.mrb[6].mxu1 }
 0x170   : > { %v416_v19 = vmul.f32 0.17677669, %v405_v18  ;;  %v1533_v20 = vpop.f32.mrb[7].mxu1  ;;  %v447_v21 = vadd.f32 %v1850_v62, %v415_v13  ;;  %v465_v22 = vsel %vm449_vm5, %v1857_v17, -inf }
 0x172   : > { %v468_v23 = vsel %vm449_vm5, %v447_v21, -inf  ;;  %v1864_v24 = vadd.f32 %v1850_v62, %v416_v19 }
 0x173   : > { %466 = vmax.xlane.f32.xlu0 %v465_v22  ;;  %469 = vmax.xlane.f32.xlu1 %v468_v23 }
 0x174   : > { %v471_v25 = vsel %vm449_vm5, %v1864_v24, -inf }
 0x177   : > { %472 = vmax.xlane.f32.xlu0 %v471_v25 }
 0x184   : > { %742 = vrot.lane.b32.xlu1 %v1765_v4, %s1721_s21  ;;  %v745_v4 = vpop.permute.xlu1 %744 }
 0x185   : > { %v750_v18 = vsel %vm199_vm1, %v745_v4, 0 }
 0x188   : > { %846 = vrot.lane.b32.xlu1 %v1775_v8, %s1719_s17 }
 0x18c   : > { %897 = vrot.lane.b32.xlu1 %v1789_v12, %s1719_s17 }
 0x18d   : > { %795 = vrot.lane.b32.xlu0 %v1784_v11, %s1719_s17 }
 0x190   : > { %895 = vrot.lane.b32.xlu1 %v1789_v12, %s1721_s21 }
 0x191   : > { %793 = vrot.lane.b32.xlu0 %v1784_v11, %s1721_s21 }
 0x194   : > { %1046 = vrot.lane.b32.xlu1 %v1757_v1, %s1721_s21 }
 0x195   : > { %844 = vrot.lane.b32.xlu0 %v1775_v8, %s1721_s21 }
 0x198   : > { %1100 = vrot.lane.b32.xlu1 %v1761_v3, %s1721_s21 }
 0x199   : > { %1048 = vrot.lane.b32.xlu0 %v1759_v2, %s1721_s21 }
 0x19c   : > { %1102 = vrot.lane.b32.xlu1 %v1767_v5, %s1721_s21 }
 0x19d   : > { %1154 = vrot.lane.b32.xlu0 %v1769_v6, %s1721_s21 }
 0x1a0   : > { %1156 = vrot.lane.b32.xlu1 %v1771_v7, %s1721_s21 }
 0x1f4   : > { %v452_v1 = vpop.xlane.xlu0 %451 }
 0x1f5   : > { %v474_v11 = vsub.f32 %v1826_v38, %v452_v1 }
 0x1f6   : > { %v455_v8 = vpop.xlane.xlu1 %454 }
 0x1f7   : > { %v482_v12 = vmul.f32 1.442695, %v474_v11  ;;  %v475_v3 = vsub.f32 %v1833_v45, %v455_v8 }
 0x1f8   : > { %v458_v33 = vpop.xlane.xlu0 %457 }
 0x1f9   : > { %v484_v34 = vmul.f32 1.442695, %v475_v3  ;;  %v476_v2 = vsub.f32 %v1838_v50, %v458_v33  ;;  %1644 = vpow2.f32 %v482_v12 }
 0x1fb   : > { %1646 = vpow2.f32 %v484_v34  ;;  %v486_v36 = vmul.f32 1.442695, %v476_v2 }
 0x1fc   : > { %v464_v5 = vpop.xlane.xlu1 %463  ;;  %v461_v35 = vpop.xlane.xlu0 %460 }
 0x1fd   : > { %v478_v37 = vsub.f32 %v1848_v61, %v464_v5  ;;  %v477_v40 = vsub.f32 %v1845_v57, %v461_v35  ;;  %1648 = vpow2.f32 %v486_v36  ;;  %v685_v57 = vrot.slane %v1779_v10, 4 }
 0x1ff   : > { %v488_v41 = vmul.f32 1.442695, %v477_v40  ;;  %v490_v45 = vmul.f32 1.442695, %v478_v37  ;;  %v1444_v60 = vcombine.low %v684_v56, %v685_v57 }
 0x200   : > { %v470_v42 = vpop.xlane.xlu1 %469  ;;  %v467_v38 = vpop.xlane.xlu0 %466 }
 0x201   : > { %v480_v46 = vsub.f32 %v447_v21, %v470_v42  ;;  %v479_v47 = vsub.f32 %v1857_v17, %v467_v38  ;;  %1650 = vpow2.f32 %v488_v41 }
 0x202   : > { %1652 = vpow2.f32 %v490_v45 }
 0x203   : > { %v492_v48 = vmul.f32 1.442695, %v479_v47  ;;  %v1908_v49 = vpop.eup %1644  ;;  %v494_v50 = vmul.f32 1.442695, %v480_v46 }
 0x204   : > { %v473_v52 = vpop.xlane.xlu0 %472  ;;  %v743_v13 = vpop.permute.xlu1 %742 }
 0x205   : > { %v1910_v53 = vpop.eup %1646  ;;  %v481_v54 = vsub.f32 %v1864_v24, %v473_v52  ;;  %1654 = vpow2.f32 %v492_v48 }
 0x206   : > { %v530_v6 = vpack.c.bf16 %v1910_v53, %v1908_v49  ;;  %1656 = vpow2.f32 %v494_v50 }
 0x207   : > { %v496_v7 = vmul.f32 1.442695, %v481_v54  ;;  %v1921_v58 = vpop.eup %1648 }
 0x208   : > { %1537 = vmatmul.mubr.msk.bf16.vlgmr.msra.gmra.mrb[8].mxu0 %vm449_vm5, %v530_v6  ;;  %v796_v19 = vpop.permute.xlu0 %795  ;;  %v847_v21 = vpop.permute.xlu1 %846 }
 0x209   : > { %1658 = vpow2.f32 %v496_v7  ;;  %1547 = vmatpush3.bf16.msra.mxu0 %v1442_v55  ;;  %1548 = vmatprep.mubr.msk.bf16.mxu0 %vm1717_vm0, %v1716_v0  ;;  %v801_v22 = vsel %vm199_vm1, %v796_v19, 0  ;;  %v852_v23 = vsel %vm199_vm1, %v847_v21, 0 }
 0x20a   : > { %1558 = vmatprep.subr.bf16.mxu0 %v1716_v0 }
 0x20b   : > { %v1923_v59 = vpop.eup %1650 }
 0x20c   : > { %v531_v61 = vpack.c.bf16 %v1923_v59, %v1921_v58  ;;  %v1927_v63 = vpop.eup %1652  ;;  %v794_v24 = vpop.permute.xlu0 %793 }
 0x20d   : > { %v898_v25 = vpop.permute.xlu1 %897 }
 0x20e   : > { %1543 = vmatmul.mubr.msk.bf16.vlgmr.msra.gmra.mrb[8].mxu1 %vm449_vm5, %v531_v61  ;;  %v903_v26 = vsel %vm199_vm1, %v898_v25, 0 }
 0x20f   : > { %v1930_v14 = vpop.eup %1654  ;;  %1553 = vmatpush3.bf16.msra.mxu1 %v1444_v60  ;;  %1554 = vmatprep.mubr.msk.bf16.mxu1 %vm1717_vm0, %v1716_v0 }
 0x210   : > { %v532_v15 = vpack.c.bf16 %v1930_v14, %v1927_v63  ;;  %1564 = vmatprep.subr.bf16.mxu1 %v1716_v0  ;;  %v1937_v16 = vpop.eup %1656  ;;  %v845_v27 = vpop.permute.xlu0 %844 }
 0x211   : > { %v896_v28 = vpop.permute.xlu1 %895 }
 0x212   : > { %1549 = vmatmul.mubr.msk.bf16.vlgmr.msra.gmra.mrb[12].mxu0 %vm449_vm5, %v532_v15 }
 0x213   : > { %v1939_v17 = vpop.eup %1658  ;;  %1559 = vmatpush3.bf16.xpose.msra.mxu0 %v750_v18  ;;  %1560 = vmatprep.mubr.msk.bf16.mxu0 %vm1717_vm0, %v1716_v0 }
 0x214   : > { %v533_v20 = vpack.c.bf16 %v1939_v17, %v1937_v16  ;;  %1570 = vmatprep.subr.bf16.mxu0 %v1716_v0  ;;  %v1049_v31 = vpop.permute.xlu0 %1048 }
 0x215   : > { %v1047_v30 = vpop.permute.xlu1 %1046  ;;  %v1051_v4 = vrot.slane %v1049_v31, 4 }
 0x216   : > { %1555 = vmatmul.mubr.msk.bf16.vlgmr.msra.gmra.mrb[12].mxu1 %vm449_vm5, %v533_v20  ;;  %v1050_v32 = vrot.slane %v1047_v30, 4 }
 0x217   : > { %1566 = vmatprep.mubr.msk.bf16.mxu1 %vm1717_vm0, %v1716_v0 }
 0x218   : > { %1565 = vmatpush3.bf16.xpose.msra.mxu1 %v801_v22  ;;  %v1450_v1 = vcombine.low %v1050_v32, %v1051_v4 }
 0x219   : > { %1576 = vmatprep.subr.bf16.mxu1 %v1716_v0  ;;  %v1101_v11 = vpop.permute.xlu1 %1100 }
 0x21a   : > { %1561 = vmatmul.mubr.msk.bf16.vlgmr.msra.gmra.mrb[16].mxu0 %vm199_vm1, %v743_v13  ;;  %v1104_v8 = vrot.slane %v1101_v11, 4 }
 0x21b   : > { %1571 = vmatpush3.bf16.xpose.msra.mxu0 %v852_v23  ;;  %1572 = vmatprep.mubr.msk.bf16.mxu0 %vm1717_vm0, %v1716_v0 }
 0x21c   : > { %1582 = vmatprep.subr.bf16.mxu0 %v1716_v0 }
 0x21d   : > { %v1103_v12 = vpop.permute.xlu1 %1102 }
 0x21e   : > { %v1105_v3 = vrot.slane %v1103_v12, 4 }
 0x21f   : > { %1567 = vmatmul.mubr.msk.bf16.vlgmr.msra.gmra.mrb[16].mxu1 %vm199_vm1, %v794_v24 }
 0x220   : > { %1577 = vmatpush3.bf16.xpose.msra.mxu1 %v903_v26  ;;  %1578 = vmatprep.mubr.msk.bf16.mxu1 %vm1717_vm0, %v1716_v0  ;;  %v1452_v33 = vcombine.low %v1104_v8, %v1105_v3 }
 0x221   : > { %1588 = vmatprep.subr.bf16.mxu1 %v1716_v0 }
 0x222   : > { %1573 = vmatmul.mubr.msk.bf16.vlgmr.msra.gmra.mrb[20].mxu0 %vm199_vm1, %v845_v27 }
 0x223   : > { %1584 = vmatprep.mubr.msk.bf16.mxu0 %vm1717_vm0, %v1716_v0  ;;  %1583 = vmatpush3.bf16.msra.mxu0 %v1450_v1 }
 0x224   : > { %1594 = vmatprep.subr.bf16.mxu0 %v1716_v0 }
 0x227   : > { %1579 = vmatmul.mubr.msk.bf16.vlgmr.msra.gmra.mrb[20].mxu1 %vm199_vm1, %v896_v28 }
 0x228   : > { %1590 = vmatprep.mubr.msk.bf16.mxu1 %vm1717_vm0, %v1716_v0  ;;  %1589 = vmatpush3.bf16.msra.mxu1 %v1452_v33 }
 0x229   : > { %1600 = vmatprep.subr.bf16.mxu1 %v1716_v0 }
 0x2db   : > { %v1971_v34 = vpop.f32.mrb[8].mxu0 }
 0x2dc   : > { %v1538_v2 = vpop.f32.mrb[9].mxu0 }
 0x2dd   : > { %v1973_v5 = vpop.f32.mrb[10].mxu0 }
 0x2de   : > { %v1539_v35 = vpop.f32.mrb[11].mxu0 }
 0x2e1   : > { %v1975_v36 = vpop.f32.mrb[8].mxu1 }
 0x2e2   : > { %v1544_v37 = vpop.f32.mrb[9].mxu1 }
 0x2e3   : > { %v1977_v40 = vpop.f32.mrb[10].mxu1 }
 0x2e4   : > { %v1545_v41 = vpop.f32.mrb[11].mxu1 }
 0x2e5   : > { %v1979_v42 = vpop.f32.mrb[12].mxu0 }
 0x2e6   : > { %v1550_v38 = vpop.f32.mrb[13].mxu0 }
 0x2e7   : > { %v1981_v43 = vpop.f32.mrb[14].mxu0 }
 0x2e8   : > { %v1551_v44 = vpop.f32.mrb[15].mxu0 }
 0x2e9   : > { %v1983_v45 = vpop.f32.mrb[12].mxu1  ;;  %v1157_v44 = vpop.permute.xlu1 %1156 }
 0x2ea   : > { %v1556_v46 = vpop.f32.mrb[13].mxu1 }
 0x2eb   : > { %v1985_v47 = vpop.f32.mrb[14].mxu1 }
 0x2ec   : > { %v1557_v48 = vpop.f32.mrb[15].mxu1 }
 0x2ed   : > { %v786_v50 = vpop.f32.mrb[16].mxu0 }
 0x2ee   : > { %v946_v52 = vmul.f32 0.17677669, %v786_v50  ;;  %v1562_v54 = vpop.f32.mrb[17].mxu0 }
 0x2ef   : > { %v789_v55 = vpop.f32.mrb[18].mxu0 }
 0x2f0   : > { %v947_v6 = vmul.f32 0.17677669, %v789_v55  ;;  %v1563_v7 = vpop.f32.mrb[19].mxu0  ;;  %v954_v56 = vadd.f32 %v946_v52, %v1823_v29 }
 0x2f2   : > { %v837_v57 = vpop.f32.mrb[16].mxu1  ;;  %v962_v60 = vsel %vm449_vm5, %v954_v56, -inf  ;;  %v955_v61 = vadd.f32 %v947_v6, %v1823_v29 }
 0x2f3   : > { %v948_v13 = vmul.f32 0.17677669, %v837_v57  ;;  %v1568_v15 = vpop.f32.mrb[17].mxu1  ;;  %963 = vmax.xlane.f32.xlu0 %v962_v60 }
 0x2f4   : > { %v840_v18 = vpop.f32.mrb[18].mxu1  ;;  %v965_v19 = vsel %vm449_vm5, %v955_v61, -inf }
 0x2f5   : > { %v949_v20 = vmul.f32 0.17677669, %v840_v18  ;;  %v1569_v21 = vpop.f32.mrb[19].mxu1  ;;  %966 = vmax.xlane.f32.xlu1 %v965_v19  ;;  %v888_v22 = vpop.f32.mrb[20].mxu0  ;;  %v956_v23 = vadd.f32 %v948_v13, %v1828_v39 }
 0x2f6   : > { %v950_v24 = vmul.f32 0.17677669, %v888_v22  ;;  %v1574_v25 = vpop.f32.mrb[21].mxu0  ;;  %v1159_v21 = vrot.slane %v1157_v44, 4 }
 0x2f7   : > { %v968_v26 = vsel %vm449_vm5, %v956_v23, -inf  ;;  %v891_v27 = vpop.f32.mrb[22].mxu0  ;;  %v957_v28 = vadd.f32 %v949_v20, %v1828_v39 }
 0x2f8   : > { %969 = vmax.xlane.f32.xlu0 %v968_v26  ;;  %v951_v29 = vmul.f32 0.17677669, %v891_v27  ;;  %v1575_v30 = vpop.f32.mrb[23].mxu0  ;;  %v958_v31 = vadd.f32 %v950_v24, %v1840_v51 }
 0x2f9   : > { %v971_v8 = vsel %vm449_vm5, %v957_v28, -inf }
 0x2fa   : > { %v939_v32 = vpop.f32.mrb[20].mxu1  ;;  %v974_v4 = vsel %vm449_vm5, %v958_v31, -inf  ;;  %v959_v12 = vadd.f32 %v951_v29, %v1840_v51  ;;  %v1155_v51 = vpop.permute.xlu0 %1154 }
 0x2fb   : > { %v952_v1 = vmul.f32 0.17677669, %v939_v32  ;;  %v1580_v11 = vpop.f32.mrb[21].mxu1  ;;  %975 = vmax.xlane.f32.xlu1 %v974_v4  ;;  %v1158_v22 = vrot.slane %v1155_v51, 4 }
 0x2fc   : > { %972 = vmax.xlane.f32.xlu0 %v971_v8  ;;  %v942_v3 = vpop.f32.mrb[22].mxu1  ;;  %v977_v37 = vsel %vm449_vm5, %v959_v12, -inf }
 0x2fd   : > { %v953_v33 = vmul.f32 0.17677669, %v942_v3  ;;  %v1581_v2 = vpop.f32.mrb[23].mxu1  ;;  %v960_v39 = vadd.f32 %v952_v1, %v1850_v62  ;;  %v1454_v32 = vcombine.low %v1158_v22, %v1159_v21 }
 0x2ff   : > { %v980_v35 = vsel %vm449_vm5, %v960_v39, -inf  ;;  %v961_v41 = vadd.f32 %v953_v33, %v1850_v62 }
 0x300   : > { %981 = vmax.xlane.f32.xlu1 %v980_v35  ;;  %978 = vmax.xlane.f32.xlu0 %v977_v37 }
 0x301   : > { %v983_v38 = vsel %vm449_vm5, %v961_v41, -inf }
 0x304   : > { %984 = vmax.xlane.f32.xlu0 %v983_v38 }
 0x311   : > { %1210 = vrot.lane.b32.xlu1 %v1779_v10, %s1721_s21 }
 0x31a   : > { %1208 = vrot.lane.b32.xlu0 %v1777_v9, %s1721_s21 }
 0x380   : > { %v964_v46 = vpop.xlane.xlu0 %963 }
 0x381   : > { %v986_v48 = vsub.f32 %v954_v56, %v964_v46 }
 0x382   : > { %v967_v50 = vpop.xlane.xlu1 %966 }
 0x383   : > { %v994_v52 = vmul.f32 1.442695, %v986_v48  ;;  %v987_v54 = vsub.f32 %v955_v61, %v967_v50 }
 0x385   : > { %1660 = vpow2.f32 %v994_v52  ;;  %v996_v62 = vmul.f32 1.442695, %v987_v54  ;;  %v970_v55 = vpop.xlane.xlu0 %969  ;;  %v498_v52 = vsel %vm449_vm5, %v1908_v49, 0.0  ;;  %v507_v49 = vsel %vm449_vm5, %v1923_v59, 0.0 }
 0x386   : > { %v988_v6 = vsub.f32 %v956_v23, %v970_v55  ;;  %v501_v55 = vsel %vm449_vm5, %v1910_v53, 0.0  ;;  %v519_v53 = vsel %vm449_vm5, %v1939_v17, 0.0 }
 0x387   : > { %1662 = vpow2.f32 %v996_v62 }
 0x388   : > { %v998_v7 = vmul.f32 1.442695, %v988_v6  ;;  %v976_v57 = vpop.xlane.xlu1 %975  ;;  %v510_v6 = vsel %vm449_vm5, %v1927_v63, 0.0 }
 0x389   : > { %v990_v60 = vsub.f32 %v958_v31, %v976_v57  ;;  %v973_v13 = vpop.xlane.xlu0 %972 }
 0x38a   : > { %1664 = vpow2.f32 %v998_v7  ;;  %v989_v10 = vsub.f32 %v957_v28, %v973_v13  ;;  %v516_v7 = vsel %vm449_vm5, %v1937_v16, 0.0 }
 0x38b   : > { %v1002_v15 = vmul.f32 1.442695, %v990_v60 }
 0x38c   : > { %v1000_v9 = vmul.f32 1.442695, %v989_v10 }
 0x38d   : > { %1666 = vpow2.f32 %v1002_v15  ;;  %v982_v18 = vpop.xlane.xlu1 %981  ;;  %v979_v19 = vpop.xlane.xlu0 %978 }
 0x38e   : > { %1668 = vpow2.f32 %v1000_v9  ;;  %v992_v56 = vsub.f32 %v960_v39, %v982_v18  ;;  %v991_v20 = vsub.f32 %v959_v12, %v979_v19 }
 0x38f   : > { %v1661_v61 = vpop.eup %1660 }
 0x390   : > { %v1006_v24 = vmul.f32 1.442695, %v992_v56  ;;  %v1004_v23 = vmul.f32 1.442695, %v991_v20  ;;  %v1010_v25 = vsel %vm449_vm5, %v1661_v61, 0.0 }
 0x391   : > { %v1663_v26 = vpop.eup %1662  ;;  %v985_v27 = vpop.xlane.xlu0 %984  ;;  %1011 = vadd.xlane.f32.xlu0 %v1010_v25 }
 0x392   : > { %v1211_v29 = vpop.permute.xlu1 %1210  ;;  %1670 = vpow2.f32 %v1006_v24  ;;  %v993_v28 = vsub.f32 %v961_v41, %v985_v27  ;;  %v1013_v30 = vsel %vm449_vm5, %v1663_v26, 0.0  ;;  %v1042_v31 = vpack.c.bf16 %v1663_v26, %v1661_v61 }
 0x393   : > { %1672 = vpow2.f32 %v1004_v23  ;;  %1014 = vadd.xlane.f32.xlu1 %v1013_v30  ;;  %v1213_v11 = vrot.slane %v1211_v29, 4 }
 0x394   : > { %v1665_v4 = vpop.eup %1664  ;;  %v1008_v1 = vmul.f32 1.442695, %v993_v28  ;;  %1585 = vmatmul.mubr.msk.bf16.vlgmr.msra.gmra.mrb[24].mxu0 %vm449_vm5, %v1042_v31 }
 0x395   : > { %1595 = vmatpush3.bf16.msra.mxu0 %v1454_v32  ;;  %v1016_v8 = vsel %vm449_vm5, %v1665_v4, 0.0  ;;  %v1209_v12 = vpop.permute.xlu0 %1208  ;;  %1596 = vmatprep.mubr.msk.bf16.mxu0 %vm1717_vm0, %v1716_v0 }
 0x396   : > { %1674 = vpow2.f32 %v1008_v1  ;;  %1017 = vadd.xlane.f32.xlu0 %v1016_v8  ;;  %v1212_v3 = vrot.slane %v1209_v12, 4 }
 0x397   : > { %v1667_v33 = vpop.eup %1666 }
 0x398   : > { %v1669_v2 = vpop.eup %1668  ;;  %v1456_v39 = vcombine.low %v1212_v3, %v1213_v11  ;;  %v1022_v35 = vsel %vm449_vm5, %v1667_v33, 0.0 }
 0x399   : > { %1023 = vadd.xlane.f32.xlu1 %v1022_v35  ;;  %v1019_v37 = vsel %vm449_vm5, %v1669_v2, 0.0  ;;  %v1043_v41 = vpack.c.bf16 %v1669_v2, %v1665_v4 }
 0x39a   : > { %1020 = vadd.xlane.f32.xlu0 %v1019_v37 }
 0x39b   : > { %1591 = vmatmul.mubr.msk.bf16.vlgmr.msra.gmra.mrb[24].mxu1 %vm449_vm5, %v1043_v41 }
 0x39c   : > { %v1671_v38 = vpop.eup %1670  ;;  %1601 = vmatpush3.bf16.msra.mxu1 %v1456_v39  ;;  %1602 = vmatprep.mubr.msk.bf16.mxu1 %vm1717_vm0, %v1716_v0  ;;  %v504_v0 = vsel %vm449_vm5, %v1921_v58, 0.0  ;;  %v513_v58 = vsel %vm449_vm5, %v1930_v14, 0.0 }
 0x39d   : > { %v1673_v51 = vpop.eup %1672  ;;  %v1028_v44 = vsel %vm449_vm5, %v1671_v38, 0.0 }
 0x39e   : > { %1029 = vadd.xlane.f32.xlu1 %v1028_v44  ;;  %v1025_v46 = vsel %vm449_vm5, %v1673_v51, 0.0  ;;  %v1044_v48 = vpack.c.bf16 %v1673_v51, %v1667_v33 }
 0x39f   : > { %1026 = vadd.xlane.f32.xlu0 %v1025_v46 }
 0x3a0   : > { %v1675_v50 = vpop.eup %1674  ;;  %1597 = vmatmul.mubr.msk.bf16.vlgmr.msra.gmra.mrb[28].mxu0 %vm449_vm5, %v1044_v48 }
 0x3a1   : > { %v1031_v54 = vsel %vm449_vm5, %v1675_v50, 0.0  ;;  %v1045_v62 = vpack.c.bf16 %v1675_v50, %v1671_v38 }
 0x3a2   : > { %499 = vadd.xlane.f32.xlu1 %v498_v52 }
 0x3a3   : > { %1032 = vadd.xlane.f32.xlu0 %v1031_v54  ;;  %1603 = vmatmul.mubr.msk.bf16.vlgmr.msra.gmra.mrb[28].mxu1 %vm449_vm5, %v1045_v62 }
 0x3a6   : > { %505 = vadd.xlane.f32.xlu1 %v504_v0 }
 0x3a7   : > { %502 = vadd.xlane.f32.xlu0 %v501_v55 }
 0x3aa   : > { %511 = vadd.xlane.f32.xlu1 %v510_v6 }
 0x3ab   : > { %508 = vadd.xlane.f32.xlu0 %v507_v49 }
 0x3ae   : > { %517 = vadd.xlane.f32.xlu1 %v516_v7 }
 0x3af   : > { %514 = vadd.xlane.f32.xlu0 %v513_v58 }
 0x3b3   : > { %520 = vadd.xlane.f32.xlu0 %v519_v53 }
 0x41e   : > { %v1012_v57 = vpop.xlane.xlu0 %1011 }
 0x41f   : > { %1676 = vrcp.f32 %v1012_v57 }
 0x420   : > { %v1015_v63 = vpop.xlane.xlu1 %1014 }
 0x421   : > { %1678 = vrcp.f32 %v1015_v63 }
 0x423   : > { %v1018_v60 = vpop.xlane.xlu0 %1017 }
 0x424   : > { %1680 = vrcp.f32 %v1018_v60 }
 0x426   : > { %v1024_v59 = vpop.xlane.xlu1 %1023 }
 0x427   : > { %v1021_v13 = vpop.xlane.xlu0 %1020 }
 0x428   : > { %1682 = vrcp.f32 %v1021_v13 }
 0x429   : > { %v1677_v15 = vpop.eup %1676  ;;  %1684 = vrcp.f32 %v1024_v59 }
 0x42b   : > { %v1679_v18 = vpop.eup %1678  ;;  %v1030_v19 = vpop.xlane.xlu1 %1029 }
 0x42c   : > { %v1027_v10 = vpop.xlane.xlu0 %1026 }
 0x42d   : > { %1686 = vrcp.f32 %v1027_v10 }
 0x42e   : > { %1688 = vrcp.f32 %v1030_v19  ;;  %v1681_v24 = vpop.eup %1680 }
 0x42f   : > { %v500_v48 = vpop.xlane.xlu1 %499 }
 0x430   : > { %v1033_v61 = vpop.xlane.xlu0 %1032 }
 0x431   : > { %1690 = vrcp.f32 %v1033_v61 }
 0x432   : > { %v1683_v25 = vpop.eup %1682  ;;  %1692 = vrcp.f32 %v500_v48 }
 0x433   : > { %v1685_v32 = vpop.eup %1684  ;;  %v506_v52 = vpop.xlane.xlu1 %505 }
 0x434   : > { %v503_v50 = vpop.xlane.xlu0 %502 }
 0x435   : > { %1694 = vrcp.f32 %v503_v50 }
 0x436   : > { %1696 = vrcp.f32 %v506_v52 }
 0x437   : > { %v1687_v1 = vpop.eup %1686  ;;  %v512_v62 = vpop.xlane.xlu1 %511 }
 0x438   : > { %v1689_v2 = vpop.eup %1688  ;;  %v509_v54 = vpop.xlane.xlu0 %508 }
 0x439   : > { %1698 = vrcp.f32 %v509_v54 }
 0x43a   : > { %1700 = vrcp.f32 %v512_v62 }
 0x43b   : > { %v1691_v35 = vpop.eup %1690  ;;  %v518_v55 = vpop.xlane.xlu1 %517 }
 0x43c   : > { %v515_v0 = vpop.xlane.xlu0 %514  ;;  %v1693_v6 = vpop.eup %1692 }
 0x43d   : > { %1702 = vrcp.f32 %v515_v0  ;;  %v734_v53 = vmul.f32 %v1693_v6, %v1971_v34 }
 0x43e   : > { %1704 = vrcp.f32 %v518_v55 }
 0x43f   : > { %v1695_v49 = vpop.eup %1694 }
 0x440   : > { %v521_v58 = vpop.xlane.xlu0 %520  ;;  %v735_v63 = vmul.f32 %v1695_v49, %v1973_v5  ;;  %v1697_v10 = vpop.eup %1696 }
 0x441   : > { %1706 = vrcp.f32 %v521_v58 }
 0x467   : > { %v1093_v16 = vpop.f32.mrb[24].mxu0 }
 0x468   : > { %v1586_v9 = vpop.f32.mrb[25].mxu0  ;;  %v1262_v56 = vmul.f32 %v1677_v15, %v1093_v16  ;;  %v1699_v15 = vpop.eup %1698 }
 0x469   : > { %v1096_v14 = vpop.f32.mrb[26].mxu0  ;;  %v736_v9 = vmul.f32 %v1697_v10, %v1975_v36 }
 0x46a   : > { %v1263_v17 = vmul.f32 %v1679_v18, %v1096_v14  ;;  %v1587_v20 = vpop.f32.mrb[27].mxu0  ;;  %v737_v18 = vmul.f32 %v1699_v15, %v1977_v40 }
 0x46c   : > { %v1620_v21 = vpack.i.bf16 %v1263_v17, %v1262_v56  ;;  %v1701_v56 = vpop.eup %1700 }
 0x46d   : > { %v1703_v17 = vpop.eup %1702  ;;  %v738_v36 = vmul.f32 %v1701_v56, %v1979_v42 }
 0x46e   : > { %v1147_v22 = vpop.f32.mrb[24].mxu1  ;;  %1621 = vrot.lane.b32.xlu1 %v1620_v21, %s1719_s17 }
 0x46f   : > { %v1592_v23 = vpop.f32.mrb[25].mxu1  ;;  %v1264_v27 = vmul.f32 %v1681_v24, %v1147_v22 }
 0x470   : > { %v1150_v26 = vpop.f32.mrb[26].mxu1  ;;  %v1705_v23 = vpop.eup %1704 }
 0x471   : > { %v1265_v29 = vmul.f32 %v1683_v25, %v1150_v26  ;;  %v1593_v28 = vpop.f32.mrb[27].mxu1  ;;  %v739_v26 = vmul.f32 %v1703_v17, %v1981_v43 }
 0x473   : > { %v1625_v30 = vpack.i.bf16 %v1265_v29, %v1264_v27  ;;  %v1201_v31 = vpop.f32.mrb[28].mxu0  ;;  %v1707_v27 = vpop.eup %1706 }
 0x474   : > { %v1598_v4 = vpop.f32.mrb[29].mxu0  ;;  %v1266_v8 = vmul.f32 %v1685_v32, %v1201_v31  ;;  %v741_v42 = vmul.f32 %v1707_v27, %v1985_v47 }
 0x475   : > { %v1204_v11 = vpop.f32.mrb[30].mxu0  ;;  %1626 = vrot.lane.b32.xlu0 %v1625_v30, %s1719_s17  ;;  %v740_v4 = vmul.f32 %v1705_v23, %v1983_v45 }
 0x476   : > { %v1267_v12 = vmul.f32 %v1687_v1, %v1204_v11  ;;  %v1599_v3 = vpop.f32.mrb[31].mxu0  ;;  %v1255_v33 = vpop.f32.mrb[28].mxu1 }
 0x477   : > { %v1604_v39 = vpop.f32.mrb[29].mxu1  ;;  %v1268_v38 = vmul.f32 %v1689_v2, %v1255_v33 }
 0x478   : > { %v1630_v37 = vpack.i.bf16 %v1267_v12, %v1266_v8  ;;  %v1258_v41 = vpop.f32.mrb[30].mxu1 }
 0x479   : > { %v1269_v51 = vmul.f32 %v1691_v35, %v1258_v41  ;;  %v1605_v44 = vpop.f32.mrb[31].mxu1 }
 0x47a   : > { %1631 = vrot.lane.b32.xlu1 %v1630_v37, %s1719_s17 }
 0x47b   : > { %v1635_v46 = vpack.i.bf16 %v1269_v51, %v1268_v38 }
 0x47e   : > { %1636 = vrot.lane.b32.xlu1 %v1635_v46, %s1719_s17 }
 0x4e0   : > { %v1622_v7 = vpop.permute.xlu1 %1621 }
 0x4e1   : > { %v1624_v57 = vunpack.i.h.bf16 %v1622_v7  ;;  %v1623_v60 = vunpack.i.l.bf16 %v1622_v7 }
 0x4e3   : > { %v1302_v13 = vsel %vm199_vm1, %v734_v53, %v1623_v60  ;;  %v1303_v59 = vsel %vm199_vm1, %v735_v63, %v1624_v57 }
 0x4e4   : > { %v1470_v34 = vpack.c.bf16 %v1302_v13, %v1302_v13  ;;  %v1471_v16 = vpack.c.bf16 %v1303_v59, %v1303_v59 }
 0x4e6   : > { %1343 = vst.msk [vmem:[%s2049_s25] sm:$0xf] %vm1342_vm7, %v1470_v34  ;;  %1344 = vst.msk [vmem:[%s2049_s25 + $0x4] sm:$0xf] %vm1342_vm7, %v1471_v16 }
 0x4e7   : > { %v1627_v5 = vpop.permute.xlu0 %1626 }
 0x4e8   : > { %v1629_v14 = vunpack.i.h.bf16 %v1627_v5  ;;  %v1628_v19 = vunpack.i.l.bf16 %v1627_v5 }
 0x4ea   : > { %v1305_v20 = vsel %vm199_vm1, %v737_v18, %v1629_v14  ;;  %v1304_v61 = vsel %vm199_vm1, %v736_v9, %v1628_v19 }
 0x4eb   : > { %v1473_v21 = vpack.c.bf16 %v1305_v20, %v1305_v20  ;;  %v1472_v22 = vpack.c.bf16 %v1304_v61, %v1304_v61 }
 0x4ec   : > { %v1632_v24 = vpop.permute.xlu1 %1631 }
 0x4ed   : > { %1346 = vst.msk [vmem:[%s2049_s25 + $0xc] sm:$0xf] %vm1342_vm7, %v1473_v21  ;;  %1345 = vst.msk [vmem:[%s2049_s25 + $0x8] sm:$0xf] %vm1342_vm7, %v1472_v22  ;;  %v1634_v40 = vunpack.i.h.bf16 %v1632_v24  ;;  %v1633_v25 = vunpack.i.l.bf16 %v1632_v24 }
 0x4ef   : > { %v1306_v29 = vsel %vm199_vm1, %v738_v36, %v1633_v25  ;;  %v1307_v28 = vsel %vm199_vm1, %v739_v26, %v1634_v40 }
 0x4f0   : > { %v1474_v30 = vpack.c.bf16 %v1306_v29, %v1306_v29  ;;  %v1475_v31 = vpack.c.bf16 %v1307_v28, %v1307_v28  ;;  %v1637_v32 = vpop.permute.xlu1 %1636 }
 0x4f1   : > { %v1639_v1 = vunpack.i.h.bf16 %v1637_v32  ;;  %v1638_v11 = vunpack.i.l.bf16 %v1637_v32 }
 0x4f2   : > { %1347 = vst.msk [vmem:[%s2049_s25 + $0x10] sm:$0xf] %vm1342_vm7, %v1474_v30  ;;  %1348 = vst.msk [vmem:[%s2049_s25 + $0x14] sm:$0xf] %vm1342_vm7, %v1475_v31 }
 0x4f3   : > { %v1308_v43 = vsel %vm199_vm1, %v740_v4, %v1638_v11  ;;  %v1309_v8 = vsel %vm199_vm1, %v741_v42, %v1639_v1 }
 0x4f4   : > { %v1476_v12 = vpack.c.bf16 %v1308_v43, %v1308_v43  ;;  %v1477_v3 = vpack.c.bf16 %v1309_v8, %v1309_v8 }
 0x4f6   : > { %1349 = vst.msk [vmem:[%s2049_s25 + $0x18] sm:$0xf] %vm1342_vm7, %v1476_v12  ;;  %1350 = vst.msk [vmem:[%s2049_s25 + $0x1c] sm:$0xf] %vm1342_vm7, %v1477_v3 }
 0x4f7 PF: > { %s12_s9 = sadd.s32 1, %s1714_s9  }
 0x4f8   : > { %p9_p4 = scmp.ge.s32.totalorder %s12_s9, 4  }
 0x4fa   :  { %11 = sbr.rel (!%p9_p4) target bundleno = 1 (0x1), region = 61 }

// kernel: fwd.16
= control target key start
LH: loop header
LB: loop body
LE: loop exit
PB: predicated region body
PF: predicated region fallthrough
CT: control target
= control target key end

     0   :  { %s808_s15 = smov 0   ;;  %s915_s0 = inlined_call_operand.vmem [shape: bf16[128,256], index: 0, kind: input, shape index: {}]   ;;  %s916_s1 = inlined_call_operand.vmem [shape: bf16[256,64], index: 1, kind: input, shape index: {}]   ;;  %s917_s2 = inlined_call_operand.vmem [shape: f32[1,64], index: 2, kind: input, shape index: {}]   ;;  %s918_s3 = inlined_call_operand.vmem [shape: bf16[128,64], index: 3, kind: input, shape index: {}]   ;;  %s919_s4 = inlined_call_operand.vmem [shape: bf16[128,64], index: 4, kind: output, shape index: {}]  }
   0x1 LB: > { %s608_s16 = sadd.s32 4294967295, %s781_s15   ;;  %p612_p0 = scmp.ge.s32.totalorder %s781_s15, 1  ;;  %s781_s15 = sphi %s808_s15, %s14_s15  }
   0x2   : > { %p175_p1 = scmp.lt.s32.totalorder %s781_s15, 3 }
   0x4   : > { %p176_p2 = pnand %p612_p0, %p175_p1 }
   0x5   : > { %v747_v0 = vld [vmem:[%s916_s1 + $0x40] sm:$0xff] (!%p176_p2)   ;;  %s613_s19 = sshll.u32 (!%p176_p2), %s608_s16, 3  ;;  %v749_v2 = vld [vmem:[%s916_s1 + $0x48] sm:$0xff] (!%p176_p2)   ;;  %v751_v4 = vld [vmem:[%s916_s1 + $0x50] sm:$0xff] (!%p176_p2)   ;;  %vm531_vm0 = vcmask (!%p176_p2), 519168  }
   0x6   : > { %179 = sbr.rel (%p176_p2) target bundleno = 270 (0x10e), region = 36  ;;  %v748_v1 = vld [vmem:[%s916_s1] sm:$0xff] (!%p176_p2)   ;;  %683 = vmatprep.subr.bf16.mxu0 (!%p176_p2), %v747_v0  ;;  %723 = vmatprep.subr.bf16.mxu1 (!%p176_p2), %v747_v0  ;;  %v750_v3 = vld [vmem:[%s916_s1 + $0x8] sm:$0xff] (!%p176_p2)   ;;  %p208_p3 = scmp.lt.s32.totalorder (!%p176_p2), %s613_s19, 15  ;;  %v752_v5 = vld [vmem:[%s916_s1 + $0x10] sm:$0xff] (!%p176_p2)  }
   0x7   : > { %684 = vmatpush3.bf16.msra.mxu0 (!%p176_p2), %v748_v1  ;;  %731 = vmatpush3.bf16.msra.mxu1 (!%p176_p2), %v748_v1  ;;  %v753_v6 = vld [vmem:[%s916_s1 + $0x58] sm:$0xff] (!%p176_p2)   ;;  %v755_v8 = vld [vmem:[%s916_s1 + $0x60] sm:$0xff] (!%p176_p2)   ;;  %v757_v10 = vld [vmem:[%s916_s1 + $0x68] sm:$0xff] (!%p176_p2)  }
   0x8   : > { %685 = vmatprep.subr.bf16.mxu0 (!%p176_p2), %v749_v2  ;;  %724 = vmatprep.subr.bf16.mxu1 (!%p176_p2), %v749_v2  ;;  %v754_v7 = vld [vmem:[%s916_s1 + $0x18] sm:$0xff] (!%p176_p2)   ;;  %v756_v9 = vld [vmem:[%s916_s1 + $0x20] sm:$0xff] (!%p176_p2)   ;;  %v758_v13 = vld [vmem:[%s916_s1 + $0x28] sm:$0xff] (!%p176_p2)  }
   0x9   : > { %v759_v14 = vld [vmem:[%s916_s1 + $0x70] sm:$0xff] (!%p176_p2)   ;;  %v761_v16 = vld [vmem:[%s916_s1 + $0x78] sm:$0xff] (!%p176_p2)   ;;  %v620_v28 = vld [vmem:[%s917_s2] ss:$0 sm:$0xff] (!%p176_p2) }
   0xa   : > { %v760_v15 = vld [vmem:[%s916_s1 + $0x30] sm:$0xff] (!%p176_p2)   ;;  %v762_v17 = vld [vmem:[%s916_s1 + $0x38] sm:$0xff] (!%p176_p2)  }
   0xb   : > { %686 = vmatpush3.bf16.msra.mxu0 (!%p176_p2), %v750_v3  ;;  %732 = vmatpush3.bf16.msra.mxu1 (!%p176_p2), %v750_v3 }
   0xc   : > { %687 = vmatprep.subr.bf16.mxu0 (!%p176_p2), %v751_v4  ;;  %725 = vmatprep.subr.bf16.mxu1 (!%p176_p2), %v751_v4 }
   0xd   : > { %s921_s19 = smov (!%p208_p3, %s613_s19), 15 }
   0xe   : > { %s655_s8 = sshll.u32 %s921_s19, 3  ;;  %s617_s30 = sshll.u32 %s921_s19, 2 }
   0xf   : > { %688 = vmatpush3.bf16.msra.mxu0 %v752_v5  ;;  %733 = vmatpush3.bf16.msra.mxu1 %v752_v5  ;;  %s849_s13 = scalar_lea.vmem %s915_s0, %s655_s8  ;;  %s218_s7 = scalar_lea.vmem %s918_s3, %s617_s30 }
  0x10   : > { %689 = vmatprep.subr.bf16.mxu0 %v753_v6  ;;  %726 = vmatprep.subr.bf16.mxu1 %v753_v6  ;;  %v765_v11 = vld [vmem:[%s849_s13 + $0x4] ss:$8 sps:$4 sm:$0xff]   ;;  %v763_v18 = vld [vmem:[%s849_s13] ss:$8 sps:$4 sm:$0xff]   ;;  %v769_v20 = vld [vmem:[%s849_s13 + $0x14] ss:$8 sps:$4 sm:$0xff]   ;;  %s894_s12 = scalar_lea.vmem %s919_s4, %s617_s30 }
  0x11   : > { %v768_v12 = vld [vmem:[%s849_s13 + $0x24] ss:$8 sps:$4 sm:$0xff]   ;;  %442 = vmatprep.mubr.bf16.mxu0 %v765_v11  ;;  %v766_v19 = vld [vmem:[%s849_s13 + $0x20] ss:$8 sps:$4 sm:$0xff]   ;;  %v771_v21 = vld [vmem:[%s849_s13 + $0x34] ss:$8 sps:$4 sm:$0xff]  }
  0x12   : > { %458 = vmatprep.mubr.bf16.mxu1 %v768_v12  ;;  %v773_v22 = vld [vmem:[%s849_s13 + $0x10] ss:$8 sps:$4 sm:$0xff]   ;;  %v665_v24 = vld [vmem:[%s218_s7] sm:$0xff]   ;;  %v680_v49 = vld [vmem:[%s218_s7 + $0x8] sm:$0xff]  }
  0x13   : > { %690 = vmatpush3.bf16.msra.mxu0 %v754_v7  ;;  %734 = vmatpush3.bf16.msra.mxu1 %v754_v7  ;;  %v774_v23 = vld [vmem:[%s849_s13 + $0x30] ss:$8 sps:$4 sm:$0xff]   ;;  %v666_v32 = vunpack.c.l.bf16 %v665_v24  ;;  %v667_v38 = vunpack.c.h.bf16 %v665_v24  ;;  %v670_v58 = vunpack.c.l.bf16 %v680_v49  ;;  %v671_v4 = vunpack.c.h.bf16 %v680_v49 }
  0x14   : > { %691 = vmatprep.subr.bf16.mxu0 %v755_v8  ;;  %727 = vmatprep.subr.bf16.mxu1 %v755_v8  ;;  %v681_v25 = vld [vmem:[%s218_s7 + $0x10] sm:$0xff]   ;;  %v682_v50 = vld [vmem:[%s218_s7 + $0x18] sm:$0xff]  }
  0x15   : > { %v674_v34 = vunpack.c.l.bf16 %v681_v25  ;;  %v675_v40 = vunpack.c.h.bf16 %v681_v25  ;;  %v678_v60 = vunpack.c.l.bf16 %v682_v50  ;;  %v679_v6 = vunpack.c.h.bf16 %v682_v50 }
  0x17   : > { %692 = vmatpush3.bf16.msra.mxu0 %v756_v9  ;;  %735 = vmatpush3.bf16.msra.mxu1 %v756_v9 }
  0x18   : > { %693 = vmatprep.subr.bf16.mxu0 %v757_v10  ;;  %728 = vmatprep.subr.bf16.mxu1 %v757_v10 }
  0x1b   : > { %694 = vmatpush3.bf16.msra.mxu0 %v758_v13  ;;  %736 = vmatpush3.bf16.msra.mxu1 %v758_v13 }
  0x1c   : > { %695 = vmatprep.subr.bf16.mxu0 %v759_v14  ;;  %729 = vmatprep.subr.bf16.mxu1 %v759_v14 }
  0x1f   : > { %696 = vmatpush3.bf16.msra.mxu0 %v760_v15  ;;  %737 = vmatpush3.bf16.msra.mxu1 %v760_v15 }
  0x20   : > { %697 = vmatprep.subr.bf16.mxu0 %v761_v16  ;;  %730 = vmatprep.subr.bf16.mxu1 %v761_v16 }
  0x23   : > { %698 = vmatpush3.bf16.msra.mxu0 %v762_v17  ;;  %738 = vmatpush3.bf16.msra.mxu1 %v762_v17 }
  0x26   : > { %443 = vmatmul.mubr.bf16.vlgmr.msra.gmra.mrb[0].mxu0 %v763_v18  ;;  %459 = vmatmul.mubr.bf16.vlgmr.msra.gmra.mrb[0].mxu1 %v766_v19 }
  0x27   : > { %450 = vmatprep.mubr.bf16.mxu0 %v769_v20  ;;  %466 = vmatprep.mubr.bf16.mxu1 %v771_v21 }
  0x2e   : > { %451 = vmatmul.mubr.bf16.gmra.mrb[4].mxu0 %v773_v22  ;;  %467 = vmatmul.mubr.bf16.gmra.mrb[4].mxu1 %v774_v23 }
  0xf9   : > { %v699_v26 = vpop.f32.mrb[0].mxu0  ;;  %v711_v27 = vpop.f32.mrb[0].mxu1 }
  0xfa   : > { %v700_v29 = vpop.f32.mrb[1].mxu0  ;;  %v712_v30 = vpop.f32.mrb[1].mxu1 }
  0xfb   : > { %v701_v31 = vadd.f32 %v700_v29, %v699_v26  ;;  %v713_v33 = vadd.f32 %v712_v30, %v711_v27  ;;  %v702_v35 = vpop.f32.mrb[2].mxu0  ;;  %v714_v36 = vpop.f32.mrb[2].mxu1 }
  0xfc   : > { %v703_v37 = vpop.f32.mrb[3].mxu0  ;;  %v715_v39 = vpop.f32.mrb[3].mxu1 }
  0xfd   : > { %v445_v41 = vadd.f32 %v701_v31, %v620_v28  ;;  %v461_v42 = vadd.f32 %v713_v33, %v620_v28  ;;  %v704_v43 = vadd.f32 %v703_v37, %v702_v35  ;;  %v716_v44 = vadd.f32 %v715_v39, %v714_v36 }
  0xff   : > { %v491_v45 = vadd.f32 %v666_v32, %v445_v41  ;;  %v495_v46 = vadd.f32 %v674_v34, %v461_v42  ;;  %v448_v47 = vadd.f32 %v704_v43, %v620_v28  ;;  %v464_v48 = vadd.f32 %v716_v44, %v620_v28 }
 0x101   : > { %v656_v51 = vpack.c.bf16 %v491_v45, %v491_v45  ;;  %v660_v52 = vpack.c.bf16 %v495_v46, %v495_v46  ;;  %v492_v53 = vadd.f32 %v667_v38, %v448_v47  ;;  %v496_v54 = vadd.f32 %v675_v40, %v464_v48  ;;  %v705_v55 = vpop.f32.mrb[4].mxu0  ;;  %v717_v56 = vpop.f32.mrb[4].mxu1 }
 0x102   : > { %v706_v57 = vpop.f32.mrb[5].mxu0  ;;  %v718_v59 = vpop.f32.mrb[5].mxu1 }
 0x103   : > { %532 = vst.msk [vmem:[%s894_s12] sm:$0xf] %vm531_vm0, %v656_v51  ;;  %536 = vst.msk [vmem:[%s894_s12 + $0x10] sm:$0xf] %vm531_vm0, %v660_v52  ;;  %v657_v61 = vpack.c.bf16 %v492_v53, %v492_v53  ;;  %v661_v62 = vpack.c.bf16 %v496_v54, %v496_v54  ;;  %v707_v63 = vadd.f32 %v706_v57, %v705_v55  ;;  %v708_v1 = vpop.f32.mrb[6].mxu0  ;;  %v720_v2 = vpop.f32.mrb[6].mxu1 }
 0x104   : > { %v719_v0 = vadd.f32 %v718_v59, %v717_v56  ;;  %v709_v3 = vpop.f32.mrb[7].mxu0  ;;  %v721_v5 = vpop.f32.mrb[7].mxu1 }
 0x105   : > { %533 = vst.msk [vmem:[%s894_s12 + $0x4] sm:$0xf] %vm531_vm0, %v657_v61  ;;  %537 = vst.msk [vmem:[%s894_s12 + $0x14] sm:$0xf] %vm531_vm0, %v661_v62  ;;  %v453_v7 = vadd.f32 %v707_v63, %v620_v28  ;;  %v710_v9 = vadd.f32 %v709_v3, %v708_v1  ;;  %v722_v10 = vadd.f32 %v721_v5, %v720_v2 }
 0x106   : > { %v469_v8 = vadd.f32 %v719_v0, %v620_v28 }
 0x107   : > { %v493_v11 = vadd.f32 %v670_v58, %v453_v7  ;;  %v456_v13 = vadd.f32 %v710_v9, %v620_v28  ;;  %v472_v14 = vadd.f32 %v722_v10, %v620_v28 }
 0x108   : > { %v497_v12 = vadd.f32 %v678_v60, %v469_v8 }
 0x109   : > { %v658_v15 = vpack.c.bf16 %v493_v11, %v493_v11  ;;  %v494_v17 = vadd.f32 %v671_v4, %v456_v13  ;;  %v498_v18 = vadd.f32 %v679_v6, %v472_v14 }
 0x10a   : > { %v662_v16 = vpack.c.bf16 %v497_v12, %v497_v12 }
 0x10b   : > { %534 = vst.msk [vmem:[%s894_s12 + $0x8] sm:$0xf] %vm531_vm0, %v658_v15  ;;  %v659_v19 = vpack.c.bf16 %v494_v17, %v494_v17  ;;  %v663_v20 = vpack.c.bf16 %v498_v18, %v498_v18 }
 0x10c   : > { %538 = vst.msk [vmem:[%s894_s12 + $0x18] sm:$0xf] %vm531_vm0, %v662_v16 }
 0x10d   : > { %535 = vst.msk [vmem:[%s894_s12 + $0xc] sm:$0xf] %vm531_vm0, %v659_v19  ;;  %539 = vst.msk [vmem:[%s894_s12 + $0x1c] sm:$0xf] %vm531_vm0, %v663_v20 }
 0x10e PF: > { %s14_s15 = sadd.s32 1, %s781_s15  }
 0x10f   : > { %p11_p4 = scmp.ge.s32.totalorder %s14_s15, 4  }
 0x111   :  { %13 = sbr.rel (!%p11_p4) target bundleno = 1 (0x1), region = 69 }

// kernel: fwd.17
= control target key start
LH: loop header
LB: loop body
LE: loop exit
PB: predicated region body
PF: predicated region fallthrough
CT: control target
= control target key end

     0   :  { %s533_s12 = smov 0   ;;  %s584_s0 = inlined_call_operand.vmem [shape: bf16[128,64], index: 0, kind: input, shape index: {}]   ;;  %s585_s1 = inlined_call_operand.vmem [shape: bf16[64,16], index: 1, kind: input, shape index: {}]   ;;  %s586_s2 = inlined_call_operand.vmem [shape: f32[1,16], index: 2, kind: input, shape index: {}]   ;;  %s587_s3 = inlined_call_operand.vmem [shape: bf16[128,16], index: 3, kind: output, shape index: {}]  }
   0x1 LB: > { %s417_s13 = sadd.s32 4294967295, %s511_s12   ;;  %p421_p0 = scmp.ge.s32.totalorder %s511_s12, 1  ;;  %s511_s12 = sphi %s533_s12, %s13_s12  }
   0x2   : > { %p138_p1 = scmp.lt.s32.totalorder %s511_s12, 3 }
   0x4   : > { %p139_p2 = pnand %p421_p0, %p138_p1 }
   0x5   : > { %v497_v0 = vld [vmem:[%s585_s1] sm:$0xff] (!%p139_p2)   ;;  %s422_s16 = sshll.u32 (!%p139_p2), %s417_s13, 3  ;;  %v498_v1 = vld [vmem:[%s585_s1 + $0x8] sm:$0xff] (!%p139_p2)   ;;  %v499_v2 = vld [vmem:[%s585_s1 + $0x10] sm:$0xff] (!%p139_p2)   ;;  %vm242_vm0 = vcmask (!%p139_p2), 523264   ;;  %vm352_vm1 = vcmask (!%p139_p2), 125952  }
   0x6   : > { %142 = sbr.rel (%p139_p2) target bundleno = 242 (0xf2), region = 32  ;;  %p163_p3 = scmp.lt.s32.totalorder (!%p139_p2), %s422_s16, 15  ;;  %465 = vmatprep.subr.bf16.mxu0 (!%p139_p2), %v497_v0  ;;  %481 = vmatprep.subr.bf16.mxu1 (!%p139_p2), %v497_v0  ;;  %v500_v3 = vld [vmem:[%s585_s1 + $0x18] sm:$0xff] (!%p139_p2)   ;;  %v426_v8 = vld [vmem:[%s586_s2] ss:$0 sm:$0xff] (!%p139_p2) }
   0x7   : > { %466 = vmatpush3.bf16.msra.mxu0 (!%p139_p2), %v497_v0  ;;  %485 = vmatpush3.bf16.msra.mxu1 (!%p139_p2), %v497_v0 }
   0x8   : > { %467 = vmatprep.subr.bf16.mxu0 (!%p139_p2), %v498_v1  ;;  %482 = vmatprep.subr.bf16.mxu1 (!%p139_p2), %v498_v1 }
   0xb   : > { %468 = vmatpush3.bf16.msra.mxu0 (!%p139_p2), %v498_v1  ;;  %486 = vmatpush3.bf16.msra.mxu1 (!%p139_p2), %v498_v1 }
   0xc   : > { %469 = vmatprep.subr.bf16.mxu0 (!%p139_p2), %v499_v2  ;;  %483 = vmatprep.subr.bf16.mxu1 (!%p139_p2), %v499_v2 }
   0xd   : > { %s589_s16 = smov (!%p163_p3, %s422_s16), 15 }
   0xe   : > { %s423_s21 = sshll.u32 %s589_s16, 2 }
   0xf   : > { %s166_s26 = scalar_lea.vmem %s584_s0, %s423_s21  ;;  %470 = vmatpush3.bf16.msra.mxu0 %v499_v2  ;;  %487 = vmatpush3.bf16.msra.mxu1 %v499_v2  ;;  %s172_s4 = scalar_lea.vmem %s587_s3, %s423_s21 }
  0x10   : > { %v501_v4 = vld [vmem:[%s166_s26] sm:$0xff]   ;;  %v502_v5 = vld [vmem:[%s166_s26 + $0x10] sm:$0xff]   ;;  %471 = vmatprep.subr.bf16.mxu0 %v500_v3  ;;  %484 = vmatprep.subr.bf16.mxu1 %v500_v3  ;;  %v503_v6 = vld [vmem:[%s166_s26 + $0x8] sm:$0xff]  }
  0x11   : > { %473 = vmatprep.mubr.msk.bf16.mxu0 %vm242_vm0, %v501_v4  ;;  %477 = vmatprep.mubr.msk.bf16.mxu1 %vm242_vm0, %v502_v5  ;;  %v504_v7 = vld [vmem:[%s166_s26 + $0x18] sm:$0xff]  }
  0x13   : > { %472 = vmatpush3.bf16.msra.mxu0 %v500_v3  ;;  %488 = vmatpush3.bf16.msra.mxu1 %v500_v3 }
  0x16   : > { %474 = vmatmul.mubr.msk.bf16.vlgmr.msra.gmra.mrb[0].mxu0 %vm242_vm0, %v503_v6  ;;  %478 = vmatmul.mubr.msk.bf16.vlgmr.msra.gmra.mrb[0].mxu1 %vm242_vm0, %v504_v7 }
  0xe9   : > { %v475_v9 = vpop.f32.mrb[0].mxu0  ;;  %v479_v10 = vpop.f32.mrb[0].mxu1 }
  0xea   : > { %v298_v11 = vadd.f32 %v475_v9, %v426_v8  ;;  %v314_v12 = vadd.f32 %v479_v10, %v426_v8  ;;  %v289_v13 = vpop.f32.mrb[1].mxu0  ;;  %v305_v14 = vpop.f32.mrb[1].mxu1 }
  0xeb   : > { %v290_v15 = vadd.f32 %v426_v8, %v289_v13  ;;  %v306_v16 = vadd.f32 %v426_v8, %v305_v14  ;;  %v476_v17 = vpop.f32.mrb[2].mxu0  ;;  %v480_v18 = vpop.f32.mrb[2].mxu1 }
  0xec   : > { %v451_v19 = vpack.c.bf16 %v298_v11, %v298_v11  ;;  %v455_v20 = vpack.c.bf16 %v314_v12, %v314_v12  ;;  %v301_v21 = vadd.f32 %v476_v17, %v426_v8  ;;  %v317_v22 = vadd.f32 %v480_v18, %v426_v8  ;;  %v292_v23 = vpop.f32.mrb[3].mxu0  ;;  %v308_v24 = vpop.f32.mrb[3].mxu1 }
  0xed   : > { %v449_v25 = vpack.c.bf16 %v290_v15, %v290_v15  ;;  %v453_v26 = vpack.c.bf16 %v306_v16, %v306_v16  ;;  %v293_v27 = vadd.f32 %v426_v8, %v292_v23  ;;  %v309_v28 = vadd.f32 %v426_v8, %v308_v24 }
  0xee   : > { %355 = vst.msk [vmem:[%s172_s4 + $0x8] sm:$0xf] %vm352_vm1, %v451_v19  ;;  %359 = vst.msk [vmem:[%s172_s4 + $0x18] sm:$0xf] %vm352_vm1, %v455_v20  ;;  %v452_v29 = vpack.c.bf16 %v301_v21, %v301_v21  ;;  %v456_v30 = vpack.c.bf16 %v317_v22, %v317_v22 }
  0xef   : > { %353 = vst.msk [vmem:[%s172_s4] sm:$0xf] %vm352_vm1, %v449_v25  ;;  %357 = vst.msk [vmem:[%s172_s4 + $0x10] sm:$0xf] %vm352_vm1, %v453_v26  ;;  %v450_v31 = vpack.c.bf16 %v293_v27, %v293_v27  ;;  %v454_v32 = vpack.c.bf16 %v309_v28, %v309_v28 }
  0xf0   : > { %356 = vst.msk [vmem:[%s172_s4 + $0xc] sm:$0xf] %vm352_vm1, %v452_v29  ;;  %360 = vst.msk [vmem:[%s172_s4 + $0x1c] sm:$0xf] %vm352_vm1, %v456_v30 }
  0xf1   : > { %354 = vst.msk [vmem:[%s172_s4 + $0x4] sm:$0xf] %vm352_vm1, %v450_v31  ;;  %358 = vst.msk [vmem:[%s172_s4 + $0x14] sm:$0xf] %vm352_vm1, %v454_v32 }
  0xf2 PF: > { %s13_s12 = sadd.s32 1, %s511_s12  }
  0xf3   : > { %p10_p4 = scmp.ge.s32.totalorder %s13_s12, 4  }
  0xf5   :  { %12 = sbr.rel (!%p10_p4) target bundleno = 1 (0x1), region = 62 }

// kernel: fwd.18
= control target key start
LH: loop header
LB: loop body
LE: loop exit
PB: predicated region body
PF: predicated region fallthrough
CT: control target
= control target key end

     0   :  { %s1599_s18 = smov 0   ;;  %s2256_s0 = inlined_call_operand.vmem [shape: bf16[512,32], index: 0, kind: input, shape index: {}]   ;;  %s2257_s1 = inlined_call_operand.vmem [shape: f32[1,32], index: 1, kind: input, shape index: {}]   ;;  %s2258_s2 = inlined_call_operand.vmem [shape: f32[1,32], index: 2, kind: input, shape index: {}]   ;;  %s2259_s3 = inlined_call_operand.vmem [shape: bf16[32,96], index: 3, kind: input, shape index: {}]   ;;  %s2260_s4 = inlined_call_operand.vmem [shape: f32[1,96], index: 4, kind: input, shape index: {}]   ;;  %s2261_s5 = inlined_call_operand.vmem [shape: bf16[512,96], index: 5, kind: output, shape index: {}]  }
   0x1 LB: > { %s1254_s19 = sadd.s32 4294967295, %s1567_s18   ;;  %p1258_p0 = scmp.ge.s32.totalorder %s1567_s18, 1  ;;  %s1567_s18 = sphi %s1599_s18, %s15_s18  }
   0x2   : > { %p188_p1 = scmp.lt.s32.totalorder %s1567_s18, 3 }
   0x4   : > { %p189_p2 = pnand %p1258_p0, %p188_p1 }
   0x5   : > { %s1259_s20 = sshll.u32 (!%p189_p2), %s1254_s19, 5  ;;  %vm293_vm0 = vcmask (!%p189_p2), 261120   ;;  %vm1165_vm1 = vcmask (!%p189_p2), 781312  }
   0x6   : > { %192 = sbr.rel (%p189_p2) target bundleno = 618 (0x26a), region = 40  ;;  %p217_p3 = scmp.lt.s32.totalorder (!%p189_p2), %s1259_s20, 63 }
   0xd   : > { %s2263_s20 = smov (!%p217_p3, %s1259_s20), 63 }
   0xe   : > { %s1260_s21 = sshll.u32 %s2263_s20, 2 }
   0xf   : > { %s1615_s24 = scalar_lea.vmem %s2256_s0, %s1260_s21  ;;  %s2156_s12 = scalar_lea.vmem %s2261_s5, %s1260_s21 }
  0x10   : > { %v1618_v0 = vld [vmem:[%s1615_s24] sm:$0xff]   ;;  %v1628_v6 = vld [vmem:[%s1615_s24 + $0x8] sm:$0xff]   ;;  %v1656_v18 = vld [vmem:[%s1615_s24 + $0x10] sm:$0xff]  }
  0x11   : > { %v1621_v1 = vld [vmem:[%s1615_s24 + $0x40] sm:$0xff]   ;;  %v1352_v2 = vunpack.c.l.bf16 %v1618_v0  ;;  %v1353_v4 = vunpack.c.h.bf16 %v1618_v0  ;;  %v1356_v11 = vunpack.c.l.bf16 %v1628_v6  ;;  %v1357_v12 = vunpack.c.h.bf16 %v1628_v6  ;;  %v1645_v13 = vld [vmem:[%s1615_s24 + $0x48] sm:$0xff]   ;;  %v1667_v23 = vld [vmem:[%s1615_s24 + $0x50] sm:$0xff]  }
  0x12   : > { %v1384_v3 = vunpack.c.l.bf16 %v1621_v1  ;;  %v1385_v5 = vunpack.c.h.bf16 %v1621_v1  ;;  %v1388_v16 = vunpack.c.l.bf16 %v1645_v13  ;;  %v1389_v17 = vunpack.c.h.bf16 %v1645_v13  ;;  %v1678_v28 = vld [vmem:[%s1615_s24 + $0x18] sm:$0xff]   ;;  %v1700_v38 = vld [vmem:[%s1615_s24 + $0x20] sm:$0xff]   ;;  %v1722_v48 = vld [vmem:[%s1615_s24 + $0x28] sm:$0xff]  }
  0x13   : > { %v294_v7 = vsel %vm293_vm0, %v1352_v2, 0.0  ;;  %v297_v9 = vsel %vm293_vm0, %v1353_v4, 0.0  ;;  %v300_v14 = vsel %vm293_vm0, %v1356_v11, 0.0  ;;  %v303_v15 = vsel %vm293_vm0, %v1357_v12, 0.0  ;;  %v1689_v33 = vld [vmem:[%s1615_s24 + $0x58] sm:$0xff]   ;;  %v1711_v43 = vld [vmem:[%s1615_s24 + $0x60] sm:$0xff]  }
  0x14   : > { %v342_v8 = vsel %vm293_vm0, %v1384_v3, 0.0  ;;  %295 = vadd.xlane.f32.xlu0 %v294_v7  ;;  %v345_v10 = vsel %vm293_vm0, %v1385_v5, 0.0  ;;  %v348_v19 = vsel %vm293_vm0, %v1388_v16, 0.0  ;;  %v351_v20 = vsel %vm293_vm0, %v1389_v17, 0.0  ;;  %v1733_v53 = vld [vmem:[%s1615_s24 + $0x68] sm:$0xff]   ;;  %v1744_v58 = vld [vmem:[%s1615_s24 + $0x30] sm:$0xff]  }
  0x15   : > { %343 = vadd.xlane.f32.xlu1 %v342_v8  ;;  %v1360_v21 = vunpack.c.l.bf16 %v1656_v18  ;;  %v1361_v22 = vunpack.c.h.bf16 %v1656_v18  ;;  %v1392_v26 = vunpack.c.l.bf16 %v1667_v23  ;;  %v1393_v27 = vunpack.c.h.bf16 %v1667_v23  ;;  %v1755_v63 = vld [vmem:[%s1615_s24 + $0x70] sm:$0xff]  }
  0x16   : > { %v1364_v31 = vunpack.c.l.bf16 %v1678_v28  ;;  %v1365_v32 = vunpack.c.h.bf16 %v1678_v28  ;;  %v1396_v36 = vunpack.c.l.bf16 %v1689_v33  ;;  %v1397_v37 = vunpack.c.h.bf16 %v1689_v33 }
  0x17   : > { %v306_v24 = vsel %vm293_vm0, %v1360_v21, 0.0  ;;  %v309_v25 = vsel %vm293_vm0, %v1361_v22, 0.0  ;;  %v354_v29 = vsel %vm293_vm0, %v1392_v26, 0.0  ;;  %v357_v30 = vsel %vm293_vm0, %v1393_v27, 0.0 }
  0x18   : > { %298 = vadd.xlane.f32.xlu0 %v297_v9  ;;  %v312_v34 = vsel %vm293_vm0, %v1364_v31, 0.0  ;;  %v315_v35 = vsel %vm293_vm0, %v1365_v32, 0.0  ;;  %v360_v39 = vsel %vm293_vm0, %v1396_v36, 0.0  ;;  %v363_v40 = vsel %vm293_vm0, %v1397_v37, 0.0 }
  0x19   : > { %346 = vadd.xlane.f32.xlu1 %v345_v10  ;;  %v1368_v41 = vunpack.c.l.bf16 %v1700_v38  ;;  %v1369_v42 = vunpack.c.h.bf16 %v1700_v38  ;;  %v1400_v46 = vunpack.c.l.bf16 %v1711_v43  ;;  %v1401_v47 = vunpack.c.h.bf16 %v1711_v43 }
  0x1a   : > { %v1372_v51 = vunpack.c.l.bf16 %v1722_v48  ;;  %v1373_v52 = vunpack.c.h.bf16 %v1722_v48  ;;  %v1404_v56 = vunpack.c.l.bf16 %v1733_v53  ;;  %v1405_v57 = vunpack.c.h.bf16 %v1733_v53 }
  0x1b   : > { %v318_v44 = vsel %vm293_vm0, %v1368_v41, 0.0  ;;  %v321_v45 = vsel %vm293_vm0, %v1369_v42, 0.0  ;;  %v366_v49 = vsel %vm293_vm0, %v1400_v46, 0.0  ;;  %v369_v50 = vsel %vm293_vm0, %v1401_v47, 0.0 }
  0x1c   : > { %301 = vadd.xlane.f32.xlu0 %v300_v14  ;;  %v324_v54 = vsel %vm293_vm0, %v1372_v51, 0.0  ;;  %v327_v55 = vsel %vm293_vm0, %v1373_v52, 0.0  ;;  %v372_v59 = vsel %vm293_vm0, %v1404_v56, 0.0  ;;  %v375_v60 = vsel %vm293_vm0, %v1405_v57, 0.0  ;;  %v1766_v14 = vld [vmem:[%s1615_s24 + $0x38] sm:$0xff]  }
  0x1d   : > { %304 = vadd.xlane.f32.xlu1 %v303_v15  ;;  %v1376_v61 = vunpack.c.l.bf16 %v1744_v58  ;;  %v1377_v62 = vunpack.c.h.bf16 %v1744_v58  ;;  %v1408_v9 = vunpack.c.l.bf16 %v1755_v63  ;;  %v1409_v10 = vunpack.c.h.bf16 %v1755_v63 }
  0x1f   : > { %v330_v7 = vsel %vm293_vm0, %v1376_v61, 0.0  ;;  %v333_v8 = vsel %vm293_vm0, %v1377_v62, 0.0  ;;  %v378_v15 = vsel %vm293_vm0, %v1408_v9, 0.0 }
  0x20   : > { %349 = vadd.xlane.f32.xlu0 %v348_v19  ;;  %v381_v19 = vsel %vm293_vm0, %v1409_v10, 0.0 }
  0x21   : > { %352 = vadd.xlane.f32.xlu1 %v351_v20  ;;  %v1380_v20 = vunpack.c.l.bf16 %v1766_v14 }
  0x24   : > { %307 = vadd.xlane.f32.xlu0 %v306_v24  ;;  %v1381_v24 = vunpack.c.h.bf16 %v1766_v14 }
  0x25   : > { %310 = vadd.xlane.f32.xlu1 %v309_v25  ;;  %v1777_v25 = vld [vmem:[%s1615_s24 + $0x78] sm:$0xff]  }
  0x28   : > { %355 = vadd.xlane.f32.xlu0 %v354_v29  ;;  %v336_v29 = vsel %vm293_vm0, %v1380_v20, 0.0 }
  0x29   : > { %358 = vadd.xlane.f32.xlu1 %v357_v30  ;;  %v339_v30 = vsel %vm293_vm0, %v1381_v24, 0.0 }
  0x2c   : > { %313 = vadd.xlane.f32.xlu0 %v312_v34  ;;  %v1412_v34 = vunpack.c.l.bf16 %v1777_v25 }
  0x2d   : > { %316 = vadd.xlane.f32.xlu1 %v315_v35  ;;  %v1413_v35 = vunpack.c.h.bf16 %v1777_v25 }
  0x30   : > { %361 = vadd.xlane.f32.xlu0 %v360_v39  ;;  %v384_v39 = vsel %vm293_vm0, %v1412_v34, 0.0 }
  0x31   : > { %364 = vadd.xlane.f32.xlu1 %v363_v40  ;;  %v387_v40 = vsel %vm293_vm0, %v1413_v35, 0.0 }
  0x34   : > { %319 = vadd.xlane.f32.xlu0 %v318_v44 }
  0x35   : > { %322 = vadd.xlane.f32.xlu1 %v321_v45 }
  0x38   : > { %367 = vadd.xlane.f32.xlu0 %v366_v49 }
  0x39   : > { %370 = vadd.xlane.f32.xlu1 %v369_v50 }
  0x3c   : > { %325 = vadd.xlane.f32.xlu0 %v324_v54 }
  0x3d   : > { %328 = vadd.xlane.f32.xlu1 %v327_v55 }
  0x40   : > { %373 = vadd.xlane.f32.xlu0 %v372_v59 }
  0x41   : > { %376 = vadd.xlane.f32.xlu1 %v375_v60 }
  0x44   : > { %331 = vadd.xlane.f32.xlu0 %v330_v7 }
  0x45   : > { %334 = vadd.xlane.f32.xlu1 %v333_v8 }
  0x48   : > { %379 = vadd.xlane.f32.xlu0 %v378_v15 }
  0x49   : > { %382 = vadd.xlane.f32.xlu1 %v381_v19 }
  0x4c   : > { %337 = vadd.xlane.f32.xlu0 %v336_v29 }
  0x4d   : > { %340 = vadd.xlane.f32.xlu1 %v339_v30 }
  0x50   : > { %385 = vadd.xlane.f32.xlu0 %v384_v39 }
  0x51   : > { %388 = vadd.xlane.f32.xlu1 %v387_v40 }
  0xa1   : > { %v296_v44 = vpop.xlane.xlu0 %295 }
  0xa2   : > { %v344_v45 = vpop.xlane.xlu1 %343  ;;  %v391_v49 = vmul.f32 0.03125, %v296_v44 }
  0xa3   : > { %v407_v50 = vmul.f32 0.03125, %v344_v45 }
  0xa4   : > { %v1795_v54 = vsub.f32 %v1352_v2, %v391_v49 }
  0xa5   : > { %v1799_v55 = vsub.f32 %v1384_v3, %v407_v50  ;;  %v299_v59 = vpop.xlane.xlu0 %298 }
  0xa6   : > { %v347_v60 = vpop.xlane.xlu1 %346  ;;  %v392_v7 = vmul.f32 0.03125, %v299_v59  ;;  %v455_v15 = vmul.f32 %v1795_v54, %v1795_v54 }
  0xa7   : > { %v408_v8 = vmul.f32 0.03125, %v347_v60  ;;  %v471_v19 = vmul.f32 %v1799_v55, %v1799_v55 }
  0xa8   : > { %v1807_v29 = vsub.f32 %v1353_v4, %v392_v7  ;;  %v487_v3 = vsel %vm293_vm0, %v455_v15, 0.0 }
  0xa9   : > { %v1811_v2 = vsub.f32 %v1385_v5, %v408_v8  ;;  %488 = vadd.xlane.f32.xlu0 %v487_v3  ;;  %v302_v30 = vpop.xlane.xlu0 %301  ;;  %v535_v40 = vsel %vm293_vm0, %v471_v19, 0.0 }
  0xaa   : > { %v305_v39 = vpop.xlane.xlu1 %304  ;;  %v393_v44 = vmul.f32 0.03125, %v302_v30  ;;  %v456_v49 = vmul.f32 %v1807_v29, %v1807_v29 }
  0xab   : > { %v394_v45 = vmul.f32 0.03125, %v305_v39  ;;  %v472_v0 = vmul.f32 %v1811_v2, %v1811_v2 }
  0xac   : > { %v1821_v1 = vsub.f32 %v1356_v11, %v393_v44  ;;  %v490_v5 = vsel %vm293_vm0, %v456_v49, 0.0 }
  0xad   : > { %v1825_v4 = vsub.f32 %v1357_v12, %v394_v45  ;;  %536 = vadd.xlane.f32.xlu0 %v535_v40  ;;  %491 = vadd.xlane.f32.xlu1 %v490_v5  ;;  %v350_v50 = vpop.xlane.xlu0 %349  ;;  %v538_v60 = vsel %vm293_vm0, %v472_v0, 0.0 }
  0xae   : > { %v353_v59 = vpop.xlane.xlu1 %352  ;;  %v409_v7 = vmul.f32 0.03125, %v350_v50  ;;  %v457_v15 = vmul.f32 %v1821_v1, %v1821_v1 }
  0xaf   : > { %v410_v8 = vmul.f32 0.03125, %v353_v59  ;;  %v458_v11 = vmul.f32 %v1825_v4, %v1825_v4 }
  0xb0   : > { %v1835_v6 = vsub.f32 %v1388_v16, %v409_v7  ;;  %v493_v19 = vsel %vm293_vm0, %v457_v15, 0.0 }
  0xb1   : > { %v1839_v12 = vsub.f32 %v1389_v17, %v410_v8  ;;  %539 = vadd.xlane.f32.xlu1 %v538_v60  ;;  %494 = vadd.xlane.f32.xlu0 %v493_v19  ;;  %v308_v3 = vpop.xlane.xlu0 %307  ;;  %v496_v39 = vsel %vm293_vm0, %v458_v11, 0.0 }
  0xb2   : > { %v311_v30 = vpop.xlane.xlu1 %310  ;;  %v395_v40 = vmul.f32 0.03125, %v308_v3  ;;  %v473_v45 = vmul.f32 %v1835_v6, %v1835_v6 }
  0xb3   : > { %v396_v44 = vmul.f32 0.03125, %v311_v30  ;;  %v474_v16 = vmul.f32 %v1839_v12, %v1839_v12 }
  0xb4   : > { %v1849_v13 = vsub.f32 %v1360_v21, %v395_v40  ;;  %v541_v49 = vsel %vm293_vm0, %v473_v45, 0.0 }
  0xb5   : > { %v1853_v17 = vsub.f32 %v1361_v22, %v396_v44  ;;  %497 = vadd.xlane.f32.xlu1 %v496_v39  ;;  %542 = vadd.xlane.f32.xlu0 %v541_v49  ;;  %v356_v0 = vpop.xlane.xlu0 %355  ;;  %v544_v50 = vsel %vm293_vm0, %v474_v16, 0.0 }
  0xb6   : > { %v359_v5 = vpop.xlane.xlu1 %358  ;;  %v411_v59 = vmul.f32 0.03125, %v356_v0  ;;  %v459_v7 = vmul.f32 %v1849_v13, %v1849_v13 }
  0xb7   : > { %v412_v60 = vmul.f32 0.03125, %v359_v5  ;;  %v460_v21 = vmul.f32 %v1853_v17, %v1853_v17 }
  0xb8   : > { %v1863_v18 = vsub.f32 %v1392_v26, %v411_v59  ;;  %v499_v8 = vsel %vm293_vm0, %v459_v7, 0.0 }
  0xb9   : > { %v1867_v22 = vsub.f32 %v1393_v27, %v412_v60  ;;  %545 = vadd.xlane.f32.xlu1 %v544_v50  ;;  %500 = vadd.xlane.f32.xlu0 %v499_v8  ;;  %v314_v15 = vpop.xlane.xlu0 %313  ;;  %v502_v19 = vsel %vm293_vm0, %v460_v21, 0.0 }
  0xba   : > { %v317_v11 = vpop.xlane.xlu1 %316  ;;  %v397_v3 = vmul.f32 0.03125, %v314_v15  ;;  %v475_v39 = vmul.f32 %v1863_v18, %v1863_v18 }
  0xbb   : > { %v398_v30 = vmul.f32 0.03125, %v317_v11  ;;  %v476_v26 = vmul.f32 %v1867_v22, %v1867_v22 }
  0xbc   : > { %v1877_v23 = vsub.f32 %v1364_v31, %v397_v3  ;;  %v547_v40 = vsel %vm293_vm0, %v475_v39, 0.0 }
  0xbd   : > { %v1881_v27 = vsub.f32 %v1365_v32, %v398_v30  ;;  %503 = vadd.xlane.f32.xlu1 %v502_v19  ;;  %548 = vadd.xlane.f32.xlu0 %v547_v40  ;;  %v362_v44 = vpop.xlane.xlu0 %361  ;;  %v550_v16 = vsel %vm293_vm0, %v476_v26, 0.0 }
  0xbe   : > { %v365_v45 = vpop.xlane.xlu1 %364  ;;  %v413_v49 = vmul.f32 0.03125, %v362_v44  ;;  %v461_v5 = vmul.f32 %v1877_v23, %v1877_v23 }
  0xbf   : > { %v414_v0 = vmul.f32 0.03125, %v365_v45  ;;  %v462_v31 = vmul.f32 %v1881_v27, %v1881_v27 }
  0xc0   : > { %v1891_v28 = vsub.f32 %v1396_v36, %v413_v49  ;;  %v505_v50 = vsel %vm293_vm0, %v461_v5, 0.0 }
  0xc1   : > { %v1895_v32 = vsub.f32 %v1397_v37, %v414_v0  ;;  %551 = vadd.xlane.f32.xlu1 %v550_v16  ;;  %506 = vadd.xlane.f32.xlu0 %v505_v50  ;;  %v320_v59 = vpop.xlane.xlu0 %319  ;;  %v508_v7 = vsel %vm293_vm0, %v462_v31, 0.0 }
  0xc2   : > { %v323_v60 = vpop.xlane.xlu1 %322  ;;  %v399_v21 = vmul.f32 0.03125, %v320_v59  ;;  %v477_v15 = vmul.f32 %v1891_v28, %v1891_v28 }
  0xc3   : > { %v400_v8 = vmul.f32 0.03125, %v323_v60  ;;  %v478_v36 = vmul.f32 %v1895_v32, %v1895_v32 }
  0xc4   : > { %v1905_v33 = vsub.f32 %v1368_v41, %v399_v21  ;;  %v553_v11 = vsel %vm293_vm0, %v477_v15, 0.0 }
  0xc5   : > { %v1909_v37 = vsub.f32 %v1369_v42, %v400_v8  ;;  %509 = vadd.xlane.f32.xlu1 %v508_v7  ;;  %554 = vadd.xlane.f32.xlu0 %v553_v11  ;;  %v368_v19 = vpop.xlane.xlu0 %367  ;;  %v556_v30 = vsel %vm293_vm0, %v478_v36, 0.0 }
  0xc6   : > { %v371_v3 = vpop.xlane.xlu1 %370  ;;  %v415_v39 = vmul.f32 0.03125, %v368_v19  ;;  %v463_v40 = vmul.f32 %v1905_v33, %v1905_v33 }
  0xc7   : > { %v416_v26 = vmul.f32 0.03125, %v371_v3  ;;  %v464_v41 = vmul.f32 %v1909_v37, %v1909_v37 }
  0xc8   : > { %v1919_v38 = vsub.f32 %v1400_v46, %v415_v39  ;;  %v511_v44 = vsel %vm293_vm0, %v463_v40, 0.0 }
  0xc9   : > { %v1923_v42 = vsub.f32 %v1401_v47, %v416_v26  ;;  %557 = vadd.xlane.f32.xlu1 %v556_v30  ;;  %512 = vadd.xlane.f32.xlu0 %v511_v44  ;;  %v326_v45 = vpop.xlane.xlu0 %325  ;;  %v514_v49 = vsel %vm293_vm0, %v464_v41, 0.0  ;;  %v1495_v30 = vld [vmem:[%s2259_s3] sm:$0xff]  }
  0xca   : > { %v329_v16 = vpop.xlane.xlu1 %328  ;;  %v401_v0 = vmul.f32 0.03125, %v326_v45  ;;  %v479_v31 = vmul.f32 %v1919_v38, %v1919_v38  ;;  %1447 = vmatprep.subr.bf16.mxu0 %v1495_v30  ;;  %1483 = vmatprep.subr.bf16.mxu1 %v1495_v30 }
  0xcb   : > { %v402_v5 = vmul.f32 0.03125, %v329_v16  ;;  %v480_v46 = vmul.f32 %v1923_v42, %v1923_v42  ;;  %1448 = vmatpush3.bf16.msra.mxu0 %v1495_v30  ;;  %1485 = vmatpush3.bf16.msra.mxu1 %v1495_v30 }
  0xcc   : > { %v1933_v43 = vsub.f32 %v1372_v51, %v401_v0  ;;  %v559_v50 = vsel %vm293_vm0, %v479_v31, 0.0 }
  0xcd   : > { %v1937_v47 = vsub.f32 %v1373_v52, %v402_v5  ;;  %515 = vadd.xlane.f32.xlu1 %v514_v49  ;;  %560 = vadd.xlane.f32.xlu0 %v559_v50  ;;  %v374_v59 = vpop.xlane.xlu0 %373  ;;  %v562_v7 = vsel %vm293_vm0, %v480_v46, 0.0  ;;  %v1496_v49 = vld [vmem:[%s2259_s3 + $0x8] sm:$0xff]  }
  0xce   : > { %v377_v60 = vpop.xlane.xlu1 %376  ;;  %v417_v21 = vmul.f32 0.03125, %v374_v59  ;;  %v465_v15 = vmul.f32 %v1933_v43, %v1933_v43  ;;  %1449 = vmatprep.subr.bf16.mxu0 %v1496_v49  ;;  %1484 = vmatprep.subr.bf16.mxu1 %v1496_v49 }
  0xcf   : > { %v418_v8 = vmul.f32 0.03125, %v377_v60  ;;  %v466_v51 = vmul.f32 %v1937_v47, %v1937_v47  ;;  %1450 = vmatpush3.bf16.msra.mxu0 %v1496_v49  ;;  %1486 = vmatpush3.bf16.msra.mxu1 %v1496_v49 }
  0xd0   : > { %v1947_v48 = vsub.f32 %v1404_v56, %v417_v21  ;;  %v517_v36 = vsel %vm293_vm0, %v465_v15, 0.0 }
  0xd1   : > { %v1951_v52 = vsub.f32 %v1405_v57, %v418_v8  ;;  %563 = vadd.xlane.f32.xlu1 %v562_v7  ;;  %518 = vadd.xlane.f32.xlu0 %v517_v36  ;;  %v332_v11 = vpop.xlane.xlu0 %331  ;;  %v520_v3 = vsel %vm293_vm0, %v466_v51, 0.0 }
  0xd2   : > { %v335_v19 = vpop.xlane.xlu1 %334  ;;  %v403_v39 = vmul.f32 0.03125, %v332_v11  ;;  %v481_v56 = vmul.f32 %v1947_v48, %v1947_v48 }
  0xd3   : > { %v404_v26 = vmul.f32 0.03125, %v335_v19  ;;  %v482_v53 = vmul.f32 %v1951_v52, %v1951_v52 }
  0xd4   : > { %v1964_v57 = vsub.f32 %v1376_v61, %v403_v39  ;;  %v565_v41 = vsel %vm293_vm0, %v481_v56, 0.0 }
  0xd5   : > { %v1968_v40 = vsub.f32 %v1377_v62, %v404_v26  ;;  %521 = vadd.xlane.f32.xlu1 %v520_v3  ;;  %566 = vadd.xlane.f32.xlu0 %v565_v41  ;;  %v380_v44 = vpop.xlane.xlu0 %379  ;;  %v568_v16 = vsel %vm293_vm0, %v482_v53, 0.0 }
  0xd6   : > { %v383_v45 = vpop.xlane.xlu1 %382  ;;  %v419_v61 = vmul.f32 0.03125, %v380_v44  ;;  %v467_v58 = vmul.f32 %v1964_v57, %v1964_v57 }
  0xd7   : > { %v420_v0 = vmul.f32 0.03125, %v383_v45  ;;  %v468_v62 = vmul.f32 %v1968_v40, %v1968_v40 }
  0xd8   : > { %v1981_v5 = vsub.f32 %v1408_v9, %v419_v61  ;;  %v523_v46 = vsel %vm293_vm0, %v467_v58, 0.0 }
  0xd9   : > { %v1985_v31 = vsub.f32 %v1409_v10, %v420_v0  ;;  %569 = vadd.xlane.f32.xlu1 %v568_v16  ;;  %524 = vadd.xlane.f32.xlu0 %v523_v46  ;;  %v338_v50 = vpop.xlane.xlu0 %337  ;;  %v526_v60 = vsel %vm293_vm0, %v468_v62, 0.0 }
  0xda   : > { %v341_v59 = vpop.xlane.xlu1 %340  ;;  %v405_v7 = vmul.f32 0.03125, %v338_v50  ;;  %v483_v9 = vmul.f32 %v1981_v5, %v1981_v5 }
  0xdb   : > { %v406_v21 = vmul.f32 0.03125, %v341_v59  ;;  %v484_v63 = vmul.f32 %v1985_v31, %v1985_v31 }
  0xdc   : > { %v1995_v10 = vsub.f32 %v1380_v20, %v405_v7  ;;  %v571_v15 = vsel %vm293_vm0, %v483_v9, 0.0 }
  0xdd   : > { %v1999_v8 = vsub.f32 %v1381_v24, %v406_v21  ;;  %527 = vadd.xlane.f32.xlu1 %v526_v60  ;;  %572 = vadd.xlane.f32.xlu0 %v571_v15  ;;  %v386_v51 = vpop.xlane.xlu0 %385  ;;  %v574_v11 = vsel %vm293_vm0, %v484_v63, 0.0 }
  0xde   : > { %v389_v36 = vpop.xlane.xlu1 %388  ;;  %v421_v19 = vmul.f32 0.03125, %v386_v51  ;;  %v469_v30 = vmul.f32 %v1995_v10, %v1995_v10 }
  0xdf   : > { %v422_v3 = vmul.f32 0.03125, %v389_v36  ;;  %v470_v20 = vmul.f32 %v1999_v8, %v1999_v8 }
  0xe0   : > { %v2009_v14 = vsub.f32 %v1412_v34, %v421_v19  ;;  %v529_v39 = vsel %vm293_vm0, %v469_v30, 0.0 }
  0xe1   : > { %v2013_v24 = vsub.f32 %v1413_v35, %v422_v3  ;;  %575 = vadd.xlane.f32.xlu1 %v574_v11  ;;  %530 = vadd.xlane.f32.xlu0 %v529_v39  ;;  %v532_v26 = vsel %vm293_vm0, %v470_v20, 0.0 }
  0xe2   : > { %v485_v56 = vmul.f32 %v2009_v14, %v2009_v14 }
  0xe3   : > { %v486_v53 = vmul.f32 %v2013_v24, %v2013_v24 }
  0xe4   : > { %v577_v41 = vsel %vm293_vm0, %v485_v56, 0.0 }
  0xe5   : > { %533 = vadd.xlane.f32.xlu1 %v532_v26  ;;  %578 = vadd.xlane.f32.xlu0 %v577_v41  ;;  %v580_v25 = vsel %vm293_vm0, %v486_v53, 0.0  ;;  %v2027_v26 = vld [vmem:[%s2257_s1] ss:$0 sm:$0xff] }
  0xe9   : > { %581 = vadd.xlane.f32.xlu1 %v580_v25 }
 0x136   : > { %v489_v34 = vpop.xlane.xlu0 %488 }
 0x137   : > { %v583_v35 = vmul.f32 0.03125, %v489_v34 }
 0x139   : > { %v615_v44 = vadd.f32 1e-05, %v583_v35 }
 0x13a   : > { %v492_v45 = vpop.xlane.xlu1 %491  ;;  %v537_v16 = vpop.xlane.xlu0 %536 }
 0x13b   : > { %1497 = vrsqrt.f32 %v615_v44  ;;  %v584_v49 = vmul.f32 0.03125, %v492_v45  ;;  %v599_v61 = vmul.f32 0.03125, %v537_v16 }
 0x13d   : > { %v616_v0 = vadd.f32 1e-05, %v584_v49  ;;  %v631_v58 = vadd.f32 1e-05, %v599_v61  ;;  %v2034_v49 = vld [vmem:[%s2258_s2] ss:$0 sm:$0xff] }
 0x13e   : > { %v540_v62 = vpop.xlane.xlu1 %539  ;;  %v495_v46 = vpop.xlane.xlu0 %494 }
 0x13f   : > { %1499 = vrsqrt.f32 %v616_v0  ;;  %v600_v50 = vmul.f32 0.03125, %v540_v62  ;;  %v585_v59 = vmul.f32 0.03125, %v495_v46 }
 0x140   : > { %1501 = vrsqrt.f32 %v631_v58 }
 0x141   : > { %v632_v60 = vadd.f32 1e-05, %v600_v50  ;;  %v617_v7 = vadd.f32 1e-05, %v585_v59 }
 0x142   : > { %v498_v21 = vpop.xlane.xlu1 %497  ;;  %v543_v9 = vpop.xlane.xlu0 %542 }
 0x143   : > { %1503 = vrsqrt.f32 %v632_v60  ;;  %v586_v63 = vmul.f32 0.03125, %v498_v21  ;;  %v601_v15 = vmul.f32 0.03125, %v543_v9 }
 0x144   : > { %1505 = vrsqrt.f32 %v617_v7 }
 0x145   : > { %v1498_v51 = vpop.eup %1497  ;;  %v618_v36 = vadd.f32 1e-05, %v586_v63  ;;  %v633_v11 = vadd.f32 1e-05, %v601_v15 }
 0x146   : > { %v546_v19 = vpop.xlane.xlu1 %545  ;;  %v501_v3 = vpop.xlane.xlu0 %500  ;;  %v679_v30 = vmul.f32 %v1498_v51, %v1795_v54 }
 0x147   : > { %1507 = vrsqrt.f32 %v618_v36  ;;  %v602_v20 = vmul.f32 0.03125, %v546_v19  ;;  %v587_v39 = vmul.f32 0.03125, %v501_v3 }
 0x148   : > { %1509 = vrsqrt.f32 %v633_v11  ;;  %v718_v45 = vmul.f32 %v2027_v26, %v679_v30 }
 0x149   : > { %v1500_v56 = vpop.eup %1499  ;;  %v634_v53 = vadd.f32 1e-05, %v602_v20  ;;  %v619_v41 = vadd.f32 1e-05, %v587_v39 }
 0x14a   : > { %v1502_v25 = vpop.eup %1501  ;;  %v504_v34 = vpop.xlane.xlu1 %503  ;;  %v680_v44 = vmul.f32 %v1500_v56, %v1807_v29  ;;  %v757_v60 = vadd.f32 %v2034_v49, %v718_v45 }
 0x14b   : > { %v549_v35 = vpop.xlane.xlu0 %548  ;;  %1511 = vrsqrt.f32 %v634_v53  ;;  %v588_v54 = vmul.f32 0.03125, %v504_v34  ;;  %v695_v61 = vmul.f32 %v1502_v25, %v1799_v55 }
 0x14c   : > { %v603_v16 = vmul.f32 0.03125, %v549_v35  ;;  %1513 = vrsqrt.f32 %v619_v41  ;;  %v719_v0 = vmul.f32 %v2027_v26, %v680_v44 }
 0x14d   : > { %v1504_v58 = vpop.eup %1503  ;;  %v620_v62 = vadd.f32 1e-05, %v588_v54  ;;  %v734_v9 = vmul.f32 %v2027_v26, %v695_v61 }
 0x14e   : > { %v635_v46 = vadd.f32 1e-05, %v603_v16  ;;  %v1506_v50 = vpop.eup %1505  ;;  %v552_v29 = vpop.xlane.xlu1 %551  ;;  %v758_v7 = vadd.f32 %v2034_v49, %v719_v0  ;;  %v696_v21 = vmul.f32 %v1504_v58, %v1811_v2 }
 0x14f   : > { %v507_v59 = vpop.xlane.xlu0 %506  ;;  %v681_v63 = vmul.f32 %v1506_v50, %v1821_v1  ;;  %1515 = vrsqrt.f32 %v620_v62  ;;  %v604_v55 = vmul.f32 0.03125, %v552_v29  ;;  %v773_v56 = vadd.f32 %v2034_v49, %v734_v9 }
 0x150   : > { %v589_v15 = vmul.f32 0.03125, %v507_v59  ;;  %1517 = vrsqrt.f32 %v635_v46  ;;  %v789_v51 = vpack.c.bf16 %v758_v7, %v757_v60  ;;  %v735_v36 = vmul.f32 %v2027_v26, %v696_v21 }
 0x151   : > { %v1508_v11 = vpop.eup %1507  ;;  %v636_v19 = vadd.f32 1e-05, %v604_v55  ;;  %v720_v53 = vmul.f32 %v2027_v26, %v681_v63 }
 0x152   : > { %v621_v3 = vadd.f32 1e-05, %v589_v15  ;;  %v1510_v30 = vpop.eup %1509  ;;  %v682_v20 = vmul.f32 %v1508_v11, %v1825_v4  ;;  %v510_v39 = vpop.xlane.xlu1 %509  ;;  %1451 = vmatprep.mubr.msk.bf16.mxu0 %vm293_vm0, %v789_v51  ;;  %v774_v1 = vadd.f32 %v2034_v49, %v735_v36 }
 0x153   : > { %v555_v2 = vpop.xlane.xlu0 %554  ;;  %v697_v41 = vmul.f32 %v1510_v30, %v1835_v6  ;;  %1519 = vrsqrt.f32 %v636_v19  ;;  %v590_v25 = vmul.f32 0.03125, %v510_v39  ;;  %v759_v62 = vadd.f32 %v2034_v49, %v720_v53 }
 0x154   : > { %v605_v34 = vmul.f32 0.03125, %v555_v2  ;;  %1521 = vrsqrt.f32 %v621_v3  ;;  %v797_v35 = vpack.c.bf16 %v774_v1, %v773_v56  ;;  %v721_v44 = vmul.f32 %v2027_v26, %v682_v20 }
 0x155   : > { %v1512_v4 = vpop.eup %1511  ;;  %v622_v45 = vadd.f32 1e-05, %v590_v25  ;;  %v736_v46 = vmul.f32 %v2027_v26, %v697_v41 }
 0x156   : > { %v637_v54 = vadd.f32 1e-05, %v605_v34  ;;  %v1514_v16 = vpop.eup %1513  ;;  %v698_v61 = vmul.f32 %v1512_v4, %v1839_v12  ;;  %v558_v0 = vpop.xlane.xlu1 %557  ;;  %1467 = vmatprep.mubr.msk.bf16.mxu1 %vm293_vm0, %v797_v35  ;;  %v760_v6 = vadd.f32 %v2034_v49, %v721_v44 }
 0x157   : > { %v513_v58 = vpop.xlane.xlu0 %512  ;;  %v683_v50 = vmul.f32 %v1514_v16, %v1849_v13  ;;  %1523 = vrsqrt.f32 %v622_v45  ;;  %v606_v29 = vmul.f32 0.03125, %v558_v0  ;;  %v775_v36 = vadd.f32 %v2034_v49, %v736_v46 }
 0x158   : > { %v591_v59 = vmul.f32 0.03125, %v513_v58  ;;  %1525 = vrsqrt.f32 %v637_v54  ;;  %v790_v60 = vpack.c.bf16 %v760_v6, %v759_v62  ;;  %v737_v7 = vmul.f32 %v2027_v26, %v698_v61 }
 0x159   : > { %v1516_v12 = vpop.eup %1515  ;;  %v638_v21 = vadd.f32 1e-05, %v606_v29  ;;  %v722_v11 = vmul.f32 %v2027_v26, %v683_v50 }
 0x15a   : > { %v623_v9 = vadd.f32 1e-05, %v591_v59  ;;  %v1518_v63 = vpop.eup %1517  ;;  %v684_v55 = vmul.f32 %v1516_v12, %v1853_v17  ;;  %v516_v15 = vpop.xlane.xlu1 %515  ;;  %1452 = vmatmul.mubr.msk.bf16.vlgmr.msra.gmra.mrb[0].mxu0 %vm293_vm0, %v790_v60  ;;  %v776_v13 = vadd.f32 %v2034_v49, %v737_v7 }
 0x15b   : > { %v561_v51 = vpop.xlane.xlu0 %560  ;;  %v699_v19 = vmul.f32 %v1518_v63, %v1863_v18  ;;  %1527 = vrsqrt.f32 %v638_v21  ;;  %v592_v3 = vmul.f32 0.03125, %v516_v15  ;;  %v761_v34 = vadd.f32 %v2034_v49, %v722_v11 }
 0x15c   : > { %v607_v30 = vmul.f32 0.03125, %v561_v51  ;;  %1529 = vrsqrt.f32 %v623_v9  ;;  %v798_v20 = vpack.c.bf16 %v776_v13, %v775_v36  ;;  %v723_v39 = vmul.f32 %v2027_v26, %v684_v55 }
 0x15d   : > { %v1520_v17 = vpop.eup %1519  ;;  %v624_v2 = vadd.f32 1e-05, %v592_v3  ;;  %v738_v35 = vmul.f32 %v2027_v26, %v699_v19 }
 0x15e   : > { %v639_v56 = vadd.f32 1e-05, %v607_v30  ;;  %v1522_v1 = vpop.eup %1521  ;;  %v700_v53 = vmul.f32 %v1520_v17, %v1867_v22  ;;  %v564_v41 = vpop.xlane.xlu1 %563  ;;  %1468 = vmatmul.mubr.msk.bf16.vlgmr.msra.gmra.mrb[0].mxu1 %vm293_vm0, %v798_v20  ;;  %v762_v18 = vadd.f32 %v2034_v49, %v723_v39 }
 0x15f   : > { %v519_v25 = vpop.xlane.xlu0 %518  ;;  %v685_v44 = vmul.f32 %v1522_v1, %v1877_v23  ;;  %1531 = vrsqrt.f32 %v624_v2  ;;  %v608_v4 = vmul.f32 0.03125, %v564_v41  ;;  %v777_v50 = vadd.f32 %v2034_v49, %v738_v35 }
 0x160   : > { %v593_v45 = vmul.f32 0.03125, %v519_v25  ;;  %1533 = vrsqrt.f32 %v639_v56  ;;  %v791_v54 = vpack.c.bf16 %v762_v18, %v761_v34  ;;  %v739_v16 = vmul.f32 %v2027_v26, %v700_v53 }
 0x161   : > { %v1524_v22 = vpop.eup %1523  ;;  %v640_v61 = vadd.f32 1e-05, %v608_v4  ;;  %v724_v29 = vmul.f32 %v2027_v26, %v685_v44 }
 0x162   : > { %v625_v0 = vadd.f32 1e-05, %v593_v45  ;;  %v1526_v58 = vpop.eup %1525  ;;  %v686_v62 = vmul.f32 %v1524_v22, %v1881_v27  ;;  %v522_v6 = vpop.xlane.xlu1 %521  ;;  %1455 = vmatprep.mubr.msk.bf16.mxu0 %vm293_vm0, %v791_v54  ;;  %v778_v23 = vadd.f32 %v2034_v49, %v739_v16 }
 0x163   : > { %v567_v46 = vpop.xlane.xlu0 %566  ;;  %v701_v59 = vmul.f32 %v1526_v58, %v1891_v28  ;;  %1535 = vrsqrt.f32 %v640_v61  ;;  %v594_v60 = vmul.f32 0.03125, %v522_v6  ;;  %v763_v13 = vadd.f32 %v2034_v49, %v724_v29 }
 0x164   : > { %v609_v7 = vmul.f32 0.03125, %v567_v46  ;;  %1537 = vrsqrt.f32 %v625_v0  ;;  %v799_v12 = vpack.c.bf16 %v778_v23, %v777_v50  ;;  %v725_v21 = vmul.f32 %v2027_v26, %v686_v62 }
 0x165   : > { %v1528_v27 = vpop.eup %1527  ;;  %v626_v9 = vadd.f32 1e-05, %v594_v60  ;;  %v740_v11 = vmul.f32 %v2027_v26, %v701_v59 }
 0x166   : > { %v641_v63 = vadd.f32 1e-05, %v609_v7  ;;  %v1530_v55 = vpop.eup %1529  ;;  %v702_v15 = vmul.f32 %v1528_v27, %v1895_v32  ;;  %v570_v51 = vpop.xlane.xlu1 %569  ;;  %1471 = vmatprep.mubr.msk.bf16.mxu1 %vm293_vm0, %v799_v12  ;;  %v764_v28 = vadd.f32 %v2034_v49, %v725_v21 }
 0x167   : > { %v525_v36 = vpop.xlane.xlu0 %524  ;;  %v687_v19 = vmul.f32 %v1530_v55, %v1905_v33  ;;  %1539 = vrsqrt.f32 %v626_v9  ;;  %v610_v3 = vmul.f32 0.03125, %v570_v51  ;;  %v779_v25 = vadd.f32 %v2034_v49, %v740_v11 }
 0x168   : > { %v595_v30 = vmul.f32 0.03125, %v525_v36  ;;  %1541 = vrsqrt.f32 %v641_v63  ;;  %v792_v20 = vpack.c.bf16 %v764_v28, %v763_v13  ;;  %v741_v39 = vmul.f32 %v2027_v26, %v702_v15 }
 0x169   : > { %v1532_v32 = vpop.eup %1531  ;;  %v642_v17 = vadd.f32 1e-05, %v610_v3  ;;  %v726_v34 = vmul.f32 %v2027_v26, %v687_v19 }
 0x16a   : > { %v627_v2 = vadd.f32 1e-05, %v595_v30  ;;  %v1534_v56 = vpop.eup %1533  ;;  %v688_v1 = vmul.f32 %v1532_v32, %v1909_v37  ;;  %v528_v53 = vpop.xlane.xlu1 %527  ;;  %1456 = vmatmul.mubr.msk.bf16.gmra.mrb[4].mxu0 %vm293_vm0, %v792_v20  ;;  %v780_v33 = vadd.f32 %v2034_v49, %v741_v39 }
 0x16b   : > { %v573_v41 = vpop.xlane.xlu0 %572  ;;  %v703_v18 = vmul.f32 %v1534_v56, %v1919_v38  ;;  %1543 = vrsqrt.f32 %v642_v17  ;;  %v596_v35 = vmul.f32 0.03125, %v528_v53  ;;  %v765_v62 = vadd.f32 %v2034_v49, %v726_v34 }
 0x16c   : > { %v611_v44 = vmul.f32 0.03125, %v573_v41  ;;  %1545 = vrsqrt.f32 %v627_v2  ;;  %v800_v4 = vpack.c.bf16 %v780_v33, %v779_v25  ;;  %v727_v45 = vmul.f32 %v2027_v26, %v688_v1 }
 0x16d   : > { %v1536_v37 = vpop.eup %1535  ;;  %v628_v54 = vadd.f32 1e-05, %v596_v35  ;;  %v742_v6 = vmul.f32 %v2027_v26, %v703_v18 }
 0x16e   : > { %v643_v16 = vadd.f32 1e-05, %v611_v44  ;;  %v1538_v22 = vpop.eup %1537  ;;  %v704_v61 = vmul.f32 %v1536_v37, %v1923_v42  ;;  %v576_v0 = vpop.xlane.xlu1 %575  ;;  %1472 = vmatmul.mubr.msk.bf16.gmra.mrb[4].mxu1 %vm293_vm0, %v800_v4  ;;  %v766_v38 = vadd.f32 %v2034_v49, %v727_v45 }
 0x16f   : > { %v531_v58 = vpop.xlane.xlu0 %530  ;;  %v689_v46 = vmul.f32 %v1538_v22, %v1933_v43  ;;  %1547 = vrsqrt.f32 %v628_v54  ;;  %v612_v50 = vmul.f32 0.03125, %v576_v0  ;;  %v781_v63 = vadd.f32 %v2034_v49, %v742_v6 }
 0x170   : > { %v597_v23 = vmul.f32 0.03125, %v531_v58  ;;  %1549 = vrsqrt.f32 %v643_v16  ;;  %v793_v29 = vpack.c.bf16 %v766_v38, %v765_v62  ;;  %v743_v59 = vmul.f32 %v2027_v26, %v704_v61 }
 0x171   : > { %v1540_v42 = vpop.eup %1539  ;;  %v644_v60 = vadd.f32 1e-05, %v612_v50  ;;  %v728_v55 = vmul.f32 %v2027_v26, %v689_v46 }
 0x172   : > { %v629_v7 = vadd.f32 1e-05, %v597_v23  ;;  %v1542_v12 = vpop.eup %1541  ;;  %v690_v21 = vmul.f32 %v1540_v42, %v1937_v47  ;;  %v534_v27 = vpop.xlane.xlu1 %533  ;;  %1459 = vmatprep.mubr.msk.bf16.mxu0 %vm293_vm0, %v793_v29  ;;  %v782_v43 = vadd.f32 %v2034_v49, %v743_v59 }
 0x173   : > { %v579_v9 = vpop.xlane.xlu0 %578  ;;  %v705_v15 = vmul.f32 %v1542_v12, %v1947_v48  ;;  %1551 = vrsqrt.f32 %v644_v60  ;;  %v598_v51 = vmul.f32 0.03125, %v534_v27  ;;  %v767_v39 = vadd.f32 %v2034_v49, %v728_v55 }
 0x174   : > { %v613_v36 = vmul.f32 0.03125, %v579_v9  ;;  %1553 = vrsqrt.f32 %v629_v7  ;;  %v801_v13 = vpack.c.bf16 %v782_v43, %v781_v63  ;;  %v729_v28 = vmul.f32 %v2027_v26, %v690_v21 }
 0x175   : > { %v1544_v47 = vpop.eup %1543  ;;  %v630_v11 = vadd.f32 1e-05, %v598_v51  ;;  %v744_v32 = vmul.f32 %v2027_v26, %v705_v15 }
 0x176   : > { %v645_v19 = vadd.f32 1e-05, %v613_v36  ;;  %v1546_v3 = vpop.eup %1545  ;;  %v706_v30 = vmul.f32 %v1544_v47, %v1951_v52  ;;  %v582_v20 = vpop.xlane.xlu1 %581  ;;  %1475 = vmatprep.mubr.msk.bf16.mxu1 %vm293_vm0, %v801_v13  ;;  %v768_v48 = vadd.f32 %v2034_v49, %v729_v28 }
 0x177   : > { %v691_v17 = vmul.f32 %v1546_v3, %v1964_v57  ;;  %1555 = vrsqrt.f32 %v630_v11  ;;  %v614_v2 = vmul.f32 0.03125, %v582_v20  ;;  %v783_v33 = vadd.f32 %v2034_v49, %v744_v32 }
 0x178   : > { %1557 = vrsqrt.f32 %v645_v19  ;;  %v794_v56 = vpack.c.bf16 %v768_v48, %v767_v39  ;;  %v745_v1 = vmul.f32 %v2027_v26, %v706_v30 }
 0x179   : > { %v1548_v53 = vpop.eup %1547  ;;  %v646_v41 = vadd.f32 1e-05, %v614_v2  ;;  %v730_v18 = vmul.f32 %v2027_v26, %v691_v17 }
 0x17a   : > { %v1550_v52 = vpop.eup %1549  ;;  %v692_v25 = vmul.f32 %v1548_v53, %v1968_v40  ;;  %1460 = vmatmul.mubr.msk.bf16.gmra.mrb[8].mxu0 %vm293_vm0, %v794_v56  ;;  %v784_v34 = vadd.f32 %v2034_v49, %v745_v1 }
 0x17b   : > { %v707_v57 = vmul.f32 %v1550_v52, %v1981_v5  ;;  %1559 = vrsqrt.f32 %v646_v41  ;;  %v769_v40 = vadd.f32 %v2034_v49, %v730_v18 }
 0x17c   : > { %v802_v35 = vpack.c.bf16 %v784_v34, %v783_v33  ;;  %v731_v44 = vmul.f32 %v2027_v26, %v692_v25 }
 0x17d   : > { %v1552_v4 = vpop.eup %1551  ;;  %v746_v16 = vmul.f32 %v2027_v26, %v707_v57 }
 0x17e   : > { %v1554_v45 = vpop.eup %1553  ;;  %v708_v37 = vmul.f32 %v1552_v4, %v1985_v31  ;;  %1476 = vmatmul.mubr.msk.bf16.gmra.mrb[8].mxu1 %vm293_vm0, %v802_v35  ;;  %v770_v54 = vadd.f32 %v2034_v49, %v731_v44 }
 0x17f   : > { %v693_v22 = vmul.f32 %v1554_v45, %v1995_v10  ;;  %v785_v31 = vadd.f32 %v2034_v49, %v746_v16 }
 0x180   : > { %v795_v61 = vpack.c.bf16 %v770_v54, %v769_v40  ;;  %v747_v5 = vmul.f32 %v2027_v26, %v708_v37 }
 0x181   : > { %v1556_v0 = vpop.eup %1555  ;;  %v732_v6 = vmul.f32 %v2027_v26, %v693_v22 }
 0x182   : > { %v1558_v58 = vpop.eup %1557  ;;  %v694_v62 = vmul.f32 %v1556_v0, %v1999_v8  ;;  %1463 = vmatprep.mubr.msk.bf16.mxu0 %vm293_vm0, %v795_v61  ;;  %v786_v38 = vadd.f32 %v2034_v49, %v747_v5 }
 0x183   : > { %v709_v46 = vmul.f32 %v1558_v58, %v2009_v14  ;;  %v771_v8 = vadd.f32 %v2034_v49, %v732_v6 }
 0x184   : > { %v803_v50 = vpack.c.bf16 %v786_v38, %v785_v31  ;;  %v733_v10 = vmul.f32 %v2027_v26, %v694_v62 }
 0x185   : > { %v1560_v23 = vpop.eup %1559  ;;  %v748_v42 = vmul.f32 %v2027_v26, %v709_v46 }
 0x186   : > { %v710_v29 = vmul.f32 %v1560_v23, %v2013_v24  ;;  %1479 = vmatprep.mubr.msk.bf16.mxu1 %vm293_vm0, %v803_v50  ;;  %v772_v59 = vadd.f32 %v2034_v49, %v733_v10  ;;  %v2148_v24 = vld [vmem:[%s2260_s4] ss:$0 sm:$0xff] }
 0x187   : > { %v787_v14 = vadd.f32 %v2034_v49, %v748_v42 }
 0x188   : > { %v796_v60 = vpack.c.bf16 %v772_v59, %v771_v8  ;;  %v749_v7 = vmul.f32 %v2027_v26, %v710_v29 }
 0x18a   : > { %1464 = vmatmul.mubr.msk.bf16.gmra.mrb[12].mxu0 %vm293_vm0, %v796_v60  ;;  %v788_v12 = vadd.f32 %v2034_v49, %v749_v7 }
 0x18c   : > { %v804_v21 = vpack.c.bf16 %v788_v12, %v787_v14 }
 0x18e   : > { %1480 = vmatmul.mubr.msk.bf16.gmra.mrb[12].mxu1 %vm293_vm0, %v804_v21 }
 0x22d   : > { %v1453_v27 = vpop.f32.mrb[0].mxu0 }
 0x22e   : > { %v919_v9 = vadd.f32 %v1453_v27, %v2148_v24  ;;  %v910_v63 = vpop.f32.mrb[1].mxu0 }
 0x22f   : > { %v911_v26 = vadd.f32 %v2148_v24, %v910_v63  ;;  %v1454_v49 = vpop.f32.mrb[2].mxu0 }
 0x230   : > { %v1320_v43 = vpack.c.bf16 %v919_v9, %v919_v9  ;;  %v922_v55 = vadd.f32 %v1454_v49, %v2148_v24  ;;  %v913_v15 = vpop.f32.mrb[3].mxu0 }
 0x231   : > { %v1318_v51 = vpack.c.bf16 %v911_v26, %v911_v26  ;;  %v914_v36 = vadd.f32 %v2148_v24, %v913_v15  ;;  %v1469_v13 = vpop.f32.mrb[0].mxu1 }
 0x232   : > { %1168 = vst.msk [vmem:[%s2156_s12 + $0x8] sm:$0xf] %vm1165_vm1, %v1320_v43  ;;  %v1321_v28 = vpack.c.bf16 %v922_v55, %v922_v55  ;;  %v983_v47 = vadd.f32 %v1469_v13, %v2148_v24  ;;  %v974_v11 = vpop.f32.mrb[1].mxu1 }
 0x233   : > { %1166 = vst.msk [vmem:[%s2156_s12] sm:$0xf] %vm1165_vm1, %v1318_v51  ;;  %v1319_v19 = vpack.c.bf16 %v914_v36, %v914_v36  ;;  %v975_v3 = vadd.f32 %v2148_v24, %v974_v11  ;;  %v1470_v30 = vpop.f32.mrb[2].mxu1 }
 0x234   : > { %1169 = vst.msk [vmem:[%s2156_s12 + $0xc] sm:$0xf] %vm1165_vm1, %v1321_v28  ;;  %v1336_v20 = vpack.c.bf16 %v983_v47, %v983_v47  ;;  %v986_v39 = vadd.f32 %v1470_v30, %v2148_v24  ;;  %v977_v48 = vpop.f32.mrb[3].mxu1 }
 0x235   : > { %1167 = vst.msk [vmem:[%s2156_s12 + $0x4] sm:$0xf] %vm1165_vm1, %v1319_v19  ;;  %v1334_v32 = vpack.c.bf16 %v975_v3, %v975_v3  ;;  %v978_v17 = vadd.f32 %v2148_v24, %v977_v48 }
 0x236   : > { %1184 = vst.msk [vmem:[%s2156_s12 + $0x48] sm:$0xf] %vm1165_vm1, %v1336_v20  ;;  %v1337_v2 = vpack.c.bf16 %v986_v39, %v986_v39 }
 0x237   : > { %1182 = vst.msk [vmem:[%s2156_s12 + $0x40] sm:$0xf] %vm1165_vm1, %v1334_v32  ;;  %v1335_v56 = vpack.c.bf16 %v978_v17, %v978_v17 }
 0x238   : > { %1185 = vst.msk [vmem:[%s2156_s12 + $0x4c] sm:$0xf] %vm1165_vm1, %v1337_v2 }
 0x239   : > { %1183 = vst.msk [vmem:[%s2156_s12 + $0x44] sm:$0xf] %vm1165_vm1, %v1335_v56 }
 0x23d   : > { %v1457_v1 = vpop.f32.mrb[4].mxu0 }
 0x23e   : > { %v935_v53 = vadd.f32 %v1457_v1, %v2148_v24  ;;  %v926_v41 = vpop.f32.mrb[5].mxu0 }
 0x23f   : > { %v927_v52 = vadd.f32 %v2148_v24, %v926_v41  ;;  %v1458_v25 = vpop.f32.mrb[6].mxu0 }
 0x240   : > { %v1324_v33 = vpack.c.bf16 %v935_v53, %v935_v53  ;;  %v938_v34 = vadd.f32 %v1458_v25, %v2148_v24  ;;  %v929_v18 = vpop.f32.mrb[7].mxu0 }
 0x241   : > { %v1322_v57 = vpack.c.bf16 %v927_v52, %v927_v52  ;;  %v930_v35 = vadd.f32 %v2148_v24, %v929_v18  ;;  %v1473_v44 = vpop.f32.mrb[4].mxu1 }
 0x242   : > { %1172 = vst.msk [vmem:[%s2156_s12 + $0x18] sm:$0xf] %vm1165_vm1, %v1324_v33  ;;  %v1325_v4 = vpack.c.bf16 %v938_v34, %v938_v34  ;;  %v999_v45 = vadd.f32 %v1473_v44, %v2148_v24  ;;  %v990_v37 = vpop.f32.mrb[5].mxu1 }
 0x243   : > { %1170 = vst.msk [vmem:[%s2156_s12 + $0x10] sm:$0xf] %vm1165_vm1, %v1322_v57  ;;  %v1323_v40 = vpack.c.bf16 %v930_v35, %v930_v35  ;;  %v991_v54 = vadd.f32 %v2148_v24, %v990_v37  ;;  %v1474_v16 = vpop.f32.mrb[6].mxu1 }
 0x244   : > { %1173 = vst.msk [vmem:[%s2156_s12 + $0x1c] sm:$0xf] %vm1165_vm1, %v1325_v4  ;;  %v1340_v22 = vpack.c.bf16 %v999_v45, %v999_v45  ;;  %v1002_v61 = vadd.f32 %v1474_v16, %v2148_v24  ;;  %v993_v5 = vpop.f32.mrb[7].mxu1 }
 0x245   : > { %1171 = vst.msk [vmem:[%s2156_s12 + $0x14] sm:$0xf] %vm1165_vm1, %v1323_v40  ;;  %v1338_v0 = vpack.c.bf16 %v991_v54, %v991_v54  ;;  %v994_v58 = vadd.f32 %v2148_v24, %v993_v5 }
 0x246   : > { %1188 = vst.msk [vmem:[%s2156_s12 + $0x58] sm:$0xf] %vm1165_vm1, %v1340_v22  ;;  %v1341_v62 = vpack.c.bf16 %v1002_v61, %v1002_v61 }
 0x247   : > { %1186 = vst.msk [vmem:[%s2156_s12 + $0x50] sm:$0xf] %vm1165_vm1, %v1338_v0  ;;  %v1339_v31 = vpack.c.bf16 %v994_v58, %v994_v58 }
 0x248   : > { %1189 = vst.msk [vmem:[%s2156_s12 + $0x5c] sm:$0xf] %vm1165_vm1, %v1341_v62 }
 0x249   : > { %1187 = vst.msk [vmem:[%s2156_s12 + $0x54] sm:$0xf] %vm1165_vm1, %v1339_v31 }
 0x24d   : > { %v1461_v38 = vpop.f32.mrb[8].mxu0 }
 0x24e   : > { %v951_v6 = vadd.f32 %v1461_v38, %v2148_v24  ;;  %v942_v46 = vpop.f32.mrb[9].mxu0 }
 0x24f   : > { %v943_v50 = vadd.f32 %v2148_v24, %v942_v46  ;;  %v1462_v10 = vpop.f32.mrb[10].mxu0 }
 0x250   : > { %v1328_v23 = vpack.c.bf16 %v951_v6, %v951_v6  ;;  %v954_v29 = vadd.f32 %v1462_v10, %v2148_v24  ;;  %v945_v8 = vpop.f32.mrb[11].mxu0 }
 0x251   : > { %v1326_v59 = vpack.c.bf16 %v943_v50, %v943_v50  ;;  %v946_v42 = vadd.f32 %v2148_v24, %v945_v8  ;;  %v1477_v60 = vpop.f32.mrb[8].mxu1 }
 0x252   : > { %1176 = vst.msk [vmem:[%s2156_s12 + $0x28] sm:$0xf] %vm1165_vm1, %v1328_v23  ;;  %v1329_v7 = vpack.c.bf16 %v954_v29, %v954_v29  ;;  %v1015_v14 = vadd.f32 %v1477_v60, %v2148_v24  ;;  %v1006_v12 = vpop.f32.mrb[9].mxu1 }
 0x253   : > { %1174 = vst.msk [vmem:[%s2156_s12 + $0x20] sm:$0xf] %vm1165_vm1, %v1326_v59  ;;  %v1327_v21 = vpack.c.bf16 %v946_v42, %v946_v42  ;;  %v1007_v27 = vadd.f32 %v2148_v24, %v1006_v12  ;;  %v1478_v9 = vpop.f32.mrb[10].mxu1 }
 0x254   : > { %1177 = vst.msk [vmem:[%s2156_s12 + $0x2c] sm:$0xf] %vm1165_vm1, %v1329_v7  ;;  %v1344_v63 = vpack.c.bf16 %v1015_v14, %v1015_v14  ;;  %v1018_v26 = vadd.f32 %v1478_v9, %v2148_v24  ;;  %v1009_v49 = vpop.f32.mrb[11].mxu1 }
 0x255   : > { %1175 = vst.msk [vmem:[%s2156_s12 + $0x24] sm:$0xf] %vm1165_vm1, %v1327_v21  ;;  %v1342_v43 = vpack.c.bf16 %v1007_v27, %v1007_v27  ;;  %v1010_v55 = vadd.f32 %v2148_v24, %v1009_v49 }
 0x256   : > { %1192 = vst.msk [vmem:[%s2156_s12 + $0x68] sm:$0xf] %vm1165_vm1, %v1344_v63  ;;  %v1345_v15 = vpack.c.bf16 %v1018_v26, %v1018_v26 }
 0x257   : > { %1190 = vst.msk [vmem:[%s2156_s12 + $0x60] sm:$0xf] %vm1165_vm1, %v1342_v43  ;;  %v1343_v51 = vpack.c.bf16 %v1010_v55, %v1010_v55 }
 0x258   : > { %1193 = vst.msk [vmem:[%s2156_s12 + $0x6c] sm:$0xf] %vm1165_vm1, %v1345_v15 }
 0x259   : > { %1191 = vst.msk [vmem:[%s2156_s12 + $0x64] sm:$0xf] %vm1165_vm1, %v1343_v51 }
 0x25d   : > { %v1465_v36 = vpop.f32.mrb[12].mxu0 }
 0x25e   : > { %v967_v13 = vadd.f32 %v1465_v36, %v2148_v24  ;;  %v958_v28 = vpop.f32.mrb[13].mxu0 }
 0x25f   : > { %v959_v47 = vadd.f32 %v2148_v24, %v958_v28  ;;  %v1466_v11 = vpop.f32.mrb[14].mxu0 }
 0x260   : > { %v1332_v19 = vpack.c.bf16 %v967_v13, %v967_v13  ;;  %v970_v3 = vadd.f32 %v1466_v11, %v2148_v24  ;;  %v961_v30 = vpop.f32.mrb[15].mxu0 }
 0x261   : > { %v1330_v20 = vpack.c.bf16 %v959_v47, %v959_v47  ;;  %v962_v39 = vadd.f32 %v2148_v24, %v961_v30  ;;  %v1481_v48 = vpop.f32.mrb[12].mxu1 }
 0x262   : > { %1180 = vst.msk [vmem:[%s2156_s12 + $0x38] sm:$0xf] %vm1165_vm1, %v1332_v19  ;;  %v1333_v32 = vpack.c.bf16 %v970_v3, %v970_v3  ;;  %v1031_v17 = vadd.f32 %v1481_v48, %v2148_v24  ;;  %v1022_v2 = vpop.f32.mrb[13].mxu1 }
 0x263   : > { %1178 = vst.msk [vmem:[%s2156_s12 + $0x30] sm:$0xf] %vm1165_vm1, %v1330_v20  ;;  %v1331_v56 = vpack.c.bf16 %v962_v39, %v962_v39  ;;  %v1023_v1 = vadd.f32 %v2148_v24, %v1022_v2  ;;  %v1482_v53 = vpop.f32.mrb[14].mxu1 }
 0x264   : > { %1181 = vst.msk [vmem:[%s2156_s12 + $0x3c] sm:$0xf] %vm1165_vm1, %v1333_v32  ;;  %v1348_v41 = vpack.c.bf16 %v1031_v17, %v1031_v17  ;;  %v1034_v52 = vadd.f32 %v1482_v53, %v2148_v24  ;;  %v1025_v25 = vpop.f32.mrb[15].mxu1 }
 0x265   : > { %1179 = vst.msk [vmem:[%s2156_s12 + $0x34] sm:$0xf] %vm1165_vm1, %v1331_v56  ;;  %v1346_v33 = vpack.c.bf16 %v1023_v1, %v1023_v1  ;;  %v1026_v34 = vadd.f32 %v2148_v24, %v1025_v25 }
 0x266   : > { %1196 = vst.msk [vmem:[%s2156_s12 + $0x78] sm:$0xf] %vm1165_vm1, %v1348_v41  ;;  %v1349_v18 = vpack.c.bf16 %v1034_v52, %v1034_v52 }
 0x267   : > { %1194 = vst.msk [vmem:[%s2156_s12 + $0x70] sm:$0xf] %vm1165_vm1, %v1346_v33  ;;  %v1347_v57 = vpack.c.bf16 %v1026_v34, %v1026_v34 }
 0x268   : > { %1197 = vst.msk [vmem:[%s2156_s12 + $0x7c] sm:$0xf] %vm1165_vm1, %v1349_v18 }
 0x269   : > { %1195 = vst.msk [vmem:[%s2156_s12 + $0x74] sm:$0xf] %vm1165_vm1, %v1347_v57 }
 0x26a PF: > { %s15_s18 = sadd.s32 1, %s1567_s18  }
 0x26b   : > { %p12_p4 = scmp.ge.s32.totalorder %s15_s18, 4  }
 0x26d   :  { %14 = sbr.rel (!%p12_p4) target bundleno = 1 (0x1), region = 70 }

// kernel: fwd.20
= control target key start
LH: loop header
LB: loop body
LE: loop exit
PB: predicated region body
PF: predicated region fallthrough
CT: control target
= control target key end

     0   :  { %s1202_s15 = smov 0   ;;  %s1388_s0 = inlined_call_operand.vmem [shape: bf16[512,32], index: 0, kind: input, shape index: {}]   ;;  %s1389_s1 = inlined_call_operand.vmem [shape: bf16[32,32], index: 1, kind: input, shape index: {}]   ;;  %s1390_s2 = inlined_call_operand.vmem [shape: f32[1,32], index: 2, kind: input, shape index: {}]   ;;  %s1391_s3 = inlined_call_operand.vmem [shape: bf16[512,32], index: 3, kind: input, shape index: {}]   ;;  %s1392_s4 = inlined_call_operand.vmem [shape: bf16[512,32], index: 4, kind: output, shape index: {}]  }
   0x1 LB: > { %s894_s16 = sadd.s32 4294967295, %s1175_s15   ;;  %p898_p0 = scmp.ge.s32.totalorder %s1175_s15, 1  ;;  %s1175_s15 = sphi %s1202_s15, %s14_s15  }
   0x2   : > { %p174_p1 = scmp.lt.s32.totalorder %s1175_s15, 3 }
   0x4   : > { %p175_p2 = pnand %p898_p0, %p174_p1 }
   0x5   : > { %v1151_v0 = vld [vmem:[%s1389_s1] sm:$0xff] (!%p175_p2)   ;;  %s899_s19 = sshll.u32 (!%p175_p2), %s894_s16, 5  ;;  %v1152_v1 = vld [vmem:[%s1389_s1 + $0x8] sm:$0xff] (!%p175_p2)   ;;  %vm359_vm0 = vcmask (!%p175_p2), 261120   ;;  %vm793_vm1 = vcmask (!%p175_p2), 257024  }
   0x6   : > { %178 = sbr.rel (%p175_p2) target bundleno = 265 (0x109), region = 36  ;;  %p206_p3 = scmp.lt.s32.totalorder (!%p175_p2), %s899_s19, 63  ;;  %1103 = vmatprep.subr.bf16.mxu0 (!%p175_p2), %v1151_v0  ;;  %1139 = vmatprep.subr.bf16.mxu1 (!%p175_p2), %v1151_v0  ;;  %v1268_v21 = vld [vmem:[%s1390_s2] ss:$0 sm:$0xff] (!%p175_p2) }
   0x7   : > { %1104 = vmatpush3.bf16.msra.mxu0 (!%p175_p2), %v1151_v0  ;;  %1141 = vmatpush3.bf16.msra.mxu1 (!%p175_p2), %v1151_v0 }
   0x8   : > { %1105 = vmatprep.subr.bf16.mxu0 (!%p175_p2), %v1152_v1  ;;  %1140 = vmatprep.subr.bf16.mxu1 (!%p175_p2), %v1152_v1 }
   0xb   : > { %1106 = vmatpush3.bf16.msra.mxu0 (!%p175_p2), %v1152_v1  ;;  %1142 = vmatpush3.bf16.msra.mxu1 (!%p175_p2), %v1152_v1 }
   0xd   : > { %s1394_s19 = smov (!%p206_p3, %s899_s19), 63 }
   0xe   : > { %s1216_s22 = sshll.u32 %s1394_s19, 2 }
   0xf   : > { %s1222_s25 = scalar_lea.vmem %s1388_s0, %s1216_s22  ;;  %s1260_s28 = scalar_lea.vmem %s1391_s3, %s1216_s22 }
  0x10   : > { %v1153_v2 = vld [vmem:[%s1222_s25] sm:$0xff]   ;;  %v1155_v4 = vld [vmem:[%s1222_s25 + $0x8] sm:$0xff]   ;;  %v1157_v6 = vld [vmem:[%s1222_s25 + $0x10] sm:$0xff]   ;;  %s1280_s7 = scalar_lea.vmem %s1392_s4, %s1216_s22 }
  0x11   : > { %v1154_v3 = vld [vmem:[%s1222_s25 + $0x40] sm:$0xff]   ;;  %1107 = vmatprep.mubr.msk.bf16.mxu0 %vm359_vm0, %v1153_v2  ;;  %v1156_v5 = vld [vmem:[%s1222_s25 + $0x48] sm:$0xff]   ;;  %v1158_v7 = vld [vmem:[%s1222_s25 + $0x50] sm:$0xff]  }
  0x12   : > { %1123 = vmatprep.mubr.msk.bf16.mxu1 %vm359_vm0, %v1154_v3  ;;  %1108 = vmatmul.mubr.msk.bf16.vlgmr.msra.gmra.mrb[0].mxu0 %vm359_vm0, %v1155_v4  ;;  %v1159_v8 = vld [vmem:[%s1222_s25 + $0x18] sm:$0xff]   ;;  %v1161_v10 = vld [vmem:[%s1222_s25 + $0x20] sm:$0xff]   ;;  %v1163_v12 = vld [vmem:[%s1222_s25 + $0x28] sm:$0xff]  }
  0x13   : > { %1124 = vmatmul.mubr.msk.bf16.vlgmr.msra.gmra.mrb[0].mxu1 %vm359_vm0, %v1156_v5  ;;  %1111 = vmatprep.mubr.msk.bf16.mxu0 %vm359_vm0, %v1157_v6  ;;  %v1160_v9 = vld [vmem:[%s1222_s25 + $0x58] sm:$0xff]   ;;  %v1162_v11 = vld [vmem:[%s1222_s25 + $0x60] sm:$0xff]   ;;  %v1164_v13 = vld [vmem:[%s1222_s25 + $0x68] sm:$0xff]  }
  0x14   : > { %1127 = vmatprep.mubr.msk.bf16.mxu1 %vm359_vm0, %v1158_v7  ;;  %v1165_v14 = vld [vmem:[%s1222_s25 + $0x30] sm:$0xff]   ;;  %v1167_v16 = vld [vmem:[%s1222_s25 + $0x38] sm:$0xff]   ;;  %v1070_v18 = vld [vmem:[%s1260_s28 + $0x8] sm:$0xff]  }
  0x15   : > { %v1166_v15 = vld [vmem:[%s1222_s25 + $0x70] sm:$0xff]   ;;  %v1168_v17 = vld [vmem:[%s1222_s25 + $0x78] sm:$0xff]   ;;  %v1078_v19 = vld [vmem:[%s1260_s28 + $0x48] sm:$0xff]   ;;  %v1012_v23 = vunpack.c.l.bf16 %v1070_v18  ;;  %v1013_v31 = vunpack.c.h.bf16 %v1070_v18 }
  0x16   : > { %v1007_v20 = vld [vmem:[%s1260_s28] sm:$0xff]   ;;  %v1044_v25 = vunpack.c.l.bf16 %v1078_v19  ;;  %v1045_v32 = vunpack.c.h.bf16 %v1078_v19  ;;  %v1072_v49 = vld [vmem:[%s1260_s28 + $0x18] sm:$0xff]   ;;  %v1071_v55 = vld [vmem:[%s1260_s28 + $0x10] sm:$0xff]  }
  0x17   : > { %v1077_v22 = vld [vmem:[%s1260_s28 + $0x40] sm:$0xff]   ;;  %v1008_v26 = vunpack.c.l.bf16 %v1007_v20  ;;  %v1009_v37 = vunpack.c.h.bf16 %v1007_v20  ;;  %v1080_v54 = vld [vmem:[%s1260_s28 + $0x58] sm:$0xff]   ;;  %v1079_v60 = vld [vmem:[%s1260_s28 + $0x50] sm:$0xff]   ;;  %v1020_v0 = vunpack.c.l.bf16 %v1072_v49  ;;  %v1016_v5 = vunpack.c.l.bf16 %v1071_v55 }
  0x18   : > { %v1040_v30 = vunpack.c.l.bf16 %v1077_v22  ;;  %v1041_v43 = vunpack.c.h.bf16 %v1077_v22  ;;  %v1052_v4 = vunpack.c.l.bf16 %v1080_v54 }
  0x1a   : > { %1112 = vmatmul.mubr.msk.bf16.gmra.mrb[4].mxu0 %vm359_vm0, %v1159_v8 }
  0x1b   : > { %1128 = vmatmul.mubr.msk.bf16.gmra.mrb[4].mxu1 %vm359_vm0, %v1160_v9  ;;  %1115 = vmatprep.mubr.msk.bf16.mxu0 %vm359_vm0, %v1161_v10  ;;  %v1048_v10 = vunpack.c.l.bf16 %v1079_v60 }
  0x1c   : > { %1131 = vmatprep.mubr.msk.bf16.mxu1 %vm359_vm0, %v1162_v11  ;;  %v1021_v11 = vunpack.c.h.bf16 %v1072_v49 }
  0x22   : > { %1116 = vmatmul.mubr.msk.bf16.gmra.mrb[8].mxu0 %vm359_vm0, %v1163_v12 }
  0x23   : > { %1132 = vmatmul.mubr.msk.bf16.gmra.mrb[8].mxu1 %vm359_vm0, %v1164_v13  ;;  %1119 = vmatprep.mubr.msk.bf16.mxu0 %vm359_vm0, %v1165_v14 }
  0x24   : > { %1135 = vmatprep.mubr.msk.bf16.mxu1 %vm359_vm0, %v1166_v15 }
  0x2a   : > { %1120 = vmatmul.mubr.msk.bf16.gmra.mrb[12].mxu0 %vm359_vm0, %v1167_v16  ;;  %v1053_v16 = vunpack.c.h.bf16 %v1080_v54 }
  0x2b   : > { %1136 = vmatmul.mubr.msk.bf16.gmra.mrb[12].mxu1 %vm359_vm0, %v1168_v17  ;;  %v1017_v17 = vunpack.c.h.bf16 %v1071_v55 }
  0xe5   : > { %v1109_v24 = vpop.f32.mrb[0].mxu0 }
  0xe6   : > { %v451_v27 = vadd.f32 %v1109_v24, %v1268_v21  ;;  %v1125_v28 = vpop.f32.mrb[0].mxu1  ;;  %v442_v29 = vpop.f32.mrb[1].mxu0  ;;  %v1049_v24 = vunpack.c.h.bf16 %v1079_v60 }
  0xe7   : > { %v515_v33 = vadd.f32 %v1125_v28, %v1268_v21  ;;  %v443_v34 = vadd.f32 %v1268_v21, %v442_v29  ;;  %v506_v35 = vpop.f32.mrb[1].mxu1  ;;  %v1110_v36 = vpop.f32.mrb[2].mxu0 }
  0xe8   : > { %v635_v38 = vadd.f32 %v1012_v23, %v451_v27  ;;  %v507_v39 = vadd.f32 %v1268_v21, %v506_v35  ;;  %v454_v40 = vadd.f32 %v1110_v36, %v1268_v21  ;;  %v1126_v41 = vpop.f32.mrb[2].mxu1  ;;  %v445_v42 = vpop.f32.mrb[3].mxu0  ;;  %v1082_v35 = vld [vmem:[%s1260_s28 + $0x68] sm:$0xff]   ;;  %v1073_v36 = vld [vmem:[%s1260_s28 + $0x20] sm:$0xff]  }
  0xe9   : > { %v651_v44 = vadd.f32 %v1044_v25, %v515_v33  ;;  %v633_v45 = vadd.f32 %v1008_v26, %v443_v34  ;;  %v518_v46 = vadd.f32 %v1126_v41, %v1268_v21  ;;  %v446_v47 = vadd.f32 %v1268_v21, %v445_v42  ;;  %v509_v48 = vpop.f32.mrb[3].mxu1  ;;  %v1081_v41 = vld [vmem:[%s1260_s28 + $0x60] sm:$0xff]  }
  0xea   : > { %v976_v50 = vpack.c.bf16 %v635_v38, %v635_v38  ;;  %v649_v51 = vadd.f32 %v1040_v30, %v507_v39  ;;  %v636_v52 = vadd.f32 %v1013_v31, %v454_v40  ;;  %v510_v53 = vadd.f32 %v1268_v21, %v509_v48  ;;  %v1074_v30 = vld [vmem:[%s1260_s28 + $0x28] sm:$0xff]  }
  0xeb   : > { %v992_v56 = vpack.c.bf16 %v651_v44, %v651_v44  ;;  %v974_v57 = vpack.c.bf16 %v633_v45, %v633_v45  ;;  %v652_v58 = vadd.f32 %v1045_v32, %v518_v46  ;;  %v634_v59 = vadd.f32 %v1009_v37, %v446_v47 }
  0xec   : > { %796 = vst.msk [vmem:[%s1280_s7 + $0x8] sm:$0xf] %vm793_vm1, %v976_v50  ;;  %v990_v61 = vpack.c.bf16 %v649_v51, %v649_v51  ;;  %v977_v62 = vpack.c.bf16 %v636_v52, %v636_v52  ;;  %v650_v63 = vadd.f32 %v1041_v43, %v510_v53  ;;  %v1028_v45 = vunpack.c.l.bf16 %v1074_v30 }
  0xed   : > { %812 = vst.msk [vmem:[%s1280_s7 + $0x48] sm:$0xf] %vm793_vm1, %v992_v56  ;;  %794 = vst.msk [vmem:[%s1280_s7] sm:$0xf] %vm793_vm1, %v974_v57  ;;  %v993_v1 = vpack.c.bf16 %v652_v58, %v652_v58  ;;  %v975_v2 = vpack.c.bf16 %v634_v59, %v634_v59  ;;  %v1113_v3 = vpop.f32.mrb[4].mxu0  ;;  %v1060_v49 = vunpack.c.l.bf16 %v1082_v35  ;;  %v1024_v50 = vunpack.c.l.bf16 %v1073_v36 }
  0xee   : > { %810 = vst.msk [vmem:[%s1280_s7 + $0x40] sm:$0xf] %vm793_vm1, %v990_v61  ;;  %797 = vst.msk [vmem:[%s1280_s7 + $0xc] sm:$0xf] %vm793_vm1, %v977_v62  ;;  %v991_v6 = vpack.c.bf16 %v650_v63, %v650_v63  ;;  %v467_v7 = vadd.f32 %v1113_v3, %v1268_v21  ;;  %v1129_v8 = vpop.f32.mrb[4].mxu1  ;;  %v458_v9 = vpop.f32.mrb[5].mxu0  ;;  %v1056_v55 = vunpack.c.l.bf16 %v1081_v41  ;;  %v1029_v56 = vunpack.c.h.bf16 %v1074_v30 }
  0xef   : > { %813 = vst.msk [vmem:[%s1280_s7 + $0x4c] sm:$0xf] %vm793_vm1, %v993_v1  ;;  %795 = vst.msk [vmem:[%s1280_s7 + $0x4] sm:$0xf] %vm793_vm1, %v975_v2  ;;  %v531_v12 = vadd.f32 %v1129_v8, %v1268_v21  ;;  %v459_v13 = vadd.f32 %v1268_v21, %v458_v9  ;;  %v522_v14 = vpop.f32.mrb[5].mxu1  ;;  %v1114_v15 = vpop.f32.mrb[6].mxu0  ;;  %v1061_v61 = vunpack.c.h.bf16 %v1082_v35  ;;  %v1025_v62 = vunpack.c.h.bf16 %v1073_v36 }
  0xf0   : > { %811 = vst.msk [vmem:[%s1280_s7 + $0x44] sm:$0xf] %vm793_vm1, %v991_v6  ;;  %v639_v18 = vadd.f32 %v1020_v0, %v467_v7  ;;  %v523_v19 = vadd.f32 %v1268_v21, %v522_v14  ;;  %v470_v20 = vadd.f32 %v1114_v15, %v1268_v21  ;;  %v1130_v22 = vpop.f32.mrb[6].mxu1  ;;  %v461_v23 = vpop.f32.mrb[7].mxu0  ;;  %v1084_v15 = vld [vmem:[%s1260_s28 + $0x78] sm:$0xff]  }
  0xf1   : > { %v655_v25 = vadd.f32 %v1052_v4, %v531_v12  ;;  %v637_v26 = vadd.f32 %v1016_v5, %v459_v13  ;;  %v534_v27 = vadd.f32 %v1130_v22, %v1268_v21  ;;  %v462_v28 = vadd.f32 %v1268_v21, %v461_v23  ;;  %v525_v29 = vpop.f32.mrb[7].mxu1  ;;  %v1083_v22 = vld [vmem:[%s1260_s28 + $0x70] sm:$0xff]  }
  0xf2   : > { %v980_v31 = vpack.c.bf16 %v639_v18, %v639_v18  ;;  %v653_v32 = vadd.f32 %v1048_v10, %v523_v19  ;;  %v640_v33 = vadd.f32 %v1021_v11, %v470_v20  ;;  %v526_v34 = vadd.f32 %v1268_v21, %v525_v29  ;;  %v1076_v10 = vld [vmem:[%s1260_s28 + $0x38] sm:$0xff]  }
  0xf3   : > { %v996_v37 = vpack.c.bf16 %v655_v25, %v655_v25  ;;  %v978_v38 = vpack.c.bf16 %v637_v26, %v637_v26  ;;  %v656_v39 = vadd.f32 %v1053_v16, %v534_v27  ;;  %v638_v40 = vadd.f32 %v1017_v17, %v462_v28  ;;  %v1075_v16 = vld [vmem:[%s1260_s28 + $0x30] sm:$0xff]  }
  0xf4   : > { %800 = vst.msk [vmem:[%s1280_s7 + $0x18] sm:$0xf] %vm793_vm1, %v980_v31  ;;  %v994_v42 = vpack.c.bf16 %v653_v32, %v653_v32  ;;  %v981_v43 = vpack.c.bf16 %v640_v33, %v640_v33  ;;  %v654_v44 = vadd.f32 %v1049_v24, %v526_v34  ;;  %v1057_v4 = vunpack.c.h.bf16 %v1081_v41 }
  0xf5   : > { %816 = vst.msk [vmem:[%s1280_s7 + $0x58] sm:$0xf] %vm793_vm1, %v996_v37  ;;  %798 = vst.msk [vmem:[%s1280_s7 + $0x10] sm:$0xf] %vm793_vm1, %v978_v38  ;;  %v997_v46 = vpack.c.bf16 %v656_v39, %v656_v39  ;;  %v979_v47 = vpack.c.bf16 %v638_v40, %v638_v40  ;;  %v1117_v48 = vpop.f32.mrb[8].mxu0  ;;  %v1036_v26 = vunpack.c.l.bf16 %v1076_v10  ;;  %v1068_v30 = vunpack.c.l.bf16 %v1084_v15 }
  0xf6   : > { %814 = vst.msk [vmem:[%s1280_s7 + $0x50] sm:$0xf] %vm793_vm1, %v994_v42  ;;  %801 = vst.msk [vmem:[%s1280_s7 + $0x1c] sm:$0xf] %vm793_vm1, %v981_v43  ;;  %v995_v51 = vpack.c.bf16 %v654_v44, %v654_v44  ;;  %v483_v52 = vadd.f32 %v1117_v48, %v1268_v21  ;;  %v1133_v53 = vpop.f32.mrb[8].mxu1  ;;  %v474_v54 = vpop.f32.mrb[9].mxu0  ;;  %v1032_v31 = vunpack.c.l.bf16 %v1075_v16  ;;  %v1064_v36 = vunpack.c.l.bf16 %v1083_v22 }
  0xf7   : > { %817 = vst.msk [vmem:[%s1280_s7 + $0x5c] sm:$0xf] %vm793_vm1, %v997_v46  ;;  %799 = vst.msk [vmem:[%s1280_s7 + $0x14] sm:$0xf] %vm793_vm1, %v979_v47  ;;  %v547_v57 = vadd.f32 %v1133_v53, %v1268_v21  ;;  %v475_v58 = vadd.f32 %v1268_v21, %v474_v54  ;;  %v538_v59 = vpop.f32.mrb[9].mxu1  ;;  %v1118_v60 = vpop.f32.mrb[10].mxu0  ;;  %v1037_v37 = vunpack.c.h.bf16 %v1076_v10  ;;  %v1069_v42 = vunpack.c.h.bf16 %v1084_v15 }
  0xf8   : > { %815 = vst.msk [vmem:[%s1280_s7 + $0x54] sm:$0xf] %vm793_vm1, %v995_v51  ;;  %v643_v63 = vadd.f32 %v1028_v45, %v483_v52  ;;  %v539_v0 = vadd.f32 %v1268_v21, %v538_v59  ;;  %v486_v1 = vadd.f32 %v1118_v60, %v1268_v21  ;;  %v1134_v2 = vpop.f32.mrb[10].mxu1  ;;  %v477_v3 = vpop.f32.mrb[11].mxu0  ;;  %v1033_v43 = vunpack.c.h.bf16 %v1075_v16 }
  0xf9   : > { %v659_v5 = vadd.f32 %v1060_v49, %v547_v57  ;;  %v641_v6 = vadd.f32 %v1024_v50, %v475_v58  ;;  %v550_v7 = vadd.f32 %v1134_v2, %v1268_v21  ;;  %v478_v8 = vadd.f32 %v1268_v21, %v477_v3  ;;  %v541_v9 = vpop.f32.mrb[11].mxu1 }
  0xfa   : > { %v984_v11 = vpack.c.bf16 %v643_v63, %v643_v63  ;;  %v657_v12 = vadd.f32 %v1056_v55, %v539_v0  ;;  %v644_v13 = vadd.f32 %v1029_v56, %v486_v1  ;;  %v542_v14 = vadd.f32 %v1268_v21, %v541_v9 }
  0xfb   : > { %v1000_v17 = vpack.c.bf16 %v659_v5, %v659_v5  ;;  %v982_v18 = vpack.c.bf16 %v641_v6, %v641_v6  ;;  %v660_v19 = vadd.f32 %v1061_v61, %v550_v7  ;;  %v642_v20 = vadd.f32 %v1025_v62, %v478_v8 }
  0xfc   : > { %804 = vst.msk [vmem:[%s1280_s7 + $0x28] sm:$0xf] %vm793_vm1, %v984_v11  ;;  %v998_v23 = vpack.c.bf16 %v657_v12, %v657_v12  ;;  %v985_v24 = vpack.c.bf16 %v644_v13, %v644_v13  ;;  %v658_v25 = vadd.f32 %v1057_v4, %v542_v14  ;;  %v1065_v49 = vunpack.c.h.bf16 %v1083_v22 }
  0xfd   : > { %820 = vst.msk [vmem:[%s1280_s7 + $0x68] sm:$0xf] %vm793_vm1, %v1000_v17  ;;  %802 = vst.msk [vmem:[%s1280_s7 + $0x20] sm:$0xf] %vm793_vm1, %v982_v18  ;;  %v1001_v27 = vpack.c.bf16 %v660_v19, %v660_v19  ;;  %v983_v28 = vpack.c.bf16 %v642_v20, %v642_v20  ;;  %v1121_v29 = vpop.f32.mrb[12].mxu0 }
  0xfe   : > { %818 = vst.msk [vmem:[%s1280_s7 + $0x60] sm:$0xf] %vm793_vm1, %v998_v23  ;;  %805 = vst.msk [vmem:[%s1280_s7 + $0x2c] sm:$0xf] %vm793_vm1, %v985_v24  ;;  %v999_v32 = vpack.c.bf16 %v658_v25, %v658_v25  ;;  %v499_v33 = vadd.f32 %v1121_v29, %v1268_v21  ;;  %v1137_v34 = vpop.f32.mrb[12].mxu1  ;;  %v490_v35 = vpop.f32.mrb[13].mxu0 }
  0xff   : > { %821 = vst.msk [vmem:[%s1280_s7 + $0x6c] sm:$0xf] %vm793_vm1, %v1001_v27  ;;  %803 = vst.msk [vmem:[%s1280_s7 + $0x24] sm:$0xf] %vm793_vm1, %v983_v28  ;;  %v563_v38 = vadd.f32 %v1137_v34, %v1268_v21  ;;  %v491_v39 = vadd.f32 %v1268_v21, %v490_v35  ;;  %v554_v40 = vpop.f32.mrb[13].mxu1  ;;  %v1122_v41 = vpop.f32.mrb[14].mxu0 }
 0x100   : > { %819 = vst.msk [vmem:[%s1280_s7 + $0x64] sm:$0xf] %vm793_vm1, %v999_v32  ;;  %v647_v44 = vadd.f32 %v1036_v26, %v499_v33  ;;  %v555_v45 = vadd.f32 %v1268_v21, %v554_v40  ;;  %v502_v46 = vadd.f32 %v1122_v41, %v1268_v21  ;;  %v1138_v47 = vpop.f32.mrb[14].mxu1  ;;  %v493_v48 = vpop.f32.mrb[15].mxu0 }
 0x101   : > { %v663_v50 = vadd.f32 %v1068_v30, %v563_v38  ;;  %v645_v51 = vadd.f32 %v1032_v31, %v491_v39  ;;  %v566_v52 = vadd.f32 %v1138_v47, %v1268_v21  ;;  %v494_v53 = vadd.f32 %v1268_v21, %v493_v48  ;;  %v557_v54 = vpop.f32.mrb[15].mxu1 }
 0x102   : > { %v988_v55 = vpack.c.bf16 %v647_v44, %v647_v44  ;;  %v661_v56 = vadd.f32 %v1064_v36, %v555_v45  ;;  %v648_v57 = vadd.f32 %v1037_v37, %v502_v46  ;;  %v558_v58 = vadd.f32 %v1268_v21, %v557_v54 }
 0x103   : > { %v1004_v59 = vpack.c.bf16 %v663_v50, %v663_v50  ;;  %v986_v60 = vpack.c.bf16 %v645_v51, %v645_v51  ;;  %v664_v61 = vadd.f32 %v1069_v42, %v566_v52  ;;  %v646_v62 = vadd.f32 %v1033_v43, %v494_v53 }
 0x104   : > { %808 = vst.msk [vmem:[%s1280_s7 + $0x38] sm:$0xf] %vm793_vm1, %v988_v55  ;;  %v1002_v63 = vpack.c.bf16 %v661_v56, %v661_v56  ;;  %v989_v0 = vpack.c.bf16 %v648_v57, %v648_v57  ;;  %v662_v1 = vadd.f32 %v1065_v49, %v558_v58 }
 0x105   : > { %824 = vst.msk [vmem:[%s1280_s7 + $0x78] sm:$0xf] %vm793_vm1, %v1004_v59  ;;  %806 = vst.msk [vmem:[%s1280_s7 + $0x30] sm:$0xf] %vm793_vm1, %v986_v60  ;;  %v1005_v2 = vpack.c.bf16 %v664_v61, %v664_v61  ;;  %v987_v3 = vpack.c.bf16 %v646_v62, %v646_v62 }
 0x106   : > { %822 = vst.msk [vmem:[%s1280_s7 + $0x70] sm:$0xf] %vm793_vm1, %v1002_v63  ;;  %809 = vst.msk [vmem:[%s1280_s7 + $0x3c] sm:$0xf] %vm793_vm1, %v989_v0  ;;  %v1003_v21 = vpack.c.bf16 %v662_v1, %v662_v1 }
 0x107   : > { %825 = vst.msk [vmem:[%s1280_s7 + $0x7c] sm:$0xf] %vm793_vm1, %v1005_v2  ;;  %807 = vst.msk [vmem:[%s1280_s7 + $0x34] sm:$0xf] %vm793_vm1, %v987_v3 }
 0x108   : > { %823 = vst.msk [vmem:[%s1280_s7 + $0x74] sm:$0xf] %vm793_vm1, %v1003_v21 }
 0x109 PF: > { %s14_s15 = sadd.s32 1, %s1175_s15  }
 0x10a   : > { %p11_p4 = scmp.ge.s32.totalorder %s14_s15, 4  }
 0x10c   :  { %13 = sbr.rel (!%p11_p4) target bundleno = 1 (0x1), region = 69 }

// kernel: fwd.19
= control target key start
LH: loop header
LB: loop body
LE: loop exit
PB: predicated region body
PF: predicated region fallthrough
CT: control target
= control target key end

     0   :  { %s3195_s9 = smov 0   ;;  %s3831_s0 = inlined_call_operand.vmem [shape: bf16[32,16,96], index: 0, kind: input, shape index: {}]   ;;  %s3832_s1 = inlined_call_operand.vmem [shape: f32[32,1,16], index: 1, kind: input, shape index: {}]   ;;  %s3833_s2 = inlined_call_operand.vmem [shape: bf16[32,16,32], index: 2, kind: output, shape index: {}]  }
   0x1 LB: > { %s2626_s10 = sadd.s32 4294967295, %s3173_s9   ;;  %p2630_p0 = scmp.ge.s32.totalorder %s3173_s9, 1  ;;  %s3173_s9 = sphi %s3195_s9, %s12_s9  }
   0x2   : > { %p124_p1 = scmp.lt.s32.totalorder %s3173_s9, 3 }
   0x4   : > { %p125_p2 = pnand %p2630_p0, %p124_p1 }
   0x5   : > { %s2631_s11 = sshll.u32 (!%p125_p2), %s2626_s10, 4  ;;  %v3175_v0 = vmov (!%p125_p2), 0.0   ;;  %vm3176_vm0 = vmmov (!%p125_p2), 0   ;;  %s3177_s16 = smov (!%p125_p2), 96   ;;  %vm259_vm1 = vcmask (!%p125_p2), 261120   ;;  %v1165_v51 = vlaneseq (!%p125_p2) }
   0x6   : > { %128 = sbr.rel (%p125_p2) target bundleno = 800 (0x320), region = 28  ;;  %p153_p3 = scmp.lt.s32.totalorder (!%p125_p2), %s2631_s11, 31  ;;  %2818 = vmatprep.subr.bf16.mxu0 (!%p125_p2), %v3175_v0  ;;  %2824 = vmatprep.subr.bf16.mxu1 (!%p125_p2), %v3175_v0  ;;  %v3179_v56 = vmov (!%p125_p2), -1e+09   ;;  %vm1277_vm5 = vcmask (!%p125_p2), 130048  }
   0x7   : > { %2820 = vmatprep.mubr.msk.bf16.mxu0 (!%p125_p2), %vm3176_vm0, %v3175_v0  ;;  %2826 = vmatprep.mubr.msk.bf16.mxu1 (!%p125_p2), %vm3176_vm0, %v3175_v0  ;;  %s3178_s17 = smov (!%p125_p2), 64   ;;  %v1166_v53 = vshrl.u32 (!%p125_p2), %v1165_v51, 7 }
   0x9   : > { %v3412_v55 = vsub.s32 (!%p125_p2), 0, %v1166_v53 }
   0xd   : > { %s3835_s11 = smov (!%p153_p3, %s2631_s11), 31 }
   0xe   : > { %s2720_s12 = sshll.u32 %s3835_s11, 3  ;;  %s3408_s20 = scalar_lea.vmem %s3832_s1, %s3835_s11 }
   0xf   : > { %s3217_s15 = scalar_lea.vmem %s3831_s0, %s2720_s12  ;;  %v204_v52 = vld [vmem:[%s3408_s20] sm:$0x1]  ;;  %v205_v54 = vld [vmem:[%s3408_s20 + $0x1] sm:$0x1]  ;;  %v206_v58 = vld [vmem:[%s3408_s20 + $0x2] sm:$0x1]  ;;  %s3752_s23 = scalar_lea.vmem %s3833_s2, %s2720_s12 }
  0x10   : > { %v3023_v1 = vld [vmem:[%s3217_s15] sm:$0xff]   ;;  %v3221_v2 = vld [vmem:[%s3217_s15 + $0x8] sm:$0xff]   ;;  %v3224_v3 = vld [vmem:[%s3217_s15 + $0x10] sm:$0xff]   ;;  %vm220_vm2 = vcmp.gt.f32.partialorder %v204_v52, 0.5  ;;  %vm221_vm3 = vcmp.gt.f32.partialorder %v205_v54, 0.5  ;;  %vm222_vm4 = vcmp.gt.f32.partialorder %v206_v58, 0.5 }
  0x11   : > { %257 = vrot.lane.b32.xlu0 %v3023_v1, %s3177_s16  ;;  %366 = vrot.lane.b32.xlu1 %v3224_v3, %s3177_s16  ;;  %v3228_v4 = vld [vmem:[%s3217_s15 + $0x18] sm:$0xff]   ;;  %v3232_v5 = vld [vmem:[%s3217_s15 + $0x20] sm:$0xff]   ;;  %v236_v57 = vsel %vm220_vm2, 0.0, %v3179_v56  ;;  %v237_v61 = vsel %vm221_vm3, 0.0, %v3179_v56 }
  0x12   : > { %v3236_v6 = vld [vmem:[%s3217_s15 + $0x28] sm:$0xff]   ;;  %v3240_v7 = vld [vmem:[%s3217_s15 + $0x30] sm:$0xff]   ;;  %v3244_v8 = vld [vmem:[%s3217_s15 + $0x38] sm:$0xff]   ;;  %v1168_v59 = vrot.slane %v236_v57, %v3412_v55 }
  0x13   : > { %v3248_v9 = vld [vmem:[%s3217_s15 + $0x40] sm:$0xff]   ;;  %v3252_v10 = vld [vmem:[%s3217_s15 + $0x48] sm:$0xff]   ;;  %v3256_v11 = vld [vmem:[%s3217_s15 + $0x50] sm:$0xff]  }
  0x14   : > { %v3260_v12 = vld [vmem:[%s3217_s15 + $0x58] sm:$0xff]   ;;  %v3264_v13 = vld [vmem:[%s3217_s15 + $0x60] sm:$0xff]   ;;  %v3268_v14 = vld [vmem:[%s3217_s15 + $0x68] sm:$0xff]  }
  0x15   : > { %312 = vrot.lane.b32.xlu0 %v3221_v2, %s3177_s16  ;;  %420 = vrot.lane.b32.xlu1 %v3228_v4, %s3177_s16  ;;  %v3272_v15 = vld [vmem:[%s3217_s15 + $0x70] sm:$0xff]   ;;  %v3276_v16 = vld [vmem:[%s3217_s15 + $0x78] sm:$0xff]  }
  0x19   : > { %474 = vrot.lane.b32.xlu0 %v3232_v5, %s3177_s16  ;;  %528 = vrot.lane.b32.xlu1 %v3236_v6, %s3177_s16 }
  0x1d   : > { %582 = vrot.lane.b32.xlu0 %v3240_v7, %s3177_s16  ;;  %636 = vrot.lane.b32.xlu1 %v3244_v8, %s3177_s16 }
  0x21   : > { %690 = vrot.lane.b32.xlu0 %v3248_v9, %s3177_s16  ;;  %744 = vrot.lane.b32.xlu1 %v3252_v10, %s3177_s16 }
  0x25   : > { %798 = vrot.lane.b32.xlu0 %v3256_v11, %s3177_s16  ;;  %852 = vrot.lane.b32.xlu1 %v3260_v12, %s3177_s16 }
  0x29   : > { %906 = vrot.lane.b32.xlu0 %v3264_v13, %s3177_s16  ;;  %960 = vrot.lane.b32.xlu1 %v3268_v14, %s3177_s16 }
  0x2d   : > { %1014 = vrot.lane.b32.xlu0 %v3272_v15, %s3177_s16  ;;  %1068 = vrot.lane.b32.xlu1 %v3276_v16, %s3177_s16 }
  0x31   : > { %1614 = vrot.lane.b32.xlu1 %v3023_v1, %s3178_s17  ;;  %1661 = vrot.lane.b32.xlu0 %v3221_v2, %s3178_s17 }
  0x35   : > { %1708 = vrot.lane.b32.xlu1 %v3224_v3, %s3178_s17  ;;  %1755 = vrot.lane.b32.xlu0 %v3228_v4, %s3178_s17 }
  0x39   : > { %1802 = vrot.lane.b32.xlu1 %v3232_v5, %s3178_s17  ;;  %1849 = vrot.lane.b32.xlu0 %v3236_v6, %s3178_s17 }
  0x3d   : > { %1896 = vrot.lane.b32.xlu1 %v3240_v7, %s3178_s17  ;;  %1943 = vrot.lane.b32.xlu0 %v3244_v8, %s3178_s17 }
  0x41   : > { %1990 = vrot.lane.b32.xlu1 %v3248_v9, %s3178_s17  ;;  %2037 = vrot.lane.b32.xlu0 %v3252_v10, %s3178_s17 }
  0x45   : > { %2084 = vrot.lane.b32.xlu1 %v3256_v11, %s3178_s17  ;;  %2178 = vrot.lane.b32.xlu0 %v3264_v13, %s3178_s17 }
  0x49   : > { %2131 = vrot.lane.b32.xlu1 %v3260_v12, %s3178_s17 }
  0x4d   : > { %2225 = vrot.lane.b32.xlu1 %v3268_v14, %s3178_s17 }
  0x83   : > { %v258_v17 = vpop.permute.xlu0 %257  ;;  %v367_v19 = vpop.permute.xlu1 %366 }
  0x84   : > { %v264_v18 = vsel %vm259_vm1, %v258_v17, 0  ;;  %v372_v22 = vsel %vm259_vm1, %v367_v19, 0 }
  0x85   : > { %2819 = vmatpush3.bf16.xpose.msra.mxu0 %v264_v18 }
  0x86   : > { %2830 = vmatprep.subr.bf16.mxu0 %v3175_v0 }
  0x87   : > { %v313_v20 = vpop.permute.xlu0 %312  ;;  %v421_v23 = vpop.permute.xlu1 %420 }
  0x88   : > { %v318_v21 = vsel %vm259_vm1, %v313_v20, 0  ;;  %v426_v24 = vsel %vm259_vm1, %v421_v23, 0 }
  0x89   : > { %2825 = vmatpush3.bf16.xpose.msra.mxu1 %v318_v21 }
  0x8a   : > { %2836 = vmatprep.subr.bf16.mxu1 %v3175_v0 }
  0x8b   : > { %v475_v25 = vpop.permute.xlu0 %474  ;;  %v529_v27 = vpop.permute.xlu1 %528 }
  0x8c   : > { %2821 = vmatmul.mubr.msk.bf16.vlgmr.msra.gmra.mrb[0].mxu0 %vm259_vm1, %v3023_v1  ;;  %v480_v26 = vsel %vm259_vm1, %v475_v25, 0  ;;  %v534_v28 = vsel %vm259_vm1, %v529_v27, 0  ;;  %v207_v1 = vld [vmem:[%s3408_s20 + $0x3] sm:$0x1] }
  0x8d   : > { %2831 = vmatpush3.bf16.xpose.msra.mxu0 %v372_v22  ;;  %2832 = vmatprep.mubr.msk.bf16.mxu0 %vm3176_vm0, %v3175_v0  ;;  %vm223_vm6 = vcmp.gt.f32.partialorder %v207_v1, 0.5  ;;  %v212_v1 = vld [vmem:[%s3408_s20 + $0x8] sm:$0x1] }
  0x8e   : > { %2842 = vmatprep.subr.bf16.mxu0 %v3175_v0  ;;  %v239_v23 = vsel %vm223_vm6, 0.0, %v3179_v56  ;;  %vm228_vm11 = vcmp.gt.f32.partialorder %v212_v1, 0.5 }
  0x8f   : > { %v583_v29 = vpop.permute.xlu0 %582  ;;  %v637_v31 = vpop.permute.xlu1 %636 }
  0x90   : > { %2827 = vmatmul.mubr.msk.bf16.vlgmr.msra.gmra.mrb[0].mxu1 %vm259_vm1, %v3221_v2  ;;  %v588_v30 = vsel %vm259_vm1, %v583_v29, 0  ;;  %v642_v32 = vsel %vm259_vm1, %v637_v31, 0 }
  0x91   : > { %2837 = vmatpush3.bf16.xpose.msra.mxu1 %v426_v24  ;;  %2838 = vmatprep.mubr.msk.bf16.mxu1 %vm3176_vm0, %v3175_v0 }
  0x92   : > { %2848 = vmatprep.subr.bf16.mxu1 %v3175_v0 }
  0x93   : > { %v691_v33 = vpop.permute.xlu0 %690  ;;  %v745_v35 = vpop.permute.xlu1 %744 }
  0x94   : > { %2833 = vmatmul.mubr.msk.bf16.vlgmr.msra.gmra.mrb[4].mxu0 %vm259_vm1, %v3224_v3  ;;  %v696_v34 = vsel %vm259_vm1, %v691_v33, 0  ;;  %v750_v36 = vsel %vm259_vm1, %v745_v35, 0  ;;  %v1180_v33 = vrot.slane %v239_v23, %v3412_v55 }
  0x95   : > { %2843 = vmatpush3.bf16.xpose.msra.mxu0 %v480_v26  ;;  %2844 = vmatprep.mubr.msk.bf16.mxu0 %vm3176_vm0, %v3175_v0 }
  0x96   : > { %2854 = vmatprep.subr.bf16.mxu0 %v3175_v0 }
  0x97   : > { %v799_v37 = vpop.permute.xlu0 %798  ;;  %v853_v39 = vpop.permute.xlu1 %852 }
  0x98   : > { %2839 = vmatmul.mubr.msk.bf16.vlgmr.msra.gmra.mrb[4].mxu1 %vm259_vm1, %v3228_v4  ;;  %v804_v38 = vsel %vm259_vm1, %v799_v37, 0  ;;  %v858_v40 = vsel %vm259_vm1, %v853_v39, 0 }
  0x99   : > { %2849 = vmatpush3.bf16.xpose.msra.mxu1 %v534_v28  ;;  %2850 = vmatprep.mubr.msk.bf16.mxu1 %vm3176_vm0, %v3175_v0  ;;  %v209_v28 = vld [vmem:[%s3408_s20 + $0x5] sm:$0x1] }
  0x9a   : > { %2860 = vmatprep.subr.bf16.mxu1 %v3175_v0  ;;  %vm225_vm8 = vcmp.gt.f32.partialorder %v209_v28, 0.5 }
  0x9b   : > { %v907_v41 = vpop.permute.xlu0 %906  ;;  %v961_v43 = vpop.permute.xlu1 %960 }
  0x9c   : > { %2845 = vmatmul.mubr.msk.bf16.vlgmr.msra.gmra.mrb[8].mxu0 %vm259_vm1, %v3232_v5  ;;  %v912_v42 = vsel %vm259_vm1, %v907_v41, 0  ;;  %v966_v44 = vsel %vm259_vm1, %v961_v43, 0 }
  0x9d   : > { %2855 = vmatpush3.bf16.xpose.msra.mxu0 %v588_v30  ;;  %2856 = vmatprep.mubr.msk.bf16.mxu0 %vm3176_vm0, %v3175_v0 }
  0x9e   : > { %2866 = vmatprep.subr.bf16.mxu0 %v3175_v0 }
  0x9f   : > { %v1015_v45 = vpop.permute.xlu0 %1014  ;;  %v1069_v47 = vpop.permute.xlu1 %1068 }
  0xa0   : > { %2851 = vmatmul.mubr.msk.bf16.vlgmr.msra.gmra.mrb[8].mxu1 %vm259_vm1, %v3236_v6  ;;  %v1020_v46 = vsel %vm259_vm1, %v1015_v45, 0  ;;  %v1074_v48 = vsel %vm259_vm1, %v1069_v47, 0  ;;  %v1172_v6 = vrot.slane %v237_v61, %v3412_v55 }
  0xa1   : > { %2861 = vmatpush3.bf16.xpose.msra.mxu1 %v642_v32  ;;  %2862 = vmatprep.mubr.msk.bf16.mxu1 %vm3176_vm0, %v3175_v0 }
  0xa2   : > { %2872 = vmatprep.subr.bf16.mxu1 %v3175_v0 }
  0xa3   : > { %v1615_v49 = vpop.permute.xlu1 %1614  ;;  %v1662_v50 = vpop.permute.xlu0 %1661 }
  0xa4   : > { %2857 = vmatmul.mubr.msk.bf16.vlgmr.msra.gmra.mrb[12].mxu0 %vm259_vm1, %v3240_v7 }
  0xa5   : > { %2867 = vmatpush3.bf16.xpose.msra.mxu0 %v696_v34  ;;  %2868 = vmatprep.mubr.msk.bf16.mxu0 %vm3176_vm0, %v3175_v0 }
  0xa6   : > { %2878 = vmatprep.subr.bf16.mxu0 %v3175_v0 }
  0xa8   : > { %2863 = vmatmul.mubr.msk.bf16.vlgmr.msra.gmra.mrb[12].mxu1 %vm259_vm1, %v3244_v8  ;;  %v238_v8 = vsel %vm222_vm4, 0.0, %v3179_v56 }
  0xa9   : > { %2873 = vmatpush3.bf16.xpose.msra.mxu1 %v750_v36  ;;  %2874 = vmatprep.mubr.msk.bf16.mxu1 %vm3176_vm0, %v3175_v0  ;;  %v1176_v21 = vrot.slane %v238_v8, %v3412_v55  ;;  %v210_v36 = vld [vmem:[%s3408_s20 + $0x6] sm:$0x1] }
  0xaa   : > { %2884 = vmatprep.subr.bf16.mxu1 %v3175_v0  ;;  %vm226_vm9 = vcmp.gt.f32.partialorder %v210_v36, 0.5 }
  0xac   : > { %2869 = vmatmul.mubr.msk.bf16.vlgmr.msra.gmra.mrb[16].mxu0 %vm259_vm1, %v3248_v9 }
  0xad   : > { %2879 = vmatpush3.bf16.xpose.msra.mxu0 %v804_v38  ;;  %2880 = vmatprep.mubr.msk.bf16.mxu0 %vm3176_vm0, %v3175_v0 }
  0xae   : > { %2890 = vmatprep.subr.bf16.mxu0 %v3175_v0 }
  0xb0   : > { %2875 = vmatmul.mubr.msk.bf16.vlgmr.msra.gmra.mrb[16].mxu1 %vm259_vm1, %v3252_v10 }
  0xb1   : > { %2885 = vmatpush3.bf16.xpose.msra.mxu1 %v858_v40  ;;  %2886 = vmatprep.mubr.msk.bf16.mxu1 %vm3176_vm0, %v3175_v0 }
  0xb2   : > { %2896 = vmatprep.subr.bf16.mxu1 %v3175_v0 }
  0xb4   : > { %2881 = vmatmul.mubr.msk.bf16.vlgmr.msra.gmra.mrb[20].mxu0 %vm259_vm1, %v3256_v11 }
  0xb5   : > { %2891 = vmatpush3.bf16.xpose.msra.mxu0 %v912_v42  ;;  %2892 = vmatprep.mubr.msk.bf16.mxu0 %vm3176_vm0, %v3175_v0 }
  0xb6   : > { %2902 = vmatprep.subr.bf16.mxu0 %v3175_v0 }
  0xb8   : > { %2887 = vmatmul.mubr.msk.bf16.vlgmr.msra.gmra.mrb[20].mxu1 %vm259_vm1, %v3260_v12 }
  0xb9   : > { %2897 = vmatpush3.bf16.xpose.msra.mxu1 %v966_v44  ;;  %2898 = vmatprep.mubr.msk.bf16.mxu1 %vm3176_vm0, %v3175_v0 }
  0xba   : > { %2908 = vmatprep.subr.bf16.mxu1 %v3175_v0 }
  0xbc   : > { %2893 = vmatmul.mubr.msk.bf16.vlgmr.msra.gmra.mrb[24].mxu0 %vm259_vm1, %v3264_v13  ;;  %v208_v13 = vld [vmem:[%s3408_s20 + $0x4] sm:$0x1] }
  0xbd   : > { %2903 = vmatpush3.bf16.xpose.msra.mxu0 %v1020_v46  ;;  %2904 = vmatprep.mubr.msk.bf16.mxu0 %vm3176_vm0, %v3175_v0  ;;  %vm224_vm7 = vcmp.gt.f32.partialorder %v208_v13, 0.5 }
  0xbe   : > { %2914 = vmatprep.subr.bf16.mxu0 %v3175_v0  ;;  %v240_v35 = vsel %vm224_vm7, 0.0, %v3179_v56 }
  0xbf   : > { %v1184_v46 = vrot.slane %v240_v35, %v3412_v55 }
  0xc0   : > { %2899 = vmatmul.mubr.msk.bf16.vlgmr.msra.gmra.mrb[24].mxu1 %vm259_vm1, %v3268_v14 }
  0xc1   : > { %2909 = vmatpush3.bf16.xpose.msra.mxu1 %v1074_v48  ;;  %2910 = vmatprep.mubr.msk.bf16.mxu1 %vm3176_vm0, %v3175_v0  ;;  %v241_v48 = vsel %vm225_vm8, 0.0, %v3179_v56 }
  0xc2   : > { %2920 = vmatprep.subr.bf16.mxu1 %v3175_v0  ;;  %v1188_v61 = vrot.slane %v241_v48, %v3412_v55 }
  0xc4   : > { %2905 = vmatmul.mubr.msk.bf16.vlgmr.msra.gmra.mrb[28].mxu0 %vm259_vm1, %v3272_v15 }
  0xc5   : > { %2916 = vmatprep.mubr.msk.bf16.mxu0 %vm3176_vm0, %v3175_v0  ;;  %2915 = vmatpush3.bf16.msra.mxu0 %v1615_v49  ;;  %v211_v49 = vld [vmem:[%s3408_s20 + $0x7] sm:$0x1] }
  0xc6   : > { %2926 = vmatprep.subr.bf16.mxu0 %v3175_v0  ;;  %vm227_vm10 = vcmp.gt.f32.partialorder %v211_v49, 0.5  ;;  %v215_v49 = vld [vmem:[%s3408_s20 + $0xb] sm:$0x1] }
  0xc7   : > { %vm231_vm14 = vcmp.gt.f32.partialorder %v215_v49, 0.5 }
  0xc8   : > { %2911 = vmatmul.mubr.msk.bf16.vlgmr.msra.gmra.mrb[28].mxu1 %vm259_vm1, %v3276_v16 }
  0xc9   : > { %2922 = vmatprep.mubr.msk.bf16.mxu1 %vm3176_vm0, %v3175_v0  ;;  %2921 = vmatpush3.bf16.msra.mxu1 %v1662_v50 }
  0xca   : > { %2932 = vmatprep.subr.bf16.mxu1 %v3175_v0 }
 0x15f   : > { %v300_v60 = vpop.f32.mrb[0].mxu0 }
 0x160   : > { %v1117_v62 = vmul.f32 0.17677669, %v300_v60  ;;  %v2822_v63 = vpop.f32.mrb[1].mxu0 }
 0x161   : > { %v303_v2 = vpop.f32.mrb[2].mxu0  ;;  %v242_v63 = vsel %vm226_vm9, 0.0, %v3179_v56 }
 0x162   : > { %v1118_v3 = vmul.f32 0.17677669, %v303_v2  ;;  %v2823_v4 = vpop.f32.mrb[3].mxu0  ;;  %v3419_v5 = vadd.f32 %v1168_v59, %v1117_v62  ;;  %v1192_v13 = vrot.slane %v242_v63, %v3412_v55 }
 0x163   : > { %v354_v7 = vpop.f32.mrb[0].mxu1 }
 0x164   : > { %v1119_v9 = vmul.f32 0.17677669, %v354_v7  ;;  %v2828_v10 = vpop.f32.mrb[1].mxu1  ;;  %v1278_v11 = vsel %vm1277_vm5, %v3419_v5, -inf  ;;  %v3425_v12 = vadd.f32 %v1168_v59, %v1118_v3 }
 0x165   : > { %1279 = vmax.xlane.f32.xlu0 %v1278_v11  ;;  %v357_v14 = vpop.f32.mrb[2].mxu1 }
 0x166   : > { %v1120_v17 = vmul.f32 0.17677669, %v357_v14  ;;  %v2829_v18 = vpop.f32.mrb[3].mxu1  ;;  %v1281_v19 = vsel %vm1277_vm5, %v3425_v12, -inf  ;;  %v3430_v20 = vadd.f32 %v1172_v6, %v1119_v9 }
 0x167   : > { %1282 = vmax.xlane.f32.xlu1 %v1281_v19  ;;  %v408_v22 = vpop.f32.mrb[4].mxu0  ;;  %v213_v18 = vld [vmem:[%s3408_s20 + $0x9] sm:$0x1] }
 0x168   : > { %v1121_v24 = vmul.f32 0.17677669, %v408_v22  ;;  %v2834_v25 = vpop.f32.mrb[5].mxu0  ;;  %v1284_v26 = vsel %vm1277_vm5, %v3430_v20, -inf  ;;  %v3436_v27 = vadd.f32 %v1172_v6, %v1120_v17  ;;  %v243_v17 = vsel %vm227_vm10, 0.0, %v3179_v56 }
 0x169   : > { %v411_v29 = vpop.f32.mrb[6].mxu0  ;;  %1285 = vmax.xlane.f32.xlu0 %v1284_v26  ;;  %vm229_vm12 = vcmp.gt.f32.partialorder %v213_v18, 0.5 }
 0x16a   : > { %v1122_v30 = vmul.f32 0.17677669, %v411_v29  ;;  %v2835_v31 = vpop.f32.mrb[7].mxu0  ;;  %v3439_v32 = vadd.f32 %v1176_v21, %v1121_v24  ;;  %v1287_v40 = vsel %vm1277_vm5, %v3436_v27, -inf  ;;  %v245_v48 = vsel %vm229_vm12, 0.0, %v3179_v56 }
 0x16b   : > { %v462_v34 = vpop.f32.mrb[4].mxu1  ;;  %v1204_v63 = vrot.slane %v245_v48, %v3412_v55 }
 0x16c   : > { %v1123_v37 = vmul.f32 0.17677669, %v462_v34  ;;  %v2840_v38 = vpop.f32.mrb[5].mxu1  ;;  %v1290_v39 = vsel %vm1277_vm5, %v3439_v32, -inf  ;;  %v3448_v41 = vadd.f32 %v1176_v21, %v1122_v30  ;;  %v1196_v30 = vrot.slane %v243_v17, %v3412_v55  ;;  %v214_v34 = vld [vmem:[%s3408_s20 + $0xa] sm:$0x1] }
 0x16d   : > { %1291 = vmax.xlane.f32.xlu1 %v1290_v39  ;;  %1288 = vmax.xlane.f32.xlu0 %v1287_v40  ;;  %v465_v42 = vpop.f32.mrb[6].mxu1  ;;  %vm230_vm13 = vcmp.gt.f32.partialorder %v214_v34, 0.5 }
 0x16e   : > { %v1124_v43 = vmul.f32 0.17677669, %v465_v42  ;;  %v2841_v44 = vpop.f32.mrb[7].mxu1  ;;  %v3450_v45 = vadd.f32 %v1180_v33, %v1123_v37  ;;  %v1293_v52 = vsel %vm1277_vm5, %v3448_v41, -inf }
 0x16f   : > { %v516_v47 = vpop.f32.mrb[8].mxu0 }
 0x170   : > { %v1125_v50 = vmul.f32 0.17677669, %v516_v47  ;;  %v2846_v51 = vpop.f32.mrb[9].mxu0  ;;  %v1296_v53 = vsel %vm1277_vm5, %v3450_v45, -inf  ;;  %v3459_v54 = vadd.f32 %v1180_v33, %v1124_v43  ;;  %v244_v33 = vsel %vm228_vm11, 0.0, %v3179_v56 }
 0x171   : > { %1294 = vmax.xlane.f32.xlu0 %v1293_v52  ;;  %1297 = vmax.xlane.f32.xlu1 %v1296_v53  ;;  %v519_v57 = vpop.f32.mrb[10].mxu0 }
 0x172   : > { %v1126_v58 = vmul.f32 0.17677669, %v519_v57  ;;  %v2847_v59 = vpop.f32.mrb[11].mxu0  ;;  %v3461_v60 = vadd.f32 %v1184_v46, %v1125_v50  ;;  %v1299_v4 = vsel %vm1277_vm5, %v3459_v54, -inf }
 0x173   : > { %v570_v62 = vpop.f32.mrb[8].mxu1 }
 0x174   : > { %v1127_v2 = vmul.f32 0.17677669, %v570_v62  ;;  %v2852_v3 = vpop.f32.mrb[9].mxu1  ;;  %v1302_v6 = vsel %vm1277_vm5, %v3461_v60, -inf  ;;  %v3470_v7 = vadd.f32 %v1184_v46, %v1126_v58  ;;  %v1200_v46 = vrot.slane %v244_v33, %v3412_v55 }
 0x175   : > { %1300 = vmax.xlane.f32.xlu0 %v1299_v4  ;;  %v573_v8 = vpop.f32.mrb[10].mxu1  ;;  %1303 = vmax.xlane.f32.xlu1 %v1302_v6  ;;  %v216_v3 = vld [vmem:[%s3408_s20 + $0xc] sm:$0x1] }
 0x176   : > { %v1128_v9 = vmul.f32 0.17677669, %v573_v8  ;;  %v2853_v10 = vpop.f32.mrb[11].mxu1  ;;  %v3472_v11 = vadd.f32 %v1188_v61, %v1127_v2  ;;  %v1305_v23 = vsel %vm1277_vm5, %v3470_v7, -inf  ;;  %v246_v2 = vsel %vm230_vm13, 0.0, %v3179_v56 }
 0x177   : > { %v624_v14 = vpop.f32.mrb[12].mxu0  ;;  %vm232_vm15 = vcmp.gt.f32.partialorder %v216_v3, 0.5 }
 0x178   : > { %v1129_v19 = vmul.f32 0.17677669, %v624_v14  ;;  %v2858_v21 = vpop.f32.mrb[13].mxu0  ;;  %v1308_v22 = vsel %vm1277_vm5, %v3472_v11, -inf  ;;  %v3481_v24 = vadd.f32 %v1188_v61, %v1128_v9 }
 0x179   : > { %1309 = vmax.xlane.f32.xlu1 %v1308_v22  ;;  %1306 = vmax.xlane.f32.xlu0 %v1305_v23  ;;  %v627_v25 = vpop.f32.mrb[14].mxu0  ;;  %v247_v22 = vsel %vm231_vm14, 0.0, %v3179_v56  ;;  %v217_v23 = vld [vmem:[%s3408_s20 + $0xd] sm:$0x1] }
 0x17a   : > { %v1130_v26 = vmul.f32 0.17677669, %v627_v25  ;;  %v2859_v28 = vpop.f32.mrb[15].mxu0  ;;  %v3483_v29 = vadd.f32 %v1192_v13, %v1129_v19  ;;  %v1311_v37 = vsel %vm1277_vm5, %v3481_v24, -inf  ;;  %v1208_v19 = vrot.slane %v246_v2, %v3412_v55 }
 0x17b   : > { %v678_v31 = vpop.f32.mrb[12].mxu1  ;;  %vm233_vm1 = vcmp.gt.f32.partialorder %v217_v23, 0.5 }
 0x17c   : > { %v1131_v35 = vmul.f32 0.17677669, %v678_v31  ;;  %v2864_v36 = vpop.f32.mrb[13].mxu1  ;;  %v1314_v38 = vsel %vm1277_vm5, %v3483_v29, -inf  ;;  %v3492_v39 = vadd.f32 %v1192_v13, %v1130_v26 }
 0x17d   : > { %v681_v40 = vpop.f32.mrb[14].mxu1  ;;  %1312 = vmax.xlane.f32.xlu0 %v1311_v37  ;;  %1315 = vmax.xlane.f32.xlu1 %v1314_v38  ;;  %v1212_v37 = vrot.slane %v247_v22, %v3412_v55 }
 0x17e   : > { %v1132_v42 = vmul.f32 0.17677669, %v681_v40  ;;  %v2865_v43 = vpop.f32.mrb[15].mxu1  ;;  %v3494_v44 = vadd.f32 %v1196_v30, %v1131_v35  ;;  %v1317_v53 = vsel %vm1277_vm5, %v3492_v39, -inf  ;;  %v248_v40 = vsel %vm232_vm15, 0.0, %v3179_v56 }
 0x17f   : > { %v732_v47 = vpop.f32.mrb[16].mxu0 }
 0x180   : > { %v1133_v50 = vmul.f32 0.17677669, %v732_v47  ;;  %v2870_v51 = vpop.f32.mrb[17].mxu0  ;;  %v1320_v52 = vsel %vm1277_vm5, %v3494_v44, -inf  ;;  %v3503_v57 = vadd.f32 %v1196_v30, %v1132_v42  ;;  %v218_v42 = vld [vmem:[%s3408_s20 + $0xe] sm:$0x1] }
 0x181   : > { %1321 = vmax.xlane.f32.xlu1 %v1320_v52  ;;  %1318 = vmax.xlane.f32.xlu0 %v1317_v53  ;;  %v735_v58 = vpop.f32.mrb[18].mxu0  ;;  %vm234_vm2 = vcmp.gt.f32.partialorder %v218_v42, 0.5 }
 0x182   : > { %v1134_v59 = vmul.f32 0.17677669, %v735_v58  ;;  %v2871_v61 = vpop.f32.mrb[19].mxu0  ;;  %v3505_v62 = vadd.f32 %v1200_v46, %v1133_v50  ;;  %v1323_v8 = vsel %vm1277_vm5, %v3503_v57, -inf  ;;  %v1216_v58 = vrot.slane %v248_v40, %v3412_v55 }
 0x183   : > { %v786_v1 = vpop.f32.mrb[16].mxu1  ;;  %v249_v61 = vsel %vm233_vm1, 0.0, %v3179_v56 }
 0x184   : > { %v1135_v4 = vmul.f32 0.17677669, %v786_v1  ;;  %v2876_v6 = vpop.f32.mrb[17].mxu1  ;;  %v1326_v9 = vsel %vm1277_vm5, %v3505_v62, -inf  ;;  %v3514_v10 = vadd.f32 %v1200_v46, %v1134_v59 }
 0x185   : > { %v789_v13 = vpop.f32.mrb[18].mxu1  ;;  %1324 = vmax.xlane.f32.xlu0 %v1323_v8  ;;  %1327 = vmax.xlane.f32.xlu1 %v1326_v9 }
 0x186   : > { %v1136_v14 = vmul.f32 0.17677669, %v789_v13  ;;  %v2877_v17 = vpop.f32.mrb[19].mxu1  ;;  %v3516_v18 = vadd.f32 %v1204_v63, %v1135_v4  ;;  %v1329_v30 = vsel %vm1277_vm5, %v3514_v10, -inf }
 0x187   : > { %v840_v21 = vpop.f32.mrb[20].mxu0  ;;  %v1220_v17 = vrot.slane %v249_v61, %v3412_v55 }
 0x188   : > { %v1137_v25 = vmul.f32 0.17677669, %v840_v21  ;;  %v2882_v26 = vpop.f32.mrb[21].mxu0  ;;  %v1332_v28 = vsel %vm1277_vm5, %v3516_v18, -inf  ;;  %v3525_v31 = vadd.f32 %v1204_v63, %v1136_v14  ;;  %v219_v63 = vld [vmem:[%s3408_s20 + $0xf] sm:$0x1] }
 0x189   : > { %1333 = vmax.xlane.f32.xlu1 %v1332_v28  ;;  %1330 = vmax.xlane.f32.xlu0 %v1329_v30  ;;  %v843_v33 = vpop.f32.mrb[22].mxu0  ;;  %v250_v21 = vsel %vm234_vm2, 0.0, %v3179_v56  ;;  %vm235_vm3 = vcmp.gt.f32.partialorder %v219_v63, 0.5 }
 0x18a   : > { %v1138_v34 = vmul.f32 0.17677669, %v843_v33  ;;  %v2883_v35 = vpop.f32.mrb[23].mxu0  ;;  %v3527_v36 = vadd.f32 %v1208_v19, %v1137_v25  ;;  %v1335_v47 = vsel %vm1277_vm5, %v3525_v31, -inf  ;;  %v251_v40 = vsel %vm235_vm3, 0.0, %v3179_v56 }
 0x18b   : > { %v894_v38 = vpop.f32.mrb[20].mxu1 }
 0x18c   : > { %v1139_v43 = vmul.f32 0.17677669, %v894_v38  ;;  %v2888_v46 = vpop.f32.mrb[21].mxu1  ;;  %v1338_v48 = vsel %vm1277_vm5, %v3527_v36, -inf  ;;  %v3536_v49 = vadd.f32 %v1208_v19, %v1138_v34 }
 0x18d   : > { %v897_v50 = vpop.f32.mrb[22].mxu1  ;;  %1336 = vmax.xlane.f32.xlu0 %v1335_v47  ;;  %1339 = vmax.xlane.f32.xlu1 %v1338_v48 }
 0x18e   : > { %v1140_v51 = vmul.f32 0.17677669, %v897_v50  ;;  %v2889_v52 = vpop.f32.mrb[23].mxu1  ;;  %v3538_v53 = vadd.f32 %v1212_v37, %v1139_v43  ;;  %v1341_v4 = vsel %vm1277_vm5, %v3536_v49, -inf }
 0x18f   : > { %v948_v59 = vpop.f32.mrb[24].mxu0 }
 0x190   : > { %v1141_v1 = vmul.f32 0.17677669, %v948_v59  ;;  %v2894_v2 = vpop.f32.mrb[25].mxu0  ;;  %v1344_v3 = vsel %vm1277_vm5, %v3538_v53, -inf  ;;  %v3547_v6 = vadd.f32 %v1212_v37, %v1140_v51  ;;  %v1224_v37 = vrot.slane %v250_v21, %v3412_v55 }
 0x191   : > { %1345 = vmax.xlane.f32.xlu1 %v1344_v3  ;;  %1342 = vmax.xlane.f32.xlu0 %v1341_v4  ;;  %v951_v8 = vpop.f32.mrb[26].mxu0  ;;  %v1228_v59 = vrot.slane %v251_v40, %v3412_v55 }
 0x192   : > { %v1142_v9 = vmul.f32 0.17677669, %v951_v8  ;;  %v2895_v13 = vpop.f32.mrb[27].mxu0  ;;  %v3549_v14 = vadd.f32 %v1216_v58, %v1141_v1  ;;  %v1347_v25 = vsel %vm1277_vm5, %v3547_v6, -inf }
 0x193   : > { %v1002_v19 = vpop.f32.mrb[24].mxu1 }
 0x194   : > { %v1143_v22 = vmul.f32 0.17677669, %v1002_v19  ;;  %v2900_v23 = vpop.f32.mrb[25].mxu1  ;;  %v1350_v26 = vsel %vm1277_vm5, %v3549_v14, -inf  ;;  %v3557_v28 = vadd.f32 %v1216_v58, %v1142_v9 }
 0x195   : > { %v1005_v30 = vpop.f32.mrb[26].mxu1  ;;  %1348 = vmax.xlane.f32.xlu0 %v1347_v25  ;;  %1351 = vmax.xlane.f32.xlu1 %v1350_v26  ;;  %v3594_v25 = vpop.permute.xlu0 %1755 }
 0x196   : > { %v1144_v33 = vmul.f32 0.17677669, %v1005_v30  ;;  %v2901_v34 = vpop.f32.mrb[27].mxu1  ;;  %v3559_v35 = vadd.f32 %v1220_v17, %v1143_v22  ;;  %v1353_v47 = vsel %vm1277_vm5, %v3557_v28, -inf  ;;  %v1709_v22 = vpop.permute.xlu1 %1708 }
 0x197   : > { %v1056_v38 = vpop.f32.mrb[28].mxu0 }
 0x198   : > { %v1145_v42 = vmul.f32 0.17677669, %v1056_v38  ;;  %v2906_v43 = vpop.f32.mrb[29].mxu0  ;;  %v1356_v46 = vsel %vm1277_vm5, %v3559_v35, -inf  ;;  %v3567_v48 = vadd.f32 %v1220_v17, %v1144_v33 }
 0x199   : > { %1357 = vmax.xlane.f32.xlu1 %v1356_v46  ;;  %1354 = vmax.xlane.f32.xlu0 %v1353_v47  ;;  %v1059_v50 = vpop.f32.mrb[30].mxu0  ;;  %v3598_v30 = vpop.permute.xlu0 %1849 }
 0x19a   : > { %v1146_v51 = vmul.f32 0.17677669, %v1059_v50  ;;  %v2907_v52 = vpop.f32.mrb[31].mxu0  ;;  %v3569_v58 = vadd.f32 %v1224_v37, %v1145_v42  ;;  %v1359_v1 = vsel %vm1277_vm5, %v3567_v48, -inf  ;;  %v3592_v23 = vpop.permute.xlu1 %1802 }
 0x19b   : > { %v1110_v56 = vpop.f32.mrb[28].mxu1 }
 0x19c   : > { %v1147_v61 = vmul.f32 0.17677669, %v1110_v56  ;;  %v2912_v63 = vpop.f32.mrb[29].mxu1  ;;  %v1362_v2 = vsel %vm1277_vm5, %v3569_v58, -inf  ;;  %v3576_v3 = vadd.f32 %v1224_v37, %v1146_v51 }
 0x19d   : > { %v1113_v4 = vpop.f32.mrb[30].mxu1  ;;  %1360 = vmax.xlane.f32.xlu0 %v1359_v1  ;;  %1363 = vmax.xlane.f32.xlu1 %v1362_v2  ;;  %v3602_v34 = vpop.permute.xlu0 %1943 }
 0x19e   : > { %v1148_v8 = vmul.f32 0.17677669, %v1113_v4  ;;  %v2913_v9 = vpop.f32.mrb[31].mxu1  ;;  %v3578_v13 = vadd.f32 %v1228_v59, %v1147_v61  ;;  %v1365_v17 = vsel %vm1277_vm5, %v3576_v3, -inf  ;;  %v3596_v26 = vpop.permute.xlu1 %1896 }
 0x1a0   : > { %v1368_v55 = vsel %vm1277_vm5, %v3578_v13, -inf  ;;  %v3584_v19 = vadd.f32 %v1228_v59, %v1148_v8 }
 0x1a1   : > { %1369 = vmax.xlane.f32.xlu1 %v1368_v55  ;;  %1366 = vmax.xlane.f32.xlu0 %v1365_v17  ;;  %v3606_v38 = vpop.permute.xlu0 %2037 }
 0x1a2   : > { %v1371_v21 = vsel %vm1277_vm5, %v3584_v19, -inf  ;;  %v3600_v33 = vpop.permute.xlu1 %1990 }
 0x1a5   : > { %1372 = vmax.xlane.f32.xlu0 %v1371_v21 }
 0x1a6   : > { %v3604_v37 = vpop.permute.xlu1 %2084 }
 0x1b2   : > { %2319 = vrot.lane.b32.xlu1 %v3276_v16, %s3178_s17  ;;  %v3608_v16 = vpop.permute.xlu1 %2131 }
 0x1b6   : > { %v3612_v40 = vpop.permute.xlu1 %2225 }
 0x1bb   : > { %2272 = vrot.lane.b32.xlu0 %v3272_v15, %s3178_s17  ;;  %v3610_v15 = vpop.permute.xlu0 %2178 }
 0x1f2   : > { %v1280_v42 = vpop.xlane.xlu0 %1279 }
 0x1f3   : > { %v1374_v43 = vsub.f32 %v3419_v5, %v1280_v42 }
 0x1f4   : > { %v1283_v46 = vpop.xlane.xlu1 %1282 }
 0x1f5   : > { %v1406_v47 = vmul.f32 1.442695, %v1374_v43  ;;  %v1375_v50 = vsub.f32 %v3425_v12, %v1283_v46 }
 0x1f6   : > { %v1286_v51 = vpop.xlane.xlu0 %1285 }
 0x1f7   : > { %3039 = vpow2.f32 %v1406_v47  ;;  %v1408_v52 = vmul.f32 1.442695, %v1375_v50  ;;  %v1376_v59 = vsub.f32 %v3430_v20, %v1286_v51 }
 0x1f9   : > { %3041 = vpow2.f32 %v1408_v52  ;;  %v1410_v56 = vmul.f32 1.442695, %v1376_v59 }
 0x1fa   : > { %v1292_v61 = vpop.xlane.xlu1 %1291  ;;  %v1289_v63 = vpop.xlane.xlu0 %1288 }
 0x1fb   : > { %3043 = vpow2.f32 %v1410_v56  ;;  %v1378_v1 = vsub.f32 %v3439_v32, %v1292_v61  ;;  %v1377_v2 = vsub.f32 %v3436_v27, %v1289_v63 }
 0x1fd   : > { %v1414_v4 = vmul.f32 1.442695, %v1378_v1  ;;  %v1412_v5 = vmul.f32 1.442695, %v1377_v2 }
 0x1fe   : > { %v1298_v8 = vpop.xlane.xlu1 %1297  ;;  %v1295_v9 = vpop.xlane.xlu0 %1294 }
 0x1ff   : > { %3045 = vpow2.f32 %v1414_v4  ;;  %v1380_v12 = vsub.f32 %v3450_v45, %v1298_v8  ;;  %v1379_v55 = vsub.f32 %v3448_v41, %v1295_v9 }
 0x200   : > { %3047 = vpow2.f32 %v1412_v5 }
 0x201   : > { %v3040_v20 = vpop.eup %3039  ;;  %v1418_v17 = vmul.f32 1.442695, %v1380_v12  ;;  %v1416_v21 = vmul.f32 1.442695, %v1379_v55 }
 0x202   : > { %v1304_v42 = vpop.xlane.xlu1 %1303  ;;  %v1301_v43 = vpop.xlane.xlu0 %1300  ;;  %v1470_v46 = vsel %vm1277_vm5, %v3040_v20, 0.0 }
 0x203   : > { %v3042_v32 = vpop.eup %3041  ;;  %3049 = vpow2.f32 %v1418_v17  ;;  %v1382_v27 = vsub.f32 %v3461_v60, %v1304_v42  ;;  %v1381_v47 = vsub.f32 %v3459_v54, %v1301_v43  ;;  %1471 = vadd.xlane.f32.xlu0 %v1470_v46 }
 0x204   : > { %3051 = vpow2.f32 %v1416_v21  ;;  %v1473_v45 = vsel %vm1277_vm5, %v3042_v32, 0.0  ;;  %v1598_v50 = vpack.c.bf16 %v3042_v32, %v3040_v20 }
 0x205   : > { %v3044_v41 = vpop.eup %3043  ;;  %v1422_v51 = vmul.f32 1.442695, %v1382_v27  ;;  %v1420_v52 = vmul.f32 1.442695, %v1381_v47  ;;  %1474 = vadd.xlane.f32.xlu1 %v1473_v45 }
 0x206   : > { %v1310_v59 = vpop.xlane.xlu1 %1309  ;;  %2917 = vmatmul.mubr.msk.bf16.vlgmr.msra.gmra.mrb[32].mxu0 %vm1277_vm5, %v1598_v50  ;;  %v1307_v56 = vpop.xlane.xlu0 %1306  ;;  %v1476_v61 = vsel %vm1277_vm5, %v3044_v41, 0.0 }
 0x207   : > { %3053 = vpow2.f32 %v1422_v51  ;;  %v1384_v60 = vsub.f32 %v3472_v11, %v1310_v59  ;;  %2927 = vmatpush3.bf16.msra.mxu0 %v1709_v22  ;;  %v1383_v54 = vsub.f32 %v3470_v7, %v1307_v56  ;;  %1477 = vadd.xlane.f32.xlu0 %v1476_v61 }
 0x208   : > { %3055 = vpow2.f32 %v1420_v52  ;;  %2928 = vmatprep.mubr.msk.bf16.mxu0 %vm3176_vm0, %v3175_v0  ;;  %2938 = vmatprep.subr.bf16.mxu0 %v3175_v0 }
 0x209   : > { %v3046_v63 = vpop.eup %3045  ;;  %v1426_v1 = vmul.f32 1.442695, %v1384_v60  ;;  %v1424_v2 = vmul.f32 1.442695, %v1383_v54 }
 0x20a   : > { %v3048_v4 = vpop.eup %3047  ;;  %v1316_v5 = vpop.xlane.xlu1 %1315  ;;  %v1482_v9 = vsel %vm1277_vm5, %v3046_v63, 0.0 }
 0x20b   : > { %v1313_v8 = vpop.xlane.xlu0 %1312  ;;  %3057 = vpow2.f32 %v1426_v1  ;;  %v1386_v11 = vsub.f32 %v3483_v29, %v1316_v5  ;;  %1483 = vadd.xlane.f32.xlu1 %v1482_v9  ;;  %v1479_v22 = vsel %vm1277_vm5, %v3048_v4, 0.0  ;;  %v1599_v12 = vpack.c.bf16 %v3048_v4, %v3044_v41 }
 0x20c   : > { %v1385_v7 = vsub.f32 %v3481_v24, %v1313_v8  ;;  %3059 = vpow2.f32 %v1424_v2  ;;  %1480 = vadd.xlane.f32.xlu0 %v1479_v22 }
 0x20d   : > { %v3050_v55 = vpop.eup %3049  ;;  %v1430_v20 = vmul.f32 1.442695, %v1386_v11  ;;  %2923 = vmatmul.mubr.msk.bf16.vlgmr.msra.gmra.mrb[32].mxu1 %vm1277_vm5, %v1599_v12 }
 0x20e   : > { %v1428_v17 = vmul.f32 1.442695, %v1385_v7  ;;  %v3052_v21 = vpop.eup %3051  ;;  %v1322_v42 = vpop.xlane.xlu1 %1321  ;;  %v1488_v46 = vsel %vm1277_vm5, %v3050_v55, 0.0  ;;  %2933 = vmatpush3.bf16.msra.mxu1 %v3594_v25  ;;  %2934 = vmatprep.mubr.msk.bf16.mxu1 %vm3176_vm0, %v3175_v0 }
 0x20f   : > { %v1319_v43 = vpop.xlane.xlu0 %1318  ;;  %3061 = vpow2.f32 %v1430_v20  ;;  %v1388_v24 = vsub.f32 %v3494_v44, %v1322_v42  ;;  %1489 = vadd.xlane.f32.xlu1 %v1488_v46  ;;  %v1485_v32 = vsel %vm1277_vm5, %v3052_v21, 0.0  ;;  %v1600_v27 = vpack.c.bf16 %v3052_v21, %v3046_v63  ;;  %2944 = vmatprep.subr.bf16.mxu1 %v3175_v0 }
 0x210   : > { %v1387_v29 = vsub.f32 %v3492_v39, %v1319_v43  ;;  %3063 = vpow2.f32 %v1428_v17  ;;  %1486 = vadd.xlane.f32.xlu0 %v1485_v32 }
 0x211   : > { %v3054_v47 = vpop.eup %3053  ;;  %v1434_v45 = vmul.f32 1.442695, %v1388_v24  ;;  %2929 = vmatmul.mubr.msk.bf16.vlgmr.msra.gmra.mrb[36].mxu0 %vm1277_vm5, %v1600_v27 }
 0x212   : > { %v1432_v50 = vmul.f32 1.442695, %v1387_v29  ;;  %v3056_v41 = vpop.eup %3055  ;;  %v1328_v44 = vpop.xlane.xlu1 %1327  ;;  %v1494_v39 = vsel %vm1277_vm5, %v3054_v47, 0.0  ;;  %2939 = vmatpush3.bf16.msra.mxu0 %v3592_v23  ;;  %2940 = vmatprep.mubr.msk.bf16.mxu0 %vm3176_vm0, %v3175_v0 }
 0x213   : > { %v1325_v25 = vpop.xlane.xlu0 %1324  ;;  %3065 = vpow2.f32 %v1434_v45  ;;  %v1390_v51 = vsub.f32 %v3505_v62, %v1328_v44  ;;  %1495 = vadd.xlane.f32.xlu1 %v1494_v39  ;;  %v1491_v59 = vsel %vm1277_vm5, %v3056_v41, 0.0  ;;  %v1601_v56 = vpack.c.bf16 %v3056_v41, %v3050_v55  ;;  %2950 = vmatprep.subr.bf16.mxu0 %v3175_v0 }
 0x214   : > { %v1389_v52 = vsub.f32 %v3503_v57, %v1325_v25  ;;  %3067 = vpow2.f32 %v1432_v50  ;;  %1492 = vadd.xlane.f32.xlu0 %v1491_v59 }
 0x215   : > { %v3058_v61 = vpop.eup %3057  ;;  %v1438_v60 = vmul.f32 1.442695, %v1390_v51  ;;  %2935 = vmatmul.mubr.msk.bf16.vlgmr.msra.gmra.mrb[36].mxu1 %vm1277_vm5, %v1601_v56 }
 0x216   : > { %v1436_v54 = vmul.f32 1.442695, %v1389_v52  ;;  %v3060_v63 = vpop.eup %3059  ;;  %v1334_v62 = vpop.xlane.xlu1 %1333  ;;  %v1500_v57 = vsel %vm1277_vm5, %v3058_v61, 0.0  ;;  %2945 = vmatpush3.bf16.msra.mxu1 %v3598_v30  ;;  %2946 = vmatprep.mubr.msk.bf16.mxu1 %vm3176_vm0, %v3175_v0 }
 0x217   : > { %v1331_v23 = vpop.xlane.xlu0 %1330  ;;  %3069 = vpow2.f32 %v1438_v60  ;;  %v1392_v1 = vsub.f32 %v3516_v18, %v1334_v62  ;;  %1501 = vadd.xlane.f32.xlu1 %v1500_v57  ;;  %v1497_v4 = vsel %vm1277_vm5, %v3060_v63, 0.0  ;;  %v1602_v5 = vpack.c.bf16 %v3060_v63, %v3054_v47  ;;  %2956 = vmatprep.subr.bf16.mxu1 %v3175_v0 }
 0x218   : > { %v1391_v2 = vsub.f32 %v3514_v10, %v1331_v23  ;;  %3071 = vpow2.f32 %v1436_v54  ;;  %1498 = vadd.xlane.f32.xlu0 %v1497_v4 }
 0x219   : > { %v3062_v8 = vpop.eup %3061  ;;  %v1442_v9 = vmul.f32 1.442695, %v1392_v1  ;;  %2941 = vmatmul.mubr.msk.bf16.vlgmr.msra.gmra.mrb[40].mxu0 %vm1277_vm5, %v1602_v5 }
 0x21a   : > { %v1440_v11 = vmul.f32 1.442695, %v1391_v2  ;;  %v3064_v7 = vpop.eup %3063  ;;  %v1340_v18 = vpop.xlane.xlu1 %1339  ;;  %v1506_v10 = vsel %vm1277_vm5, %v3062_v8, 0.0  ;;  %2951 = vmatpush3.bf16.msra.mxu0 %v3596_v26  ;;  %2952 = vmatprep.mubr.msk.bf16.mxu0 %vm3176_vm0, %v3175_v0 }
 0x21b   : > { %v1337_v30 = vpop.xlane.xlu0 %1336  ;;  %3073 = vpow2.f32 %v1442_v9  ;;  %v1394_v22 = vsub.f32 %v3527_v36, %v1340_v18  ;;  %1507 = vadd.xlane.f32.xlu1 %v1506_v10  ;;  %v1503_v55 = vsel %vm1277_vm5, %v3064_v7, 0.0  ;;  %v1603_v20 = vpack.c.bf16 %v3064_v7, %v3058_v61  ;;  %2962 = vmatprep.subr.bf16.mxu0 %v3175_v0 }
 0x21c   : > { %v1393_v12 = vsub.f32 %v3525_v31, %v1337_v30  ;;  %3075 = vpow2.f32 %v1440_v11  ;;  %1504 = vadd.xlane.f32.xlu0 %v1503_v55 }
 0x21d   : > { %v3066_v17 = vpop.eup %3065  ;;  %v1446_v21 = vmul.f32 1.442695, %v1394_v22  ;;  %2947 = vmatmul.mubr.msk.bf16.vlgmr.msra.gmra.mrb[40].mxu1 %vm1277_vm5, %v1603_v20 }
 0x21e   : > { %v1444_v42 = vmul.f32 1.442695, %v1393_v12  ;;  %v3068_v43 = vpop.eup %3067  ;;  %v1346_v36 = vpop.xlane.xlu1 %1345  ;;  %v1512_v31 = vsel %vm1277_vm5, %v3066_v17, 0.0  ;;  %2957 = vmatpush3.bf16.msra.mxu1 %v3602_v34  ;;  %2958 = vmatprep.mubr.msk.bf16.mxu1 %vm3176_vm0, %v3175_v0 }
 0x21f   : > { %v1343_v26 = vpop.xlane.xlu0 %1342  ;;  %3077 = vpow2.f32 %v1446_v21  ;;  %v1396_v46 = vsub.f32 %v3538_v53, %v1346_v36  ;;  %1513 = vadd.xlane.f32.xlu1 %v1512_v31  ;;  %v1509_v29 = vsel %vm1277_vm5, %v3068_v43, 0.0  ;;  %v1604_v32 = vpack.c.bf16 %v3068_v43, %v3062_v8  ;;  %2968 = vmatprep.subr.bf16.mxu1 %v3175_v0 }
 0x220   : > { %v1395_v24 = vsub.f32 %v3536_v49, %v1343_v26  ;;  %3079 = vpow2.f32 %v1444_v42  ;;  %1510 = vadd.xlane.f32.xlu0 %v1509_v29 }
 0x221   : > { %v3070_v27 = vpop.eup %3069  ;;  %v1450_v47 = vmul.f32 1.442695, %v1396_v46  ;;  %2953 = vmatmul.mubr.msk.bf16.vlgmr.msra.gmra.mrb[44].mxu0 %vm1277_vm5, %v1604_v32 }
 0x222   : > { %v1448_v45 = vmul.f32 1.442695, %v1395_v24  ;;  %v3072_v50 = vpop.eup %3071  ;;  %v1352_v53 = vpop.xlane.xlu1 %1351  ;;  %v1518_v49 = vsel %vm1277_vm5, %v3070_v27, 0.0  ;;  %2963 = vmatpush3.bf16.msra.mxu0 %v3600_v33  ;;  %2964 = vmatprep.mubr.msk.bf16.mxu0 %vm3176_vm0, %v3175_v0 }
 0x223   : > { %v1349_v34 = vpop.xlane.xlu0 %1348  ;;  %3081 = vpow2.f32 %v1450_v47  ;;  %v1398_v41 = vsub.f32 %v3549_v14, %v1352_v53  ;;  %1519 = vadd.xlane.f32.xlu1 %v1518_v49  ;;  %v1515_v25 = vsel %vm1277_vm5, %v3072_v50, 0.0  ;;  %v1605_v39 = vpack.c.bf16 %v3072_v50, %v3066_v17  ;;  %2974 = vmatprep.subr.bf16.mxu0 %v3175_v0 }
 0x224   : > { %v1397_v44 = vsub.f32 %v3547_v6, %v1349_v34  ;;  %3083 = vpow2.f32 %v1448_v45  ;;  %1516 = vadd.xlane.f32.xlu0 %v1515_v25 }
 0x225   : > { %v3074_v51 = vpop.eup %3073  ;;  %v1454_v52 = vmul.f32 1.442695, %v1398_v41  ;;  %2959 = vmatmul.mubr.msk.bf16.vlgmr.msra.gmra.mrb[44].mxu1 %vm1277_vm5, %v1605_v39 }
 0x226   : > { %v1452_v59 = vmul.f32 1.442695, %v1397_v44  ;;  %v3076_v56 = vpop.eup %3075  ;;  %v1358_v14 = vpop.xlane.xlu1 %1357  ;;  %v1524_v6 = vsel %vm1277_vm5, %v3074_v51, 0.0  ;;  %2969 = vmatpush3.bf16.msra.mxu1 %v3606_v38  ;;  %2970 = vmatprep.mubr.msk.bf16.mxu1 %vm3176_vm0, %v3175_v0 }
 0x227   : > { %v1355_v33 = vpop.xlane.xlu0 %1354  ;;  %3085 = vpow2.f32 %v1454_v52  ;;  %v1400_v61 = vsub.f32 %v3559_v35, %v1358_v14  ;;  %1525 = vadd.xlane.f32.xlu1 %v1524_v6  ;;  %v1521_v54 = vsel %vm1277_vm5, %v3076_v56, 0.0  ;;  %v1606_v63 = vpack.c.bf16 %v3076_v56, %v3070_v27  ;;  %2980 = vmatprep.subr.bf16.mxu1 %v3175_v0 }
 0x228   : > { %v1399_v60 = vsub.f32 %v3557_v28, %v1355_v33  ;;  %3087 = vpow2.f32 %v1452_v59  ;;  %1522 = vadd.xlane.f32.xlu0 %v1521_v54 }
 0x229   : > { %v3078_v62 = vpop.eup %3077  ;;  %v1458_v23 = vmul.f32 1.442695, %v1400_v61  ;;  %2965 = vmatmul.mubr.msk.bf16.vlgmr.msra.gmra.mrb[48].mxu0 %vm1277_vm5, %v1606_v63 }
 0x22a   : > { %v1456_v57 = vmul.f32 1.442695, %v1399_v60  ;;  %v3080_v1 = vpop.eup %3079  ;;  %v1364_v35 = vpop.xlane.xlu1 %1363  ;;  %v1530_v28 = vsel %vm1277_vm5, %v3078_v62, 0.0  ;;  %2975 = vmatpush3.bf16.msra.mxu0 %v3604_v37  ;;  %2976 = vmatprep.mubr.msk.bf16.mxu0 %vm3176_vm0, %v3175_v0 }
 0x22b   : > { %v1361_v38 = vpop.xlane.xlu0 %1360  ;;  %3089 = vpow2.f32 %v1458_v23  ;;  %v1402_v2 = vsub.f32 %v3569_v58, %v1364_v35  ;;  %1531 = vadd.xlane.f32.xlu1 %v1530_v28  ;;  %v1527_v5 = vsel %vm1277_vm5, %v3080_v1, 0.0  ;;  %v1607_v8 = vpack.c.bf16 %v3080_v1, %v3074_v51  ;;  %2986 = vmatprep.subr.bf16.mxu0 %v3175_v0 }
 0x22c   : > { %v1401_v4 = vsub.f32 %v3567_v48, %v1361_v38  ;;  %3091 = vpow2.f32 %v1456_v57  ;;  %1528 = vadd.xlane.f32.xlu0 %v1527_v5 }
 0x22d   : > { %v3082_v9 = vpop.eup %3081  ;;  %v1462_v11 = vmul.f32 1.442695, %v1402_v2  ;;  %2971 = vmatmul.mubr.msk.bf16.vlgmr.msra.gmra.mrb[48].mxu1 %vm1277_vm5, %v1607_v8 }
 0x22e   : > { %v1460_v7 = vmul.f32 1.442695, %v1401_v4  ;;  %v3084_v18 = vpop.eup %3083  ;;  %v1370_v58 = vpop.xlane.xlu1 %1369  ;;  %v1536_v48 = vsel %vm1277_vm5, %v3082_v9, 0.0  ;;  %2981 = vmatpush3.bf16.msra.mxu1 %v3608_v16  ;;  %2982 = vmatprep.mubr.msk.bf16.mxu1 %vm3176_vm0, %v3175_v0 }
 0x22f   : > { %v1367_v37 = vpop.xlane.xlu0 %1366  ;;  %3093 = vpow2.f32 %v1462_v11  ;;  %v1404_v30 = vsub.f32 %v3578_v13, %v1370_v58  ;;  %1537 = vadd.xlane.f32.xlu1 %v1536_v48  ;;  %v1533_v22 = vsel %vm1277_vm5, %v3084_v18, 0.0  ;;  %v1608_v12 = vpack.c.bf16 %v3084_v18, %v3078_v62  ;;  %2992 = vmatprep.subr.bf16.mxu1 %v3175_v0 }
 0x230   : > { %v1403_v10 = vsub.f32 %v3576_v3, %v1367_v37  ;;  %3095 = vpow2.f32 %v1460_v7  ;;  %1534 = vadd.xlane.f32.xlu0 %v1533_v22 }
 0x231   : > { %v3086_v55 = vpop.eup %3085  ;;  %v1466_v20 = vmul.f32 1.442695, %v1404_v30  ;;  %2977 = vmatmul.mubr.msk.bf16.vlgmr.msra.gmra.mrb[52].mxu0 %vm1277_vm5, %v1608_v12 }
 0x232   : > { %v1464_v17 = vmul.f32 1.442695, %v1403_v10  ;;  %v3088_v21 = vpop.eup %3087  ;;  %v1542_v3 = vsel %vm1277_vm5, %v3086_v55, 0.0  ;;  %2987 = vmatpush3.bf16.msra.mxu0 %v3610_v15  ;;  %2988 = vmatprep.mubr.msk.bf16.mxu0 %vm3176_vm0, %v3175_v0  ;;  %v2320_v45 = vpop.permute.xlu1 %2319 }
 0x233   : > { %v1373_v13 = vpop.xlane.xlu0 %1372  ;;  %3097 = vpow2.f32 %v1466_v20  ;;  %1543 = vadd.xlane.f32.xlu1 %v1542_v3  ;;  %v1539_v42 = vsel %vm1277_vm5, %v3088_v21, 0.0  ;;  %v1609_v43 = vpack.c.bf16 %v3088_v21, %v3082_v9  ;;  %2998 = vmatprep.subr.bf16.mxu0 %v3175_v0 }
 0x234   : > { %v1405_v16 = vsub.f32 %v3584_v19, %v1373_v13  ;;  %3099 = vpow2.f32 %v1464_v17  ;;  %1540 = vadd.xlane.f32.xlu0 %v1539_v42 }
 0x235   : > { %v3090_v36 = vpop.eup %3089  ;;  %2983 = vmatmul.mubr.msk.bf16.vlgmr.msra.gmra.mrb[52].mxu1 %vm1277_vm5, %v1609_v43 }
 0x236   : > { %v1468_v26 = vmul.f32 1.442695, %v1405_v16  ;;  %v3092_v31 = vpop.eup %3091  ;;  %v1548_v15 = vsel %vm1277_vm5, %v3090_v36, 0.0  ;;  %2993 = vmatpush3.bf16.msra.mxu1 %v3612_v40  ;;  %2994 = vmatprep.mubr.msk.bf16.mxu1 %vm3176_vm0, %v3175_v0 }
 0x237   : > { %1549 = vadd.xlane.f32.xlu1 %v1548_v15  ;;  %v1545_v19 = vsel %vm1277_vm5, %v3092_v31, 0.0  ;;  %v1610_v46 = vpack.c.bf16 %v3092_v31, %v3086_v55  ;;  %v2273_v24 = vpop.permute.xlu0 %2272  ;;  %3004 = vmatprep.subr.bf16.mxu1 %v3175_v0 }
 0x238   : > { %3101 = vpow2.f32 %v1468_v26  ;;  %1546 = vadd.xlane.f32.xlu0 %v1545_v19 }
 0x239   : > { %v3094_v29 = vpop.eup %3093  ;;  %2989 = vmatmul.mubr.msk.bf16.vlgmr.msra.gmra.mrb[56].mxu0 %vm1277_vm5, %v1610_v46 }
 0x23a   : > { %v3096_v32 = vpop.eup %3095  ;;  %v1554_v27 = vsel %vm1277_vm5, %v3094_v29, 0.0  ;;  %2999 = vmatpush3.bf16.msra.mxu0 %v2273_v24  ;;  %3000 = vmatprep.mubr.msk.bf16.mxu0 %vm3176_vm0, %v3175_v0 }
 0x23b   : > { %1555 = vadd.xlane.f32.xlu1 %v1554_v27  ;;  %v1551_v40 = vsel %vm1277_vm5, %v3096_v32, 0.0  ;;  %v1611_v47 = vpack.c.bf16 %v3096_v32, %v3090_v36 }
 0x23c   : > { %1552 = vadd.xlane.f32.xlu0 %v1551_v40 }
 0x23d   : > { %v3098_v50 = vpop.eup %3097  ;;  %2995 = vmatmul.mubr.msk.bf16.vlgmr.msra.gmra.mrb[56].mxu1 %vm1277_vm5, %v1611_v47 }
 0x23e   : > { %v3100_v53 = vpop.eup %3099  ;;  %v1560_v34 = vsel %vm1277_vm5, %v3098_v50, 0.0  ;;  %3005 = vmatpush3.bf16.msra.mxu1 %v2320_v45  ;;  %3006 = vmatprep.mubr.msk.bf16.mxu1 %vm3176_vm0, %v3175_v0  ;;  %vm2526_vm0 = vcmask 257024  }
 0x23f   : > { %1561 = vadd.xlane.f32.xlu1 %v1560_v34  ;;  %v1557_v49 = vsel %vm1277_vm5, %v3100_v53, 0.0  ;;  %v1612_v41 = vpack.c.bf16 %v3100_v53, %v3094_v29 }
 0x240   : > { %1558 = vadd.xlane.f32.xlu0 %v1557_v49 }
 0x241   : > { %3001 = vmatmul.mubr.msk.bf16.vlgmr.msra.gmra.mrb[60].mxu0 %vm1277_vm5, %v1612_v41 }
 0x242   : > { %v3102_v44 = vpop.eup %3101 }
 0x243   : > { %v1563_v25 = vsel %vm1277_vm5, %v3102_v44, 0.0  ;;  %v1613_v39 = vpack.c.bf16 %v3102_v44, %v3098_v50 }
 0x244   : > { %1564 = vadd.xlane.f32.xlu0 %v1563_v25 }
 0x245   : > { %3007 = vmatmul.mubr.msk.bf16.vlgmr.msra.gmra.mrb[60].mxu1 %vm1277_vm5, %v1613_v39 }
 0x290   : > { %v1472_v51 = vpop.xlane.xlu0 %1471 }
 0x291   : > { %3103 = vrcp.f32 %v1472_v51 }
 0x292   : > { %v1475_v59 = vpop.xlane.xlu1 %1474 }
 0x293   : > { %3105 = vrcp.f32 %v1475_v59 }
 0x294   : > { %v1478_v52 = vpop.xlane.xlu0 %1477 }
 0x295   : > { %3107 = vrcp.f32 %v1478_v52 }
 0x298   : > { %v1484_v14 = vpop.xlane.xlu1 %1483 }
 0x299   : > { %v1481_v56 = vpop.xlane.xlu0 %1480 }
 0x29a   : > { %3109 = vrcp.f32 %v1481_v56 }
 0x29b   : > { %v3104_v57 = vpop.eup %3103  ;;  %3111 = vrcp.f32 %v1484_v14 }
 0x29c   : > { %v1490_v6 = vpop.xlane.xlu1 %1489 }
 0x29d   : > { %v1487_v33 = vpop.xlane.xlu0 %1486  ;;  %v3106_v28 = vpop.eup %3105 }
 0x29e   : > { %3113 = vrcp.f32 %v1487_v33 }
 0x29f   : > { %3115 = vrcp.f32 %v1490_v6  ;;  %v3108_v18 = vpop.eup %3107 }
 0x2a0   : > { %v1496_v60 = vpop.xlane.xlu1 %1495 }
 0x2a1   : > { %v1493_v61 = vpop.xlane.xlu0 %1492 }
 0x2a2   : > { %3117 = vrcp.f32 %v1493_v61 }
 0x2a3   : > { %3119 = vrcp.f32 %v1496_v60 }
 0x2a4   : > { %v1502_v54 = vpop.xlane.xlu1 %1501  ;;  %v3110_v10 = vpop.eup %3109 }
 0x2a5   : > { %v1499_v0 = vpop.xlane.xlu0 %1498  ;;  %v3112_v21 = vpop.eup %3111 }
 0x2a6   : > { %3121 = vrcp.f32 %v1499_v0 }
 0x2a7   : > { %3123 = vrcp.f32 %v1502_v54 }
 0x2a8   : > { %v1508_v62 = vpop.xlane.xlu1 %1507  ;;  %v3114_v43 = vpop.eup %3113 }
 0x2a9   : > { %v1505_v63 = vpop.xlane.xlu0 %1504  ;;  %v3116_v46 = vpop.eup %3115 }
 0x2aa   : > { %3125 = vrcp.f32 %v1505_v63 }
 0x2ab   : > { %3127 = vrcp.f32 %v1508_v62 }
 0x2ac   : > { %v1514_v4 = vpop.xlane.xlu1 %1513  ;;  %v3118_v47 = vpop.eup %3117 }
 0x2ad   : > { %v3745_v23 = vpop.xlane.xlu0 %1510  ;;  %v3120_v49 = vpop.eup %3119 }
 0x2ae   : > { %3129 = vrcp.f32 %v3745_v23 }
 0x2af   : > { %3131 = vrcp.f32 %v1514_v4 }
 0x2b0   : > { %v3760_v37 = vpop.xlane.xlu1 %1519  ;;  %v3122_v52 = vpop.eup %3121 }
 0x2b1   : > { %v3754_v11 = vpop.xlane.xlu0 %1516  ;;  %v3124_v61 = vpop.eup %3123 }
 0x2b2   : > { %3133 = vrcp.f32 %v3754_v11 }
 0x2b3   : > { %3135 = vrcp.f32 %v3760_v37 }
 0x2b4   : > { %v1526_v26 = vpop.xlane.xlu1 %1525  ;;  %v3126_v62 = vpop.eup %3125 }
 0x2b5   : > { %v3762_v12 = vpop.xlane.xlu0 %1522 }
 0x2b6   : > { %3137 = vrcp.f32 %v3762_v12 }
 0x2b7   : > { %3139 = vrcp.f32 %v1526_v26 }
 0x2b8   : > { %v1532_v44 = vpop.xlane.xlu1 %1531 }
 0x2b9   : > { %v1529_v29 = vpop.xlane.xlu0 %1528 }
 0x2ba   : > { %3141 = vrcp.f32 %v1529_v29 }
 0x2bb   : > { %3143 = vrcp.f32 %v1532_v44 }
 0x2bd   : > { %v1535_v56 = vpop.xlane.xlu0 %1534 }
 0x2be   : > { %3145 = vrcp.f32 %v1535_v56 }
 0x2c1   : > { %v1541_v4 = vpop.xlane.xlu0 %1540 }
 0x2d9   : > { %v1654_v1 = vpop.f32.mrb[32].mxu0 }
 0x2da   : > { %v2366_v35 = vmul.f32 %v3104_v57, %v1654_v1  ;;  %v2918_v38 = vpop.f32.mrb[33].mxu0  ;;  %v1538_v57 = vpop.xlane.xlu1 %1537 }
 0x2db   : > { %v1657_v2 = vpop.f32.mrb[34].mxu0  ;;  %3147 = vrcp.f32 %v1538_v57 }
 0x2dc   : > { %v2722_v5 = vpack.c.bf16 %v2366_v35, %v2366_v35  ;;  %v2367_v8 = vmul.f32 %v3106_v28, %v1657_v2  ;;  %v2919_v9 = vpop.f32.mrb[35].mxu0  ;;  %v3128_v28 = vpop.eup %3127  ;;  %3149 = vrcp.f32 %v1541_v4 }
 0x2dd   : > { %v3130_v11 = vpop.eup %3129 }
 0x2de   : > { %2527 = vst.msk [vmem:[%s3752_s23] sm:$0xf] %vm2526_vm0, %v2722_v5  ;;  %v2723_v7 = vpack.c.bf16 %v2367_v8, %v2367_v8 }
 0x2e0   : > { %2528 = vst.msk [vmem:[%s3752_s23 + $0x4] sm:$0xf] %vm2526_vm0, %v2723_v7  ;;  %v1701_v58 = vpop.f32.mrb[32].mxu1 }
 0x2e1   : > { %v2368_v48 = vmul.f32 %v3108_v18, %v1701_v58  ;;  %v2924_v30 = vpop.f32.mrb[33].mxu1 }
 0x2e2   : > { %v1704_v22 = vpop.f32.mrb[34].mxu1 }
 0x2e3   : > { %v2724_v55 = vpack.c.bf16 %v2368_v48, %v2368_v48  ;;  %v2369_v20 = vmul.f32 %v3110_v10, %v1704_v22  ;;  %v2925_v17 = vpop.f32.mrb[35].mxu1  ;;  %v3132_v48 = vpop.eup %3131 }
 0x2e4   : > { %v1748_v13 = vpop.f32.mrb[36].mxu0  ;;  %v1544_v10 = vpop.xlane.xlu1 %1543 }
 0x2e5   : > { %2529 = vst.msk [vmem:[%s3752_s23 + $0x8] sm:$0xf] %vm2526_vm0, %v2724_v55  ;;  %v2725_v3 = vpack.c.bf16 %v2369_v20, %v2369_v20  ;;  %v2370_v16 = vmul.f32 %v3112_v21, %v1748_v13  ;;  %v2930_v42 = vpop.f32.mrb[37].mxu0  ;;  %v3134_v20 = vpop.eup %3133  ;;  %3151 = vrcp.f32 %v1544_v10 }
 0x2e6   : > { %v1751_v36 = vpop.f32.mrb[38].mxu0  ;;  %v1547_v21 = vpop.xlane.xlu0 %1546 }
 0x2e7   : > { %2530 = vst.msk [vmem:[%s3752_s23 + $0xc] sm:$0xf] %vm2526_vm0, %v2725_v3  ;;  %v2726_v31 = vpack.c.bf16 %v2370_v16, %v2370_v16  ;;  %v2371_v15 = vmul.f32 %v3114_v43, %v1751_v36  ;;  %v2931_v19 = vpop.f32.mrb[39].mxu0  ;;  %v3136_v42 = vpop.eup %3135  ;;  %3153 = vrcp.f32 %v1547_v21 }
 0x2e8   : > { %v1795_v24 = vpop.f32.mrb[36].mxu1 }
 0x2e9   : > { %2531 = vst.msk [vmem:[%s3752_s23 + $0x10] sm:$0xf] %vm2526_vm0, %v2726_v31  ;;  %v2727_v32 = vpack.c.bf16 %v2371_v15, %v2371_v15  ;;  %v2372_v27 = vmul.f32 %v3116_v46, %v1795_v24  ;;  %v2936_v40 = vpop.f32.mrb[37].mxu1  ;;  %v3138_v15 = vpop.eup %3137 }
 0x2ea   : > { %v1798_v45 = vpop.f32.mrb[38].mxu1  ;;  %v1550_v46 = vpop.xlane.xlu1 %1549 }
 0x2eb   : > { %2532 = vst.msk [vmem:[%s3752_s23 + $0x14] sm:$0xf] %vm2526_vm0, %v2727_v32  ;;  %v2728_v50 = vpack.c.bf16 %v2372_v27, %v2372_v27  ;;  %v2373_v53 = vmul.f32 %v3118_v47, %v1798_v45  ;;  %v2937_v34 = vpop.f32.mrb[39].mxu1  ;;  %v3140_v27 = vpop.eup %3139  ;;  %3155 = vrcp.f32 %v1550_v46 }
 0x2ec   : > { %v1842_v41 = vpop.f32.mrb[40].mxu0  ;;  %v1553_v47 = vpop.xlane.xlu0 %1552 }
 0x2ed   : > { %2533 = vst.msk [vmem:[%s3752_s23 + $0x18] sm:$0xf] %vm2526_vm0, %v2728_v50  ;;  %v2729_v25 = vpack.c.bf16 %v2373_v53, %v2373_v53  ;;  %v2374_v39 = vmul.f32 %v3120_v49, %v1842_v41  ;;  %v2942_v51 = vpop.f32.mrb[41].mxu0  ;;  %v3142_v34 = vpop.eup %3141  ;;  %3157 = vrcp.f32 %v1553_v47 }
 0x2ee   : > { %v1845_v59 = vpop.f32.mrb[42].mxu0 }
 0x2ef   : > { %2534 = vst.msk [vmem:[%s3752_s23 + $0x1c] sm:$0xf] %vm2526_vm0, %v2729_v25  ;;  %v2730_v14 = vpack.c.bf16 %v2374_v39, %v2374_v39  ;;  %v2375_v33 = vmul.f32 %v3122_v52, %v1845_v59  ;;  %v2943_v6 = vpop.f32.mrb[43].mxu0  ;;  %v3144_v39 = vpop.eup %3143 }
 0x2f0   : > { %v1889_v60 = vpop.f32.mrb[40].mxu1  ;;  %v1556_v52 = vpop.xlane.xlu1 %1555 }
 0x2f1   : > { %2535 = vst.msk [vmem:[%s3752_s23 + $0x20] sm:$0xf] %vm2526_vm0, %v2730_v14  ;;  %v2731_v0 = vpack.c.bf16 %v2375_v33, %v2375_v33  ;;  %v2376_v54 = vmul.f32 %v3124_v61, %v1889_v60  ;;  %v2948_v63 = vpop.f32.mrb[41].mxu1  ;;  %v3146_v33 = vpop.eup %3145  ;;  %3159 = vrcp.f32 %v1556_v52 }
 0x2f2   : > { %v1892_v23 = vpop.f32.mrb[42].mxu1  ;;  %v1559_v61 = vpop.xlane.xlu0 %1558 }
 0x2f3   : > { %2536 = vst.msk [vmem:[%s3752_s23 + $0x24] sm:$0xf] %vm2526_vm0, %v2731_v0  ;;  %v2732_v1 = vpack.c.bf16 %v2376_v54, %v2376_v54  ;;  %v2377_v35 = vmul.f32 %v3126_v62, %v1892_v23  ;;  %v2949_v38 = vpop.f32.mrb[43].mxu1  ;;  %v3148_v63 = vpop.eup %3147  ;;  %3161 = vrcp.f32 %v1559_v61 }
 0x2f4   : > { %v1936_v2 = vpop.f32.mrb[44].mxu0 }
 0x2f5   : > { %2537 = vst.msk [vmem:[%s3752_s23 + $0x28] sm:$0xf] %vm2526_vm0, %v2732_v1  ;;  %v2733_v5 = vpack.c.bf16 %v2377_v35, %v2377_v35  ;;  %v2378_v8 = vmul.f32 %v3128_v28, %v1936_v2  ;;  %v2954_v9 = vpop.f32.mrb[45].mxu0  ;;  %v3150_v35 = vpop.eup %3149 }
 0x2f6   : > { %v1939_v7 = vpop.f32.mrb[46].mxu0  ;;  %v1562_v28 = vpop.xlane.xlu1 %1561 }
 0x2f7   : > { %2538 = vst.msk [vmem:[%s3752_s23 + $0x2c] sm:$0xf] %vm2526_vm0, %v2733_v5  ;;  %v2734_v18 = vpack.c.bf16 %v2378_v8, %v2378_v8  ;;  %v2379_v58 = vmul.f32 %v3130_v11, %v1939_v7  ;;  %v2955_v37 = vpop.f32.mrb[47].mxu0  ;;  %v3152_v8 = vpop.eup %3151  ;;  %3163 = vrcp.f32 %v1562_v28 }
 0x2f8   : > { %v1983_v30 = vpop.f32.mrb[44].mxu1  ;;  %v1565_v11 = vpop.xlane.xlu0 %1564 }
 0x2f9   : > { %2539 = vst.msk [vmem:[%s3752_s23 + $0x30] sm:$0xf] %vm2526_vm0, %v2734_v18  ;;  %v2735_v22 = vpack.c.bf16 %v2379_v58, %v2379_v58  ;;  %v2380_v12 = vmul.f32 %v3132_v48, %v1983_v30  ;;  %v2960_v55 = vpop.f32.mrb[45].mxu1  ;;  %v3154_v37 = vpop.eup %3153  ;;  %3165 = vrcp.f32 %v1565_v11 }
 0x2fa   : > { %v1986_v17 = vpop.f32.mrb[46].mxu1 }
 0x2fb   : > { %2540 = vst.msk [vmem:[%s3752_s23 + $0x34] sm:$0xf] %vm2526_vm0, %v2735_v22  ;;  %v2736_v13 = vpack.c.bf16 %v2380_v12, %v2380_v12  ;;  %v2381_v3 = vmul.f32 %v3134_v20, %v1986_v17  ;;  %v2961_v16 = vpop.f32.mrb[47].mxu1  ;;  %v3156_v12 = vpop.eup %3155 }
 0x2fc   : > { %v2030_v43 = vpop.f32.mrb[48].mxu0 }
 0x2fd   : > { %2541 = vst.msk [vmem:[%s3752_s23 + $0x38] sm:$0xf] %vm2526_vm0, %v2736_v13  ;;  %v2737_v36 = vpack.c.bf16 %v2381_v3, %v2381_v3  ;;  %v2382_v26 = vmul.f32 %v3136_v42, %v2030_v43  ;;  %v2966_v31 = vpop.f32.mrb[49].mxu0  ;;  %v3158_v13 = vpop.eup %3157 }
 0x2fe   : > { %v2033_v19 = vpop.f32.mrb[50].mxu0 }
 0x2ff   : > { %2542 = vst.msk [vmem:[%s3752_s23 + $0x3c] sm:$0xf] %vm2526_vm0, %v2737_v36  ;;  %v2738_v24 = vpack.c.bf16 %v2382_v26, %v2382_v26  ;;  %v2383_v29 = vmul.f32 %v3138_v15, %v2033_v19  ;;  %v2967_v32 = vpop.f32.mrb[51].mxu0  ;;  %v3160_v36 = vpop.eup %3159 }
 0x300   : > { %v2077_v40 = vpop.f32.mrb[48].mxu1  ;;  %v3162_v46 = vpop.eup %3161 }
 0x301   : > { %2543 = vst.msk [vmem:[%s3752_s23 + $0x40] sm:$0xf] %vm2526_vm0, %v2738_v24  ;;  %v2739_v45 = vpack.c.bf16 %v2383_v29, %v2383_v29  ;;  %v2384_v50 = vmul.f32 %v3140_v27, %v2077_v40  ;;  %v2972_v53 = vpop.f32.mrb[49].mxu1  ;;  %v3164_v40 = vpop.eup %3163 }
 0x302   : > { %v2080_v49 = vpop.f32.mrb[50].mxu1 }
 0x303   : > { %2544 = vst.msk [vmem:[%s3752_s23 + $0x44] sm:$0xf] %vm2526_vm0, %v2739_v45  ;;  %v2740_v41 = vpack.c.bf16 %v2384_v50, %v2384_v50  ;;  %v2385_v44 = vmul.f32 %v3142_v34, %v2080_v49  ;;  %v2973_v25 = vpop.f32.mrb[51].mxu1  ;;  %v3166_v34 = vpop.eup %3165 }
 0x304   : > { %v2124_v51 = vpop.f32.mrb[52].mxu0 }
 0x305   : > { %2545 = vst.msk [vmem:[%s3752_s23 + $0x48] sm:$0xf] %vm2526_vm0, %v2740_v41  ;;  %v2741_v59 = vpack.c.bf16 %v2385_v44, %v2385_v44  ;;  %v2386_v56 = vmul.f32 %v3144_v39, %v2124_v51  ;;  %v2978_v14 = vpop.f32.mrb[53].mxu0 }
 0x306   : > { %v2127_v6 = vpop.f32.mrb[54].mxu0 }
 0x307   : > { %2546 = vst.msk [vmem:[%s3752_s23 + $0x4c] sm:$0xf] %vm2526_vm0, %v2741_v59  ;;  %v2742_v60 = vpack.c.bf16 %v2386_v56, %v2386_v56  ;;  %v2387_v0 = vmul.f32 %v3146_v33, %v2127_v6  ;;  %v2979_v54 = vpop.f32.mrb[55].mxu0 }
 0x308   : > { %v2171_v62 = vpop.f32.mrb[52].mxu1 }
 0x309   : > { %2547 = vst.msk [vmem:[%s3752_s23 + $0x50] sm:$0xf] %vm2526_vm0, %v2742_v60  ;;  %v2743_v23 = vpack.c.bf16 %v2387_v0, %v2387_v0  ;;  %v2388_v57 = vmul.f32 %v3148_v63, %v2171_v62  ;;  %v2984_v1 = vpop.f32.mrb[53].mxu1 }
 0x30a   : > { %v2174_v38 = vpop.f32.mrb[54].mxu1 }
 0x30b   : > { %2548 = vst.msk [vmem:[%s3752_s23 + $0x54] sm:$0xf] %vm2526_vm0, %v2743_v23  ;;  %v2744_v2 = vpack.c.bf16 %v2388_v57, %v2388_v57  ;;  %v2389_v4 = vmul.f32 %v3150_v35, %v2174_v38  ;;  %v2985_v5 = vpop.f32.mrb[55].mxu1 }
 0x30c   : > { %v2218_v9 = vpop.f32.mrb[56].mxu0 }
 0x30d   : > { %2549 = vst.msk [vmem:[%s3752_s23 + $0x58] sm:$0xf] %vm2526_vm0, %v2744_v2  ;;  %v2745_v7 = vpack.c.bf16 %v2389_v4, %v2389_v4  ;;  %v2390_v18 = vmul.f32 %v3152_v8, %v2218_v9  ;;  %v2990_v58 = vpop.f32.mrb[57].mxu0 }
 0x30e   : > { %v2221_v48 = vpop.f32.mrb[58].mxu0 }
 0x30f   : > { %2550 = vst.msk [vmem:[%s3752_s23 + $0x5c] sm:$0xf] %vm2526_vm0, %v2745_v7  ;;  %v2746_v30 = vpack.c.bf16 %v2390_v18, %v2390_v18  ;;  %v2391_v10 = vmul.f32 %v3154_v37, %v2221_v48  ;;  %v2991_v22 = vpop.f32.mrb[59].mxu0 }
 0x310   : > { %v2265_v55 = vpop.f32.mrb[56].mxu1 }
 0x311   : > { %2551 = vst.msk [vmem:[%s3752_s23 + $0x60] sm:$0xf] %vm2526_vm0, %v2746_v30  ;;  %v2747_v20 = vpack.c.bf16 %v2391_v10, %v2391_v10  ;;  %v2392_v17 = vmul.f32 %v3156_v12, %v2265_v55  ;;  %v2996_v21 = vpop.f32.mrb[57].mxu1 }
 0x312   : > { %v2268_v3 = vpop.f32.mrb[58].mxu1 }
 0x313   : > { %2552 = vst.msk [vmem:[%s3752_s23 + $0x64] sm:$0xf] %vm2526_vm0, %v2747_v20  ;;  %v2748_v16 = vpack.c.bf16 %v2392_v17, %v2392_v17  ;;  %v2393_v42 = vmul.f32 %v3158_v13, %v2268_v3  ;;  %v2997_v43 = vpop.f32.mrb[59].mxu1 }
 0x314   : > { %v2312_v26 = vpop.f32.mrb[60].mxu0 }
 0x315   : > { %2553 = vst.msk [vmem:[%s3752_s23 + $0x68] sm:$0xf] %vm2526_vm0, %v2748_v16  ;;  %v2749_v31 = vpack.c.bf16 %v2393_v42, %v2393_v42  ;;  %v2394_v15 = vmul.f32 %v3160_v36, %v2312_v26  ;;  %v3002_v19 = vpop.f32.mrb[61].mxu0 }
 0x316   : > { %v2315_v24 = vpop.f32.mrb[62].mxu0 }
 0x317   : > { %2554 = vst.msk [vmem:[%s3752_s23 + $0x6c] sm:$0xf] %vm2526_vm0, %v2749_v31  ;;  %v2750_v29 = vpack.c.bf16 %v2394_v15, %v2394_v15  ;;  %v2395_v32 = vmul.f32 %v3162_v46, %v2315_v24  ;;  %v3003_v27 = vpop.f32.mrb[63].mxu0 }
 0x318   : > { %v2359_v47 = vpop.f32.mrb[60].mxu1 }
 0x319   : > { %2555 = vst.msk [vmem:[%s3752_s23 + $0x70] sm:$0xf] %vm2526_vm0, %v2750_v29  ;;  %v2751_v45 = vpack.c.bf16 %v2395_v32, %v2395_v32  ;;  %v2396_v50 = vmul.f32 %v3164_v40, %v2359_v47  ;;  %v3008_v53 = vpop.f32.mrb[61].mxu1 }
 0x31a   : > { %v2362_v49 = vpop.f32.mrb[62].mxu1 }
 0x31b   : > { %2556 = vst.msk [vmem:[%s3752_s23 + $0x74] sm:$0xf] %vm2526_vm0, %v2751_v45  ;;  %v2752_v41 = vpack.c.bf16 %v2396_v50, %v2396_v50  ;;  %v2397_v44 = vmul.f32 %v3166_v34, %v2362_v49  ;;  %v3009_v25 = vpop.f32.mrb[63].mxu1 }
 0x31d   : > { %2557 = vst.msk [vmem:[%s3752_s23 + $0x78] sm:$0xf] %vm2526_vm0, %v2752_v41  ;;  %v2753_v39 = vpack.c.bf16 %v2397_v44, %v2397_v44 }
 0x31f   : > { %2558 = vst.msk [vmem:[%s3752_s23 + $0x7c] sm:$0xf] %vm2526_vm0, %v2753_v39 }
 0x320 PF: > { %s12_s9 = sadd.s32 1, %s3173_s9  }
 0x321   : > { %p9_p4 = scmp.ge.s32.totalorder %s12_s9, 4  }
 0x323   :  { %11 = sbr.rel (!%p9_p4) target bundleno = 1 (0x1), region = 61 }

// kernel: fwd.22
= control target key start
LH: loop header
LB: loop body
LE: loop exit
PB: predicated region body
PF: predicated region fallthrough
CT: control target
= control target key end

     0   :  { %s1243_s15 = smov 0   ;;  %s1431_s0 = inlined_call_operand.vmem [shape: bf16[512,128], index: 0, kind: input, shape index: {}]   ;;  %s1432_s1 = inlined_call_operand.vmem [shape: bf16[128,32], index: 1, kind: input, shape index: {}]   ;;  %s1433_s2 = inlined_call_operand.vmem [shape: f32[1,32], index: 2, kind: input, shape index: {}]   ;;  %s1434_s3 = inlined_call_operand.vmem [shape: bf16[512,32], index: 3, kind: input, shape index: {}]   ;;  %s1435_s4 = inlined_call_operand.vmem [shape: bf16[512,32], index: 4, kind: output, shape index: {}]  }
   0x1 LB: > { %s909_s16 = sadd.s32 4294967295, %s1216_s15   ;;  %p913_p0 = scmp.ge.s32.totalorder %s1216_s15, 1  ;;  %s1216_s15 = sphi %s1243_s15, %s14_s15  }
   0x2   : > { %p174_p1 = scmp.lt.s32.totalorder %s1216_s15, 3 }
   0x4   : > { %p175_p2 = pnand %p913_p0, %p174_p1 }
   0x5   : > { %v1186_v0 = vld [vmem:[%s1432_s1] sm:$0xff] (!%p175_p2)   ;;  %s914_s19 = sshll.u32 (!%p175_p2), %s909_s16, 5  ;;  %v1187_v1 = vld [vmem:[%s1432_s1 + $0x8] sm:$0xff] (!%p175_p2)   ;;  %v1188_v2 = vld [vmem:[%s1432_s1 + $0x10] sm:$0xff] (!%p175_p2)   ;;  %vm808_vm0 = vcmask (!%p175_p2), 257024  }
   0x6   : > { %178 = sbr.rel (%p175_p2) target bundleno = 284 (0x11c), region = 36  ;;  %p206_p3 = scmp.lt.s32.totalorder (!%p175_p2), %s914_s19, 63  ;;  %1114 = vmatprep.subr.bf16.mxu0 (!%p175_p2), %v1186_v0  ;;  %1162 = vmatprep.subr.bf16.mxu1 (!%p175_p2), %v1186_v0  ;;  %v1189_v3 = vld [vmem:[%s1432_s1 + $0x18] sm:$0xff] (!%p175_p2)   ;;  %v1190_v6 = vld [vmem:[%s1432_s1 + $0x20] sm:$0xff] (!%p175_p2)   ;;  %v1191_v7 = vld [vmem:[%s1432_s1 + $0x28] sm:$0xff] (!%p175_p2)  }
   0x7   : > { %1115 = vmatpush3.bf16.msra.mxu0 (!%p175_p2), %v1186_v0  ;;  %1170 = vmatpush3.bf16.msra.mxu1 (!%p175_p2), %v1186_v0  ;;  %v1192_v8 = vld [vmem:[%s1432_s1 + $0x30] sm:$0xff] (!%p175_p2)   ;;  %v1193_v9 = vld [vmem:[%s1432_s1 + $0x38] sm:$0xff] (!%p175_p2)   ;;  %v1312_v28 = vld [vmem:[%s1433_s2] ss:$0 sm:$0xff] (!%p175_p2) }
   0x8   : > { %1116 = vmatprep.subr.bf16.mxu0 (!%p175_p2), %v1187_v1  ;;  %1163 = vmatprep.subr.bf16.mxu1 (!%p175_p2), %v1187_v1 }
   0xb   : > { %1117 = vmatpush3.bf16.msra.mxu0 (!%p175_p2), %v1187_v1  ;;  %1171 = vmatpush3.bf16.msra.mxu1 (!%p175_p2), %v1187_v1 }
   0xc   : > { %1118 = vmatprep.subr.bf16.mxu0 (!%p175_p2), %v1188_v2  ;;  %1164 = vmatprep.subr.bf16.mxu1 (!%p175_p2), %v1188_v2 }
   0xd   : > { %s1437_s19 = smov (!%p206_p3, %s914_s19), 63 }
   0xe   : > { %s1260_s24 = sshll.u32 %s1437_s19, 2 }
   0xf   : > { %s1266_s27 = scalar_lea.vmem %s1431_s0, %s1260_s24  ;;  %1119 = vmatpush3.bf16.msra.mxu0 %v1188_v2  ;;  %1172 = vmatpush3.bf16.msra.mxu1 %v1188_v2  ;;  %s1303_s14 = scalar_lea.vmem %s1434_s3, %s1260_s24 }
  0x10   : > { %v1194_v4 = vld [vmem:[%s1266_s27] sm:$0xff]   ;;  %1120 = vmatprep.subr.bf16.mxu0 %v1189_v3  ;;  %1165 = vmatprep.subr.bf16.mxu1 %v1189_v3  ;;  %v1196_v10 = vld [vmem:[%s1266_s27 + $0x8] sm:$0xff]   ;;  %v1198_v12 = vld [vmem:[%s1266_s27 + $0x10] sm:$0xff]   ;;  %s1324_s20 = scalar_lea.vmem %s1435_s4, %s1260_s24 }
  0x11   : > { %v1195_v5 = vld [vmem:[%s1266_s27 + $0x40] sm:$0xff]   ;;  %1130 = vmatprep.mubr.bf16.mxu0 %v1194_v4  ;;  %v1197_v11 = vld [vmem:[%s1266_s27 + $0x48] sm:$0xff]   ;;  %v1199_v13 = vld [vmem:[%s1266_s27 + $0x50] sm:$0xff]  }
  0x12   : > { %1146 = vmatprep.mubr.bf16.mxu1 %v1195_v5  ;;  %v1200_v14 = vld [vmem:[%s1266_s27 + $0x18] sm:$0xff]   ;;  %v1202_v16 = vld [vmem:[%s1266_s27 + $0x20] sm:$0xff]   ;;  %v1204_v18 = vld [vmem:[%s1266_s27 + $0x28] sm:$0xff]  }
  0x13   : > { %1121 = vmatpush3.bf16.msra.mxu0 %v1189_v3  ;;  %1173 = vmatpush3.bf16.msra.mxu1 %v1189_v3  ;;  %v1201_v15 = vld [vmem:[%s1266_s27 + $0x58] sm:$0xff]   ;;  %v1203_v17 = vld [vmem:[%s1266_s27 + $0x60] sm:$0xff]   ;;  %v1205_v19 = vld [vmem:[%s1266_s27 + $0x68] sm:$0xff]  }
  0x14   : > { %1122 = vmatprep.subr.bf16.mxu0 %v1190_v6  ;;  %1166 = vmatprep.subr.bf16.mxu1 %v1190_v6  ;;  %v1206_v20 = vld [vmem:[%s1266_s27 + $0x30] sm:$0xff]   ;;  %v1208_v22 = vld [vmem:[%s1266_s27 + $0x38] sm:$0xff]   ;;  %v1075_v24 = vld [vmem:[%s1303_s14 + $0x8] sm:$0xff]  }
  0x15   : > { %v1207_v21 = vld [vmem:[%s1266_s27 + $0x70] sm:$0xff]   ;;  %v1209_v23 = vld [vmem:[%s1266_s27 + $0x78] sm:$0xff]   ;;  %v1083_v25 = vld [vmem:[%s1303_s14 + $0x48] sm:$0xff]   ;;  %v1017_v29 = vunpack.c.l.bf16 %v1075_v24  ;;  %v1018_v35 = vunpack.c.h.bf16 %v1075_v24 }
  0x16   : > { %v1012_v26 = vld [vmem:[%s1303_s14] sm:$0xff]   ;;  %v1049_v30 = vunpack.c.l.bf16 %v1083_v25  ;;  %v1050_v40 = vunpack.c.h.bf16 %v1083_v25  ;;  %v1077_v57 = vld [vmem:[%s1303_s14 + $0x18] sm:$0xff]   ;;  %v1076_v63 = vld [vmem:[%s1303_s14 + $0x10] sm:$0xff]  }
  0x17   : > { %1123 = vmatpush3.bf16.msra.mxu0 %v1190_v6  ;;  %1174 = vmatpush3.bf16.msra.mxu1 %v1190_v6  ;;  %v1082_v27 = vld [vmem:[%s1303_s14 + $0x40] sm:$0xff]   ;;  %v1013_v33 = vunpack.c.l.bf16 %v1012_v26  ;;  %v1014_v41 = vunpack.c.h.bf16 %v1012_v26  ;;  %v1085_v58 = vld [vmem:[%s1303_s14 + $0x58] sm:$0xff]   ;;  %v1084_v0 = vld [vmem:[%s1303_s14 + $0x50] sm:$0xff]   ;;  %v1022_v25 = vunpack.c.h.bf16 %v1076_v63 }
  0x18   : > { %1124 = vmatprep.subr.bf16.mxu0 %v1191_v7  ;;  %1167 = vmatprep.subr.bf16.mxu1 %v1191_v7  ;;  %v1045_v34 = vunpack.c.l.bf16 %v1082_v27  ;;  %v1046_v46 = vunpack.c.h.bf16 %v1082_v27  ;;  %v1054_v26 = vunpack.c.h.bf16 %v1084_v0 }
  0x1b   : > { %1125 = vmatpush3.bf16.msra.mxu0 %v1191_v7  ;;  %1175 = vmatpush3.bf16.msra.mxu1 %v1191_v7  ;;  %v1025_v7 = vunpack.c.l.bf16 %v1077_v57 }
  0x1c   : > { %1126 = vmatprep.subr.bf16.mxu0 %v1192_v8  ;;  %1168 = vmatprep.subr.bf16.mxu1 %v1192_v8 }
  0x1f   : > { %1127 = vmatpush3.bf16.msra.mxu0 %v1192_v8  ;;  %1176 = vmatpush3.bf16.msra.mxu1 %v1192_v8  ;;  %v1057_v8 = vunpack.c.l.bf16 %v1085_v58 }
  0x20   : > { %1128 = vmatprep.subr.bf16.mxu0 %v1193_v9  ;;  %1169 = vmatprep.subr.bf16.mxu1 %v1193_v9 }
  0x23   : > { %1129 = vmatpush3.bf16.msra.mxu0 %v1193_v9  ;;  %1177 = vmatpush3.bf16.msra.mxu1 %v1193_v9 }
  0x26   : > { %1131 = vmatmul.mubr.bf16.vlgmr.msra.gmra.mrb[0].mxu0 %v1196_v10  ;;  %1147 = vmatmul.mubr.bf16.vlgmr.msra.gmra.mrb[0].mxu1 %v1197_v11 }
  0x27   : > { %1134 = vmatprep.mubr.bf16.mxu0 %v1198_v12  ;;  %1150 = vmatprep.mubr.bf16.mxu1 %v1199_v13  ;;  %v1021_v13 = vunpack.c.l.bf16 %v1076_v63 }
  0x2e   : > { %1135 = vmatmul.mubr.bf16.gmra.mrb[4].mxu0 %v1200_v14  ;;  %1151 = vmatmul.mubr.bf16.gmra.mrb[4].mxu1 %v1201_v15  ;;  %v1053_v14 = vunpack.c.l.bf16 %v1084_v0 }
  0x2f   : > { %1138 = vmatprep.mubr.bf16.mxu0 %v1202_v16  ;;  %1154 = vmatprep.mubr.bf16.mxu1 %v1203_v17 }
  0x36   : > { %1139 = vmatmul.mubr.bf16.gmra.mrb[8].mxu0 %v1204_v18  ;;  %1155 = vmatmul.mubr.bf16.gmra.mrb[8].mxu1 %v1205_v19  ;;  %v1026_v19 = vunpack.c.h.bf16 %v1077_v57 }
  0x37   : > { %1142 = vmatprep.mubr.bf16.mxu0 %v1206_v20  ;;  %1158 = vmatprep.mubr.bf16.mxu1 %v1207_v21  ;;  %v1058_v20 = vunpack.c.h.bf16 %v1085_v58 }
  0x3e   : > { %1143 = vmatmul.mubr.bf16.gmra.mrb[12].mxu0 %v1208_v22  ;;  %1159 = vmatmul.mubr.bf16.gmra.mrb[12].mxu1 %v1209_v23 }
  0xf9   : > { %v1132_v31 = vpop.f32.mrb[0].mxu0  ;;  %v1148_v32 = vpop.f32.mrb[0].mxu1 }
  0xfa   : > { %v466_v36 = vadd.f32 %v1132_v31, %v1312_v28  ;;  %v530_v37 = vadd.f32 %v1148_v32, %v1312_v28  ;;  %v457_v38 = vpop.f32.mrb[1].mxu0  ;;  %v521_v39 = vpop.f32.mrb[1].mxu1 }
  0xfb   : > { %v458_v42 = vadd.f32 %v1312_v28, %v457_v38  ;;  %v522_v43 = vadd.f32 %v1312_v28, %v521_v39  ;;  %v1133_v44 = vpop.f32.mrb[2].mxu0  ;;  %v1149_v45 = vpop.f32.mrb[2].mxu1  ;;  %v1079_v38 = vld [vmem:[%s1303_s14 + $0x28] sm:$0xff]  }
  0xfc   : > { %v650_v47 = vadd.f32 %v1017_v29, %v466_v36  ;;  %v666_v48 = vadd.f32 %v1049_v30, %v530_v37  ;;  %v469_v49 = vadd.f32 %v1133_v44, %v1312_v28  ;;  %v533_v50 = vadd.f32 %v1149_v45, %v1312_v28  ;;  %v460_v51 = vpop.f32.mrb[3].mxu0  ;;  %v524_v52 = vpop.f32.mrb[3].mxu1  ;;  %v1087_v39 = vld [vmem:[%s1303_s14 + $0x68] sm:$0xff]   ;;  %v1078_v44 = vld [vmem:[%s1303_s14 + $0x20] sm:$0xff]  }
  0xfd   : > { %v648_v53 = vadd.f32 %v1013_v33, %v458_v42  ;;  %v664_v54 = vadd.f32 %v1045_v34, %v522_v43  ;;  %v461_v55 = vadd.f32 %v1312_v28, %v460_v51  ;;  %v525_v56 = vadd.f32 %v1312_v28, %v524_v52  ;;  %v1086_v45 = vld [vmem:[%s1303_s14 + $0x60] sm:$0xff]  }
  0xfe   : > { %v981_v59 = vpack.c.bf16 %v650_v47, %v650_v47  ;;  %v997_v60 = vpack.c.bf16 %v666_v48, %v666_v48  ;;  %v651_v61 = vadd.f32 %v1018_v35, %v469_v49  ;;  %v667_v62 = vadd.f32 %v1050_v40, %v533_v50 }
  0xff   : > { %v979_v1 = vpack.c.bf16 %v648_v53, %v648_v53  ;;  %v995_v2 = vpack.c.bf16 %v664_v54, %v664_v54  ;;  %v649_v3 = vadd.f32 %v1014_v41, %v461_v55  ;;  %v665_v4 = vadd.f32 %v1046_v46, %v525_v56 }
 0x100   : > { %811 = vst.msk [vmem:[%s1324_s20 + $0x8] sm:$0xf] %vm808_vm0, %v981_v59  ;;  %827 = vst.msk [vmem:[%s1324_s20 + $0x48] sm:$0xf] %vm808_vm0, %v997_v60  ;;  %v982_v5 = vpack.c.bf16 %v651_v61, %v651_v61  ;;  %v998_v6 = vpack.c.bf16 %v667_v62, %v667_v62  ;;  %v1033_v52 = vunpack.c.l.bf16 %v1079_v38  ;;  %v1065_v53 = vunpack.c.l.bf16 %v1087_v39 }
 0x101   : > { %809 = vst.msk [vmem:[%s1324_s20] sm:$0xf] %vm808_vm0, %v979_v1  ;;  %825 = vst.msk [vmem:[%s1324_s20 + $0x40] sm:$0xf] %vm808_vm0, %v995_v2  ;;  %v980_v9 = vpack.c.bf16 %v649_v3, %v649_v3  ;;  %v996_v10 = vpack.c.bf16 %v665_v4, %v665_v4  ;;  %v1136_v11 = vpop.f32.mrb[4].mxu0  ;;  %v1152_v12 = vpop.f32.mrb[4].mxu1  ;;  %v1029_v58 = vunpack.c.l.bf16 %v1078_v44  ;;  %v1061_v59 = vunpack.c.l.bf16 %v1086_v45 }
 0x102   : > { %812 = vst.msk [vmem:[%s1324_s20 + $0xc] sm:$0xf] %vm808_vm0, %v982_v5  ;;  %828 = vst.msk [vmem:[%s1324_s20 + $0x4c] sm:$0xf] %vm808_vm0, %v998_v6  ;;  %v482_v15 = vadd.f32 %v1136_v11, %v1312_v28  ;;  %v546_v16 = vadd.f32 %v1152_v12, %v1312_v28  ;;  %v473_v17 = vpop.f32.mrb[5].mxu0  ;;  %v537_v18 = vpop.f32.mrb[5].mxu1  ;;  %v1034_v0 = vunpack.c.h.bf16 %v1079_v38  ;;  %v1066_v1 = vunpack.c.h.bf16 %v1087_v39 }
 0x103   : > { %810 = vst.msk [vmem:[%s1324_s20 + $0x4] sm:$0xf] %vm808_vm0, %v980_v9  ;;  %826 = vst.msk [vmem:[%s1324_s20 + $0x44] sm:$0xf] %vm808_vm0, %v996_v10  ;;  %v474_v21 = vadd.f32 %v1312_v28, %v473_v17  ;;  %v538_v22 = vadd.f32 %v1312_v28, %v537_v18  ;;  %v1137_v23 = vpop.f32.mrb[6].mxu0  ;;  %v1153_v24 = vpop.f32.mrb[6].mxu1  ;;  %v1030_v6 = vunpack.c.h.bf16 %v1078_v44 }
 0x104   : > { %v654_v27 = vadd.f32 %v1025_v7, %v482_v15  ;;  %v670_v29 = vadd.f32 %v1057_v8, %v546_v16  ;;  %v485_v30 = vadd.f32 %v1137_v23, %v1312_v28  ;;  %v549_v31 = vadd.f32 %v1153_v24, %v1312_v28  ;;  %v476_v32 = vpop.f32.mrb[7].mxu0  ;;  %v540_v33 = vpop.f32.mrb[7].mxu1  ;;  %v1081_v18 = vld [vmem:[%s1303_s14 + $0x38] sm:$0xff]   ;;  %v1080_v24 = vld [vmem:[%s1303_s14 + $0x30] sm:$0xff]  }
 0x105   : > { %v652_v34 = vadd.f32 %v1021_v13, %v474_v21  ;;  %v668_v35 = vadd.f32 %v1053_v14, %v538_v22  ;;  %v477_v36 = vadd.f32 %v1312_v28, %v476_v32  ;;  %v541_v37 = vadd.f32 %v1312_v28, %v540_v33 }
 0x106   : > { %v985_v40 = vpack.c.bf16 %v654_v27, %v654_v27  ;;  %v1001_v41 = vpack.c.bf16 %v670_v29, %v670_v29  ;;  %v655_v42 = vadd.f32 %v1026_v19, %v485_v30  ;;  %v671_v43 = vadd.f32 %v1058_v20, %v549_v31  ;;  %v1089_v19 = vld [vmem:[%s1303_s14 + $0x78] sm:$0xff]  }
 0x107   : > { %v983_v46 = vpack.c.bf16 %v652_v34, %v652_v34  ;;  %v999_v47 = vpack.c.bf16 %v668_v35, %v668_v35  ;;  %v653_v48 = vadd.f32 %v1022_v25, %v477_v36  ;;  %v669_v49 = vadd.f32 %v1054_v26, %v541_v37  ;;  %v1088_v25 = vld [vmem:[%s1303_s14 + $0x70] sm:$0xff]  }
 0x108   : > { %815 = vst.msk [vmem:[%s1324_s20 + $0x18] sm:$0xf] %vm808_vm0, %v985_v40  ;;  %831 = vst.msk [vmem:[%s1324_s20 + $0x58] sm:$0xf] %vm808_vm0, %v1001_v41  ;;  %v986_v50 = vpack.c.bf16 %v655_v42, %v655_v42  ;;  %v1002_v51 = vpack.c.bf16 %v671_v43, %v671_v43  ;;  %v1062_v7 = vunpack.c.h.bf16 %v1086_v45  ;;  %v1041_v33 = vunpack.c.l.bf16 %v1081_v18 }
 0x109   : > { %813 = vst.msk [vmem:[%s1324_s20 + $0x10] sm:$0xf] %vm808_vm0, %v983_v46  ;;  %829 = vst.msk [vmem:[%s1324_s20 + $0x50] sm:$0xf] %vm808_vm0, %v999_v47  ;;  %v984_v54 = vpack.c.bf16 %v653_v48, %v653_v48  ;;  %v1000_v55 = vpack.c.bf16 %v669_v49, %v669_v49  ;;  %v1140_v56 = vpop.f32.mrb[8].mxu0  ;;  %v1156_v57 = vpop.f32.mrb[8].mxu1  ;;  %v1073_v34 = vunpack.c.l.bf16 %v1089_v19  ;;  %v1037_v39 = vunpack.c.l.bf16 %v1080_v24 }
 0x10a   : > { %816 = vst.msk [vmem:[%s1324_s20 + $0x1c] sm:$0xf] %vm808_vm0, %v986_v50  ;;  %832 = vst.msk [vmem:[%s1324_s20 + $0x5c] sm:$0xf] %vm808_vm0, %v1002_v51  ;;  %v498_v60 = vadd.f32 %v1140_v56, %v1312_v28  ;;  %v562_v61 = vadd.f32 %v1156_v57, %v1312_v28  ;;  %v489_v62 = vpop.f32.mrb[9].mxu0  ;;  %v553_v63 = vpop.f32.mrb[9].mxu1  ;;  %v1069_v40 = vunpack.c.l.bf16 %v1088_v25  ;;  %v1042_v45 = vunpack.c.h.bf16 %v1081_v18 }
 0x10b   : > { %814 = vst.msk [vmem:[%s1324_s20 + $0x14] sm:$0xf] %vm808_vm0, %v984_v54  ;;  %830 = vst.msk [vmem:[%s1324_s20 + $0x54] sm:$0xf] %vm808_vm0, %v1000_v55  ;;  %v490_v2 = vadd.f32 %v1312_v28, %v489_v62  ;;  %v554_v3 = vadd.f32 %v1312_v28, %v553_v63  ;;  %v1141_v4 = vpop.f32.mrb[10].mxu0  ;;  %v1157_v5 = vpop.f32.mrb[10].mxu1  ;;  %v1074_v46 = vunpack.c.h.bf16 %v1089_v19  ;;  %v1038_v51 = vunpack.c.h.bf16 %v1080_v24 }
 0x10c   : > { %v658_v8 = vadd.f32 %v1033_v52, %v498_v60  ;;  %v674_v9 = vadd.f32 %v1065_v53, %v562_v61  ;;  %v501_v10 = vadd.f32 %v1141_v4, %v1312_v28  ;;  %v565_v11 = vadd.f32 %v1157_v5, %v1312_v28  ;;  %v492_v12 = vpop.f32.mrb[11].mxu0  ;;  %v556_v13 = vpop.f32.mrb[11].mxu1 }
 0x10d   : > { %v656_v14 = vadd.f32 %v1029_v58, %v490_v2  ;;  %v672_v15 = vadd.f32 %v1061_v59, %v554_v3  ;;  %v493_v16 = vadd.f32 %v1312_v28, %v492_v12  ;;  %v557_v17 = vadd.f32 %v1312_v28, %v556_v13 }
 0x10e   : > { %v989_v20 = vpack.c.bf16 %v658_v8, %v658_v8  ;;  %v1005_v21 = vpack.c.bf16 %v674_v9, %v674_v9  ;;  %v659_v22 = vadd.f32 %v1034_v0, %v501_v10  ;;  %v675_v23 = vadd.f32 %v1066_v1, %v565_v11 }
 0x10f   : > { %v987_v26 = vpack.c.bf16 %v656_v14, %v656_v14  ;;  %v1003_v27 = vpack.c.bf16 %v672_v15, %v672_v15  ;;  %v657_v29 = vadd.f32 %v1030_v6, %v493_v16  ;;  %v673_v30 = vadd.f32 %v1062_v7, %v557_v17 }
 0x110   : > { %819 = vst.msk [vmem:[%s1324_s20 + $0x28] sm:$0xf] %vm808_vm0, %v989_v20  ;;  %835 = vst.msk [vmem:[%s1324_s20 + $0x68] sm:$0xf] %vm808_vm0, %v1005_v21  ;;  %v990_v31 = vpack.c.bf16 %v659_v22, %v659_v22  ;;  %v1006_v32 = vpack.c.bf16 %v675_v23, %v675_v23  ;;  %v1070_v52 = vunpack.c.h.bf16 %v1088_v25 }
 0x111   : > { %817 = vst.msk [vmem:[%s1324_s20 + $0x20] sm:$0xf] %vm808_vm0, %v987_v26  ;;  %833 = vst.msk [vmem:[%s1324_s20 + $0x60] sm:$0xf] %vm808_vm0, %v1003_v27  ;;  %v988_v35 = vpack.c.bf16 %v657_v29, %v657_v29  ;;  %v1004_v36 = vpack.c.bf16 %v673_v30, %v673_v30  ;;  %v1144_v37 = vpop.f32.mrb[12].mxu0  ;;  %v1160_v38 = vpop.f32.mrb[12].mxu1 }
 0x112   : > { %820 = vst.msk [vmem:[%s1324_s20 + $0x2c] sm:$0xf] %vm808_vm0, %v990_v31  ;;  %836 = vst.msk [vmem:[%s1324_s20 + $0x6c] sm:$0xf] %vm808_vm0, %v1006_v32  ;;  %v514_v41 = vadd.f32 %v1144_v37, %v1312_v28  ;;  %v578_v42 = vadd.f32 %v1160_v38, %v1312_v28  ;;  %v505_v43 = vpop.f32.mrb[13].mxu0  ;;  %v569_v44 = vpop.f32.mrb[13].mxu1 }
 0x113   : > { %818 = vst.msk [vmem:[%s1324_s20 + $0x24] sm:$0xf] %vm808_vm0, %v988_v35  ;;  %834 = vst.msk [vmem:[%s1324_s20 + $0x64] sm:$0xf] %vm808_vm0, %v1004_v36  ;;  %v506_v47 = vadd.f32 %v1312_v28, %v505_v43  ;;  %v570_v48 = vadd.f32 %v1312_v28, %v569_v44  ;;  %v1145_v49 = vpop.f32.mrb[14].mxu0  ;;  %v1161_v50 = vpop.f32.mrb[14].mxu1 }
 0x114   : > { %v662_v53 = vadd.f32 %v1041_v33, %v514_v41  ;;  %v678_v54 = vadd.f32 %v1073_v34, %v578_v42  ;;  %v517_v55 = vadd.f32 %v1145_v49, %v1312_v28  ;;  %v581_v56 = vadd.f32 %v1161_v50, %v1312_v28  ;;  %v508_v57 = vpop.f32.mrb[15].mxu0  ;;  %v572_v58 = vpop.f32.mrb[15].mxu1 }
 0x115   : > { %v660_v59 = vadd.f32 %v1037_v39, %v506_v47  ;;  %v676_v60 = vadd.f32 %v1069_v40, %v570_v48  ;;  %v509_v61 = vadd.f32 %v1312_v28, %v508_v57  ;;  %v573_v62 = vadd.f32 %v1312_v28, %v572_v58 }
 0x116   : > { %v993_v63 = vpack.c.bf16 %v662_v53, %v662_v53  ;;  %v1009_v0 = vpack.c.bf16 %v678_v54, %v678_v54  ;;  %v663_v1 = vadd.f32 %v1042_v45, %v517_v55  ;;  %v679_v2 = vadd.f32 %v1074_v46, %v581_v56 }
 0x117   : > { %v991_v3 = vpack.c.bf16 %v660_v59, %v660_v59  ;;  %v1007_v4 = vpack.c.bf16 %v676_v60, %v676_v60  ;;  %v661_v5 = vadd.f32 %v1038_v51, %v509_v61  ;;  %v677_v6 = vadd.f32 %v1070_v52, %v573_v62 }
 0x118   : > { %823 = vst.msk [vmem:[%s1324_s20 + $0x38] sm:$0xf] %vm808_vm0, %v993_v63  ;;  %839 = vst.msk [vmem:[%s1324_s20 + $0x78] sm:$0xf] %vm808_vm0, %v1009_v0  ;;  %v994_v7 = vpack.c.bf16 %v663_v1, %v663_v1  ;;  %v1010_v8 = vpack.c.bf16 %v679_v2, %v679_v2 }
 0x119   : > { %821 = vst.msk [vmem:[%s1324_s20 + $0x30] sm:$0xf] %vm808_vm0, %v991_v3  ;;  %837 = vst.msk [vmem:[%s1324_s20 + $0x70] sm:$0xf] %vm808_vm0, %v1007_v4  ;;  %v992_v28 = vpack.c.bf16 %v661_v5, %v661_v5  ;;  %v1008_v9 = vpack.c.bf16 %v677_v6, %v677_v6 }
 0x11a   : > { %824 = vst.msk [vmem:[%s1324_s20 + $0x3c] sm:$0xf] %vm808_vm0, %v994_v7  ;;  %840 = vst.msk [vmem:[%s1324_s20 + $0x7c] sm:$0xf] %vm808_vm0, %v1010_v8 }
 0x11b   : > { %822 = vst.msk [vmem:[%s1324_s20 + $0x34] sm:$0xf] %vm808_vm0, %v992_v28  ;;  %838 = vst.msk [vmem:[%s1324_s20 + $0x74] sm:$0xf] %vm808_vm0, %v1008_v9 }
 0x11c PF: > { %s14_s15 = sadd.s32 1, %s1216_s15  }
 0x11d   : > { %p11_p4 = scmp.ge.s32.totalorder %s14_s15, 4  }
 0x11f   :  { %13 = sbr.rel (!%p11_p4) target bundleno = 1 (0x1), region = 69 }

// kernel: fwd.21
= control target key start
LH: loop header
LB: loop body
LE: loop exit
PB: predicated region body
PF: predicated region fallthrough
CT: control target
= control target key end

     0   :  { %s2045_s18 = smov 0   ;;  %s2889_s0 = inlined_call_operand.vmem [shape: bf16[512,32], index: 0, kind: input, shape index: {}]   ;;  %s2890_s1 = inlined_call_operand.vmem [shape: f32[1,32], index: 1, kind: input, shape index: {}]   ;;  %s2891_s2 = inlined_call_operand.vmem [shape: f32[1,32], index: 2, kind: input, shape index: {}]   ;;  %s2892_s3 = inlined_call_operand.vmem [shape: bf16[32,128], index: 3, kind: input, shape index: {}]   ;;  %s2893_s4 = inlined_call_operand.vmem [shape: f32[1,128], index: 4, kind: input, shape index: {}]   ;;  %s2894_s5 = inlined_call_operand.vmem [shape: bf16[512,128], index: 5, kind: output, shape index: {}]  }
   0x1 LB: > { %s1541_s19 = sadd.s32 4294967295, %s2013_s18   ;;  %p1545_p0 = scmp.ge.s32.totalorder %s2013_s18, 1  ;;  %s2013_s18 = sphi %s2045_s18, %s15_s18  }
   0x2   : > { %p188_p1 = scmp.lt.s32.totalorder %s2013_s18, 3 }
   0x4   : > { %p189_p2 = pnand %p1545_p0, %p188_p1 }
   0x5   : > { %s1546_s20 = sshll.u32 (!%p189_p2), %s1541_s19, 5  ;;  %vm293_vm0 = vcmask (!%p189_p2), 261120  }
   0x6   : > { %192 = sbr.rel (%p189_p2) target bundleno = 665 (0x299), region = 40  ;;  %p217_p3 = scmp.lt.s32.totalorder (!%p189_p2), %s1546_s20, 63 }
   0xd   : > { %s2896_s20 = smov (!%p217_p3, %s1546_s20), 63 }
   0xe   : > { %s1547_s21 = sshll.u32 %s2896_s20, 2 }
   0xf   : > { %s2061_s24 = scalar_lea.vmem %s2889_s0, %s1547_s21  ;;  %s2701_s12 = scalar_lea.vmem %s2894_s5, %s1547_s21 }
  0x10   : > { %v2064_v0 = vld [vmem:[%s2061_s24] sm:$0xff]   ;;  %v2074_v6 = vld [vmem:[%s2061_s24 + $0x8] sm:$0xff]   ;;  %v2102_v18 = vld [vmem:[%s2061_s24 + $0x10] sm:$0xff]  }
  0x11   : > { %v2067_v1 = vld [vmem:[%s2061_s24 + $0x40] sm:$0xff]   ;;  %v1639_v2 = vunpack.c.l.bf16 %v2064_v0  ;;  %v1640_v4 = vunpack.c.h.bf16 %v2064_v0  ;;  %v1643_v11 = vunpack.c.l.bf16 %v2074_v6  ;;  %v1644_v12 = vunpack.c.h.bf16 %v2074_v6  ;;  %v2091_v13 = vld [vmem:[%s2061_s24 + $0x48] sm:$0xff]   ;;  %v2113_v23 = vld [vmem:[%s2061_s24 + $0x50] sm:$0xff]  }
  0x12   : > { %v1671_v3 = vunpack.c.l.bf16 %v2067_v1  ;;  %v1672_v5 = vunpack.c.h.bf16 %v2067_v1  ;;  %v1675_v16 = vunpack.c.l.bf16 %v2091_v13  ;;  %v1676_v17 = vunpack.c.h.bf16 %v2091_v13  ;;  %v2124_v28 = vld [vmem:[%s2061_s24 + $0x18] sm:$0xff]   ;;  %v2146_v38 = vld [vmem:[%s2061_s24 + $0x20] sm:$0xff]   ;;  %v2168_v48 = vld [vmem:[%s2061_s24 + $0x28] sm:$0xff]  }
  0x13   : > { %v294_v7 = vsel %vm293_vm0, %v1639_v2, 0.0  ;;  %v297_v9 = vsel %vm293_vm0, %v1640_v4, 0.0  ;;  %v300_v14 = vsel %vm293_vm0, %v1643_v11, 0.0  ;;  %v303_v15 = vsel %vm293_vm0, %v1644_v12, 0.0  ;;  %v2135_v33 = vld [vmem:[%s2061_s24 + $0x58] sm:$0xff]   ;;  %v2157_v43 = vld [vmem:[%s2061_s24 + $0x60] sm:$0xff]  }
  0x14   : > { %v342_v8 = vsel %vm293_vm0, %v1671_v3, 0.0  ;;  %295 = vadd.xlane.f32.xlu0 %v294_v7  ;;  %v345_v10 = vsel %vm293_vm0, %v1672_v5, 0.0  ;;  %v348_v19 = vsel %vm293_vm0, %v1675_v16, 0.0  ;;  %v351_v20 = vsel %vm293_vm0, %v1676_v17, 0.0  ;;  %v2179_v53 = vld [vmem:[%s2061_s24 + $0x68] sm:$0xff]   ;;  %v2190_v58 = vld [vmem:[%s2061_s24 + $0x30] sm:$0xff]  }
  0x15   : > { %343 = vadd.xlane.f32.xlu1 %v342_v8  ;;  %v1647_v21 = vunpack.c.l.bf16 %v2102_v18  ;;  %v1648_v22 = vunpack.c.h.bf16 %v2102_v18  ;;  %v1679_v26 = vunpack.c.l.bf16 %v2113_v23  ;;  %v1680_v27 = vunpack.c.h.bf16 %v2113_v23  ;;  %v2201_v63 = vld [vmem:[%s2061_s24 + $0x70] sm:$0xff]  }
  0x16   : > { %v1651_v31 = vunpack.c.l.bf16 %v2124_v28  ;;  %v1652_v32 = vunpack.c.h.bf16 %v2124_v28  ;;  %v1683_v36 = vunpack.c.l.bf16 %v2135_v33  ;;  %v1684_v37 = vunpack.c.h.bf16 %v2135_v33 }
  0x17   : > { %v306_v24 = vsel %vm293_vm0, %v1647_v21, 0.0  ;;  %v309_v25 = vsel %vm293_vm0, %v1648_v22, 0.0  ;;  %v354_v29 = vsel %vm293_vm0, %v1679_v26, 0.0  ;;  %v357_v30 = vsel %vm293_vm0, %v1680_v27, 0.0 }
  0x18   : > { %298 = vadd.xlane.f32.xlu0 %v297_v9  ;;  %v312_v34 = vsel %vm293_vm0, %v1651_v31, 0.0  ;;  %v315_v35 = vsel %vm293_vm0, %v1652_v32, 0.0  ;;  %v360_v39 = vsel %vm293_vm0, %v1683_v36, 0.0  ;;  %v363_v40 = vsel %vm293_vm0, %v1684_v37, 0.0 }
  0x19   : > { %346 = vadd.xlane.f32.xlu1 %v345_v10  ;;  %v1655_v41 = vunpack.c.l.bf16 %v2146_v38  ;;  %v1656_v42 = vunpack.c.h.bf16 %v2146_v38  ;;  %v1687_v46 = vunpack.c.l.bf16 %v2157_v43  ;;  %v1688_v47 = vunpack.c.h.bf16 %v2157_v43 }
  0x1a   : > { %v1659_v51 = vunpack.c.l.bf16 %v2168_v48  ;;  %v1660_v52 = vunpack.c.h.bf16 %v2168_v48  ;;  %v1691_v56 = vunpack.c.l.bf16 %v2179_v53  ;;  %v1692_v57 = vunpack.c.h.bf16 %v2179_v53 }
  0x1b   : > { %v318_v44 = vsel %vm293_vm0, %v1655_v41, 0.0  ;;  %v321_v45 = vsel %vm293_vm0, %v1656_v42, 0.0  ;;  %v366_v49 = vsel %vm293_vm0, %v1687_v46, 0.0  ;;  %v369_v50 = vsel %vm293_vm0, %v1688_v47, 0.0 }
  0x1c   : > { %301 = vadd.xlane.f32.xlu0 %v300_v14  ;;  %v324_v54 = vsel %vm293_vm0, %v1659_v51, 0.0  ;;  %v327_v55 = vsel %vm293_vm0, %v1660_v52, 0.0  ;;  %v372_v59 = vsel %vm293_vm0, %v1691_v56, 0.0  ;;  %v375_v60 = vsel %vm293_vm0, %v1692_v57, 0.0  ;;  %v2212_v14 = vld [vmem:[%s2061_s24 + $0x38] sm:$0xff]  }
  0x1d   : > { %304 = vadd.xlane.f32.xlu1 %v303_v15  ;;  %v1663_v61 = vunpack.c.l.bf16 %v2190_v58  ;;  %v1664_v62 = vunpack.c.h.bf16 %v2190_v58  ;;  %v1695_v9 = vunpack.c.l.bf16 %v2201_v63  ;;  %v1696_v10 = vunpack.c.h.bf16 %v2201_v63 }
  0x1f   : > { %v330_v7 = vsel %vm293_vm0, %v1663_v61, 0.0  ;;  %v333_v8 = vsel %vm293_vm0, %v1664_v62, 0.0  ;;  %v378_v15 = vsel %vm293_vm0, %v1695_v9, 0.0 }
  0x20   : > { %349 = vadd.xlane.f32.xlu0 %v348_v19  ;;  %v381_v19 = vsel %vm293_vm0, %v1696_v10, 0.0 }
  0x21   : > { %352 = vadd.xlane.f32.xlu1 %v351_v20  ;;  %v1667_v20 = vunpack.c.l.bf16 %v2212_v14 }
  0x24   : > { %307 = vadd.xlane.f32.xlu0 %v306_v24  ;;  %v1668_v24 = vunpack.c.h.bf16 %v2212_v14 }
  0x25   : > { %310 = vadd.xlane.f32.xlu1 %v309_v25  ;;  %v2223_v25 = vld [vmem:[%s2061_s24 + $0x78] sm:$0xff]  }
  0x28   : > { %355 = vadd.xlane.f32.xlu0 %v354_v29  ;;  %v336_v29 = vsel %vm293_vm0, %v1667_v20, 0.0 }
  0x29   : > { %358 = vadd.xlane.f32.xlu1 %v357_v30  ;;  %v339_v30 = vsel %vm293_vm0, %v1668_v24, 0.0 }
  0x2c   : > { %313 = vadd.xlane.f32.xlu0 %v312_v34  ;;  %v1699_v34 = vunpack.c.l.bf16 %v2223_v25 }
  0x2d   : > { %316 = vadd.xlane.f32.xlu1 %v315_v35  ;;  %v1700_v35 = vunpack.c.h.bf16 %v2223_v25 }
  0x30   : > { %361 = vadd.xlane.f32.xlu0 %v360_v39  ;;  %v384_v39 = vsel %vm293_vm0, %v1699_v34, 0.0 }
  0x31   : > { %364 = vadd.xlane.f32.xlu1 %v363_v40  ;;  %v387_v40 = vsel %vm293_vm0, %v1700_v35, 0.0 }
  0x34   : > { %319 = vadd.xlane.f32.xlu0 %v318_v44 }
  0x35   : > { %322 = vadd.xlane.f32.xlu1 %v321_v45 }
  0x38   : > { %367 = vadd.xlane.f32.xlu0 %v366_v49 }
  0x39   : > { %370 = vadd.xlane.f32.xlu1 %v369_v50 }
  0x3c   : > { %325 = vadd.xlane.f32.xlu0 %v324_v54 }
  0x3d   : > { %328 = vadd.xlane.f32.xlu1 %v327_v55 }
  0x40   : > { %373 = vadd.xlane.f32.xlu0 %v372_v59 }
  0x41   : > { %376 = vadd.xlane.f32.xlu1 %v375_v60 }
  0x44   : > { %331 = vadd.xlane.f32.xlu0 %v330_v7 }
  0x45   : > { %334 = vadd.xlane.f32.xlu1 %v333_v8 }
  0x48   : > { %379 = vadd.xlane.f32.xlu0 %v378_v15 }
  0x49   : > { %382 = vadd.xlane.f32.xlu1 %v381_v19 }
  0x4c   : > { %337 = vadd.xlane.f32.xlu0 %v336_v29 }
  0x4d   : > { %340 = vadd.xlane.f32.xlu1 %v339_v30 }
  0x50   : > { %385 = vadd.xlane.f32.xlu0 %v384_v39 }
  0x51   : > { %388 = vadd.xlane.f32.xlu1 %v387_v40 }
  0xa1   : > { %v296_v44 = vpop.xlane.xlu0 %295 }
  0xa2   : > { %v344_v45 = vpop.xlane.xlu1 %343  ;;  %v391_v49 = vmul.f32 0.03125, %v296_v44 }
  0xa3   : > { %v407_v50 = vmul.f32 0.03125, %v344_v45 }
  0xa4   : > { %v2241_v54 = vsub.f32 %v1639_v2, %v391_v49 }
  0xa5   : > { %v2245_v55 = vsub.f32 %v1671_v3, %v407_v50  ;;  %v299_v59 = vpop.xlane.xlu0 %298 }
  0xa6   : > { %v347_v60 = vpop.xlane.xlu1 %346  ;;  %v392_v7 = vmul.f32 0.03125, %v299_v59  ;;  %v455_v15 = vmul.f32 %v2241_v54, %v2241_v54 }
  0xa7   : > { %v408_v8 = vmul.f32 0.03125, %v347_v60  ;;  %v471_v19 = vmul.f32 %v2245_v55, %v2245_v55 }
  0xa8   : > { %v2253_v29 = vsub.f32 %v1640_v4, %v392_v7  ;;  %v487_v3 = vsel %vm293_vm0, %v455_v15, 0.0 }
  0xa9   : > { %v2257_v2 = vsub.f32 %v1672_v5, %v408_v8  ;;  %488 = vadd.xlane.f32.xlu0 %v487_v3  ;;  %v302_v30 = vpop.xlane.xlu0 %301  ;;  %v535_v40 = vsel %vm293_vm0, %v471_v19, 0.0 }
  0xaa   : > { %v305_v39 = vpop.xlane.xlu1 %304  ;;  %v393_v44 = vmul.f32 0.03125, %v302_v30  ;;  %v456_v49 = vmul.f32 %v2253_v29, %v2253_v29 }
  0xab   : > { %v394_v45 = vmul.f32 0.03125, %v305_v39  ;;  %v472_v0 = vmul.f32 %v2257_v2, %v2257_v2 }
  0xac   : > { %v2267_v1 = vsub.f32 %v1643_v11, %v393_v44  ;;  %v490_v5 = vsel %vm293_vm0, %v456_v49, 0.0 }
  0xad   : > { %v2271_v4 = vsub.f32 %v1644_v12, %v394_v45  ;;  %536 = vadd.xlane.f32.xlu0 %v535_v40  ;;  %491 = vadd.xlane.f32.xlu1 %v490_v5  ;;  %v350_v50 = vpop.xlane.xlu0 %349  ;;  %v538_v60 = vsel %vm293_vm0, %v472_v0, 0.0 }
  0xae   : > { %v353_v59 = vpop.xlane.xlu1 %352  ;;  %v409_v7 = vmul.f32 0.03125, %v350_v50  ;;  %v457_v15 = vmul.f32 %v2267_v1, %v2267_v1 }
  0xaf   : > { %v410_v8 = vmul.f32 0.03125, %v353_v59  ;;  %v458_v11 = vmul.f32 %v2271_v4, %v2271_v4 }
  0xb0   : > { %v2281_v6 = vsub.f32 %v1675_v16, %v409_v7  ;;  %v493_v19 = vsel %vm293_vm0, %v457_v15, 0.0 }
  0xb1   : > { %v2285_v12 = vsub.f32 %v1676_v17, %v410_v8  ;;  %539 = vadd.xlane.f32.xlu1 %v538_v60  ;;  %494 = vadd.xlane.f32.xlu0 %v493_v19  ;;  %v308_v3 = vpop.xlane.xlu0 %307  ;;  %v496_v39 = vsel %vm293_vm0, %v458_v11, 0.0 }
  0xb2   : > { %v311_v30 = vpop.xlane.xlu1 %310  ;;  %v395_v40 = vmul.f32 0.03125, %v308_v3  ;;  %v473_v45 = vmul.f32 %v2281_v6, %v2281_v6 }
  0xb3   : > { %v396_v44 = vmul.f32 0.03125, %v311_v30  ;;  %v474_v16 = vmul.f32 %v2285_v12, %v2285_v12 }
  0xb4   : > { %v2295_v13 = vsub.f32 %v1647_v21, %v395_v40  ;;  %v541_v49 = vsel %vm293_vm0, %v473_v45, 0.0 }
  0xb5   : > { %v2299_v17 = vsub.f32 %v1648_v22, %v396_v44  ;;  %497 = vadd.xlane.f32.xlu1 %v496_v39  ;;  %542 = vadd.xlane.f32.xlu0 %v541_v49  ;;  %v356_v0 = vpop.xlane.xlu0 %355  ;;  %v544_v50 = vsel %vm293_vm0, %v474_v16, 0.0 }
  0xb6   : > { %v359_v5 = vpop.xlane.xlu1 %358  ;;  %v411_v59 = vmul.f32 0.03125, %v356_v0  ;;  %v459_v7 = vmul.f32 %v2295_v13, %v2295_v13 }
  0xb7   : > { %v412_v60 = vmul.f32 0.03125, %v359_v5  ;;  %v460_v21 = vmul.f32 %v2299_v17, %v2299_v17 }
  0xb8   : > { %v2309_v18 = vsub.f32 %v1679_v26, %v411_v59  ;;  %v499_v8 = vsel %vm293_vm0, %v459_v7, 0.0 }
  0xb9   : > { %v2313_v22 = vsub.f32 %v1680_v27, %v412_v60  ;;  %545 = vadd.xlane.f32.xlu1 %v544_v50  ;;  %500 = vadd.xlane.f32.xlu0 %v499_v8  ;;  %v314_v15 = vpop.xlane.xlu0 %313  ;;  %v502_v19 = vsel %vm293_vm0, %v460_v21, 0.0 }
  0xba   : > { %v317_v11 = vpop.xlane.xlu1 %316  ;;  %v397_v3 = vmul.f32 0.03125, %v314_v15  ;;  %v475_v39 = vmul.f32 %v2309_v18, %v2309_v18 }
  0xbb   : > { %v398_v30 = vmul.f32 0.03125, %v317_v11  ;;  %v476_v26 = vmul.f32 %v2313_v22, %v2313_v22 }
  0xbc   : > { %v2323_v23 = vsub.f32 %v1651_v31, %v397_v3  ;;  %v547_v40 = vsel %vm293_vm0, %v475_v39, 0.0 }
  0xbd   : > { %v2327_v27 = vsub.f32 %v1652_v32, %v398_v30  ;;  %503 = vadd.xlane.f32.xlu1 %v502_v19  ;;  %548 = vadd.xlane.f32.xlu0 %v547_v40  ;;  %v362_v44 = vpop.xlane.xlu0 %361  ;;  %v550_v16 = vsel %vm293_vm0, %v476_v26, 0.0 }
  0xbe   : > { %v365_v45 = vpop.xlane.xlu1 %364  ;;  %v413_v49 = vmul.f32 0.03125, %v362_v44  ;;  %v461_v5 = vmul.f32 %v2323_v23, %v2323_v23 }
  0xbf   : > { %v414_v0 = vmul.f32 0.03125, %v365_v45  ;;  %v462_v31 = vmul.f32 %v2327_v27, %v2327_v27 }
  0xc0   : > { %v2337_v28 = vsub.f32 %v1683_v36, %v413_v49  ;;  %v505_v50 = vsel %vm293_vm0, %v461_v5, 0.0 }
  0xc1   : > { %v2341_v32 = vsub.f32 %v1684_v37, %v414_v0  ;;  %551 = vadd.xlane.f32.xlu1 %v550_v16  ;;  %506 = vadd.xlane.f32.xlu0 %v505_v50  ;;  %v320_v59 = vpop.xlane.xlu0 %319  ;;  %v508_v7 = vsel %vm293_vm0, %v462_v31, 0.0 }
  0xc2   : > { %v323_v60 = vpop.xlane.xlu1 %322  ;;  %v399_v21 = vmul.f32 0.03125, %v320_v59  ;;  %v477_v15 = vmul.f32 %v2337_v28, %v2337_v28 }
  0xc3   : > { %v400_v8 = vmul.f32 0.03125, %v323_v60  ;;  %v478_v36 = vmul.f32 %v2341_v32, %v2341_v32 }
  0xc4   : > { %v2351_v33 = vsub.f32 %v1655_v41, %v399_v21  ;;  %v553_v11 = vsel %vm293_vm0, %v477_v15, 0.0 }
  0xc5   : > { %v2355_v37 = vsub.f32 %v1656_v42, %v400_v8  ;;  %509 = vadd.xlane.f32.xlu1 %v508_v7  ;;  %554 = vadd.xlane.f32.xlu0 %v553_v11  ;;  %v368_v19 = vpop.xlane.xlu0 %367  ;;  %v556_v30 = vsel %vm293_vm0, %v478_v36, 0.0 }
  0xc6   : > { %v371_v3 = vpop.xlane.xlu1 %370  ;;  %v415_v39 = vmul.f32 0.03125, %v368_v19  ;;  %v463_v40 = vmul.f32 %v2351_v33, %v2351_v33 }
  0xc7   : > { %v416_v26 = vmul.f32 0.03125, %v371_v3  ;;  %v464_v41 = vmul.f32 %v2355_v37, %v2355_v37 }
  0xc8   : > { %v2365_v38 = vsub.f32 %v1687_v46, %v415_v39  ;;  %v511_v44 = vsel %vm293_vm0, %v463_v40, 0.0 }
  0xc9   : > { %v2369_v42 = vsub.f32 %v1688_v47, %v416_v26  ;;  %557 = vadd.xlane.f32.xlu1 %v556_v30  ;;  %512 = vadd.xlane.f32.xlu0 %v511_v44  ;;  %v326_v45 = vpop.xlane.xlu0 %325  ;;  %v514_v49 = vsel %vm293_vm0, %v464_v41, 0.0  ;;  %v1877_v30 = vld [vmem:[%s2892_s3] sm:$0xff]  }
  0xca   : > { %v329_v16 = vpop.xlane.xlu1 %328  ;;  %v401_v0 = vmul.f32 0.03125, %v326_v45  ;;  %v479_v31 = vmul.f32 %v2365_v38, %v2365_v38  ;;  %1829 = vmatprep.subr.bf16.mxu0 %v1877_v30  ;;  %1865 = vmatprep.subr.bf16.mxu1 %v1877_v30 }
  0xcb   : > { %v402_v5 = vmul.f32 0.03125, %v329_v16  ;;  %v480_v46 = vmul.f32 %v2369_v42, %v2369_v42  ;;  %1830 = vmatpush3.bf16.msra.mxu0 %v1877_v30  ;;  %1867 = vmatpush3.bf16.msra.mxu1 %v1877_v30 }
  0xcc   : > { %v2379_v43 = vsub.f32 %v1659_v51, %v401_v0  ;;  %v559_v50 = vsel %vm293_vm0, %v479_v31, 0.0 }
  0xcd   : > { %v2383_v47 = vsub.f32 %v1660_v52, %v402_v5  ;;  %515 = vadd.xlane.f32.xlu1 %v514_v49  ;;  %560 = vadd.xlane.f32.xlu0 %v559_v50  ;;  %v374_v59 = vpop.xlane.xlu0 %373  ;;  %v562_v7 = vsel %vm293_vm0, %v480_v46, 0.0  ;;  %v1878_v49 = vld [vmem:[%s2892_s3 + $0x8] sm:$0xff]  }
  0xce   : > { %v377_v60 = vpop.xlane.xlu1 %376  ;;  %v417_v21 = vmul.f32 0.03125, %v374_v59  ;;  %v465_v15 = vmul.f32 %v2379_v43, %v2379_v43  ;;  %1831 = vmatprep.subr.bf16.mxu0 %v1878_v49  ;;  %1866 = vmatprep.subr.bf16.mxu1 %v1878_v49 }
  0xcf   : > { %v418_v8 = vmul.f32 0.03125, %v377_v60  ;;  %v466_v51 = vmul.f32 %v2383_v47, %v2383_v47  ;;  %1832 = vmatpush3.bf16.msra.mxu0 %v1878_v49  ;;  %1868 = vmatpush3.bf16.msra.mxu1 %v1878_v49 }
  0xd0   : > { %v2393_v48 = vsub.f32 %v1691_v56, %v417_v21  ;;  %v517_v36 = vsel %vm293_vm0, %v465_v15, 0.0 }
  0xd1   : > { %v2397_v52 = vsub.f32 %v1692_v57, %v418_v8  ;;  %563 = vadd.xlane.f32.xlu1 %v562_v7  ;;  %518 = vadd.xlane.f32.xlu0 %v517_v36  ;;  %v332_v11 = vpop.xlane.xlu0 %331  ;;  %v520_v3 = vsel %vm293_vm0, %v466_v51, 0.0 }
  0xd2   : > { %v335_v19 = vpop.xlane.xlu1 %334  ;;  %v403_v39 = vmul.f32 0.03125, %v332_v11  ;;  %v481_v56 = vmul.f32 %v2393_v48, %v2393_v48 }
  0xd3   : > { %v404_v26 = vmul.f32 0.03125, %v335_v19  ;;  %v482_v53 = vmul.f32 %v2397_v52, %v2397_v52 }
  0xd4   : > { %v2410_v57 = vsub.f32 %v1663_v61, %v403_v39  ;;  %v565_v41 = vsel %vm293_vm0, %v481_v56, 0.0 }
  0xd5   : > { %v2414_v40 = vsub.f32 %v1664_v62, %v404_v26  ;;  %521 = vadd.xlane.f32.xlu1 %v520_v3  ;;  %566 = vadd.xlane.f32.xlu0 %v565_v41  ;;  %v380_v44 = vpop.xlane.xlu0 %379  ;;  %v568_v16 = vsel %vm293_vm0, %v482_v53, 0.0 }
  0xd6   : > { %v383_v45 = vpop.xlane.xlu1 %382  ;;  %v419_v61 = vmul.f32 0.03125, %v380_v44  ;;  %v467_v58 = vmul.f32 %v2410_v57, %v2410_v57 }
  0xd7   : > { %v420_v0 = vmul.f32 0.03125, %v383_v45  ;;  %v468_v62 = vmul.f32 %v2414_v40, %v2414_v40 }
  0xd8   : > { %v2427_v5 = vsub.f32 %v1695_v9, %v419_v61  ;;  %v523_v46 = vsel %vm293_vm0, %v467_v58, 0.0 }
  0xd9   : > { %v2431_v31 = vsub.f32 %v1696_v10, %v420_v0  ;;  %569 = vadd.xlane.f32.xlu1 %v568_v16  ;;  %524 = vadd.xlane.f32.xlu0 %v523_v46  ;;  %v338_v50 = vpop.xlane.xlu0 %337  ;;  %v526_v60 = vsel %vm293_vm0, %v468_v62, 0.0 }
  0xda   : > { %v341_v59 = vpop.xlane.xlu1 %340  ;;  %v405_v7 = vmul.f32 0.03125, %v338_v50  ;;  %v483_v9 = vmul.f32 %v2427_v5, %v2427_v5 }
  0xdb   : > { %v406_v21 = vmul.f32 0.03125, %v341_v59  ;;  %v484_v63 = vmul.f32 %v2431_v31, %v2431_v31 }
  0xdc   : > { %v2441_v10 = vsub.f32 %v1667_v20, %v405_v7  ;;  %v571_v15 = vsel %vm293_vm0, %v483_v9, 0.0 }
  0xdd   : > { %v2445_v8 = vsub.f32 %v1668_v24, %v406_v21  ;;  %527 = vadd.xlane.f32.xlu1 %v526_v60  ;;  %572 = vadd.xlane.f32.xlu0 %v571_v15  ;;  %v386_v51 = vpop.xlane.xlu0 %385  ;;  %v574_v11 = vsel %vm293_vm0, %v484_v63, 0.0 }
  0xde   : > { %v389_v36 = vpop.xlane.xlu1 %388  ;;  %v421_v19 = vmul.f32 0.03125, %v386_v51  ;;  %v469_v30 = vmul.f32 %v2441_v10, %v2441_v10 }
  0xdf   : > { %v422_v3 = vmul.f32 0.03125, %v389_v36  ;;  %v470_v20 = vmul.f32 %v2445_v8, %v2445_v8 }
  0xe0   : > { %v2455_v14 = vsub.f32 %v1699_v34, %v421_v19  ;;  %v529_v39 = vsel %vm293_vm0, %v469_v30, 0.0 }
  0xe1   : > { %v2459_v24 = vsub.f32 %v1700_v35, %v422_v3  ;;  %575 = vadd.xlane.f32.xlu1 %v574_v11  ;;  %530 = vadd.xlane.f32.xlu0 %v529_v39  ;;  %v532_v26 = vsel %vm293_vm0, %v470_v20, 0.0 }
  0xe2   : > { %v485_v56 = vmul.f32 %v2455_v14, %v2455_v14 }
  0xe3   : > { %v486_v53 = vmul.f32 %v2459_v24, %v2459_v24 }
  0xe4   : > { %v577_v41 = vsel %vm293_vm0, %v485_v56, 0.0 }
  0xe5   : > { %533 = vadd.xlane.f32.xlu1 %v532_v26  ;;  %578 = vadd.xlane.f32.xlu0 %v577_v41  ;;  %v580_v25 = vsel %vm293_vm0, %v486_v53, 0.0  ;;  %v2473_v26 = vld [vmem:[%s2890_s1] ss:$0 sm:$0xff] }
  0xe9   : > { %581 = vadd.xlane.f32.xlu1 %v580_v25 }
 0x136   : > { %v489_v34 = vpop.xlane.xlu0 %488 }
 0x137   : > { %v583_v35 = vmul.f32 0.03125, %v489_v34 }
 0x139   : > { %v615_v44 = vadd.f32 1e-05, %v583_v35 }
 0x13a   : > { %v492_v45 = vpop.xlane.xlu1 %491  ;;  %v537_v16 = vpop.xlane.xlu0 %536 }
 0x13b   : > { %1879 = vrsqrt.f32 %v615_v44  ;;  %v584_v49 = vmul.f32 0.03125, %v492_v45  ;;  %v599_v61 = vmul.f32 0.03125, %v537_v16 }
 0x13d   : > { %v616_v0 = vadd.f32 1e-05, %v584_v49  ;;  %v631_v58 = vadd.f32 1e-05, %v599_v61  ;;  %v2480_v49 = vld [vmem:[%s2891_s2] ss:$0 sm:$0xff] }
 0x13e   : > { %v540_v62 = vpop.xlane.xlu1 %539  ;;  %v495_v46 = vpop.xlane.xlu0 %494 }
 0x13f   : > { %1881 = vrsqrt.f32 %v616_v0  ;;  %v600_v50 = vmul.f32 0.03125, %v540_v62  ;;  %v585_v59 = vmul.f32 0.03125, %v495_v46 }
 0x140   : > { %1883 = vrsqrt.f32 %v631_v58 }
 0x141   : > { %v632_v60 = vadd.f32 1e-05, %v600_v50  ;;  %v617_v7 = vadd.f32 1e-05, %v585_v59 }
 0x142   : > { %v498_v21 = vpop.xlane.xlu1 %497  ;;  %v543_v9 = vpop.xlane.xlu0 %542 }
 0x143   : > { %1885 = vrsqrt.f32 %v632_v60  ;;  %v586_v63 = vmul.f32 0.03125, %v498_v21  ;;  %v601_v15 = vmul.f32 0.03125, %v543_v9 }
 0x144   : > { %1887 = vrsqrt.f32 %v617_v7 }
 0x145   : > { %v1880_v51 = vpop.eup %1879  ;;  %v618_v36 = vadd.f32 1e-05, %v586_v63  ;;  %v633_v11 = vadd.f32 1e-05, %v601_v15 }
 0x146   : > { %v546_v19 = vpop.xlane.xlu1 %545  ;;  %v501_v3 = vpop.xlane.xlu0 %500  ;;  %v679_v30 = vmul.f32 %v1880_v51, %v2241_v54 }
 0x147   : > { %1889 = vrsqrt.f32 %v618_v36  ;;  %v602_v20 = vmul.f32 0.03125, %v546_v19  ;;  %v587_v39 = vmul.f32 0.03125, %v501_v3 }
 0x148   : > { %1891 = vrsqrt.f32 %v633_v11  ;;  %v718_v45 = vmul.f32 %v2473_v26, %v679_v30 }
 0x149   : > { %v1882_v56 = vpop.eup %1881  ;;  %v634_v53 = vadd.f32 1e-05, %v602_v20  ;;  %v619_v41 = vadd.f32 1e-05, %v587_v39 }
 0x14a   : > { %v1884_v25 = vpop.eup %1883  ;;  %v504_v34 = vpop.xlane.xlu1 %503  ;;  %v680_v44 = vmul.f32 %v1882_v56, %v2253_v29  ;;  %v757_v60 = vadd.f32 %v2480_v49, %v718_v45 }
 0x14b   : > { %v549_v35 = vpop.xlane.xlu0 %548  ;;  %1893 = vrsqrt.f32 %v634_v53  ;;  %v588_v54 = vmul.f32 0.03125, %v504_v34  ;;  %v695_v61 = vmul.f32 %v1884_v25, %v2245_v55 }
 0x14c   : > { %v603_v16 = vmul.f32 0.03125, %v549_v35  ;;  %1895 = vrsqrt.f32 %v619_v41  ;;  %v719_v0 = vmul.f32 %v2473_v26, %v680_v44 }
 0x14d   : > { %v1886_v58 = vpop.eup %1885  ;;  %v620_v62 = vadd.f32 1e-05, %v588_v54  ;;  %v734_v9 = vmul.f32 %v2473_v26, %v695_v61 }
 0x14e   : > { %v635_v46 = vadd.f32 1e-05, %v603_v16  ;;  %v1888_v50 = vpop.eup %1887  ;;  %v552_v29 = vpop.xlane.xlu1 %551  ;;  %v758_v7 = vadd.f32 %v2480_v49, %v719_v0  ;;  %v696_v21 = vmul.f32 %v1886_v58, %v2257_v2 }
 0x14f   : > { %v507_v59 = vpop.xlane.xlu0 %506  ;;  %v681_v63 = vmul.f32 %v1888_v50, %v2267_v1  ;;  %1897 = vrsqrt.f32 %v620_v62  ;;  %v604_v55 = vmul.f32 0.03125, %v552_v29  ;;  %v773_v56 = vadd.f32 %v2480_v49, %v734_v9 }
 0x150   : > { %v589_v15 = vmul.f32 0.03125, %v507_v59  ;;  %1899 = vrsqrt.f32 %v635_v46  ;;  %v789_v51 = vpack.c.bf16 %v758_v7, %v757_v60  ;;  %v735_v36 = vmul.f32 %v2473_v26, %v696_v21 }
 0x151   : > { %v1890_v11 = vpop.eup %1889  ;;  %v636_v19 = vadd.f32 1e-05, %v604_v55  ;;  %v720_v53 = vmul.f32 %v2473_v26, %v681_v63 }
 0x152   : > { %v621_v3 = vadd.f32 1e-05, %v589_v15  ;;  %v1892_v30 = vpop.eup %1891  ;;  %v682_v20 = vmul.f32 %v1890_v11, %v2271_v4  ;;  %v510_v39 = vpop.xlane.xlu1 %509  ;;  %1833 = vmatprep.mubr.msk.bf16.mxu0 %vm293_vm0, %v789_v51  ;;  %v774_v1 = vadd.f32 %v2480_v49, %v735_v36 }
 0x153   : > { %v555_v2 = vpop.xlane.xlu0 %554  ;;  %v697_v41 = vmul.f32 %v1892_v30, %v2281_v6  ;;  %1901 = vrsqrt.f32 %v636_v19  ;;  %v590_v25 = vmul.f32 0.03125, %v510_v39  ;;  %v759_v62 = vadd.f32 %v2480_v49, %v720_v53 }
 0x154   : > { %v605_v34 = vmul.f32 0.03125, %v555_v2  ;;  %1903 = vrsqrt.f32 %v621_v3  ;;  %v797_v35 = vpack.c.bf16 %v774_v1, %v773_v56  ;;  %v721_v44 = vmul.f32 %v2473_v26, %v682_v20 }
 0x155   : > { %v1894_v4 = vpop.eup %1893  ;;  %v622_v45 = vadd.f32 1e-05, %v590_v25  ;;  %v736_v46 = vmul.f32 %v2473_v26, %v697_v41 }
 0x156   : > { %v637_v54 = vadd.f32 1e-05, %v605_v34  ;;  %v1896_v16 = vpop.eup %1895  ;;  %v698_v61 = vmul.f32 %v1894_v4, %v2285_v12  ;;  %v558_v0 = vpop.xlane.xlu1 %557  ;;  %1849 = vmatprep.mubr.msk.bf16.mxu1 %vm293_vm0, %v797_v35  ;;  %v760_v6 = vadd.f32 %v2480_v49, %v721_v44 }
 0x157   : > { %v513_v58 = vpop.xlane.xlu0 %512  ;;  %v683_v50 = vmul.f32 %v1896_v16, %v2295_v13  ;;  %1905 = vrsqrt.f32 %v622_v45  ;;  %v606_v29 = vmul.f32 0.03125, %v558_v0  ;;  %v775_v36 = vadd.f32 %v2480_v49, %v736_v46 }
 0x158   : > { %v591_v59 = vmul.f32 0.03125, %v513_v58  ;;  %1907 = vrsqrt.f32 %v637_v54  ;;  %v790_v60 = vpack.c.bf16 %v760_v6, %v759_v62  ;;  %v737_v7 = vmul.f32 %v2473_v26, %v698_v61 }
 0x159   : > { %v1898_v12 = vpop.eup %1897  ;;  %v638_v21 = vadd.f32 1e-05, %v606_v29  ;;  %v722_v11 = vmul.f32 %v2473_v26, %v683_v50 }
 0x15a   : > { %v623_v9 = vadd.f32 1e-05, %v591_v59  ;;  %v1900_v63 = vpop.eup %1899  ;;  %v684_v55 = vmul.f32 %v1898_v12, %v2299_v17  ;;  %v516_v15 = vpop.xlane.xlu1 %515  ;;  %1834 = vmatmul.mubr.msk.bf16.vlgmr.msra.gmra.mrb[0].mxu0 %vm293_vm0, %v790_v60  ;;  %v776_v13 = vadd.f32 %v2480_v49, %v737_v7 }
 0x15b   : > { %v561_v51 = vpop.xlane.xlu0 %560  ;;  %v699_v19 = vmul.f32 %v1900_v63, %v2309_v18  ;;  %1909 = vrsqrt.f32 %v638_v21  ;;  %v592_v3 = vmul.f32 0.03125, %v516_v15  ;;  %v761_v34 = vadd.f32 %v2480_v49, %v722_v11 }
 0x15c   : > { %v607_v30 = vmul.f32 0.03125, %v561_v51  ;;  %1911 = vrsqrt.f32 %v623_v9  ;;  %v798_v20 = vpack.c.bf16 %v776_v13, %v775_v36  ;;  %v723_v39 = vmul.f32 %v2473_v26, %v684_v55 }
 0x15d   : > { %v1902_v17 = vpop.eup %1901  ;;  %v624_v2 = vadd.f32 1e-05, %v592_v3  ;;  %v738_v35 = vmul.f32 %v2473_v26, %v699_v19 }
 0x15e   : > { %v639_v56 = vadd.f32 1e-05, %v607_v30  ;;  %v1904_v1 = vpop.eup %1903  ;;  %v700_v53 = vmul.f32 %v1902_v17, %v2313_v22  ;;  %v564_v41 = vpop.xlane.xlu1 %563  ;;  %1850 = vmatmul.mubr.msk.bf16.vlgmr.msra.gmra.mrb[0].mxu1 %vm293_vm0, %v798_v20  ;;  %v762_v18 = vadd.f32 %v2480_v49, %v723_v39 }
 0x15f   : > { %v519_v25 = vpop.xlane.xlu0 %518  ;;  %v685_v44 = vmul.f32 %v1904_v1, %v2323_v23  ;;  %1913 = vrsqrt.f32 %v624_v2  ;;  %v608_v4 = vmul.f32 0.03125, %v564_v41  ;;  %v777_v50 = vadd.f32 %v2480_v49, %v738_v35 }
 0x160   : > { %v593_v45 = vmul.f32 0.03125, %v519_v25  ;;  %1915 = vrsqrt.f32 %v639_v56  ;;  %v791_v54 = vpack.c.bf16 %v762_v18, %v761_v34  ;;  %v739_v16 = vmul.f32 %v2473_v26, %v700_v53 }
 0x161   : > { %v1906_v22 = vpop.eup %1905  ;;  %v640_v61 = vadd.f32 1e-05, %v608_v4  ;;  %v724_v29 = vmul.f32 %v2473_v26, %v685_v44 }
 0x162   : > { %v625_v0 = vadd.f32 1e-05, %v593_v45  ;;  %v1908_v58 = vpop.eup %1907  ;;  %v686_v62 = vmul.f32 %v1906_v22, %v2327_v27  ;;  %v522_v6 = vpop.xlane.xlu1 %521  ;;  %1837 = vmatprep.mubr.msk.bf16.mxu0 %vm293_vm0, %v791_v54  ;;  %v778_v23 = vadd.f32 %v2480_v49, %v739_v16 }
 0x163   : > { %v567_v46 = vpop.xlane.xlu0 %566  ;;  %v701_v59 = vmul.f32 %v1908_v58, %v2337_v28  ;;  %1917 = vrsqrt.f32 %v640_v61  ;;  %v594_v60 = vmul.f32 0.03125, %v522_v6  ;;  %v763_v13 = vadd.f32 %v2480_v49, %v724_v29 }
 0x164   : > { %v609_v7 = vmul.f32 0.03125, %v567_v46  ;;  %1919 = vrsqrt.f32 %v625_v0  ;;  %v799_v12 = vpack.c.bf16 %v778_v23, %v777_v50  ;;  %v725_v21 = vmul.f32 %v2473_v26, %v686_v62 }
 0x165   : > { %v1910_v27 = vpop.eup %1909  ;;  %v626_v9 = vadd.f32 1e-05, %v594_v60  ;;  %v740_v11 = vmul.f32 %v2473_v26, %v701_v59 }
 0x166   : > { %v641_v63 = vadd.f32 1e-05, %v609_v7  ;;  %v1912_v55 = vpop.eup %1911  ;;  %v702_v15 = vmul.f32 %v1910_v27, %v2341_v32  ;;  %v570_v51 = vpop.xlane.xlu1 %569  ;;  %1853 = vmatprep.mubr.msk.bf16.mxu1 %vm293_vm0, %v799_v12  ;;  %v764_v28 = vadd.f32 %v2480_v49, %v725_v21 }
 0x167   : > { %v525_v36 = vpop.xlane.xlu0 %524  ;;  %v687_v19 = vmul.f32 %v1912_v55, %v2351_v33  ;;  %1921 = vrsqrt.f32 %v626_v9  ;;  %v610_v3 = vmul.f32 0.03125, %v570_v51  ;;  %v779_v25 = vadd.f32 %v2480_v49, %v740_v11 }
 0x168   : > { %v595_v30 = vmul.f32 0.03125, %v525_v36  ;;  %1923 = vrsqrt.f32 %v641_v63  ;;  %v792_v20 = vpack.c.bf16 %v764_v28, %v763_v13  ;;  %v741_v39 = vmul.f32 %v2473_v26, %v702_v15 }
 0x169   : > { %v1914_v32 = vpop.eup %1913  ;;  %v642_v17 = vadd.f32 1e-05, %v610_v3  ;;  %v726_v34 = vmul.f32 %v2473_v26, %v687_v19 }
 0x16a   : > { %v627_v2 = vadd.f32 1e-05, %v595_v30  ;;  %v1916_v56 = vpop.eup %1915  ;;  %v688_v1 = vmul.f32 %v1914_v32, %v2355_v37  ;;  %v528_v53 = vpop.xlane.xlu1 %527  ;;  %1838 = vmatmul.mubr.msk.bf16.gmra.mrb[4].mxu0 %vm293_vm0, %v792_v20  ;;  %v780_v33 = vadd.f32 %v2480_v49, %v741_v39 }
 0x16b   : > { %v573_v41 = vpop.xlane.xlu0 %572  ;;  %v703_v18 = vmul.f32 %v1916_v56, %v2365_v38  ;;  %1925 = vrsqrt.f32 %v642_v17  ;;  %v596_v35 = vmul.f32 0.03125, %v528_v53  ;;  %v765_v62 = vadd.f32 %v2480_v49, %v726_v34 }
 0x16c   : > { %v611_v44 = vmul.f32 0.03125, %v573_v41  ;;  %1927 = vrsqrt.f32 %v627_v2  ;;  %v800_v4 = vpack.c.bf16 %v780_v33, %v779_v25  ;;  %v727_v45 = vmul.f32 %v2473_v26, %v688_v1 }
 0x16d   : > { %v1918_v37 = vpop.eup %1917  ;;  %v628_v54 = vadd.f32 1e-05, %v596_v35  ;;  %v742_v6 = vmul.f32 %v2473_v26, %v703_v18 }
 0x16e   : > { %v643_v16 = vadd.f32 1e-05, %v611_v44  ;;  %v1920_v22 = vpop.eup %1919  ;;  %v704_v61 = vmul.f32 %v1918_v37, %v2369_v42  ;;  %v576_v0 = vpop.xlane.xlu1 %575  ;;  %1854 = vmatmul.mubr.msk.bf16.gmra.mrb[4].mxu1 %vm293_vm0, %v800_v4  ;;  %v766_v38 = vadd.f32 %v2480_v49, %v727_v45 }
 0x16f   : > { %v531_v58 = vpop.xlane.xlu0 %530  ;;  %v689_v46 = vmul.f32 %v1920_v22, %v2379_v43  ;;  %1929 = vrsqrt.f32 %v628_v54  ;;  %v612_v50 = vmul.f32 0.03125, %v576_v0  ;;  %v781_v63 = vadd.f32 %v2480_v49, %v742_v6 }
 0x170   : > { %v597_v23 = vmul.f32 0.03125, %v531_v58  ;;  %1931 = vrsqrt.f32 %v643_v16  ;;  %v793_v29 = vpack.c.bf16 %v766_v38, %v765_v62  ;;  %v743_v59 = vmul.f32 %v2473_v26, %v704_v61 }
 0x171   : > { %v1922_v42 = vpop.eup %1921  ;;  %v644_v60 = vadd.f32 1e-05, %v612_v50  ;;  %v728_v55 = vmul.f32 %v2473_v26, %v689_v46 }
 0x172   : > { %v629_v7 = vadd.f32 1e-05, %v597_v23  ;;  %v1924_v12 = vpop.eup %1923  ;;  %v690_v21 = vmul.f32 %v1922_v42, %v2383_v47  ;;  %v534_v27 = vpop.xlane.xlu1 %533  ;;  %1841 = vmatprep.mubr.msk.bf16.mxu0 %vm293_vm0, %v793_v29  ;;  %v782_v43 = vadd.f32 %v2480_v49, %v743_v59 }
 0x173   : > { %v579_v9 = vpop.xlane.xlu0 %578  ;;  %v705_v15 = vmul.f32 %v1924_v12, %v2393_v48  ;;  %1933 = vrsqrt.f32 %v644_v60  ;;  %v598_v51 = vmul.f32 0.03125, %v534_v27  ;;  %v767_v39 = vadd.f32 %v2480_v49, %v728_v55 }
 0x174   : > { %v613_v36 = vmul.f32 0.03125, %v579_v9  ;;  %1935 = vrsqrt.f32 %v629_v7  ;;  %v801_v13 = vpack.c.bf16 %v782_v43, %v781_v63  ;;  %v729_v28 = vmul.f32 %v2473_v26, %v690_v21 }
 0x175   : > { %v1926_v47 = vpop.eup %1925  ;;  %v630_v11 = vadd.f32 1e-05, %v598_v51  ;;  %v744_v32 = vmul.f32 %v2473_v26, %v705_v15 }
 0x176   : > { %v645_v19 = vadd.f32 1e-05, %v613_v36  ;;  %v1928_v3 = vpop.eup %1927  ;;  %v706_v30 = vmul.f32 %v1926_v47, %v2397_v52  ;;  %v582_v20 = vpop.xlane.xlu1 %581  ;;  %1857 = vmatprep.mubr.msk.bf16.mxu1 %vm293_vm0, %v801_v13  ;;  %v768_v48 = vadd.f32 %v2480_v49, %v729_v28 }
 0x177   : > { %v691_v17 = vmul.f32 %v1928_v3, %v2410_v57  ;;  %1937 = vrsqrt.f32 %v630_v11  ;;  %v614_v2 = vmul.f32 0.03125, %v582_v20  ;;  %v783_v33 = vadd.f32 %v2480_v49, %v744_v32 }
 0x178   : > { %1939 = vrsqrt.f32 %v645_v19  ;;  %v794_v56 = vpack.c.bf16 %v768_v48, %v767_v39  ;;  %v745_v1 = vmul.f32 %v2473_v26, %v706_v30 }
 0x179   : > { %v1930_v53 = vpop.eup %1929  ;;  %v646_v41 = vadd.f32 1e-05, %v614_v2  ;;  %v730_v18 = vmul.f32 %v2473_v26, %v691_v17 }
 0x17a   : > { %v1932_v52 = vpop.eup %1931  ;;  %v692_v25 = vmul.f32 %v1930_v53, %v2414_v40  ;;  %1842 = vmatmul.mubr.msk.bf16.gmra.mrb[8].mxu0 %vm293_vm0, %v794_v56  ;;  %v784_v34 = vadd.f32 %v2480_v49, %v745_v1 }
 0x17b   : > { %v707_v57 = vmul.f32 %v1932_v52, %v2427_v5  ;;  %1941 = vrsqrt.f32 %v646_v41  ;;  %v769_v40 = vadd.f32 %v2480_v49, %v730_v18 }
 0x17c   : > { %v802_v35 = vpack.c.bf16 %v784_v34, %v783_v33  ;;  %v731_v44 = vmul.f32 %v2473_v26, %v692_v25 }
 0x17d   : > { %v1934_v4 = vpop.eup %1933  ;;  %v746_v16 = vmul.f32 %v2473_v26, %v707_v57 }
 0x17e   : > { %v1936_v45 = vpop.eup %1935  ;;  %v708_v37 = vmul.f32 %v1934_v4, %v2431_v31  ;;  %1858 = vmatmul.mubr.msk.bf16.gmra.mrb[8].mxu1 %vm293_vm0, %v802_v35  ;;  %v770_v54 = vadd.f32 %v2480_v49, %v731_v44 }
 0x17f   : > { %v693_v22 = vmul.f32 %v1936_v45, %v2441_v10  ;;  %v785_v31 = vadd.f32 %v2480_v49, %v746_v16 }
 0x180   : > { %v795_v61 = vpack.c.bf16 %v770_v54, %v769_v40  ;;  %v747_v5 = vmul.f32 %v2473_v26, %v708_v37 }
 0x181   : > { %v1938_v0 = vpop.eup %1937  ;;  %v732_v6 = vmul.f32 %v2473_v26, %v693_v22 }
 0x182   : > { %v1940_v58 = vpop.eup %1939  ;;  %v694_v62 = vmul.f32 %v1938_v0, %v2445_v8  ;;  %1845 = vmatprep.mubr.msk.bf16.mxu0 %vm293_vm0, %v795_v61  ;;  %v786_v38 = vadd.f32 %v2480_v49, %v747_v5 }
 0x183   : > { %v709_v46 = vmul.f32 %v1940_v58, %v2455_v14  ;;  %v771_v8 = vadd.f32 %v2480_v49, %v732_v6 }
 0x184   : > { %v803_v50 = vpack.c.bf16 %v786_v38, %v785_v31  ;;  %v733_v10 = vmul.f32 %v2473_v26, %v694_v62 }
 0x185   : > { %v1942_v23 = vpop.eup %1941  ;;  %v748_v42 = vmul.f32 %v2473_v26, %v709_v46 }
 0x186   : > { %v710_v29 = vmul.f32 %v1942_v23, %v2459_v24  ;;  %1861 = vmatprep.mubr.msk.bf16.mxu1 %vm293_vm0, %v803_v50  ;;  %v772_v59 = vadd.f32 %v2480_v49, %v733_v10  ;;  %v2594_v24 = vld [vmem:[%s2893_s4] ss:$0 sm:$0xff] }
 0x187   : > { %v787_v14 = vadd.f32 %v2480_v49, %v748_v42 }
 0x188   : > { %v796_v60 = vpack.c.bf16 %v772_v59, %v771_v8  ;;  %v749_v7 = vmul.f32 %v2473_v26, %v710_v29 }
 0x18a   : > { %1846 = vmatmul.mubr.msk.bf16.gmra.mrb[12].mxu0 %vm293_vm0, %v796_v60  ;;  %v788_v12 = vadd.f32 %v2480_v49, %v749_v7 }
 0x18c   : > { %v804_v21 = vpack.c.bf16 %v788_v12, %v787_v14 }
 0x18e   : > { %1862 = vmatmul.mubr.msk.bf16.gmra.mrb[12].mxu1 %vm293_vm0, %v804_v21 }
 0x22d   : > { %v1835_v27 = vpop.f32.mrb[0].mxu0 }
 0x22e   : > { %v2597_v9 = vadd.f32 %v1835_v27, %v2594_v24  ;;  %v910_v63 = vpop.f32.mrb[1].mxu0 }
 0x22f   : > { %v2600_v26 = vadd.f32 %v2594_v24, %v910_v63  ;;  %v1836_v43 = vpop.f32.mrb[2].mxu0 }
 0x230   : > { %v1039_v49 = vmul.f32 %v2597_v9, %v2597_v9  ;;  %v2605_v55 = vadd.f32 %v1836_v43, %v2594_v24  ;;  %v913_v15 = vpop.f32.mrb[3].mxu0 }
 0x231   : > { %v1037_v51 = vmul.f32 %v2600_v26, %v2600_v26  ;;  %v2610_v36 = vadd.f32 %v2594_v24, %v913_v15  ;;  %v1851_v13 = vpop.f32.mrb[0].mxu1 }
 0x232   : > { %v1071_v28 = vmul.f32 %v1039_v49, %v2597_v9  ;;  %v1040_v47 = vmul.f32 %v2605_v55, %v2605_v55  ;;  %v2616_v11 = vadd.f32 %v1851_v13, %v2594_v24  ;;  %v974_v19 = vpop.f32.mrb[1].mxu1 }
 0x233   : > { %v1069_v3 = vmul.f32 %v1037_v51, %v2600_v26  ;;  %v1038_v30 = vmul.f32 %v2610_v36, %v2610_v36  ;;  %v2622_v20 = vadd.f32 %v2594_v24, %v974_v19  ;;  %v1852_v39 = vpop.f32.mrb[2].mxu1 }
 0x234   : > { %v1103_v48 = vmul.f32 0.044715, %v1071_v28  ;;  %v1072_v32 = vmul.f32 %v1040_v47, %v2605_v55  ;;  %v1055_v17 = vmul.f32 %v2616_v11, %v2616_v11  ;;  %v2628_v2 = vadd.f32 %v1852_v39, %v2594_v24  ;;  %v977_v56 = vpop.f32.mrb[3].mxu1 }
 0x235   : > { %v1101_v1 = vmul.f32 0.044715, %v1069_v3  ;;  %v1070_v53 = vmul.f32 %v1038_v30, %v2610_v36  ;;  %v1053_v41 = vmul.f32 %v2622_v20, %v2622_v20  ;;  %v2634_v52 = vadd.f32 %v2594_v24, %v977_v56 }
 0x236   : > { %v1135_v25 = vadd.f32 %v1103_v48, %v2597_v9  ;;  %v1104_v33 = vmul.f32 0.044715, %v1072_v32  ;;  %v1087_v34 = vmul.f32 %v1055_v17, %v2616_v11  ;;  %v1056_v18 = vmul.f32 %v2628_v2, %v2628_v2 }
 0x237   : > { %v1133_v57 = vadd.f32 %v1101_v1, %v2600_v26  ;;  %v1102_v35 = vmul.f32 0.044715, %v1070_v53  ;;  %v1085_v44 = vmul.f32 %v1053_v41, %v2622_v20  ;;  %v1054_v4 = vmul.f32 %v2634_v52, %v2634_v52 }
 0x238   : > { %v1167_v45 = vmul.f32 0.7978846, %v1135_v25  ;;  %v1136_v37 = vadd.f32 %v1104_v33, %v2605_v55  ;;  %v1119_v40 = vmul.f32 0.044715, %v1087_v34  ;;  %v1088_v54 = vmul.f32 %v1056_v18, %v2628_v2 }
 0x239   : > { %v1165_v16 = vmul.f32 0.7978846, %v1133_v57  ;;  %v1134_v22 = vadd.f32 %v1102_v35, %v2610_v36  ;;  %v1117_v61 = vmul.f32 0.044715, %v1085_v44  ;;  %v1086_v5 = vmul.f32 %v1054_v4, %v2634_v52 }
 0x23a   : > { %1943 = vtanh.f32 %v1167_v45  ;;  %v1168_v0 = vmul.f32 0.7978846, %v1136_v37  ;;  %v1151_v58 = vadd.f32 %v1119_v40, %v2616_v11  ;;  %v1120_v62 = vmul.f32 0.044715, %v1088_v54 }
 0x23b   : > { %1945 = vtanh.f32 %v1165_v16  ;;  %v1166_v31 = vmul.f32 0.7978846, %v1134_v22  ;;  %v1149_v38 = vadd.f32 %v1117_v61, %v2622_v20  ;;  %v1118_v6 = vmul.f32 0.044715, %v1086_v5 }
 0x23c   : > { %1947 = vtanh.f32 %v1168_v0  ;;  %v1183_v46 = vmul.f32 0.7978846, %v1151_v58  ;;  %v1152_v50 = vadd.f32 %v1120_v62, %v2628_v2 }
 0x23d   : > { %1949 = vtanh.f32 %v1166_v31  ;;  %v1181_v10 = vmul.f32 0.7978846, %v1149_v38  ;;  %v1150_v23 = vadd.f32 %v1118_v6, %v2634_v52  ;;  %v1839_v29 = vpop.f32.mrb[4].mxu0 }
 0x23e   : > { %1951 = vtanh.f32 %v1183_v46  ;;  %v1184_v8 = vmul.f32 0.7978846, %v1152_v50  ;;  %v2653_v59 = vadd.f32 %v1839_v29, %v2594_v24  ;;  %v926_v42 = vpop.f32.mrb[5].mxu0 }
 0x23f   : > { %1953 = vtanh.f32 %v1181_v10  ;;  %v1182_v60 = vmul.f32 0.7978846, %v1150_v23  ;;  %v2656_v7 = vadd.f32 %v2594_v24, %v926_v42  ;;  %v1840_v14 = vpop.f32.mrb[6].mxu0 }
 0x240   : > { %1955 = vtanh.f32 %v1184_v8  ;;  %v1043_v12 = vmul.f32 %v2653_v59, %v2653_v59  ;;  %v2661_v21 = vadd.f32 %v1840_v14, %v2594_v24  ;;  %v929_v27 = vpop.f32.mrb[7].mxu0 }
 0x241   : > { %1957 = vtanh.f32 %v1182_v60  ;;  %v1041_v63 = vmul.f32 %v2656_v7, %v2656_v7  ;;  %v2666_v43 = vadd.f32 %v2594_v24, %v929_v27  ;;  %v1855_v49 = vpop.f32.mrb[4].mxu1 }
 0x242   : > { %v1075_v15 = vmul.f32 %v1043_v12, %v2653_v59  ;;  %v1044_v51 = vmul.f32 %v2661_v21, %v2661_v21  ;;  %v2672_v13 = vadd.f32 %v1855_v49, %v2594_v24  ;;  %v990_v28 = vpop.f32.mrb[5].mxu1 }
 0x243   : > { %v1073_v47 = vmul.f32 %v1041_v63, %v2656_v7  ;;  %v1042_v19 = vmul.f32 %v2666_v43, %v2666_v43  ;;  %v2678_v3 = vadd.f32 %v2594_v24, %v990_v28  ;;  %v1856_v30 = vpop.f32.mrb[6].mxu1 }
 0x244   : > { %v1944_v39 = vpop.eup %1943  ;;  %v1107_v48 = vmul.f32 0.044715, %v1075_v15  ;;  %v1076_v32 = vmul.f32 %v1044_v51, %v2661_v21  ;;  %v1059_v17 = vmul.f32 %v2672_v13, %v2672_v13  ;;  %v2684_v56 = vadd.f32 %v1856_v30, %v2594_v24  ;;  %v993_v1 = vpop.f32.mrb[7].mxu1 }
 0x245   : > { %v1946_v53 = vpop.eup %1945  ;;  %v1231_v41 = vadd.f32 1.0, %v1944_v39  ;;  %v1105_v25 = vmul.f32 0.044715, %v1073_v47  ;;  %v1074_v33 = vmul.f32 %v1042_v19, %v2666_v43  ;;  %v1057_v34 = vmul.f32 %v2678_v3, %v2678_v3 }
 0x246   : > { %v1948_v18 = vpop.eup %1947  ;;  %v1229_v57 = vadd.f32 1.0, %v1946_v53  ;;  %v1139_v35 = vadd.f32 %v1107_v48, %v2653_v59  ;;  %v1108_v44 = vmul.f32 0.044715, %v1076_v32  ;;  %v1091_v4 = vmul.f32 %v1059_v17, %v2672_v13 }
 0x247   : > { %v1950_v45 = vpop.eup %1949  ;;  %v1263_v37 = vmul.f32 0.5, %v1231_v41  ;;  %v1232_v40 = vadd.f32 1.0, %v1948_v18  ;;  %v1137_v54 = vadd.f32 %v1105_v25, %v2656_v7  ;;  %v1106_v16 = vmul.f32 0.044715, %v1074_v33 }
 0x248   : > { %v1952_v22 = vpop.eup %1951  ;;  %v1261_v61 = vmul.f32 0.5, %v1229_v57  ;;  %v1230_v5 = vadd.f32 1.0, %v1950_v45  ;;  %v1171_v0 = vmul.f32 0.7978846, %v1139_v35  ;;  %v1140_v58 = vadd.f32 %v1108_v44, %v2661_v21 }
 0x249   : > { %v1954_v62 = vpop.eup %1953  ;;  %v1295_v31 = vmul.f32 %v1263_v37, %v2597_v9  ;;  %v1264_v38 = vmul.f32 0.5, %v1232_v40  ;;  %v1247_v6 = vadd.f32 1.0, %v1952_v22  ;;  %v1169_v46 = vmul.f32 0.7978846, %v1137_v54 }
 0x24a   : > { %v1956_v50 = vpop.eup %1955  ;;  %v1293_v10 = vmul.f32 %v1261_v61, %v2600_v26  ;;  %v1262_v23 = vmul.f32 0.5, %v1230_v5  ;;  %v1245_v29 = vadd.f32 1.0, %v1954_v62  ;;  %1959 = vtanh.f32 %v1171_v0 }
 0x24b   : > { %v1958_v8 = vpop.eup %1957  ;;  %v1296_v42 = vmul.f32 %v1264_v38, %v2605_v55  ;;  %v1279_v60 = vmul.f32 0.5, %v1247_v6  ;;  %v1248_v14 = vadd.f32 1.0, %v1956_v50  ;;  %1961 = vtanh.f32 %v1169_v46 }
 0x24c   : > { %v1294_v9 = vmul.f32 %v1262_v23, %v2610_v36  ;;  %v1277_v12 = vmul.f32 0.5, %v1245_v29  ;;  %v1246_v26 = vadd.f32 1.0, %v1958_v8  ;;  %v1172_v27 = vmul.f32 0.7978846, %v1140_v58 }
 0x24d   : > { %v1709_v63 = vpack.c.bf16 %v1296_v42, %v1295_v31  ;;  %v1311_v49 = vmul.f32 %v1279_v60, %v2616_v11  ;;  %v1280_v55 = vmul.f32 0.5, %v1248_v14  ;;  %v1138_v15 = vadd.f32 %v1106_v16, %v2666_v43  ;;  %v1843_v51 = vpop.f32.mrb[8].mxu0 }
 0x24e   : > { %v1704_v28 = vpack.c.bf16 %v1294_v9, %v1293_v10  ;;  %v1309_v47 = vmul.f32 %v1277_v12, %v2622_v20  ;;  %v1278_v19 = vmul.f32 0.5, %v1246_v26  ;;  %1963 = vtanh.f32 %v1172_v27  ;;  %v942_v30 = vpop.f32.mrb[9].mxu0 }
 0x24f   : > { %1796 = vst [vmem:[%s2701_s12 + $0x8] sm:$0xff] %v1709_v63   ;;  %v1312_v36 = vmul.f32 %v1280_v55, %v2628_v2  ;;  %v1170_v39 = vmul.f32 0.7978846, %v1138_v15  ;;  %v1123_v48 = vmul.f32 0.044715, %v1091_v4  ;;  %v1089_v32 = vmul.f32 %v1057_v34, %v2678_v3  ;;  %v1844_v17 = vpop.f32.mrb[10].mxu0 }
 0x250   : > { %1705 = vst [vmem:[%s2701_s12] sm:$0xff] %v1704_v28   ;;  %v1310_v11 = vmul.f32 %v1278_v19, %v2634_v52  ;;  %v1060_v53 = vmul.f32 %v2684_v56, %v2684_v56  ;;  %v2715_v20 = vadd.f32 %v2594_v24, %v993_v1  ;;  %v2718_v41 = vadd.f32 %v1843_v51, %v2594_v24  ;;  %v945_v25 = vpop.f32.mrb[11].mxu0 }
 0x251   : > { %v1749_v2 = vpack.c.bf16 %v1312_v36, %v1311_v49  ;;  %1965 = vtanh.f32 %v1170_v39  ;;  %v1155_v33 = vadd.f32 %v1123_v48, %v2672_v13  ;;  %v1121_v34 = vmul.f32 0.044715, %v1089_v32  ;;  %v1859_v18 = vpop.f32.mrb[8].mxu1 }
 0x252   : > { %v1744_v57 = vpack.c.bf16 %v1310_v11, %v1309_v47  ;;  %v1092_v52 = vmul.f32 %v1060_v53, %v2684_v56  ;;  %v1058_v35 = vmul.f32 %v2715_v20, %v2715_v20  ;;  %v1047_v1 = vmul.f32 %v2718_v41, %v2718_v41  ;;  %v1006_v44 = vpop.f32.mrb[9].mxu1 }
 0x253   : > { %1804 = vst [vmem:[%s2701_s12 + $0x48] sm:$0xff] %v1749_v2   ;;  %v1187_v4 = vmul.f32 0.7978846, %v1155_v33  ;;  %v1153_v45 = vadd.f32 %v1121_v34, %v2678_v3  ;;  %v2729_v37 = vadd.f32 %v2594_v24, %v942_v30  ;;  %v2732_v40 = vadd.f32 %v1844_v17, %v2594_v24  ;;  %v1860_v54 = vpop.f32.mrb[10].mxu1 }
 0x254   : > { %v1960_v16 = vpop.eup %1959  ;;  %1803 = vst [vmem:[%s2701_s12 + $0x40] sm:$0xff] %v1744_v57   ;;  %v1124_v22 = vmul.f32 0.044715, %v1092_v52  ;;  %v1090_v61 = vmul.f32 %v1058_v35, %v2715_v20  ;;  %v1079_v5 = vmul.f32 %v1047_v1, %v2718_v41  ;;  %v2738_v0 = vadd.f32 %v2594_v24, %v945_v25  ;;  %v1009_v58 = vpop.f32.mrb[11].mxu1 }
 0x255   : > { %v1962_v62 = vpop.eup %1961  ;;  %v1235_v31 = vadd.f32 1.0, %v1960_v16  ;;  %1967 = vtanh.f32 %v1187_v4  ;;  %v1185_v38 = vmul.f32 0.7978846, %v1153_v45  ;;  %v1045_v6 = vmul.f32 %v2729_v37, %v2729_v37 }
 0x256   : > { %v1233_v46 = vadd.f32 1.0, %v1962_v62  ;;  %v1156_v50 = vadd.f32 %v1124_v22, %v2684_v56  ;;  %v1122_v10 = vmul.f32 0.044715, %v1090_v61  ;;  %v1111_v23 = vmul.f32 0.044715, %v1079_v5 }
 0x257   : > { %v1267_v29 = vmul.f32 0.5, %v1235_v31  ;;  %1969 = vtanh.f32 %v1185_v38  ;;  %v1077_v8 = vmul.f32 %v1045_v6, %v2729_v37  ;;  %v1048_v42 = vmul.f32 %v2732_v40, %v2732_v40 }
 0x258   : > { %v1964_v60 = vpop.eup %1963  ;;  %v1265_v14 = vmul.f32 0.5, %v1233_v46  ;;  %v1188_v9 = vmul.f32 0.7978846, %v1156_v50  ;;  %v1154_v12 = vadd.f32 %v1122_v10, %v2715_v20  ;;  %v1143_v26 = vadd.f32 %v1111_v23, %v2718_v41 }
 0x259   : > { %v1299_v27 = vmul.f32 %v1267_v29, %v2653_v59  ;;  %v1236_v63 = vadd.f32 1.0, %v1964_v60  ;;  %v1109_v49 = vmul.f32 0.044715, %v1077_v8  ;;  %v1080_v55 = vmul.f32 %v1048_v42, %v2732_v40 }
 0x25a   : > { %v1297_v15 = vmul.f32 %v1265_v14, %v2656_v7  ;;  %1971 = vtanh.f32 %v1188_v9  ;;  %v1186_v51 = vmul.f32 0.7978846, %v1154_v12  ;;  %v1175_v28 = vmul.f32 0.7978846, %v1143_v26 }
 0x25b   : > { %v1966_v47 = vpop.eup %1965  ;;  %v1268_v19 = vmul.f32 0.5, %v1236_v63  ;;  %v1141_v30 = vadd.f32 %v1109_v49, %v2729_v37  ;;  %v1112_v36 = vmul.f32 0.044715, %v1080_v55  ;;  %v1046_v39 = vmul.f32 %v2738_v0, %v2738_v0 }
 0x25c   : > { %v1234_v48 = vadd.f32 1.0, %v1966_v47  ;;  %1973 = vtanh.f32 %v1186_v51  ;;  %v2755_v59 = vadd.f32 %v1859_v18, %v2594_v24  ;;  %v2758_v32 = vadd.f32 %v2594_v24, %v1006_v44 }
 0x25d   : > { %v1300_v7 = vmul.f32 %v1268_v19, %v2661_v21  ;;  %1975 = vtanh.f32 %v1175_v28  ;;  %v1173_v17 = vmul.f32 0.7978846, %v1141_v30  ;;  %v1144_v11 = vadd.f32 %v1112_v36, %v2732_v40  ;;  %v1847_v53 = vpop.f32.mrb[12].mxu0 }
 0x25e   : > { %v1266_v25 = vmul.f32 0.5, %v1234_v48  ;;  %v1078_v2 = vmul.f32 %v1046_v39, %v2738_v0  ;;  %v1063_v33 = vmul.f32 %v2755_v59, %v2755_v59  ;;  %v1061_v34 = vmul.f32 %v2758_v32, %v2758_v32  ;;  %v958_v18 = vpop.f32.mrb[13].mxu0 }
 0x25f   : > { %v1968_v57 = vpop.eup %1967  ;;  %v1719_v52 = vpack.c.bf16 %v1300_v7, %v1299_v27  ;;  %1977 = vtanh.f32 %v1173_v17  ;;  %v1176_v21 = vmul.f32 0.7978846, %v1144_v11  ;;  %v2768_v35 = vadd.f32 %v1860_v54, %v2594_v24  ;;  %v2770_v1 = vpop.f32.mrb[14].mxu0 }
 0x260   : > { %v1298_v44 = vmul.f32 %v1266_v25, %v2666_v43  ;;  %v1251_v4 = vadd.f32 1.0, %v1968_v57  ;;  %v1110_v45 = vmul.f32 0.044715, %v1078_v2  ;;  %v1095_v16 = vmul.f32 %v1063_v33, %v2755_v59  ;;  %v2774_v22 = vpop.f32.mrb[15].mxu0 }
 0x261   : > { %v1970_v61 = vpop.eup %1969  ;;  %1798 = vst [vmem:[%s2701_s12 + $0x18] sm:$0xff] %v1719_v52   ;;  %1979 = vtanh.f32 %v1176_v21  ;;  %v1093_v5 = vmul.f32 %v1061_v34, %v2758_v32  ;;  %v1064_v54 = vmul.f32 %v2768_v35, %v2768_v35  ;;  %v2781_v62 = vadd.f32 %v2594_v24, %v1009_v58  ;;  %v2783_v31 = vpop.f32.mrb[12].mxu1 }
 0x262   : > { %v1714_v43 = vpack.c.bf16 %v1298_v44, %v1297_v15  ;;  %v1283_v38 = vmul.f32 0.5, %v1251_v4  ;;  %v1249_v6 = vadd.f32 1.0, %v1970_v61  ;;  %v1142_v46 = vadd.f32 %v1110_v45, %v2738_v0  ;;  %v2786_v50 = vpop.f32.mrb[13].mxu1 }
 0x263   : > { %v1127_v10 = vmul.f32 0.044715, %v1095_v16  ;;  %v1125_v23 = vmul.f32 0.044715, %v1093_v5  ;;  %v1096_v29 = vmul.f32 %v1064_v54, %v2768_v35  ;;  %v1062_v8 = vmul.f32 %v2781_v62, %v2781_v62  ;;  %v2791_v42 = vpop.f32.mrb[14].mxu1 }
 0x264   : > { %v1972_v58 = vpop.eup %1971  ;;  %1797 = vst [vmem:[%s2701_s12 + $0x10] sm:$0xff] %v1714_v43   ;;  %v1315_v60 = vmul.f32 %v1283_v38, %v2672_v13  ;;  %v1281_v14 = vmul.f32 0.5, %v1249_v6  ;;  %v1174_v9 = vmul.f32 0.7978846, %v1142_v46  ;;  %v2796_v12 = vadd.f32 %v1847_v53, %v2594_v24  ;;  %v2798_v26 = vpop.f32.mrb[15].mxu1 }
 0x265   : > { %v1252_v27 = vadd.f32 1.0, %v1972_v58  ;;  %v1159_v63 = vadd.f32 %v1127_v10, %v2755_v59  ;;  %v1157_v49 = vadd.f32 %v1125_v23, %v2758_v32  ;;  %v1128_v55 = vmul.f32 0.044715, %v1096_v29 }
 0x266   : > { %v1974_v15 = vpop.eup %1973  ;;  %v1313_v51 = vmul.f32 %v1281_v14, %v2678_v3  ;;  %1981 = vtanh.f32 %v1174_v9  ;;  %v1094_v28 = vmul.f32 %v1062_v8, %v2781_v62  ;;  %v1051_v13 = vmul.f32 %v2796_v12, %v2796_v12 }
 0x267   : > { %v1976_v47 = vpop.eup %1975  ;;  %v1284_v19 = vmul.f32 0.5, %v1252_v27  ;;  %v1250_v30 = vadd.f32 1.0, %v1974_v15  ;;  %v1191_v36 = vmul.f32 0.7978846, %v1159_v63  ;;  %v1189_v39 = vmul.f32 0.7978846, %v1157_v49 }
 0x268   : > { %v1239_v48 = vadd.f32 1.0, %v1976_v47  ;;  %v1160_v7 = vadd.f32 %v1128_v55, %v2768_v35  ;;  %v1126_v17 = vmul.f32 0.044715, %v1094_v28  ;;  %v1083_v11 = vmul.f32 %v1051_v13, %v2796_v12 }
 0x269   : > { %v1978_v53 = vpop.eup %1977  ;;  %v1316_v3 = vmul.f32 %v1284_v19, %v2684_v56  ;;  %v1282_v25 = vmul.f32 0.5, %v1250_v30  ;;  %1983 = vtanh.f32 %v1191_v36  ;;  %v2810_v2 = vadd.f32 %v2594_v24, %v958_v18 }
 0x26a   : > { %v1271_v33 = vmul.f32 0.5, %v1239_v48  ;;  %v1237_v34 = vadd.f32 1.0, %v1978_v53  ;;  %1985 = vtanh.f32 %v1189_v39  ;;  %v1192_v57 = vmul.f32 0.7978846, %v1160_v7 }
 0x26b   : > { %v1980_v52 = vpop.eup %1979  ;;  %v1759_v21 = vpack.c.bf16 %v1316_v3, %v1315_v60  ;;  %v1314_v44 = vmul.f32 %v1282_v25, %v2715_v20  ;;  %v1158_v4 = vadd.f32 %v1126_v17, %v2781_v62  ;;  %v1115_v45 = vmul.f32 0.044715, %v1083_v11 }
 0x26c   : > { %v1303_v56 = vmul.f32 %v1271_v33, %v2718_v41  ;;  %v1269_v16 = vmul.f32 0.5, %v1237_v34  ;;  %v1240_v61 = vadd.f32 1.0, %v1980_v52  ;;  %1987 = vtanh.f32 %v1192_v57 }
 0x26d   : > { %1806 = vst [vmem:[%s2701_s12 + $0x58] sm:$0xff] %v1759_v21   ;;  %v1754_v18 = vpack.c.bf16 %v1314_v44, %v1313_v51  ;;  %v1190_v5 = vmul.f32 0.7978846, %v1158_v4  ;;  %v1147_v54 = vadd.f32 %v1115_v45, %v2796_v12  ;;  %v1049_v43 = vmul.f32 %v2810_v2, %v2810_v2 }
 0x26e   : > { %v1301_v38 = vmul.f32 %v1269_v16, %v2729_v37  ;;  %v1272_v20 = vmul.f32 0.5, %v1240_v61  ;;  %v2822_v6 = vadd.f32 %v2770_v1, %v2594_v24  ;;  %v2826_v41 = vadd.f32 %v2594_v24, %v2774_v22 }
 0x26f   : > { %1805 = vst [vmem:[%s2701_s12 + $0x50] sm:$0xff] %v1754_v18   ;;  %1989 = vtanh.f32 %v1190_v5  ;;  %v1179_v46 = vmul.f32 0.7978846, %v1147_v54  ;;  %v1081_v10 = vmul.f32 %v1049_v43, %v2810_v2  ;;  %v2832_v23 = vadd.f32 %v2783_v31, %v2594_v24 }
 0x270   : > { %v1982_v29 = vpop.eup %1981  ;;  %v1304_v37 = vmul.f32 %v1272_v20, %v2732_v40  ;;  %v1052_v1 = vmul.f32 %v2822_v6, %v2822_v6  ;;  %v1050_v8 = vmul.f32 %v2826_v41, %v2826_v41  ;;  %v2841_v22 = vadd.f32 %v2594_v24, %v2786_v50 }
 0x271   : > { %v1238_v58 = vadd.f32 1.0, %v1982_v29  ;;  %1991 = vtanh.f32 %v1179_v46  ;;  %v1113_v60 = vmul.f32 0.044715, %v1081_v10  ;;  %v1067_v31 = vmul.f32 %v2832_v23, %v2832_v23 }
 0x272   : > { %v1729_v14 = vpack.c.bf16 %v1304_v37, %v1303_v56  ;;  %v1084_v40 = vmul.f32 %v1052_v1, %v2822_v6  ;;  %v1082_v9 = vmul.f32 %v1050_v8, %v2826_v41  ;;  %v1065_v27 = vmul.f32 %v2841_v22, %v2841_v22 }
 0x273   : > { %v1984_v63 = vpop.eup %1983  ;;  %v1270_v49 = vmul.f32 0.5, %v1238_v58  ;;  %v1145_v55 = vadd.f32 %v1113_v60, %v2810_v2  ;;  %v1099_v50 = vmul.f32 %v1067_v31, %v2832_v23  ;;  %v2853_v15 = vadd.f32 %v2791_v42, %v2594_v24 }
 0x274   : > { %v1986_v51 = vpop.eup %1985  ;;  %1800 = vst [vmem:[%s2701_s12 + $0x28] sm:$0xff] %v1729_v14   ;;  %v1255_v28 = vadd.f32 1.0, %v1984_v63  ;;  %v1116_v13 = vmul.f32 0.044715, %v1084_v40  ;;  %v1114_v47 = vmul.f32 0.044715, %v1082_v9  ;;  %v1097_v19 = vmul.f32 %v1065_v27, %v2841_v22 }
 0x275   : > { %v1302_v30 = vmul.f32 %v1270_v49, %v2738_v0  ;;  %v1253_v36 = vadd.f32 1.0, %v1986_v51  ;;  %v1177_v39 = vmul.f32 0.7978846, %v1145_v55  ;;  %v1131_v48 = vmul.f32 0.044715, %v1099_v50 }
 0x276   : > { %v1988_v7 = vpop.eup %1987  ;;  %v1148_v17 = vadd.f32 %v1116_v13, %v2822_v6  ;;  %v1146_v11 = vadd.f32 %v1114_v47, %v2826_v41  ;;  %v1129_v42 = vmul.f32 0.044715, %v1097_v19  ;;  %v1287_v3 = vmul.f32 0.5, %v1255_v28 }
 0x277   : > { %v1724_v53 = vpack.c.bf16 %v1302_v30, %v1301_v38  ;;  %v1256_v25 = vadd.f32 1.0, %v1988_v7  ;;  %1993 = vtanh.f32 %v1177_v39  ;;  %v1163_v57 = vadd.f32 %v1131_v48, %v2832_v23 }
 0x278   : > { %v1180_v33 = vmul.f32 0.7978846, %v1148_v17  ;;  %v1178_v34 = vmul.f32 0.7978846, %v1146_v11  ;;  %v1285_v0 = vmul.f32 0.5, %v1253_v36  ;;  %v1161_v44 = vadd.f32 %v1129_v42, %v2841_v22 }
 0x279   : > { %v1990_v52 = vpop.eup %1989  ;;  %1799 = vst [vmem:[%s2701_s12 + $0x20] sm:$0xff] %v1724_v53   ;;  %v1288_v21 = vmul.f32 0.5, %v1256_v25  ;;  %v1068_v4 = vmul.f32 %v2853_v15, %v2853_v15  ;;  %v1195_v56 = vmul.f32 0.7978846, %v1163_v57  ;;  %v1026_v16 = vadd.f32 %v2594_v24, %v2798_v26 }
 0x27a   : > { %v1254_v45 = vadd.f32 1.0, %v1990_v52  ;;  %1995 = vtanh.f32 %v1180_v33  ;;  %v1319_v18 = vmul.f32 %v1287_v3, %v2755_v59  ;;  %v1193_v38 = vmul.f32 0.7978846, %v1161_v44 }
 0x27b   : > { %v1992_v61 = vpop.eup %1991  ;;  %v1320_v5 = vmul.f32 %v1288_v21, %v2768_v35  ;;  %1997 = vtanh.f32 %v1178_v34  ;;  %v1100_v54 = vmul.f32 %v1068_v4, %v2853_v15  ;;  %v1066_v20 = vmul.f32 %v1026_v16, %v1026_v16 }
 0x27c   : > { %v1286_v43 = vmul.f32 0.5, %v1254_v45  ;;  %1999 = vtanh.f32 %v1195_v56  ;;  %v1317_v29 = vmul.f32 %v1285_v0, %v2758_v32  ;;  %v1243_v8 = vadd.f32 1.0, %v1992_v61 }
 0x27d   : > { %v1769_v46 = vpack.c.bf16 %v1320_v5, %v1319_v18  ;;  %v1132_v10 = vmul.f32 0.044715, %v1100_v54  ;;  %v1098_v24 = vmul.f32 %v1066_v20, %v1026_v16  ;;  %2001 = vtanh.f32 %v1193_v38 }
 0x27e   : > { %v1318_v37 = vmul.f32 %v1286_v43, %v2781_v62  ;;  %v1275_v32 = vmul.f32 0.5, %v1243_v8 }
 0x27f   : > { %1808 = vst [vmem:[%s2701_s12 + $0x68] sm:$0xff] %v1769_v46   ;;  %v1164_v59 = vadd.f32 %v1132_v10, %v2853_v15  ;;  %v1130_v35 = vmul.f32 0.044715, %v1098_v24 }
 0x280   : > { %v1764_v26 = vpack.c.bf16 %v1318_v37, %v1317_v29  ;;  %v1307_v51 = vmul.f32 %v1275_v32, %v2796_v12 }
 0x281   : > { %v1994_v1 = vpop.eup %1993  ;;  %v1196_v58 = vmul.f32 0.7978846, %v1164_v59  ;;  %v1162_v31 = vadd.f32 %v1130_v35, %v1026_v16 }
 0x282   : > { %1807 = vst [vmem:[%s2701_s12 + $0x60] sm:$0xff] %v1764_v26   ;;  %v1241_v60 = vadd.f32 1.0, %v1994_v1 }
 0x283   : > { %2003 = vtanh.f32 %v1196_v58  ;;  %v1194_v40 = vmul.f32 0.7978846, %v1162_v31 }
 0x284   : > { %v1996_v14 = vpop.eup %1995  ;;  %v1273_v62 = vmul.f32 0.5, %v1241_v60 }
 0x285   : > { %v1998_v9 = vpop.eup %1997  ;;  %v1244_v27 = vadd.f32 1.0, %v1996_v14  ;;  %2005 = vtanh.f32 %v1194_v40 }
 0x286   : > { %v1242_v63 = vadd.f32 1.0, %v1998_v9  ;;  %v2000_v49 = vpop.eup %1999  ;;  %v1305_v47 = vmul.f32 %v1273_v62, %v2810_v2 }
 0x287   : > { %v1276_v55 = vmul.f32 0.5, %v1244_v27  ;;  %v2002_v13 = vpop.eup %2001  ;;  %v1259_v30 = vadd.f32 1.0, %v2000_v49 }
 0x288   : > { %v1274_v50 = vmul.f32 0.5, %v1242_v63  ;;  %v1257_v7 = vadd.f32 1.0, %v2002_v13 }
 0x289   : > { %v1308_v28 = vmul.f32 %v1276_v55, %v2822_v6  ;;  %v1291_v17 = vmul.f32 0.5, %v1259_v30 }
 0x28a   : > { %v1306_v19 = vmul.f32 %v1274_v50, %v2826_v41  ;;  %v1289_v53 = vmul.f32 0.5, %v1257_v7 }
 0x28b   : > { %v1739_v36 = vpack.c.bf16 %v1308_v28, %v1307_v51  ;;  %v1323_v3 = vmul.f32 %v1291_v17, %v2832_v23 }
 0x28c   : > { %v1734_v39 = vpack.c.bf16 %v1306_v19, %v1305_v47  ;;  %v1321_v33 = vmul.f32 %v1289_v53, %v2841_v22 }
 0x28d   : > { %v2004_v48 = vpop.eup %2003  ;;  %1802 = vst [vmem:[%s2701_s12 + $0x38] sm:$0xff] %v1739_v36  }
 0x28e   : > { %1801 = vst [vmem:[%s2701_s12 + $0x30] sm:$0xff] %v1734_v39   ;;  %v1260_v11 = vadd.f32 1.0, %v2004_v48 }
 0x28f   : > { %v2006_v42 = vpop.eup %2005 }
 0x290   : > { %v1292_v12 = vmul.f32 0.5, %v1260_v11  ;;  %v1258_v6 = vadd.f32 1.0, %v2006_v42 }
 0x292   : > { %v1324_v2 = vmul.f32 %v1292_v12, %v2853_v15  ;;  %v1290_v41 = vmul.f32 0.5, %v1258_v6 }
 0x294   : > { %v1779_v25 = vpack.c.bf16 %v1324_v2, %v1323_v3  ;;  %v1322_v34 = vmul.f32 %v1290_v41, %v1026_v16 }
 0x296   : > { %1810 = vst [vmem:[%s2701_s12 + $0x78] sm:$0xff] %v1779_v25   ;;  %v1774_v57 = vpack.c.bf16 %v1322_v34, %v1321_v33 }
 0x298   : > { %1809 = vst [vmem:[%s2701_s12 + $0x70] sm:$0xff] %v1774_v57  }
 0x299 PF: > { %s15_s18 = sadd.s32 1, %s2013_s18  }
 0x29a   : > { %p12_p4 = scmp.ge.s32.totalorder %s15_s18, 4  }
 0x29c   :  { %14 = sbr.rel (!%p12_p4) target bundleno = 1 (0x1), region = 70 }

// kernel: fwd.23
= control target key start
LH: loop header
LB: loop body
LE: loop exit
PB: predicated region body
PF: predicated region fallthrough
CT: control target
= control target key end

     0   :  { %s1055_s12 = smov 0   ;;  %s1222_s0 = inlined_call_operand.vmem [shape: bf16[512,32], index: 0, kind: input, shape index: {}]   ;;  %s1223_s1 = inlined_call_operand.vmem [shape: bf16[32,3], index: 1, kind: input, shape index: {}]   ;;  %s1224_s2 = inlined_call_operand.vmem [shape: f32[1,3], index: 2, kind: input, shape index: {}]   ;;  %s1225_s3 = inlined_call_operand.vmem [shape: bf16[512,3], index: 3, kind: output, shape index: {}]  }
   0x1 LB: > { %s769_s13 = sadd.s32 4294967295, %s1033_s12   ;;  %p773_p0 = scmp.ge.s32.totalorder %s1033_s12, 1  ;;  %s1033_s12 = sphi %s1055_s12, %s13_s12  }
   0x2   : > { %p138_p1 = scmp.lt.s32.totalorder %s1033_s12, 3 }
   0x4   : > { %p139_p2 = pnand %p773_p0, %p138_p1 }
   0x5   : > { %v945_v0 = vld [vmem:[%s1223_s1] sm:$0xff] (!%p139_p2)   ;;  %s774_s16 = sshll.u32 (!%p139_p2), %s769_s13, 5  ;;  %v946_v1 = vld [vmem:[%s1223_s1 + $0x8] sm:$0xff] (!%p139_p2)   ;;  %vm310_vm0 = vcmask (!%p139_p2), 261120   ;;  %vm680_vm1 = vcmask (!%p139_p2), 19456  }
   0x6   : > { %142 = sbr.rel (%p139_p2) target bundleno = 279 (0x117), region = 32  ;;  %p163_p3 = scmp.lt.s32.totalorder (!%p139_p2), %s774_s16, 63  ;;  %897 = vmatprep.subr.bf16.mxu0 (!%p139_p2), %v945_v0  ;;  %933 = vmatprep.subr.bf16.mxu1 (!%p139_p2), %v945_v0  ;;  %v1114_v18 = vld [vmem:[%s1224_s2] ss:$0 sm:$0xff] (!%p139_p2) }
   0x7   : > { %898 = vmatpush3.bf16.msra.mxu0 (!%p139_p2), %v945_v0  ;;  %935 = vmatpush3.bf16.msra.mxu1 (!%p139_p2), %v945_v0 }
   0x8   : > { %899 = vmatprep.subr.bf16.mxu0 (!%p139_p2), %v946_v1  ;;  %934 = vmatprep.subr.bf16.mxu1 (!%p139_p2), %v946_v1 }
   0xb   : > { %900 = vmatpush3.bf16.msra.mxu0 (!%p139_p2), %v946_v1  ;;  %936 = vmatpush3.bf16.msra.mxu1 (!%p139_p2), %v946_v1 }
   0xd   : > { %s1227_s16 = smov (!%p163_p3, %s774_s16), 63 }
   0xe   : > { %s775_s19 = sshll.u32 %s1227_s16, 2 }
   0xf   : > { %s1077_s22 = scalar_lea.vmem %s1222_s0, %s775_s19  ;;  %s1135_s27 = scalar_lea.vmem %s1225_s3, %s775_s19 }
  0x10   : > { %v947_v2 = vld [vmem:[%s1077_s22] sm:$0xff]   ;;  %v949_v4 = vld [vmem:[%s1077_s22 + $0x8] sm:$0xff]   ;;  %v951_v6 = vld [vmem:[%s1077_s22 + $0x10] sm:$0xff]  }
  0x11   : > { %v948_v3 = vld [vmem:[%s1077_s22 + $0x40] sm:$0xff]   ;;  %901 = vmatprep.mubr.msk.bf16.mxu0 %vm310_vm0, %v947_v2  ;;  %v950_v5 = vld [vmem:[%s1077_s22 + $0x48] sm:$0xff]   ;;  %v952_v7 = vld [vmem:[%s1077_s22 + $0x50] sm:$0xff]  }
  0x12   : > { %917 = vmatprep.mubr.msk.bf16.mxu1 %vm310_vm0, %v948_v3  ;;  %902 = vmatmul.mubr.msk.bf16.vlgmr.msra.gmra.mrb[0].mxu0 %vm310_vm0, %v949_v4  ;;  %v953_v8 = vld [vmem:[%s1077_s22 + $0x18] sm:$0xff]   ;;  %v955_v10 = vld [vmem:[%s1077_s22 + $0x20] sm:$0xff]   ;;  %v957_v12 = vld [vmem:[%s1077_s22 + $0x28] sm:$0xff]  }
  0x13   : > { %918 = vmatmul.mubr.msk.bf16.vlgmr.msra.gmra.mrb[0].mxu1 %vm310_vm0, %v950_v5  ;;  %905 = vmatprep.mubr.msk.bf16.mxu0 %vm310_vm0, %v951_v6  ;;  %v954_v9 = vld [vmem:[%s1077_s22 + $0x58] sm:$0xff]   ;;  %v956_v11 = vld [vmem:[%s1077_s22 + $0x60] sm:$0xff]   ;;  %v958_v13 = vld [vmem:[%s1077_s22 + $0x68] sm:$0xff]  }
  0x14   : > { %921 = vmatprep.mubr.msk.bf16.mxu1 %vm310_vm0, %v952_v7  ;;  %v959_v14 = vld [vmem:[%s1077_s22 + $0x30] sm:$0xff]   ;;  %v961_v16 = vld [vmem:[%s1077_s22 + $0x38] sm:$0xff]  }
  0x15   : > { %v960_v15 = vld [vmem:[%s1077_s22 + $0x70] sm:$0xff]   ;;  %v962_v17 = vld [vmem:[%s1077_s22 + $0x78] sm:$0xff]  }
  0x1a   : > { %906 = vmatmul.mubr.msk.bf16.gmra.mrb[4].mxu0 %vm310_vm0, %v953_v8 }
  0x1b   : > { %922 = vmatmul.mubr.msk.bf16.gmra.mrb[4].mxu1 %vm310_vm0, %v954_v9  ;;  %909 = vmatprep.mubr.msk.bf16.mxu0 %vm310_vm0, %v955_v10 }
  0x1c   : > { %925 = vmatprep.mubr.msk.bf16.mxu1 %vm310_vm0, %v956_v11 }
  0x22   : > { %910 = vmatmul.mubr.msk.bf16.gmra.mrb[8].mxu0 %vm310_vm0, %v957_v12 }
  0x23   : > { %926 = vmatmul.mubr.msk.bf16.gmra.mrb[8].mxu1 %vm310_vm0, %v958_v13  ;;  %913 = vmatprep.mubr.msk.bf16.mxu0 %vm310_vm0, %v959_v14 }
  0x24   : > { %929 = vmatprep.mubr.msk.bf16.mxu1 %vm310_vm0, %v960_v15 }
  0x2a   : > { %914 = vmatmul.mubr.msk.bf16.gmra.mrb[12].mxu0 %vm310_vm0, %v961_v16 }
  0x2b   : > { %930 = vmatmul.mubr.msk.bf16.gmra.mrb[12].mxu1 %vm310_vm0, %v962_v17 }
  0xe5   : > { %v903_v19 = vpop.f32.mrb[0].mxu0 }
  0xe6   : > { %v402_v20 = vadd.f32 %v903_v19, %v1114_v18  ;;  %v919_v21 = vpop.f32.mrb[0].mxu1  ;;  %v393_v22 = vpop.f32.mrb[1].mxu0 }
  0xe7   : > { %v466_v23 = vadd.f32 %v919_v21, %v1114_v18  ;;  %v394_v24 = vadd.f32 %v1114_v18, %v393_v22  ;;  %v457_v25 = vpop.f32.mrb[1].mxu1  ;;  %v904_v26 = vpop.f32.mrb[2].mxu0 }
  0xe8   : > { %963 = vtanh.f32 %v402_v20  ;;  %v458_v27 = vadd.f32 %v1114_v18, %v457_v25  ;;  %v405_v28 = vadd.f32 %v904_v26, %v1114_v18  ;;  %v920_v29 = vpop.f32.mrb[2].mxu1  ;;  %v396_v30 = vpop.f32.mrb[3].mxu0 }
  0xe9   : > { %965 = vtanh.f32 %v466_v23  ;;  %v469_v31 = vadd.f32 %v920_v29, %v1114_v18  ;;  %v460_v32 = vpop.f32.mrb[3].mxu1  ;;  %v397_v33 = vadd.f32 %v1114_v18, %v396_v30 }
  0xea   : > { %967 = vtanh.f32 %v394_v24  ;;  %v461_v34 = vadd.f32 %v1114_v18, %v460_v32 }
  0xeb   : > { %969 = vtanh.f32 %v458_v27 }
  0xec   : > { %971 = vtanh.f32 %v405_v28 }
  0xed   : > { %973 = vtanh.f32 %v469_v31  ;;  %v907_v35 = vpop.f32.mrb[4].mxu0 }
  0xee   : > { %975 = vtanh.f32 %v397_v33  ;;  %v418_v36 = vadd.f32 %v907_v35, %v1114_v18  ;;  %v923_v37 = vpop.f32.mrb[4].mxu1  ;;  %v409_v38 = vpop.f32.mrb[5].mxu0 }
  0xef   : > { %977 = vtanh.f32 %v461_v34  ;;  %v482_v39 = vadd.f32 %v923_v37, %v1114_v18  ;;  %v410_v40 = vadd.f32 %v1114_v18, %v409_v38  ;;  %v473_v41 = vpop.f32.mrb[5].mxu1  ;;  %v908_v42 = vpop.f32.mrb[6].mxu0 }
  0xf0   : > { %979 = vtanh.f32 %v418_v36  ;;  %v474_v43 = vadd.f32 %v1114_v18, %v473_v41  ;;  %v421_v44 = vadd.f32 %v908_v42, %v1114_v18  ;;  %v924_v45 = vpop.f32.mrb[6].mxu1  ;;  %v412_v46 = vpop.f32.mrb[7].mxu0 }
  0xf1   : > { %981 = vtanh.f32 %v482_v39  ;;  %v485_v47 = vadd.f32 %v924_v45, %v1114_v18  ;;  %v476_v48 = vpop.f32.mrb[7].mxu1  ;;  %v413_v50 = vadd.f32 %v1114_v18, %v412_v46 }
  0xf2   : > { %v964_v49 = vpop.eup %963  ;;  %983 = vtanh.f32 %v410_v40  ;;  %v477_v53 = vadd.f32 %v1114_v18, %v476_v48 }
  0xf3   : > { %v966_v51 = vpop.eup %965  ;;  %v849_v52 = vpack.c.bf16 %v964_v49, %v964_v49  ;;  %985 = vtanh.f32 %v474_v43 }
  0xf4   : > { %v968_v54 = vpop.eup %967  ;;  %v865_v55 = vpack.c.bf16 %v966_v51, %v966_v51  ;;  %987 = vtanh.f32 %v421_v44 }
  0xf5   : > { %v970_v56 = vpop.eup %969  ;;  %683 = vst.msk [vmem:[%s1135_s27 + $0x8] sm:$0xf] %vm680_vm1, %v849_v52  ;;  %v847_v57 = vpack.c.bf16 %v968_v54, %v968_v54  ;;  %989 = vtanh.f32 %v485_v47  ;;  %v911_v58 = vpop.f32.mrb[8].mxu0 }
  0xf6   : > { %v972_v59 = vpop.eup %971  ;;  %699 = vst.msk [vmem:[%s1135_s27 + $0x48] sm:$0xf] %vm680_vm1, %v865_v55  ;;  %v863_v60 = vpack.c.bf16 %v970_v56, %v970_v56  ;;  %991 = vtanh.f32 %v413_v50  ;;  %v434_v61 = vadd.f32 %v911_v58, %v1114_v18  ;;  %v927_v62 = vpop.f32.mrb[8].mxu1 }
  0xf7   : > { %v425_v63 = vpop.f32.mrb[9].mxu0  ;;  %v974_v0 = vpop.eup %973  ;;  %681 = vst.msk [vmem:[%s1135_s27] sm:$0xf] %vm680_vm1, %v847_v57  ;;  %v850_v1 = vpack.c.bf16 %v972_v59, %v972_v59  ;;  %993 = vtanh.f32 %v477_v53  ;;  %v498_v2 = vadd.f32 %v927_v62, %v1114_v18 }
  0xf8   : > { %v426_v3 = vadd.f32 %v1114_v18, %v425_v63  ;;  %v489_v4 = vpop.f32.mrb[9].mxu1  ;;  %v912_v5 = vpop.f32.mrb[10].mxu0  ;;  %697 = vst.msk [vmem:[%s1135_s27 + $0x40] sm:$0xf] %vm680_vm1, %v863_v60  ;;  %v866_v7 = vpack.c.bf16 %v974_v0, %v974_v0  ;;  %995 = vtanh.f32 %v434_v61 }
  0xf9   : > { %v976_v6 = vpop.eup %975  ;;  %v490_v8 = vadd.f32 %v1114_v18, %v489_v4  ;;  %v437_v9 = vadd.f32 %v912_v5, %v1114_v18  ;;  %v928_v10 = vpop.f32.mrb[10].mxu1  ;;  %684 = vst.msk [vmem:[%s1135_s27 + $0xc] sm:$0xf] %vm680_vm1, %v850_v1  ;;  %997 = vtanh.f32 %v498_v2 }
  0xfa   : > { %v428_v11 = vpop.f32.mrb[11].mxu0  ;;  %v978_v12 = vpop.eup %977  ;;  %v848_v13 = vpack.c.bf16 %v976_v6, %v976_v6  ;;  %v501_v14 = vadd.f32 %v928_v10, %v1114_v18  ;;  %700 = vst.msk [vmem:[%s1135_s27 + $0x4c] sm:$0xf] %vm680_vm1, %v866_v7  ;;  %999 = vtanh.f32 %v426_v3 }
  0xfb   : > { %v492_v15 = vpop.f32.mrb[11].mxu1  ;;  %v980_v16 = vpop.eup %979  ;;  %v864_v17 = vpack.c.bf16 %v978_v12, %v978_v12  ;;  %v429_v19 = vadd.f32 %v1114_v18, %v428_v11  ;;  %1001 = vtanh.f32 %v490_v8 }
  0xfc   : > { %v982_v20 = vpop.eup %981  ;;  %682 = vst.msk [vmem:[%s1135_s27 + $0x4] sm:$0xf] %vm680_vm1, %v848_v13  ;;  %v853_v21 = vpack.c.bf16 %v980_v16, %v980_v16  ;;  %v493_v22 = vadd.f32 %v1114_v18, %v492_v15  ;;  %1003 = vtanh.f32 %v437_v9 }
  0xfd   : > { %v984_v23 = vpop.eup %983  ;;  %698 = vst.msk [vmem:[%s1135_s27 + $0x44] sm:$0xf] %vm680_vm1, %v864_v17  ;;  %v869_v24 = vpack.c.bf16 %v982_v20, %v982_v20  ;;  %1005 = vtanh.f32 %v501_v14  ;;  %v915_v27 = vpop.f32.mrb[12].mxu0 }
  0xfe   : > { %v986_v25 = vpop.eup %985  ;;  %687 = vst.msk [vmem:[%s1135_s27 + $0x18] sm:$0xf] %vm680_vm1, %v853_v21  ;;  %v851_v26 = vpack.c.bf16 %v984_v23, %v984_v23  ;;  %1007 = vtanh.f32 %v429_v19  ;;  %v450_v30 = vadd.f32 %v915_v27, %v1114_v18  ;;  %v931_v31 = vpop.f32.mrb[12].mxu1 }
  0xff   : > { %v988_v28 = vpop.eup %987  ;;  %703 = vst.msk [vmem:[%s1135_s27 + $0x58] sm:$0xf] %vm680_vm1, %v869_v24  ;;  %v867_v29 = vpack.c.bf16 %v986_v25, %v986_v25  ;;  %v441_v32 = vpop.f32.mrb[13].mxu0  ;;  %1009 = vtanh.f32 %v493_v22  ;;  %v514_v35 = vadd.f32 %v931_v31, %v1114_v18 }
 0x100   : > { %v990_v33 = vpop.eup %989  ;;  %685 = vst.msk [vmem:[%s1135_s27 + $0x10] sm:$0xf] %vm680_vm1, %v851_v26  ;;  %v854_v34 = vpack.c.bf16 %v988_v28, %v988_v28  ;;  %v442_v36 = vadd.f32 %v1114_v18, %v441_v32  ;;  %v505_v37 = vpop.f32.mrb[13].mxu1  ;;  %1011 = vtanh.f32 %v450_v30 }
 0x101   : > { %v916_v38 = vpop.f32.mrb[14].mxu0  ;;  %v992_v39 = vpop.eup %991  ;;  %701 = vst.msk [vmem:[%s1135_s27 + $0x50] sm:$0xf] %vm680_vm1, %v867_v29  ;;  %v870_v40 = vpack.c.bf16 %v990_v33, %v990_v33  ;;  %v506_v41 = vadd.f32 %v1114_v18, %v505_v37  ;;  %1013 = vtanh.f32 %v514_v35 }
 0x102   : > { %v453_v42 = vadd.f32 %v916_v38, %v1114_v18  ;;  %v932_v43 = vpop.f32.mrb[14].mxu1  ;;  %v444_v44 = vpop.f32.mrb[15].mxu0  ;;  %688 = vst.msk [vmem:[%s1135_s27 + $0x1c] sm:$0xf] %vm680_vm1, %v854_v34  ;;  %v852_v46 = vpack.c.bf16 %v992_v39, %v992_v39  ;;  %1015 = vtanh.f32 %v442_v36 }
 0x103   : > { %v994_v45 = vpop.eup %993  ;;  %v517_v47 = vadd.f32 %v932_v43, %v1114_v18  ;;  %v508_v48 = vpop.f32.mrb[15].mxu1  ;;  %704 = vst.msk [vmem:[%s1135_s27 + $0x5c] sm:$0xf] %vm680_vm1, %v870_v40  ;;  %v445_v51 = vadd.f32 %v1114_v18, %v444_v44  ;;  %1017 = vtanh.f32 %v506_v41 }
 0x104   : > { %v996_v49 = vpop.eup %995  ;;  %v868_v50 = vpack.c.bf16 %v994_v45, %v994_v45  ;;  %686 = vst.msk [vmem:[%s1135_s27 + $0x14] sm:$0xf] %vm680_vm1, %v852_v46  ;;  %v509_v54 = vadd.f32 %v1114_v18, %v508_v48  ;;  %1019 = vtanh.f32 %v453_v42 }
 0x105   : > { %v998_v52 = vpop.eup %997  ;;  %v857_v53 = vpack.c.bf16 %v996_v49, %v996_v49  ;;  %1021 = vtanh.f32 %v517_v47 }
 0x106   : > { %v1000_v55 = vpop.eup %999  ;;  %702 = vst.msk [vmem:[%s1135_s27 + $0x54] sm:$0xf] %vm680_vm1, %v868_v50  ;;  %v873_v56 = vpack.c.bf16 %v998_v52, %v998_v52  ;;  %1023 = vtanh.f32 %v445_v51 }
 0x107   : > { %v1002_v57 = vpop.eup %1001  ;;  %691 = vst.msk [vmem:[%s1135_s27 + $0x28] sm:$0xf] %vm680_vm1, %v857_v53  ;;  %v855_v58 = vpack.c.bf16 %v1000_v55, %v1000_v55  ;;  %1025 = vtanh.f32 %v509_v54 }
 0x108   : > { %v1004_v59 = vpop.eup %1003  ;;  %707 = vst.msk [vmem:[%s1135_s27 + $0x68] sm:$0xf] %vm680_vm1, %v873_v56  ;;  %v871_v60 = vpack.c.bf16 %v1002_v57, %v1002_v57 }
 0x109   : > { %v1006_v18 = vpop.eup %1005  ;;  %689 = vst.msk [vmem:[%s1135_s27 + $0x20] sm:$0xf] %vm680_vm1, %v855_v58  ;;  %v858_v61 = vpack.c.bf16 %v1004_v59, %v1004_v59 }
 0x10a   : > { %v1008_v62 = vpop.eup %1007  ;;  %705 = vst.msk [vmem:[%s1135_s27 + $0x60] sm:$0xf] %vm680_vm1, %v871_v60  ;;  %v874_v63 = vpack.c.bf16 %v1006_v18, %v1006_v18 }
 0x10b   : > { %v1010_v0 = vpop.eup %1009  ;;  %692 = vst.msk [vmem:[%s1135_s27 + $0x2c] sm:$0xf] %vm680_vm1, %v858_v61  ;;  %v856_v1 = vpack.c.bf16 %v1008_v62, %v1008_v62 }
 0x10c   : > { %v1012_v2 = vpop.eup %1011  ;;  %708 = vst.msk [vmem:[%s1135_s27 + $0x6c] sm:$0xf] %vm680_vm1, %v874_v63  ;;  %v872_v3 = vpack.c.bf16 %v1010_v0, %v1010_v0 }
 0x10d   : > { %v1014_v4 = vpop.eup %1013  ;;  %690 = vst.msk [vmem:[%s1135_s27 + $0x24] sm:$0xf] %vm680_vm1, %v856_v1  ;;  %v861_v5 = vpack.c.bf16 %v1012_v2, %v1012_v2 }
 0x10e   : > { %v1016_v6 = vpop.eup %1015  ;;  %706 = vst.msk [vmem:[%s1135_s27 + $0x64] sm:$0xf] %vm680_vm1, %v872_v3  ;;  %v877_v7 = vpack.c.bf16 %v1014_v4, %v1014_v4 }
 0x10f   : > { %v1018_v8 = vpop.eup %1017  ;;  %695 = vst.msk [vmem:[%s1135_s27 + $0x38] sm:$0xf] %vm680_vm1, %v861_v5  ;;  %v859_v9 = vpack.c.bf16 %v1016_v6, %v1016_v6 }
 0x110   : > { %v1020_v10 = vpop.eup %1019  ;;  %711 = vst.msk [vmem:[%s1135_s27 + $0x78] sm:$0xf] %vm680_vm1, %v877_v7  ;;  %v875_v11 = vpack.c.bf16 %v1018_v8, %v1018_v8 }
 0x111   : > { %v1022_v12 = vpop.eup %1021  ;;  %693 = vst.msk [vmem:[%s1135_s27 + $0x30] sm:$0xf] %vm680_vm1, %v859_v9  ;;  %v862_v13 = vpack.c.bf16 %v1020_v10, %v1020_v10 }
 0x112   : > { %v1024_v14 = vpop.eup %1023  ;;  %709 = vst.msk [vmem:[%s1135_s27 + $0x70] sm:$0xf] %vm680_vm1, %v875_v11  ;;  %v878_v15 = vpack.c.bf16 %v1022_v12, %v1022_v12 }
 0x113   : > { %v1026_v16 = vpop.eup %1025  ;;  %696 = vst.msk [vmem:[%s1135_s27 + $0x3c] sm:$0xf] %vm680_vm1, %v862_v13  ;;  %v860_v17 = vpack.c.bf16 %v1024_v14, %v1024_v14 }
 0x114   : > { %712 = vst.msk [vmem:[%s1135_s27 + $0x7c] sm:$0xf] %vm680_vm1, %v878_v15  ;;  %v876_v19 = vpack.c.bf16 %v1026_v16, %v1026_v16 }
 0x115   : > { %694 = vst.msk [vmem:[%s1135_s27 + $0x34] sm:$0xf] %vm680_vm1, %v860_v17 }
 0x116   : > { %710 = vst.msk [vmem:[%s1135_s27 + $0x74] sm:$0xf] %vm680_vm1, %v876_v19 }
 0x117 PF: > { %s13_s12 = sadd.s32 1, %s1033_s12  }
 0x118   : > { %p10_p4 = scmp.ge.s32.totalorder %s13_s12, 4  }
 0x11a   :  { %12 = sbr.rel (!%p10_p4) target bundleno = 1 (0x1), region = 62 }

</bundles_post_ra>
